<compile_context>
chip_gen: v7x
topology: tpu7x:2x2x1
jax: 0.10.0
libtpu: 0.0.40
codegen_flags: <defaults>
</compile_context>

<pallas_src>
import jax
import jax.numpy as jnp
from jax.experimental import pallas as pl
from jax.experimental.pallas import tpu as pltpu


# ----------------------------------------------------------------------------
# Fused RCAB kernel: one grid step handles `n_imgs` images via an in-kernel loop.
# ----------------------------------------------------------------------------
def _rcab_kernel(x_ref, w0_ref, b0_ref, w1_ref, b1_ref,
                 wdt_ref, bd_ref, wu_ref, bu_ref, o_ref, pad_ref, patch_ref):
    # x_ref    : (n_imgs, H, W, C) f32 input block
    # wK_ref   : (9*C, C) bf16 im2col conv weights, bK_ref: (1, C) f32
    # wdt_ref  : (Cr, C) f32 CA down-proj (transposed), bd_ref: (Cr, 1) f32
    # wu_ref   : (Cr, C) f32 CA up-proj,                bu_ref: (1, C) f32
    # o_ref    : (n_imgs, H, W, C) f32 output block
    # pad_ref  : (H+2, W+2, C) bf16 zero-halo conv-input scratch
    # patch_ref: (H*W, 9*C)    bf16 im2col patch scratch
    n_imgs, H, W, C = x_ref.shape

    # ---- (4) zero ONLY the 1-pixel border strips; interior is overwritten per conv.
    zrow = jnp.zeros((1, W + 2, C), pad_ref.dtype)
    zcol = jnp.zeros((H + 2, 1, C), pad_ref.dtype)
    pad_ref[0:1, :, :] = zrow
    pad_ref[H + 1:H + 2, :, :] = zrow
    pad_ref[:, 0:1, :] = zcol
    pad_ref[:, W + 1:W + 2, :] = zcol

    def conv3x3(w_ref, b_ref):
        # (2) im2col: 9 shifted bf16 slices -> (H*W, 9C) patch, one MXU matmul, f32 acc.
        for dy in range(3):
            for dx in range(3):
                t = dy * 3 + dx
                patch_ref[:, t * C:(t + 1) * C] = (
                    pad_ref[dy:dy + H, dx:dx + W, :].reshape(H * W, C))
        acc = jnp.dot(patch_ref[...], w_ref[...],
                      preferred_element_type=jnp.float32)            # (H*W, C) f32
        return acc + b_ref[...]                                      # bias (1, C)

    # ---- (1) loop over the images assigned to this grid step
    @pl.loop(0, n_imgs)
    def _per_image(n):
        xn = x_ref[n]                                                # (H, W, C) f32

        # (3) single f32->bf16 cast at the halo center write (borders stay zero)
        pad_ref[1:H + 1, 1:W + 1, :] = xn.astype(jnp.bfloat16)
        h1 = jnp.maximum(conv3x3(w0_ref, b0_ref), 0.0)               # conv1 + ReLU

        pad_ref[1:H + 1, 1:W + 1, :] = h1.reshape(H, W, C).astype(jnp.bfloat16)
        res = conv3x3(w1_ref, b1_ref)                                # conv2 (VMEM only)

        # ---- (5) channel attention in f32 on VPU/XLU: GAP -> 1x1 -> ReLU -> 1x1 -> sigmoid
        y = jnp.mean(res, axis=0, keepdims=True)                             # (1, C)
        z = jnp.sum(y * wdt_ref[...], axis=1, keepdims=True) + bd_ref[...]   # (Cr, 1)
        z = jnp.maximum(z, 0.0)
        s = jax.nn.sigmoid(
            jnp.sum(z * wu_ref[...], axis=0, keepdims=True) + bu_ref[...])   # (1, C)

        # ---- channel scale + residual add, single store of the final result
        out = xn.reshape(H * W, C) + res * s
        o_ref[n] = out.reshape(H, W, C).astype(o_ref.dtype)


# ----------------------------------------------------------------------------
# Wrapper: one fused pallas_call for the whole RCAB.
# ----------------------------------------------------------------------------
def rcab_forward(x_nhwc, params, *, steps=1, core_parallel=False):
    """Fused RCAB forward.

    steps / core_parallel: on single-TC chips (v5e/v6e) keep the default
    steps=1 (all images in one grid step, minimal launch overhead).  On v7x use
    steps=2, core_parallel=True so each TensorCore processes N/2 images.
    """
    w0, b0, w1, b1, wd, bd, wu, bu = params
    N, H, W, C = x_nhwc.shape
    Cr = wd.shape[-1]
    assert N % steps == 0
    n_per_step = N // steps

    # Conv weights: HWIO (3,3,C,C) -> im2col layout (9C, C), shipped as bf16 (MXU
    # operand dtype); accumulation stays f32 in-kernel.
    w0r = w0.reshape(9 * C, C).astype(jnp.bfloat16)
    w1r = w1.reshape(9 * C, C).astype(jnp.bfloat16)
    # CA weights stay f32; wd is transposed so both 1x1s become lane-wise VPU
    # multiplies + XLU reduces (no MXU round-trip on the serial tail).
    wdt = jnp.transpose(wd)          # (Cr, C)
    bdc = bd.reshape(Cr, 1)
    bur = bu.reshape(1, C)
    b0r = b0.reshape(1, C)
    b1r = b1.reshape(1, C)

    if core_parallel:
        sem = (pltpu.CORE_PARALLEL,)     # v7x: shard the batch axis across both TCs
    elif steps > 1:
        sem = ("parallel",)
    else:
        sem = ("arbitrary",)

    flops = int(2 * (2 * N * H * W * 9 * C * C)          # two 3x3 convs
                + 2 * N * (C * Cr + Cr * C)               # CA 1x1 "convs"
                + 3 * N * H * W * C)                       # relu / scale / residual
    bytes_accessed = int(N * H * W * C * 4 * 2             # x in + out
                         + 2 * 9 * C * C * 2               # bf16 conv weights
                         + (C * Cr + Cr * C + Cr + 3 * C) * 4)
    transcendentals = int(N * C)                            # sigmoid exps

    return pl.pallas_call(
        _rcab_kernel,
        out_shape=jax.ShapeDtypeStruct((N, H, W, C), x_nhwc.dtype),
        grid=(steps,),
        in_specs=[
            pl.BlockSpec((n_per_step, H, W, C), lambda g: (g, 0, 0, 0)),  # x
            pl.BlockSpec((9 * C, C), lambda g: (0, 0)),                   # conv1 w (bf16)
            pl.BlockSpec((1, C), lambda g: (0, 0)),                       # conv1 b
            pl.BlockSpec((9 * C, C), lambda g: (0, 0)),                   # conv2 w (bf16)
            pl.BlockSpec((1, C), lambda g: (0, 0)),                       # conv2 b
            pl.BlockSpec((Cr, C), lambda g: (0, 0)),                      # CA down w^T
            pl.BlockSpec((Cr, 1), lambda g: (0, 0)),                      # CA down b
            pl.BlockSpec((Cr, C), lambda g: (0, 0)),                      # CA up w
            pl.BlockSpec((1, C), lambda g: (0, 0)),                       # CA up b
        ],
        out_specs=pl.BlockSpec((n_per_step, H, W, C), lambda g: (g, 0, 0, 0)),
        scratch_shapes=[
            pltpu.VMEM((H + 2, W + 2, C), jnp.bfloat16),   # zero-halo conv input
            pltpu.VMEM((H * W, 9 * C), jnp.bfloat16),      # im2col patch matrix
        ],
        compiler_params=pltpu.CompilerParams(
            dimension_semantics=sem,
            vmem_limit_bytes=32 * 1024 * 1024),
        cost_estimate=pl.CostEstimate(
            flops=flops, transcendentals=transcendentals,
            bytes_accessed=bytes_accessed),
    )(x_nhwc, w0r, b0r, w1r, b1r, wdt, bdc, wu, bur)


# ----------------------------------------------------------------------------
# Pure-JAX reference with the SAME precision policy (bf16 conv operands, f32
# accumulation, f32 CA / residual) for a tight numerical check of the kernel.
# ----------------------------------------------------------------------------
def rcab_reference(x_nhwc, params):
    w0, b0, w1, b1, wd, bd, wu, bu = params

    def conv(inp_bf16, w, b):
        out = jax.lax.conv_general_dilated(
            inp_bf16, w.astype(jnp.bfloat16), window_strides=(1, 1), padding="SAME",
            dimension_numbers=("NHWC", "HWIO", "NHWC"),
            preferred_element_type=jnp.float32)
        return out + b[None, None, None, :]

    r = jnp.maximum(conv(x_nhwc.astype(jnp.bfloat16), w0, b0), 0.0)
    r = conv(r.astype(jnp.bfloat16), w1, b1)
    y = jnp.mean(r, axis=(1, 2), keepdims=True)                       # (N,1,1,C)
    z = jnp.maximum(jnp.einsum("nijc,cd->nijd", y, wd) + bd, 0.0)
    s = jax.nn.sigmoid(jnp.einsum("nijd,dc->nijc", z, wu) + bu)
    return x_nhwc + r * s


if __name__ == "__main__":
    # RCAB-consistent small shapes: n_feat=32, kernel_size=3, reduction=4, batch=2.
    N, C, H, W = 2, 32, 16, 16
    reduction = 4
    Cr = C // reduction

    key = jax.random.PRNGKey(0)
    ks = jax.random.split(key, 9)
    w0 = jax.random.normal(ks[0], (3, 3, C, C), jnp.float32) * 0.05   # HWIO
    b0 = jax.random.normal(ks[1], (C,), jnp.float32) * 0.05
    w1 = jax.random.normal(ks[2], (3, 3, C, C), jnp.float32) * 0.05
    b1 = jax.random.normal(ks[3], (C,), jnp.float32) * 0.05
    wd = jax.random.normal(ks[4], (C, Cr), jnp.float32) * 0.1         # 1x1 down [Cin,Cout]
    bd = jax.random.normal(ks[5], (Cr,), jnp.float32) * 0.1
    wu = jax.random.normal(ks[6], (Cr, C), jnp.float32) * 0.1         # 1x1 up
    bu = jax.random.normal(ks[7], (C,), jnp.float32) * 0.1
    params = (w0, b0, w1, b1, wd, bd, wu, bu)

    # PyTorch NCHW input convention, transposed to NHWC for the TPU kernel.
    x_nchw = jax.random.normal(ks[8], (N, C, H, W), jnp.float32)
    x_nhwc = jnp.transpose(x_nchw, (0, 2, 3, 1))

    out_nhwc = rcab_forward(x_nhwc, params)          # steps=1: all images, one grid step
    out_nchw = jnp.transpose(out_nhwc, (0, 3, 1, 2))
    jax.block_until_ready(out_nchw)

    ref = rcab_reference(x_nhwc, params)
    err = float(jnp.max(jnp.abs(out_nhwc - ref)))
    assert err < 1e-2, f"max abs error too large: {err}"

    print("KERNEL_OK")
</pallas_src>

<mosaic_0001>
module attributes {stable_mosaic.version = 11 : i64} {
  func.func @_rcab_kernel(%arg0: i32, %arg1: memref<2x16x16x32xf32, #tpu.memory_space<vmem>>, %arg2: memref<288x32xbf16, #tpu.memory_space<vmem>>, %arg3: memref<1x32xf32, #tpu.memory_space<vmem>>, %arg4: memref<288x32xbf16, #tpu.memory_space<vmem>>, %arg5: memref<1x32xf32, #tpu.memory_space<vmem>>, %arg6: memref<8x32xf32, #tpu.memory_space<vmem>>, %arg7: memref<8x1xf32, #tpu.memory_space<vmem>>, %arg8: memref<8x32xf32, #tpu.memory_space<vmem>>, %arg9: memref<1x32xf32, #tpu.memory_space<vmem>>, %arg10: memref<2x16x16x32xf32, #tpu.memory_space<vmem>>, %arg11: memref<18x18x32xbf16, #tpu.memory_space<vmem>>, %arg12: memref<256x288xbf16, #tpu.memory_space<vmem>>) attributes {dimension_semantics = [#tpu.dimension_semantics<arbitrary>], iteration_bounds = array<i64: 1>, scalar_prefetch = 0 : i64, scratch_operands = 2 : i64, tpu.core_type = #tpu.core_type<tc>, window_params = [{transform_indices = @transform_0, window_bounds = array<i64: 2, 16, 16, 32>}, {pipeline_mode = #tpu.pipeline_mode<synchronous>, transform_indices = @transform_1, window_bounds = array<i64: 288, 32>}, {pipeline_mode = #tpu.pipeline_mode<synchronous>, transform_indices = @transform_2, window_bounds = array<i64: 1, 32>}, {pipeline_mode = #tpu.pipeline_mode<synchronous>, transform_indices = @transform_3, window_bounds = array<i64: 288, 32>}, {pipeline_mode = #tpu.pipeline_mode<synchronous>, transform_indices = @transform_4, window_bounds = array<i64: 1, 32>}, {pipeline_mode = #tpu.pipeline_mode<synchronous>, transform_indices = @transform_5, window_bounds = array<i64: 8, 32>}, {pipeline_mode = #tpu.pipeline_mode<synchronous>, transform_indices = @transform_6, window_bounds = array<i64: 8, 1>}, {pipeline_mode = #tpu.pipeline_mode<synchronous>, transform_indices = @transform_7, window_bounds = array<i64: 8, 32>}, {pipeline_mode = #tpu.pipeline_mode<synchronous>, transform_indices = @transform_8, window_bounds = array<i64: 1, 32>}, {transform_indices = @transform_9, window_bounds = array<i64: 2, 16, 16, 32>}]} {
    %cst = arith.constant 0.000000e+00 : bf16
    %0 = vector.broadcast %cst : bf16 to vector<1x18x32xbf16>
    %cst_0 = arith.constant 0.000000e+00 : bf16
    %1 = vector.broadcast %cst_0 : bf16 to vector<18x1x32xbf16>
    %c0 = arith.constant 0 : index
    %c0_1 = arith.constant 0 : index
    %c0_2 = arith.constant 0 : index
    %2 = vector.load %arg11[%c0, %c0_1, %c0_2] : memref<18x18x32xbf16, #tpu.memory_space<vmem>>, vector<1x18x32xbf16>
    tpu.vector_store %arg11[%c0, %c0_1, %c0_2], %0 {strides = array<i32>} : memref<18x18x32xbf16, #tpu.memory_space<vmem>>, vector<1x18x32xbf16>,
    %c17 = arith.constant 17 : index
    %c0_3 = arith.constant 0 : index
    %c0_4 = arith.constant 0 : index
    %3 = vector.load %arg11[%c17, %c0_3, %c0_4] : memref<18x18x32xbf16, #tpu.memory_space<vmem>>, vector<1x18x32xbf16>
    tpu.vector_store %arg11[%c17, %c0_3, %c0_4], %0 {strides = array<i32>} : memref<18x18x32xbf16, #tpu.memory_space<vmem>>, vector<1x18x32xbf16>,
    %c0_5 = arith.constant 0 : index
    %c0_6 = arith.constant 0 : index
    %c0_7 = arith.constant 0 : index
    %4 = vector.load %arg11[%c0_5, %c0_6, %c0_7] : memref<18x18x32xbf16, #tpu.memory_space<vmem>>, vector<18x1x32xbf16>
    tpu.vector_store %arg11[%c0_5, %c0_6, %c0_7], %1 {strides = array<i32>} : memref<18x18x32xbf16, #tpu.memory_space<vmem>>, vector<18x1x32xbf16>,
    %c0_8 = arith.constant 0 : index
    %c17_9 = arith.constant 17 : index
    %c0_10 = arith.constant 0 : index
    %5 = vector.load %arg11[%c0_8, %c17_9, %c0_10] : memref<18x18x32xbf16, #tpu.memory_space<vmem>>, vector<18x1x32xbf16>
    tpu.vector_store %arg11[%c0_8, %c17_9, %c0_10], %1 {strides = array<i32>} : memref<18x18x32xbf16, #tpu.memory_space<vmem>>, vector<18x1x32xbf16>,
    %c0_i32 = arith.constant 0 : i32
    %c2_i32 = arith.constant 2 : i32
    %6 = arith.addi %c0_i32, %c2_i32 : i32
    %c1_i32 = arith.constant 1 : i32
    scf.for %arg13 = %c0_i32 to %6 step %c1_i32  : i32 {
      %c1_i32_12 = arith.constant 1 : i32
      %7 = arith.muli %arg13, %c1_i32_12 : i32
      %c0_i32_13 = arith.constant 0 : i32
      %8 = arith.addi %c0_i32_13, %7 : i32
      %9 = arith.index_cast %8 : i32 to index
      %c0_14 = arith.constant 0 : index
      %c0_15 = arith.constant 0 : index
      %c0_16 = arith.constant 0 : index
      %10 = vector.load %arg1[%9, %c0_14, %c0_15, %c0_16] : memref<2x16x16x32xf32, #tpu.memory_space<vmem>>, vector<1x16x16x32xf32>
      %11 = vector.shape_cast %10 : vector<1x16x16x32xf32> to vector<16x16x32xf32>
      %12 = arith.truncf %11 : vector<16x16x32xf32> to vector<16x16x32xbf16>
      %c1 = arith.constant 1 : index
      %c1_17 = arith.constant 1 : index
      %c0_18 = arith.constant 0 : index
      %13 = vector.load %arg11[%c1, %c1_17, %c0_18] : memref<18x18x32xbf16, #tpu.memory_space<vmem>>, vector<16x16x32xbf16>
      tpu.vector_store %arg11[%c1, %c1_17, %c0_18], %12 {strides = array<i32>} : memref<18x18x32xbf16, #tpu.memory_space<vmem>>, vector<16x16x32xbf16>,
      %c0_19 = arith.constant 0 : index
      %c0_20 = arith.constant 0 : index
      %c0_21 = arith.constant 0 : index
      %14 = vector.load %arg11[%c0_19, %c0_20, %c0_21] : memref<18x18x32xbf16, #tpu.memory_space<vmem>>, vector<16x16x32xbf16>
      %15 = vector.shape_cast %14 : vector<16x16x32xbf16> to vector<256x32xbf16>
      %c0_22 = arith.constant 0 : index
      %c0_23 = arith.constant 0 : index
      %16 = vector.load %arg12[%c0_22, %c0_23] : memref<256x288xbf16, #tpu.memory_space<vmem>>, vector<256x32xbf16>
      tpu.vector_store %arg12[%c0_22, %c0_23], %15 {strides = array<i32>} : memref<256x288xbf16, #tpu.memory_space<vmem>>, vector<256x32xbf16>,
      %c0_24 = arith.constant 0 : index
      %c1_25 = arith.constant 1 : index
      %c0_26 = arith.constant 0 : index
      %17 = vector.load %arg11[%c0_24, %c1_25, %c0_26] : memref<18x18x32xbf16, #tpu.memory_space<vmem>>, vector<16x16x32xbf16>
      %18 = vector.shape_cast %17 : vector<16x16x32xbf16> to vector<256x32xbf16>
      %c0_27 = arith.constant 0 : index
      %c32 = arith.constant 32 : index
      %19 = vector.load %arg12[%c0_27, %c32] : memref<256x288xbf16, #tpu.memory_space<vmem>>, vector<256x32xbf16>
      tpu.vector_store %arg12[%c0_27, %c32], %18 {strides = array<i32>} : memref<256x288xbf16, #tpu.memory_space<vmem>>, vector<256x32xbf16>,
      %c0_28 = arith.constant 0 : index
      %c2 = arith.constant 2 : index
      %c0_29 = arith.constant 0 : index
      %20 = vector.load %arg11[%c0_28, %c2, %c0_29] : memref<18x18x32xbf16, #tpu.memory_space<vmem>>, vector<16x16x32xbf16>
      %21 = vector.shape_cast %20 : vector<16x16x32xbf16> to vector<256x32xbf16>
      %c0_30 = arith.constant 0 : index
      %c64 = arith.constant 64 : index
      %22 = vector.load %arg12[%c0_30, %c64] : memref<256x288xbf16, #tpu.memory_space<vmem>>, vector<256x32xbf16>
      tpu.vector_store %arg12[%c0_30, %c64], %21 {strides = array<i32>} : memref<256x288xbf16, #tpu.memory_space<vmem>>, vector<256x32xbf16>,
      %c1_31 = arith.constant 1 : index
      %c0_32 = arith.constant 0 : index
      %c0_33 = arith.constant 0 : index
      %23 = vector.load %arg11[%c1_31, %c0_32, %c0_33] : memref<18x18x32xbf16, #tpu.memory_space<vmem>>, vector<16x16x32xbf16>
      %24 = vector.shape_cast %23 : vector<16x16x32xbf16> to vector<256x32xbf16>
      %c0_34 = arith.constant 0 : index
      %c96 = arith.constant 96 : index
      %25 = vector.load %arg12[%c0_34, %c96] : memref<256x288xbf16, #tpu.memory_space<vmem>>, vector<256x32xbf16>
      tpu.vector_store %arg12[%c0_34, %c96], %24 {strides = array<i32>} : memref<256x288xbf16, #tpu.memory_space<vmem>>, vector<256x32xbf16>,
      %c1_35 = arith.constant 1 : index
      %c1_36 = arith.constant 1 : index
      %c0_37 = arith.constant 0 : index
      %26 = vector.load %arg11[%c1_35, %c1_36, %c0_37] : memref<18x18x32xbf16, #tpu.memory_space<vmem>>, vector<16x16x32xbf16>
      %27 = vector.shape_cast %26 : vector<16x16x32xbf16> to vector<256x32xbf16>
      %c0_38 = arith.constant 0 : index
      %c128 = arith.constant 128 : index
      %28 = vector.load %arg12[%c0_38, %c128] : memref<256x288xbf16, #tpu.memory_space<vmem>>, vector<256x32xbf16>
      tpu.vector_store %arg12[%c0_38, %c128], %27 {strides = array<i32>} : memref<256x288xbf16, #tpu.memory_space<vmem>>, vector<256x32xbf16>,
      %c1_39 = arith.constant 1 : index
      %c2_40 = arith.constant 2 : index
      %c0_41 = arith.constant 0 : index
      %29 = vector.load %arg11[%c1_39, %c2_40, %c0_41] : memref<18x18x32xbf16, #tpu.memory_space<vmem>>, vector<16x16x32xbf16>
      %30 = vector.shape_cast %29 : vector<16x16x32xbf16> to vector<256x32xbf16>
      %c0_42 = arith.constant 0 : index
      %c160 = arith.constant 160 : index
      %31 = vector.load %arg12[%c0_42, %c160] : memref<256x288xbf16, #tpu.memory_space<vmem>>, vector<256x32xbf16>
      tpu.vector_store %arg12[%c0_42, %c160], %30 {strides = array<i32>} : memref<256x288xbf16, #tpu.memory_space<vmem>>, vector<256x32xbf16>,
      %c2_43 = arith.constant 2 : index
      %c0_44 = arith.constant 0 : index
      %c0_45 = arith.constant 0 : index
      %32 = vector.load %arg11[%c2_43, %c0_44, %c0_45] : memref<18x18x32xbf16, #tpu.memory_space<vmem>>, vector<16x16x32xbf16>
      %33 = vector.shape_cast %32 : vector<16x16x32xbf16> to vector<256x32xbf16>
      %c0_46 = arith.constant 0 : index
      %c192 = arith.constant 192 : index
      %34 = vector.load %arg12[%c0_46, %c192] : memref<256x288xbf16, #tpu.memory_space<vmem>>, vector<256x32xbf16>
      tpu.vector_store %arg12[%c0_46, %c192], %33 {strides = array<i32>} : memref<256x288xbf16, #tpu.memory_space<vmem>>, vector<256x32xbf16>,
      %c2_47 = arith.constant 2 : index
      %c1_48 = arith.constant 1 : index
      %c0_49 = arith.constant 0 : index
      %35 = vector.load %arg11[%c2_47, %c1_48, %c0_49] : memref<18x18x32xbf16, #tpu.memory_space<vmem>>, vector<16x16x32xbf16>
      %36 = vector.shape_cast %35 : vector<16x16x32xbf16> to vector<256x32xbf16>
      %c0_50 = arith.constant 0 : index
      %c224 = arith.constant 224 : index
      %37 = vector.load %arg12[%c0_50, %c224] : memref<256x288xbf16, #tpu.memory_space<vmem>>, vector<256x32xbf16>
      tpu.vector_store %arg12[%c0_50, %c224], %36 {strides = array<i32>} : memref<256x288xbf16, #tpu.memory_space<vmem>>, vector<256x32xbf16>,
      %c2_51 = arith.constant 2 : index
      %c2_52 = arith.constant 2 : index
      %c0_53 = arith.constant 0 : index
      %38 = vector.load %arg11[%c2_51, %c2_52, %c0_53] : memref<18x18x32xbf16, #tpu.memory_space<vmem>>, vector<16x16x32xbf16>
      %39 = vector.shape_cast %38 : vector<16x16x32xbf16> to vector<256x32xbf16>
      %c0_54 = arith.constant 0 : index
      %c256 = arith.constant 256 : index
      %40 = vector.load %arg12[%c0_54, %c256] : memref<256x288xbf16, #tpu.memory_space<vmem>>, vector<256x32xbf16>
      tpu.vector_store %arg12[%c0_54, %c256], %39 {strides = array<i32>} : memref<256x288xbf16, #tpu.memory_space<vmem>>, vector<256x32xbf16>,
      %c0_55 = arith.constant 0 : index
      %c0_56 = arith.constant 0 : index
      %41 = vector.load %arg12[%c0_55, %c0_56] : memref<256x288xbf16, #tpu.memory_space<vmem>>, vector<256x288xbf16>
      %c0_57 = arith.constant 0 : index
      %c0_58 = arith.constant 0 : index
      %42 = vector.load %arg2[%c0_57, %c0_58] : memref<288x32xbf16, #tpu.memory_space<vmem>>, vector<288x32xbf16>
      %cst_59 = arith.constant dense<0.000000e+00> : vector<256x32xf32>
      %43 = tpu.matmul %41, %42, %cst_59 {dimension_numbers = #tpu.dot_dimension_numbers<[1], [0], [0], [1], [0, 0, 1, 1], [], []>} : vector<256x288xbf16>, vector<288x32xbf16>, vector<256x32xf32> -> vector<256x32xf32>
      %c0_60 = arith.constant 0 : index
      %c0_61 = arith.constant 0 : index
      %44 = vector.load %arg3[%c0_60, %c0_61] : memref<1x32xf32, #tpu.memory_space<vmem>>, vector<1x32xf32>
      %45 = vector.broadcast %44 : vector<1x32xf32> to vector<256x32xf32>
      %46 = arith.addf %43, %45 : vector<256x32xf32>
      %cst_62 = arith.constant 0.000000e+00 : f32
      %47 = vector.broadcast %cst_62 : f32 to vector<256x32xf32>
      %48 = arith.maximumf %46, %47 : vector<256x32xf32>
      %49 = vector.shape_cast %48 : vector<256x32xf32> to vector<16x16x32xf32>
      %50 = arith.truncf %49 : vector<16x16x32xf32> to vector<16x16x32xbf16>
      %c1_63 = arith.constant 1 : index
      %c1_64 = arith.constant 1 : index
      %c0_65 = arith.constant 0 : index
      %51 = vector.load %arg11[%c1_63, %c1_64, %c0_65] : memref<18x18x32xbf16, #tpu.memory_space<vmem>>, vector<16x16x32xbf16>
      tpu.vector_store %arg11[%c1_63, %c1_64, %c0_65], %50 {strides = array<i32>} : memref<18x18x32xbf16, #tpu.memory_space<vmem>>, vector<16x16x32xbf16>,
      %c0_66 = arith.constant 0 : index
      %c0_67 = arith.constant 0 : index
      %c0_68 = arith.constant 0 : index
      %52 = vector.load %arg11[%c0_66, %c0_67, %c0_68] : memref<18x18x32xbf16, #tpu.memory_space<vmem>>, vector<16x16x32xbf16>
      %53 = vector.shape_cast %52 : vector<16x16x32xbf16> to vector<256x32xbf16>
      %c0_69 = arith.constant 0 : index
      %c0_70 = arith.constant 0 : index
      %54 = vector.load %arg12[%c0_69, %c0_70] : memref<256x288xbf16, #tpu.memory_space<vmem>>, vector<256x32xbf16>
      tpu.vector_store %arg12[%c0_69, %c0_70], %53 {strides = array<i32>} : memref<256x288xbf16, #tpu.memory_space<vmem>>, vector<256x32xbf16>,
      %c0_71 = arith.constant 0 : index
      %c1_72 = arith.constant 1 : index
      %c0_73 = arith.constant 0 : index
      %55 = vector.load %arg11[%c0_71, %c1_72, %c0_73] : memref<18x18x32xbf16, #tpu.memory_space<vmem>>, vector<16x16x32xbf16>
      %56 = vector.shape_cast %55 : vector<16x16x32xbf16> to vector<256x32xbf16>
      %c0_74 = arith.constant 0 : index
      %c32_75 = arith.constant 32 : index
      %57 = vector.load %arg12[%c0_74, %c32_75] : memref<256x288xbf16, #tpu.memory_space<vmem>>, vector<256x32xbf16>
      tpu.vector_store %arg12[%c0_74, %c32_75], %56 {strides = array<i32>} : memref<256x288xbf16, #tpu.memory_space<vmem>>, vector<256x32xbf16>,
      %c0_76 = arith.constant 0 : index
      %c2_77 = arith.constant 2 : index
      %c0_78 = arith.constant 0 : index
      %58 = vector.load %arg11[%c0_76, %c2_77, %c0_78] : memref<18x18x32xbf16, #tpu.memory_space<vmem>>, vector<16x16x32xbf16>
      %59 = vector.shape_cast %58 : vector<16x16x32xbf16> to vector<256x32xbf16>
      %c0_79 = arith.constant 0 : index
      %c64_80 = arith.constant 64 : index
      %60 = vector.load %arg12[%c0_79, %c64_80] : memref<256x288xbf16, #tpu.memory_space<vmem>>, vector<256x32xbf16>
      tpu.vector_store %arg12[%c0_79, %c64_80], %59 {strides = array<i32>} : memref<256x288xbf16, #tpu.memory_space<vmem>>, vector<256x32xbf16>,
      %c1_81 = arith.constant 1 : index
      %c0_82 = arith.constant 0 : index
      %c0_83 = arith.constant 0 : index
      %61 = vector.load %arg11[%c1_81, %c0_82, %c0_83] : memref<18x18x32xbf16, #tpu.memory_space<vmem>>, vector<16x16x32xbf16>
      %62 = vector.shape_cast %61 : vector<16x16x32xbf16> to vector<256x32xbf16>
      %c0_84 = arith.constant 0 : index
      %c96_85 = arith.constant 96 : index
      %63 = vector.load %arg12[%c0_84, %c96_85] : memref<256x288xbf16, #tpu.memory_space<vmem>>, vector<256x32xbf16>
      tpu.vector_store %arg12[%c0_84, %c96_85], %62 {strides = array<i32>} : memref<256x288xbf16, #tpu.memory_space<vmem>>, vector<256x32xbf16>,
      %c1_86 = arith.constant 1 : index
      %c1_87 = arith.constant 1 : index
      %c0_88 = arith.constant 0 : index
      %64 = vector.load %arg11[%c1_86, %c1_87, %c0_88] : memref<18x18x32xbf16, #tpu.memory_space<vmem>>, vector<16x16x32xbf16>
      %65 = vector.shape_cast %64 : vector<16x16x32xbf16> to vector<256x32xbf16>
      %c0_89 = arith.constant 0 : index
      %c128_90 = arith.constant 128 : index
      %66 = vector.load %arg12[%c0_89, %c128_90] : memref<256x288xbf16, #tpu.memory_space<vmem>>, vector<256x32xbf16>
      tpu.vector_store %arg12[%c0_89, %c128_90], %65 {strides = array<i32>} : memref<256x288xbf16, #tpu.memory_space<vmem>>, vector<256x32xbf16>,
      %c1_91 = arith.constant 1 : index
      %c2_92 = arith.constant 2 : index
      %c0_93 = arith.constant 0 : index
      %67 = vector.load %arg11[%c1_91, %c2_92, %c0_93] : memref<18x18x32xbf16, #tpu.memory_space<vmem>>, vector<16x16x32xbf16>
      %68 = vector.shape_cast %67 : vector<16x16x32xbf16> to vector<256x32xbf16>
      %c0_94 = arith.constant 0 : index
      %c160_95 = arith.constant 160 : index
      %69 = vector.load %arg12[%c0_94, %c160_95] : memref<256x288xbf16, #tpu.memory_space<vmem>>, vector<256x32xbf16>
      tpu.vector_store %arg12[%c0_94, %c160_95], %68 {strides = array<i32>} : memref<256x288xbf16, #tpu.memory_space<vmem>>, vector<256x32xbf16>,
      %c2_96 = arith.constant 2 : index
      %c0_97 = arith.constant 0 : index
      %c0_98 = arith.constant 0 : index
      %70 = vector.load %arg11[%c2_96, %c0_97, %c0_98] : memref<18x18x32xbf16, #tpu.memory_space<vmem>>, vector<16x16x32xbf16>
      %71 = vector.shape_cast %70 : vector<16x16x32xbf16> to vector<256x32xbf16>
      %c0_99 = arith.constant 0 : index
      %c192_100 = arith.constant 192 : index
      %72 = vector.load %arg12[%c0_99, %c192_100] : memref<256x288xbf16, #tpu.memory_space<vmem>>, vector<256x32xbf16>
      tpu.vector_store %arg12[%c0_99, %c192_100], %71 {strides = array<i32>} : memref<256x288xbf16, #tpu.memory_space<vmem>>, vector<256x32xbf16>,
      %c2_101 = arith.constant 2 : index
      %c1_102 = arith.constant 1 : index
      %c0_103 = arith.constant 0 : index
      %73 = vector.load %arg11[%c2_101, %c1_102, %c0_103] : memref<18x18x32xbf16, #tpu.memory_space<vmem>>, vector<16x16x32xbf16>
      %74 = vector.shape_cast %73 : vector<16x16x32xbf16> to vector<256x32xbf16>
      %c0_104 = arith.constant 0 : index
      %c224_105 = arith.constant 224 : index
      %75 = vector.load %arg12[%c0_104, %c224_105] : memref<256x288xbf16, #tpu.memory_space<vmem>>, vector<256x32xbf16>
      tpu.vector_store %arg12[%c0_104, %c224_105], %74 {strides = array<i32>} : memref<256x288xbf16, #tpu.memory_space<vmem>>, vector<256x32xbf16>,
      %c2_106 = arith.constant 2 : index
      %c2_107 = arith.constant 2 : index
      %c0_108 = arith.constant 0 : index
      %76 = vector.load %arg11[%c2_106, %c2_107, %c0_108] : memref<18x18x32xbf16, #tpu.memory_space<vmem>>, vector<16x16x32xbf16>
      %77 = vector.shape_cast %76 : vector<16x16x32xbf16> to vector<256x32xbf16>
      %c0_109 = arith.constant 0 : index
      %c256_110 = arith.constant 256 : index
      %78 = vector.load %arg12[%c0_109, %c256_110] : memref<256x288xbf16, #tpu.memory_space<vmem>>, vector<256x32xbf16>
      tpu.vector_store %arg12[%c0_109, %c256_110], %77 {strides = array<i32>} : memref<256x288xbf16, #tpu.memory_space<vmem>>, vector<256x32xbf16>,
      %c0_111 = arith.constant 0 : index
      %c0_112 = arith.constant 0 : index
      %79 = vector.load %arg12[%c0_111, %c0_112] : memref<256x288xbf16, #tpu.memory_space<vmem>>, vector<256x288xbf16>
      %c0_113 = arith.constant 0 : index
      %c0_114 = arith.constant 0 : index
      %80 = vector.load %arg4[%c0_113, %c0_114] : memref<288x32xbf16, #tpu.memory_space<vmem>>, vector<288x32xbf16>
      %cst_115 = arith.constant dense<0.000000e+00> : vector<256x32xf32>
      %81 = tpu.matmul %79, %80, %cst_115 {dimension_numbers = #tpu.dot_dimension_numbers<[1], [0], [0], [1], [0, 0, 1, 1], [], []>} : vector<256x288xbf16>, vector<288x32xbf16>, vector<256x32xf32> -> vector<256x32xf32>
      %c0_116 = arith.constant 0 : index
      %c0_117 = arith.constant 0 : index
      %82 = vector.load %arg5[%c0_116, %c0_117] : memref<1x32xf32, #tpu.memory_space<vmem>>, vector<1x32xf32>
      %83 = vector.broadcast %82 : vector<1x32xf32> to vector<256x32xf32>
      %84 = arith.addf %81, %83 : vector<256x32xf32>
      %cst_118 = arith.constant dense<0.000000e+00> : vector<32xf32>
      %85 = vector.multi_reduction <add>, %84, %cst_118 [0] : vector<256x32xf32> to vector<32xf32>
      %86 = vector.shape_cast %85 : vector<32xf32> to vector<1x32xf32>
      %cst_119 = arith.constant 2.560000e+02 : f32
      %87 = vector.broadcast %cst_119 : f32 to vector<1x32xf32>
      %88 = arith.divf %86, %87 : vector<1x32xf32>
      %c0_120 = arith.constant 0 : index
      %c0_121 = arith.constant 0 : index
      %89 = vector.load %arg6[%c0_120, %c0_121] : memref<8x32xf32, #tpu.memory_space<vmem>>, vector<8x32xf32>
      %90 = vector.broadcast %88 : vector<1x32xf32> to vector<8x32xf32>
      %91 = arith.mulf %90, %89 : vector<8x32xf32>
      %cst_122 = arith.constant dense<0.000000e+00> : vector<8xf32>
      %92 = vector.multi_reduction <add>, %91, %cst_122 [1] : vector<8x32xf32> to vector<8xf32>
      %93 = vector.shape_cast %92 : vector<8xf32> to vector<8x1xf32>
      %c0_123 = arith.constant 0 : index
      %c0_124 = arith.constant 0 : index
      %94 = vector.load %arg7[%c0_123, %c0_124] : memref<8x1xf32, #tpu.memory_space<vmem>>, vector<8x1xf32>
      %95 = arith.addf %93, %94 : vector<8x1xf32>
      %cst_125 = arith.constant 0.000000e+00 : f32
      %96 = vector.broadcast %cst_125 : f32 to vector<8x1xf32>
      %97 = arith.maximumf %95, %96 : vector<8x1xf32>
      %c0_126 = arith.constant 0 : index
      %c0_127 = arith.constant 0 : index
      %98 = vector.load %arg8[%c0_126, %c0_127] : memref<8x32xf32, #tpu.memory_space<vmem>>, vector<8x32xf32>
      %99 = vector.broadcast %97 : vector<8x1xf32> to vector<8x32xf32>
      %100 = arith.mulf %99, %98 : vector<8x32xf32>
      %cst_128 = arith.constant dense<0.000000e+00> : vector<32xf32>
      %101 = vector.multi_reduction <add>, %100, %cst_128 [0] : vector<8x32xf32> to vector<32xf32>
      %102 = vector.shape_cast %101 : vector<32xf32> to vector<1x32xf32>
      %c0_129 = arith.constant 0 : index
      %c0_130 = arith.constant 0 : index
      %103 = vector.load %arg9[%c0_129, %c0_130] : memref<1x32xf32, #tpu.memory_space<vmem>>, vector<1x32xf32>
      %104 = arith.addf %102, %103 : vector<1x32xf32>
      %105 = arith.negf %104 : vector<1x32xf32>
      %106 = math.exp %105 : vector<1x32xf32>
      %cst_131 = arith.constant 1.000000e+00 : f32
      %107 = vector.broadcast %cst_131 : f32 to vector<1x32xf32>
      %108 = arith.addf %107, %106 : vector<1x32xf32>
      %109 = arith.divf %107, %108 : vector<1x32xf32>
      %110 = vector.shape_cast %11 : vector<16x16x32xf32> to vector<256x32xf32>
      %111 = vector.broadcast %109 : vector<1x32xf32> to vector<256x32xf32>
      %112 = arith.mulf %84, %111 : vector<256x32xf32>
      %113 = arith.addf %110, %112 : vector<256x32xf32>
      %114 = vector.shape_cast %113 : vector<256x32xf32> to vector<16x16x32xf32>
      %115 = arith.index_cast %8 : i32 to index
      %c0_132 = arith.constant 0 : index
      %c0_133 = arith.constant 0 : index
      %c0_134 = arith.constant 0 : index
      %116 = vector.load %arg10[%115, %c0_132, %c0_133, %c0_134] : memref<2x16x16x32xf32, #tpu.memory_space<vmem>>, vector<1x16x16x32xf32>
      %117 = vector.shape_cast %116 : vector<1x16x16x32xf32> to vector<16x16x32xf32>
      %118 = vector.shape_cast %114 : vector<16x16x32xf32> to vector<1x16x16x32xf32>
      tpu.vector_store %arg10[%115, %c0_132, %c0_133, %c0_134], %118 {strides = array<i32>} : memref<2x16x16x32xf32, #tpu.memory_space<vmem>>, vector<1x16x16x32xf32>,
    }
    %c2_i32_11 = arith.constant 2 : i32
    return
  }
  func.func @transform_0(%arg0: i32) -> (i32, i32, i32, i32) {
    %c0_i32 = arith.constant 0 : i32
    %c0_i32_0 = arith.constant 0 : i32
    %c0_i32_1 = arith.constant 0 : i32
    %c0_i32_2 = arith.constant 0 : i32
    return %arg0, %c0_i32, %c0_i32_0, %c0_i32_1 : i32, i32, i32, i32
  }
  func.func @transform_1(%arg0: i32) -> (i32, i32) {
    %c0_i32 = arith.constant 0 : i32
    %c0_i32_0 = arith.constant 0 : i32
    %c0_i32_1 = arith.constant 0 : i32
    return %c0_i32, %c0_i32_0 : i32, i32
  }
  func.func @transform_2(%arg0: i32) -> (i32, i32) {
    %c0_i32 = arith.constant 0 : i32
    %c0_i32_0 = arith.constant 0 : i32
    %c0_i32_1 = arith.constant 0 : i32
    return %c0_i32, %c0_i32_0 : i32, i32
  }
  func.func @transform_3(%arg0: i32) -> (i32, i32) {
    %c0_i32 = arith.constant 0 : i32
    %c0_i32_0 = arith.constant 0 : i32
    %c0_i32_1 = arith.constant 0 : i32
    return %c0_i32, %c0_i32_0 : i32, i32
  }
  func.func @transform_4(%arg0: i32) -> (i32, i32) {
    %c0_i32 = arith.constant 0 : i32
    %c0_i32_0 = arith.constant 0 : i32
    %c0_i32_1 = arith.constant 0 : i32
    return %c0_i32, %c0_i32_0 : i32, i32
  }
  func.func @transform_5(%arg0: i32) -> (i32, i32) {
    %c0_i32 = arith.constant 0 : i32
    %c0_i32_0 = arith.constant 0 : i32
    %c0_i32_1 = arith.constant 0 : i32
    return %c0_i32, %c0_i32_0 : i32, i32
  }
  func.func @transform_6(%arg0: i32) -> (i32, i32) {
    %c0_i32 = arith.constant 0 : i32
    %c0_i32_0 = arith.constant 0 : i32
    %c0_i32_1 = arith.constant 0 : i32
    return %c0_i32, %c0_i32_0 : i32, i32
  }
  func.func @transform_7(%arg0: i32) -> (i32, i32) {
    %c0_i32 = arith.constant 0 : i32
    %c0_i32_0 = arith.constant 0 : i32
    %c0_i32_1 = arith.constant 0 : i32
    return %c0_i32, %c0_i32_0 : i32, i32
  }
  func.func @transform_8(%arg0: i32) -> (i32, i32) {
    %c0_i32 = arith.constant 0 : i32
    %c0_i32_0 = arith.constant 0 : i32
    %c0_i32_1 = arith.constant 0 : i32
    return %c0_i32, %c0_i32_0 : i32, i32
  }
  func.func @transform_9(%arg0: i32) -> (i32, i32, i32, i32) {
    %c0_i32 = arith.constant 0 : i32
    %c0_i32_0 = arith.constant 0 : i32
    %c0_i32_1 = arith.constant 0 : i32
    %c0_i32_2 = arith.constant 0 : i32
    return %arg0, %c0_i32, %c0_i32_0, %c0_i32_1 : i32, i32, i32, i32
  }
}

</mosaic_0001>

<bundles_post_ra>
// kernel: tpu_custom_call.1
= control target key start
LH: loop header
LB: loop body
LE: loop exit
PB: predicated region body
PF: predicated region fallthrough
CT: control target
= control target key end

     0   :  { %14 = vsyncpa [#allocation5], 0  ;;  %s12987_s0 = inlined_call_operand.hbm [shape: f32[2,16,16,32], index: 0, kind: input, shape index: {}]   ;;  %s12988_s1 = inlined_call_operand.vmem [shape: bf16[288,32], index: 1, kind: input, shape index: {}]   ;;  %s12989_s2 = inlined_call_operand.vmem [shape: f32[1,32], index: 2, kind: input, shape index: {}]   ;;  %s12990_s3 = inlined_call_operand.vmem [shape: bf16[288,32], index: 3, kind: input, shape index: {}]   ;;  %s12991_s4 = inlined_call_operand.vmem [shape: f32[1,32], index: 4, kind: input, shape index: {}]   ;;  %s12992_s5 = inlined_call_operand.vmem [shape: f32[8,32], index: 5, kind: input, shape index: {}]   ;;  %s12993_s6 = inlined_call_operand.vmem [shape: f32[8,1], index: 6, kind: input, shape index: {}]   ;;  %s12994_s7 = inlined_call_operand.vmem [shape: f32[8,32], index: 7, kind: input, shape index: {}]   ;;  %s12995_s8 = inlined_call_operand.vmem [shape: f32[1,32], index: 8, kind: input, shape index: {}]   ;;  %s12996_s9 = inlined_call_operand.hbm [shape: f32[2,16,16,32], index: 9, kind: output, shape index: {}]  }
   0x1   :  { %15 = vsyncpa [#allocation6], 0  ;;  %s9895_s30 = smov [#allocation4]   ;;  %s9839_s13 = scalar_lea.hbm %s12987_s0, 8192 }
   0x2   :  { %s21_s10 = sshll.u32 %s9895_s30, 4  ;;  %p9840_p0 = scmp.ne.s32.totalorder %s12987_s0, %s9839_s13  ;;  %s22_s10 = int_to_ptr.vmem [resolvable:$true] %s21_s10 }
   0x3   :  { %p9843_p1 = scmp.lt.u32.totalorder %s9839_s13, %s12987_s0 }
   0x5   :  { %p9845_p2 = pnand %p9843_p1, %p9840_p0 }
   0x7   :  { %9848 = shalt.err (!%p9845_p2)
}
   0x8   :  { %s9849_s18 = scalar_lea.vmem %s22_s10, 8192  ;;  %p9854_p4 = scmp.lt.s32.totalorder %s22_s10, %s22_s10 }
   0x9   :  { %p9850_p3 = scmp.ne.s32.totalorder %s22_s10, %s9849_s18  ;;  %p9855_p5 = scmp.lt.s32.totalorder %s9849_s18, %s9849_s18 }
   0xb   :  { %p9856_p6 = por %p9855_p5, %p9854_p4 }
   0xd   :  { %p9857_p7 = pnand %p9856_p6, %p9850_p3 }
   0xf   :  { %9860 = shalt.err (!%p9857_p7)
}
  0x10   :  { %s9896_s19 = smov 128   ;;  %s9897_s20 = smov 8  }
  0x11   :  { %27 = dma.hbm_to_vmem [thread:$0]  %s12987_s0, 8192, %s22_s10, [#allocation5], %s9896_s19, %s9896_s19, %s9897_s20  }
  0x12   :  { %9887 = dma.done.wait [#allocation5], 8192  }
  0x13   :  { %9888 = vsyncadd [#allocation5], 4294959104  ;;  %vm48_vm0 = vcmask 257024   ;;  %vm51_vm1 = vcmask 253952   ;;  %v9898_v0 = vmov 0   ;;  %s10059_s0 = smov 0  }
  0x14   :  { %49 = vst.msk [vmem:[#allocation2] sm:$0xf] %vm48_vm0, %v9898_v0  ;;  %50 = vst.msk [vmem:[#allocation2 + $0x4] sm:$0xf] %vm48_vm0, %v9898_v0  ;;  %vm58_vm2 = vsmask.f32 256 }
  0x15   :  { %54 = vst.msk [vmem:[#allocation2 + $0xcc] sm:$0xf] %vm48_vm0, %v9898_v0  ;;  %55 = vst.msk [vmem:[#allocation2 + $0xd0] sm:$0xf] %vm48_vm0, %v9898_v0  ;;  %vm114_vm4 = vsmask.f32 7938 }
  0x16   :  { %52 = vst.msk [vmem:[#allocation2 + $0x8] sm:$0x1] %vm51_vm1, %v9898_v0  ;;  %56 = vst.msk [vmem:[#allocation2 + $0xd4] sm:$0x1] %vm51_vm1, %v9898_v0  ;;  %v63_v2 = vld [vmem:[#allocation2 + $0xc] sm:$0x1] }
  0x17   :  { %vm9977_vm3 = vmand %vm51_vm1, %vm58_vm2  ;;  %v66_v3 = vld [vmem:[#allocation2 + $0x18] sm:$0x1]  ;;  %v69_v4 = vld [vmem:[#allocation2 + $0x24] sm:$0x1] }
  0x18   :  { %v64_v6 = vsel %vm9977_vm3, 0, %v63_v2  ;;  %v67_v7 = vsel %vm9977_vm3, 0, %v66_v3  ;;  %v70_v8 = vsel %vm9977_vm3, 0, %v69_v4  ;;  %v72_v10 = vld [vmem:[#allocation2 + $0x30] sm:$0x1]  ;;  %vm10007_vm5 = vmand %vm51_vm1, %vm114_vm4 }
  0x19   :  { %65 = vst [vmem:[#allocation2 + $0xc] sm:$0x1] %v64_v6  ;;  %68 = vst [vmem:[#allocation2 + $0x18] sm:$0x1] %v67_v7  ;;  %v75_v11 = vld [vmem:[#allocation2 + $0x3c] sm:$0x1] }
  0x1a   :  { %71 = vst [vmem:[#allocation2 + $0x24] sm:$0x1] %v70_v8  ;;  %v73_v12 = vsel %vm9977_vm3, 0, %v72_v10  ;;  %v76_v13 = vsel %vm9977_vm3, 0, %v75_v11  ;;  %v78_v14 = vld [vmem:[#allocation2 + $0x48] sm:$0x1] }
  0x1b   :  { %v60_v5 = vld [vmem:[#allocation2] sm:$0x1]  ;;  %v81_v15 = vld [vmem:[#allocation2 + $0x54] sm:$0x1]  ;;  %74 = vst [vmem:[#allocation2 + $0x30] sm:$0x1] %v73_v12 }
  0x1c   :  { %v61_v9 = vsel %vm9977_vm3, 0, %v60_v5  ;;  %77 = vst [vmem:[#allocation2 + $0x3c] sm:$0x1] %v76_v13  ;;  %v79_v16 = vsel %vm9977_vm3, 0, %v78_v14  ;;  %v82_v17 = vsel %vm9977_vm3, 0, %v81_v15 }
  0x1d   :  { %62 = vst [vmem:[#allocation2] sm:$0x1] %v61_v9  ;;  %v84_v18 = vld [vmem:[#allocation2 + $0x60] sm:$0x1]  ;;  %v87_v19 = vld [vmem:[#allocation2 + $0x6c] sm:$0x1] }
  0x1e   :  { %80 = vst [vmem:[#allocation2 + $0x48] sm:$0x1] %v79_v16  ;;  %83 = vst [vmem:[#allocation2 + $0x54] sm:$0x1] %v82_v17  ;;  %v85_v20 = vsel %vm9977_vm3, 0, %v84_v18  ;;  %v88_v21 = vsel %vm9977_vm3, 0, %v87_v19 }
  0x1f   :  { %v90_v22 = vld [vmem:[#allocation2 + $0x78] sm:$0x1]  ;;  %v93_v23 = vld [vmem:[#allocation2 + $0x84] sm:$0x1]  ;;  %86 = vst [vmem:[#allocation2 + $0x60] sm:$0x1] %v85_v20 }
  0x20   :  { %89 = vst [vmem:[#allocation2 + $0x6c] sm:$0x1] %v88_v21  ;;  %v91_v24 = vsel %vm9977_vm3, 0, %v90_v22  ;;  %v94_v25 = vsel %vm9977_vm3, 0, %v93_v23  ;;  %v96_v26 = vld [vmem:[#allocation2 + $0x90] sm:$0x1] }
  0x21   :  { %v99_v27 = vld [vmem:[#allocation2 + $0x9c] sm:$0x1]  ;;  %92 = vst [vmem:[#allocation2 + $0x78] sm:$0x1] %v91_v24  ;;  %95 = vst [vmem:[#allocation2 + $0x84] sm:$0x1] %v94_v25 }
  0x22   :  { %v97_v29 = vsel %vm9977_vm3, 0, %v96_v26  ;;  %v100_v30 = vsel %vm9977_vm3, 0, %v99_v27  ;;  %v102_v31 = vld [vmem:[#allocation2 + $0xa8] sm:$0x1]  ;;  %v105_v32 = vld [vmem:[#allocation2 + $0xb4] sm:$0x1] }
  0x23   :  { %98 = vst [vmem:[#allocation2 + $0x90] sm:$0x1] %v97_v29  ;;  %101 = vst [vmem:[#allocation2 + $0x9c] sm:$0x1] %v100_v30  ;;  %v103_v33 = vsel %vm9977_vm3, 0, %v102_v31  ;;  %v106_v34 = vsel %vm9977_vm3, 0, %v105_v32 }
  0x24   :  { %v108_v35 = vld [vmem:[#allocation2 + $0xc0] sm:$0x1]  ;;  %v111_v36 = vld [vmem:[#allocation2 + $0xcc] sm:$0x1]  ;;  %104 = vst [vmem:[#allocation2 + $0xa8] sm:$0x1] %v103_v33 }
  0x25   :  { %107 = vst [vmem:[#allocation2 + $0xb4] sm:$0x1] %v106_v34  ;;  %v109_v37 = vsel %vm9977_vm3, 0, %v108_v35  ;;  %v112_v38 = vsel %vm9977_vm3, 0, %v111_v36  ;;  %v116_v39 = vld [vmem:[#allocation2 + $0x8] sm:$0x1] }
  0x26   :  { %v119_v40 = vld [vmem:[#allocation2 + $0x14] sm:$0x1]  ;;  %110 = vst [vmem:[#allocation2 + $0xc0] sm:$0x1] %v109_v37  ;;  %113 = vst [vmem:[#allocation2 + $0xcc] sm:$0x1] %v112_v38 }
  0x27   :  { %v117_v41 = vsel %vm10007_vm5, 0, %v116_v39  ;;  %v120_v42 = vsel %vm10007_vm5, 0, %v119_v40  ;;  %v122_v43 = vld [vmem:[#allocation2 + $0x20] sm:$0x1]  ;;  %v125_v44 = vld [vmem:[#allocation2 + $0x2c] sm:$0x1] }
  0x28   :  { %118 = vst [vmem:[#allocation2 + $0x8] sm:$0x1] %v117_v41  ;;  %121 = vst [vmem:[#allocation2 + $0x14] sm:$0x1] %v120_v42  ;;  %v123_v45 = vsel %vm10007_vm5, 0, %v122_v43  ;;  %v126_v46 = vsel %vm10007_vm5, 0, %v125_v44 }
  0x29   :  { %v128_v47 = vld [vmem:[#allocation2 + $0x38] sm:$0x1]  ;;  %v131_v48 = vld [vmem:[#allocation2 + $0x44] sm:$0x1]  ;;  %124 = vst [vmem:[#allocation2 + $0x20] sm:$0x1] %v123_v45 }
  0x2a   :  { %127 = vst [vmem:[#allocation2 + $0x2c] sm:$0x1] %v126_v46  ;;  %v129_v49 = vsel %vm10007_vm5, 0, %v128_v47  ;;  %v132_v50 = vsel %vm10007_vm5, 0, %v131_v48  ;;  %v134_v51 = vld [vmem:[#allocation2 + $0x50] sm:$0x1] }
  0x2b   :  { %v137_v52 = vld [vmem:[#allocation2 + $0x5c] sm:$0x1]  ;;  %130 = vst [vmem:[#allocation2 + $0x38] sm:$0x1] %v129_v49  ;;  %133 = vst [vmem:[#allocation2 + $0x44] sm:$0x1] %v132_v50 }
  0x2c   :  { %v135_v53 = vsel %vm10007_vm5, 0, %v134_v51  ;;  %v138_v54 = vsel %vm10007_vm5, 0, %v137_v52  ;;  %v140_v55 = vld [vmem:[#allocation2 + $0x68] sm:$0x1]  ;;  %v143_v56 = vld [vmem:[#allocation2 + $0x74] sm:$0x1] }
  0x2d   :  { %136 = vst [vmem:[#allocation2 + $0x50] sm:$0x1] %v135_v53  ;;  %139 = vst [vmem:[#allocation2 + $0x5c] sm:$0x1] %v138_v54  ;;  %v141_v57 = vsel %vm10007_vm5, 0, %v140_v55  ;;  %v144_v58 = vsel %vm10007_vm5, 0, %v143_v56 }
  0x2e   :  { %v146_v59 = vld [vmem:[#allocation2 + $0x80] sm:$0x1]  ;;  %v149_v60 = vld [vmem:[#allocation2 + $0x8c] sm:$0x1]  ;;  %142 = vst [vmem:[#allocation2 + $0x68] sm:$0x1] %v141_v57 }
  0x2f   :  { %145 = vst [vmem:[#allocation2 + $0x74] sm:$0x1] %v144_v58  ;;  %v147_v61 = vsel %vm10007_vm5, 0, %v146_v59  ;;  %v150_v62 = vsel %vm10007_vm5, 0, %v149_v60  ;;  %v152_v63 = vld [vmem:[#allocation2 + $0x98] sm:$0x1] }
  0x30   :  { %v155_v0 = vld [vmem:[#allocation2 + $0xa4] sm:$0x1]  ;;  %148 = vst [vmem:[#allocation2 + $0x80] sm:$0x1] %v147_v61  ;;  %151 = vst [vmem:[#allocation2 + $0x8c] sm:$0x1] %v150_v62 }
  0x31   :  { %v153_v2 = vsel %vm10007_vm5, 0, %v152_v63  ;;  %v156_v3 = vsel %vm10007_vm5, 0, %v155_v0  ;;  %v158_v4 = vld [vmem:[#allocation2 + $0xb0] sm:$0x1]  ;;  %v161_v5 = vld [vmem:[#allocation2 + $0xbc] sm:$0x1] }
  0x32   :  { %154 = vst [vmem:[#allocation2 + $0x98] sm:$0x1] %v153_v2  ;;  %157 = vst [vmem:[#allocation2 + $0xa4] sm:$0x1] %v156_v3  ;;  %v159_v6 = vsel %vm10007_vm5, 0, %v158_v4  ;;  %v162_v7 = vsel %vm10007_vm5, 0, %v161_v5 }
  0x33   :  { %v164_v8 = vld [vmem:[#allocation2 + $0xc8] sm:$0x1]  ;;  %v167_v9 = vld [vmem:[#allocation2 + $0xd4] sm:$0x1]  ;;  %160 = vst [vmem:[#allocation2 + $0xb0] sm:$0x1] %v159_v6 }
  0x34   :  { %163 = vst [vmem:[#allocation2 + $0xbc] sm:$0x1] %v162_v7  ;;  %v165_v10 = vsel %vm10007_vm5, 0, %v164_v8  ;;  %v168_v11 = vsel %vm10007_vm5, 0, %v167_v9 }
  0x35   :  { %166 = vst [vmem:[#allocation2 + $0xc8] sm:$0x1] %v165_v10  ;;  %169 = vst [vmem:[#allocation2 + $0xd4] sm:$0x1] %v168_v11 }
  0x36 LB: > { %v1436_v12 = vld [vmem:[#allocation2] sm:$0xe]  ;;  %v1437_v13 = vld [vmem:[#allocation2 + $0x4] sm:$0xf]  ;;  %v1438_v14 = vld [vmem:[#allocation2 + $0x8] sm:$0x1]  ;;  %s9893_s0 = sphi %s10059_s0, %s175_s0  }
  0x37   : > { %vm1532_vm6 = vcmask 1042432   ;;  %vm1533_vm7 = vcmask 1046532   ;;  %v8793_v15 = vrot.slane %v1436_v12, 9  ;;  %v1537_v16 = vrot.slane %v1437_v13, 5  ;;  %v888_v19 = vld [vmem:[#allocation2] sm:$0xf]  ;;  %vm10091_vm13 = vmand %vm48_vm0, %vm114_vm4 }
  0x38   : > { %vm10064_vm8 = vmor %vm1532_vm6, %vm1533_vm7  ;;  %v1540_v18 = vrot.slane %v1438_v14, 5  ;;  %v889_v20 = vld [vmem:[#allocation2 + $0x4] sm:$0xf]  ;;  %v890_v23 = vld [vmem:[#allocation2 + $0x8] sm:$0x1]  ;;  %v940_v24 = vshrl.u32 %v888_v19, 16 }
  0x39   : > { %v1538_v21 = vsel %vm10064_vm8, %v8793_v15, %v1537_v16  ;;  %v1539_v22 = vrot.slane %v1537_v16, 4  ;;  %vm936_vm9 = vsmask.f32 3328  ;;  %v943_v25 = vshll.u32 %v888_v19, 16  ;;  %s8728_s23 = sshll.u32 %s9893_s0, 8  ;;  %s9899_s25 = smov 64  }
  0x3a   : > { %v949_v26 = vshll.u32 %v889_v20, 16  ;;  %v953_v27 = vshrl.u32 %v889_v20, 16  ;;  %vm937_vm10 = vsmask.f32 7440  ;;  %v942_v29 = vrot.slane %v940_v24, 4  ;;  %s10075_s24 = scalar_lea.vmem [#allocation4], %s8728_s23 }
  0x3b   : > { %v1541_v28 = vsel %vm10064_vm8, %v1539_v22, %v1540_v18  ;;  %v959_v30 = vshll.u32 %v890_v23, 16  ;;  %v945_v32 = vrot.slane %v943_v25, 5  ;;  %v182_v35 = vld [vmem:[%s10075_s24 + $0x20] sm:$0xff]  ;;  %v183_v36 = vld [vmem:[%s10075_s24 + $0x28] sm:$0xff]  ;;  %vm306_vm11 = vsmask.f32 4368  ;;  %vm10084_vm12 = vmor %vm936_vm9, %vm937_vm10 }
  0x3c   : > { %v8809_v31 = vcombine.low %v1538_v21, %v1541_v28  ;;  %v951_v33 = vrot.slane %v949_v26, 5  ;;  %v955_v34 = vrot.slane %v953_v27, 4  ;;  %v9252_v38 = vpack.c.bf16 %v182_v35, %v182_v35  ;;  %v180_v40 = vld [vmem:[%s10075_s24 + $0x10] sm:$0xff]  ;;  %v181_v41 = vld [vmem:[%s10075_s24 + $0x18] sm:$0xff]  ;;  %vm10102_vm14 = vmor %vm58_vm2, %vm306_vm11  ;;  %s9900_s26 = smov 32   ;;  %s9901_s27 = smov 96  }
  0x3d   : > { %v961_v37 = vrot.slane %v959_v30, 5  ;;  %v9253_v39 = vpack.c.bf16 %v183_v36, %v183_v36  ;;  %v946_v42 = vor.u32 %v945_v32, %v942_v29  ;;  %v9250_v44 = vpack.c.bf16 %v180_v40, %v180_v40  ;;  %v184_v51 = vld [vmem:[%s10075_s24 + $0x30] sm:$0xff]  ;;  %v185_v61 = vld [vmem:[%s10075_s24 + $0x38] sm:$0xff]  ;;  %v645_v2 = vld [vmem:[#allocation2 + $0x24] sm:$0xf]  ;;  %s12871_s12 = scalar_lea.vmem [#allocation7], %s8728_s23 }
  0x3e   : > { %1695 = vrot.lane.b32.xlu1 %v8809_v31, %s9899_s25  ;;  %v956_v43 = vor.u32 %v955_v34, %v951_v33  ;;  %v9251_v45 = vpack.c.bf16 %v181_v41, %v181_v41  ;;  %v343_v47 = vshrl.u32 %v9252_v38, 16  ;;  %v346_v48 = vshll.u32 %v9252_v38, 16  ;;  %v638_v9 = vld [vmem:[#allocation2 + $0x18] sm:$0xf]  ;;  %v178_v14 = vld [vmem:[%s10075_s24] sm:$0xff]  ;;  %v179_v15 = vld [vmem:[%s10075_s24 + $0x8] sm:$0xff] }
  0x3f   : > { %v351_v49 = vshrl.u32 %v9253_v39, 16  ;;  %v354_v50 = vshll.u32 %v9253_v39, 16  ;;  %v947_v52 = vrot.slane %v946_v42, 4  ;;  %v326_v54 = vshrl.u32 %v9250_v44, 16  ;;  %v652_v26 = vld [vmem:[#allocation2 + $0x30] sm:$0xf] }
  0x40   : > { %v957_v53 = vrot.slane %v956_v43, 4  ;;  %v329_v55 = vshll.u32 %v9250_v44, 16  ;;  %v345_v56 = vrot.slane %v343_v47, 7  ;;  %v334_v59 = vshrl.u32 %v9251_v45, 16  ;;  %v642_v32 = vld [vmem:[#allocation2 + $0x20] sm:$0x1] }
  0x41   : > { %v353_v57 = vrot.slane %v351_v49, 7  ;;  %v337_v60 = vshll.u32 %v9251_v45, 16  ;;  %v952_v62 = vsel %vm10084_vm12, %v947_v52, %v951_v33  ;;  %v328_v3 = vrot.slane %v326_v54, 7  ;;  %v649_v34 = vld [vmem:[#allocation2 + $0x2c] sm:$0x1]  ;;  %s175_s0 = sadd.s32 1, %s9893_s0  }
  0x42   : > { %v962_v63 = vsel %vm10084_vm12, %v957_v53, %v961_v37  ;;  %v9254_v4 = vpack.c.bf16 %v184_v51, %v184_v51  ;;  %v348_v6 = vor.u32 %v346_v48, %v345_v56  ;;  %v349_v7 = vrot.slane %v345_v56, 4  ;;  %v656_v39 = vld [vmem:[#allocation2 + $0x38] sm:$0x1]  ;;  %v631_v47 = vld [vmem:[#allocation2 + $0xc] sm:$0xf]  ;;  %p172_p8 = scmp.ge.s32.totalorder %s175_s0, 2  }
  0x43   : > { %v8777_v5 = vcombine.low %v952_v62, %v962_v63  ;;  %v356_v8 = vor.u32 %v354_v50, %v353_v57  ;;  %v331_v10 = vor.u32 %v329_v55, %v328_v3  ;;  %v332_v11 = vrot.slane %v328_v3, 4  ;;  %v635_v52 = vld [vmem:[#allocation2 + $0x14] sm:$0x1]  ;;  %s9903_s23 = smov (%p172_p8), [#allocation7]  }
  0x44   : > { %v336_v12 = vrot.slane %v334_v59, 7  ;;  %v9255_v13 = vpack.c.bf16 %v185_v61, %v185_v61  ;;  %v646_v18 = vsel %vm10091_vm13, %v348_v6, %v645_v2  ;;  %v360_v19 = vshrl.u32 %v9254_v4, 16 }
  0x45   : > { %1371 = vrot.lane.b32.xlu0 %v8777_v5, %s9900_s26  ;;  %v357_v16 = vsel %vm10102_vm14, %v349_v7, %v356_v8  ;;  %v363_v20 = vshll.u32 %v9254_v4, 16  ;;  %647 = vst [vmem:[#allocation2 + $0x24] sm:$0xf] %v646_v18  ;;  %v639_v22 = vsel %vm10091_vm13, %v331_v10, %v638_v9  ;;  %v9248_v27 = vpack.c.bf16 %v178_v14, %v178_v14 }
  0x46   : > { %648 = vst.msk [vmem:[#allocation2 + $0x28] sm:$0xf] %vm48_vm0, %v357_v16  ;;  %v339_v21 = vor.u32 %v337_v60, %v336_v12  ;;  %v368_v23 = vshrl.u32 %v9255_v13, 16  ;;  %v371_v24 = vshll.u32 %v9255_v13, 16  ;;  %640 = vst [vmem:[#allocation2 + $0x18] sm:$0xf] %v639_v22  ;;  %v9249_v28 = vpack.c.bf16 %v179_v15, %v179_v15 }
  0x47   : > { %v362_v25 = vrot.slane %v360_v19, 7  ;;  %v341_v29 = vrot.slane %v336_v12, 4  ;;  %v358_v33 = vrot.slane %v353_v57, 4  ;;  %v309_v37 = vshrl.u32 %v9248_v27, 16  ;;  %v186_v60 = vld [vmem:[%s10075_s24 + $0x40] sm:$0xff]  ;;  %v187_v12 = vld [vmem:[%s10075_s24 + $0x48] sm:$0xff] }
  0x48   : > { %v340_v30 = vsel %vm10102_vm14, %v332_v11, %v339_v21  ;;  %v370_v31 = vrot.slane %v368_v23, 7  ;;  %v312_v38 = vshll.u32 %v9248_v27, 16  ;;  %v317_v42 = vshrl.u32 %v9249_v28, 16 }
  0x49   : > { %641 = vst.msk [vmem:[#allocation2 + $0x1c] sm:$0xf] %vm48_vm0, %v340_v30  ;;  %v365_v35 = vor.u32 %v363_v20, %v362_v25  ;;  %v366_v36 = vrot.slane %v362_v25, 4  ;;  %v320_v43 = vshll.u32 %v9249_v28, 16  ;;  %v311_v45 = vrot.slane %v309_v37, 7  ;;  %v189_v25 = vld [vmem:[%s10075_s24 + $0x58] sm:$0xff] }
  0x4a   : > { %v373_v40 = vor.u32 %v371_v24, %v370_v31  ;;  %v375_v41 = vrot.slane %v370_v31, 4  ;;  %v643_v48 = vsel %vm9977_vm3, %v341_v29, %v642_v32  ;;  %v650_v49 = vsel %vm9977_vm3, %v358_v33, %v649_v34  ;;  %v188_v24 = vld [vmem:[%s10075_s24 + $0x50] sm:$0xff] }
  0x4b   : > { %v653_v44 = vsel %vm10091_vm13, %v365_v35, %v652_v26  ;;  %v319_v51 = vrot.slane %v317_v42, 7  ;;  %644 = vst [vmem:[#allocation2 + $0x20] sm:$0x1] %v643_v48  ;;  %651 = vst [vmem:[#allocation2 + $0x2c] sm:$0x1] %v650_v49  ;;  %v314_v55 = vor.u32 %v312_v38, %v311_v45  ;;  %v315_v56 = vrot.slane %v311_v45, 4 }
  0x4c   : > { %v374_v50 = vsel %vm10102_vm14, %v366_v36, %v373_v40  ;;  %654 = vst [vmem:[#allocation2 + $0x30] sm:$0xf] %v653_v44  ;;  %v657_v53 = vsel %vm9977_vm3, %v375_v41, %v656_v39  ;;  %v2455_v6 = vld [vmem:[#allocation2 + $0x24] sm:$0xe]  ;;  %v10139_v7 = vpack.c.bf16 %v186_v60, %v186_v60  ;;  %v10159_v33 = vpack.c.bf16 %v187_v12, %v187_v12 }
  0x4d   : > { %v9667_v54 = vld [vmem:[#allocation2 + $0x24] sm:$0xff]   ;;  %655 = vst.msk [vmem:[#allocation2 + $0x34] sm:$0xf] %vm48_vm0, %v374_v50  ;;  %658 = vst [vmem:[#allocation2 + $0x38] sm:$0x1] %v657_v53  ;;  %v322_v57 = vor.u32 %v320_v43, %v319_v51  ;;  %v324_v59 = vrot.slane %v319_v51, 4  ;;  %v632_v61 = vsel %vm10091_vm13, %v314_v55, %v631_v47  ;;  %v10165_v41 = vpack.c.bf16 %v188_v24, %v188_v24 }
  0x4e   : > { %2884 = vrot.lane.b32.xlu0 %v9667_v54, %s9899_s25  ;;  %v2452_v62 = vld [vmem:[#allocation2 + $0x18] sm:$0xe]  ;;  %633 = vst [vmem:[#allocation2 + $0xc] sm:$0xf] %v632_v61  ;;  %v2456_v9 = vld [vmem:[#allocation2 + $0x28] sm:$0xf]  ;;  %v10167_v42 = vpack.c.bf16 %v189_v25, %v189_v25 }
  0x4f   : > { %v323_v2 = vsel %vm10102_vm14, %v315_v56, %v322_v57  ;;  %v636_v3 = vsel %vm9977_vm3, %v324_v59, %v635_v52  ;;  %v8858_v5 = vrot.slane %v2452_v62, 9  ;;  %v8859_v10 = vrot.slane %v2455_v6, 9  ;;  %v2946_v11 = vld [vmem:[#allocation2 + $0x18] sm:$0xf] }
  0x50   : > { %v9668_v63 = vld [vmem:[#allocation2 + $0x18] sm:$0xff]   ;;  %634 = vst.msk [vmem:[#allocation2 + $0x10] sm:$0xf] %vm48_vm0, %v323_v2  ;;  %637 = vst [vmem:[#allocation2 + $0x14] sm:$0x1] %v636_v3  ;;  %v2561_v19 = vrot.slane %v2456_v9, 5 }
  0x51   : > { %v2453_v4 = vld [vmem:[#allocation2 + $0x1c] sm:$0xf]  ;;  %2882 = vrot.lane.b32.xlu1 %v9668_v63, %s9899_s25  ;;  %v2995_v22 = vshrl.u32 %v2946_v11, 16  ;;  %v377_v23 = vshrl.u32 %v10139_v7, 16  ;;  %v2998_v30 = vshll.u32 %v2946_v11, 16  ;;  %v9672_v11 = vld [vmem:[#allocation2 + $0x24] sm:$0xff]  }
  0x52   : > { %v2554_v8 = vrot.slane %v2453_v4, 5  ;;  %v2454_v13 = vld [vmem:[#allocation2 + $0x20] sm:$0x1]  ;;  %v2457_v14 = vld [vmem:[#allocation2 + $0x2c] sm:$0x1]  ;;  %v10157_v27 = vsel %vm10064_vm8, %v8859_v10, %v2561_v19  ;;  %v2563_v28 = vrot.slane %v2561_v19, 4 }
  0x53   : > { %v2557_v18 = vrot.slane %v2454_v13, 5  ;;  %v2564_v21 = vrot.slane %v2457_v14, 5  ;;  %v2947_v29 = vld [vmem:[#allocation2 + $0x1c] sm:$0xf]  ;;  %v2948_v39 = vld [vmem:[#allocation2 + $0x20] sm:$0x1] }
  0x54   : > { %v9669_v15 = vld [vmem:[#allocation2 + $0x30] sm:$0xff]   ;;  %v2556_v16 = vrot.slane %v2554_v8, 4  ;;  %v10145_v20 = vsel %vm10064_vm8, %v8858_v5, %v2554_v8  ;;  %v9671_v37 = vld [vmem:[#allocation2 + $0x18] sm:$0xff]   ;;  %v2997_v53 = vrot.slane %v2995_v22, 4  ;;  %v3000_v54 = vrot.slane %v2998_v30, 5 }
  0x55   : > { %2886 = vrot.lane.b32.xlu0 %v9669_v15, %s9899_s25  ;;  %v2449_v31 = vld [vmem:[#allocation2 + $0xc] sm:$0xe]  ;;  %v10163_v38 = vsel %vm10064_vm8, %v2563_v28, %v2564_v21  ;;  %v1442_v40 = vld [vmem:[#allocation2 + $0x18] sm:$0xe]  ;;  %v3004_v59 = vshll.u32 %v2947_v29, 16  ;;  %v3008_v63 = vshrl.u32 %v2947_v29, 16 }
  0x56   : > { %v10153_v26 = vsel %vm10064_vm8, %v2556_v16, %v2557_v18  ;;  %v1439_v32 = vld [vmem:[#allocation2 + $0xc] sm:$0xe]  ;;  %v8857_v36 = vrot.slane %v2449_v31, 9  ;;  %v8875_v47 = vcombine.low %v10157_v27, %v10163_v38  ;;  %v3001_v62 = vor.u32 %v3000_v54, %v2997_v53  ;;  %v1443_v2 = vld [vmem:[#allocation2 + $0x1c] sm:$0xf] }
  0x57   : > { %v9670_v34 = vld [vmem:[#allocation2 + $0xc] sm:$0xff]   ;;  %v2451_v43 = vld [vmem:[#allocation2 + $0x14] sm:$0x1]  ;;  %v8874_v45 = vcombine.low %v10145_v20, %v10153_v26  ;;  %v8794_v49 = vrot.slane %v1439_v32, 9  ;;  %v1444_v3 = vld [vmem:[#allocation2 + $0x20] sm:$0x1] }
  0x58   : > { %v2450_v35 = vld [vmem:[#allocation2 + $0x10] sm:$0xf]  ;;  %1872 = vrot.lane.b32.xlu1 %v9670_v34, %s9901_s27  ;;  %v2550_v50 = vrot.slane %v2451_v43, 5  ;;  %v1441_v51 = vld [vmem:[#allocation2 + $0x14] sm:$0x1]  ;;  %v3006_v5 = vrot.slane %v3004_v59, 5 }
  0x59   : > { %v2547_v44 = vrot.slane %v2450_v35, 5  ;;  %v1440_v48 = vld [vmem:[#allocation2 + $0x10] sm:$0xf]  ;;  %v1547_v57 = vrot.slane %v1441_v51, 5  ;;  %v3014_v6 = vshll.u32 %v2948_v39, 16  ;;  %v8795_v8 = vrot.slane %v1442_v40, 9 }
  0x5a   : > { %v1544_v52 = vrot.slane %v1440_v48, 5  ;;  %v2949_v9 = vld [vmem:[#allocation2 + $0x24] sm:$0xf]  ;;  %v3002_v13 = vrot.slane %v3001_v62, 4  ;;  %v3010_v14 = vrot.slane %v3008_v63, 4  ;;  %v1551_v19 = vrot.slane %v1443_v2, 5 }
  0x5b   : > { %v2548_v55 = vsel %vm10064_vm8, %v8857_v36, %v2547_v44  ;;  %v2549_v56 = vrot.slane %v2547_v44, 4  ;;  %v2950_v15 = vld [vmem:[#allocation2 + $0x28] sm:$0xf]  ;;  %v3016_v18 = vrot.slane %v3014_v6, 5  ;;  %v1554_v20 = vrot.slane %v1444_v3, 5 }
  0x5c   : > { %v1545_v60 = vsel %vm10064_vm8, %v8794_v49, %v1544_v52  ;;  %v1546_v61 = vrot.slane %v1544_v52, 4  ;;  %1874 = vrot.lane.b32.xlu1 %v9671_v37, %s9901_s27  ;;  %v2951_v21 = vld [vmem:[#allocation2 + $0x2c] sm:$0x1]  ;;  %v3007_v22 = vsel %vm10084_vm12, %v3002_v13, %v3006_v5  ;;  %v3011_v24 = vor.u32 %v3010_v14, %v3006_v5  ;;  %v892_v39 = vld [vmem:[#allocation2 + $0x10] sm:$0xf] }
  0x5d   : > { %v2551_v4 = vsel %vm10064_vm8, %v2549_v56, %v2550_v50  ;;  %v3019_v25 = vshrl.u32 %v2949_v9, 16  ;;  %v3022_v26 = vshll.u32 %v2949_v9, 16  ;;  %v891_v28 = vld [vmem:[#allocation2 + $0xc] sm:$0xf]  ;;  %v1552_v29 = vsel %vm10064_vm8, %v8795_v8, %v1551_v19  ;;  %v893_v48 = vld [vmem:[#allocation2 + $0x14] sm:$0x1] }
  0x5e   : > { %v8873_v10 = vcombine.low %v2548_v55, %v2551_v4  ;;  %v1548_v12 = vsel %vm10064_vm8, %v1546_v61, %v1547_v57  ;;  %v1553_v30 = vrot.slane %v1551_v19, 4  ;;  %v3028_v31 = vshll.u32 %v2950_v15, 16  ;;  %v2952_v54 = vld [vmem:[#allocation2 + $0x30] sm:$0xf]  ;;  %v2953_v2 = vld [vmem:[#allocation2 + $0x34] sm:$0xf] }
  0x5f   : > { %v8810_v16 = vcombine.low %v1545_v60, %v1548_v12  ;;  %v3032_v32 = vshrl.u32 %v2950_v15, 16  ;;  %v3012_v34 = vrot.slane %v3011_v24, 4  ;;  %v3021_v35 = vrot.slane %v3019_v25, 4  ;;  %v2954_v4 = vld [vmem:[#allocation2 + $0x38] sm:$0x1] }
  0x60   : > { %2705 = vrot.lane.b32.xlu0 %v8873_v10, %s9900_s26  ;;  %1876 = vrot.lane.b32.xlu1 %v9672_v11, %s9901_s27  ;;  %v3024_v36 = vrot.slane %v3022_v26, 5  ;;  %v3038_v37 = vshll.u32 %v2951_v21, 16  ;;  %v1555_v40 = vsel %vm10064_vm8, %v1553_v30, %v1554_v20  ;;  %v3030_v43 = vrot.slane %v3028_v31, 5  ;;  %v894_v12 = vld [vmem:[#allocation2 + $0x18] sm:$0xf] }
  0x61   : > { %v3034_v44 = vrot.slane %v3032_v32, 4  ;;  %v964_v49 = vshrl.u32 %v891_v28, 16  ;;  %v3017_v50 = vsel %vm10084_vm12, %v3012_v34, %v3016_v18  ;;  %v8811_v51 = vcombine.low %v1552_v29, %v1555_v40  ;;  %v895_v38 = vld [vmem:[#allocation2 + $0x1c] sm:$0xf]  ;;  %v896_v29 = vld [vmem:[#allocation2 + $0x20] sm:$0x1] }
  0x62   : > { %v3025_v52 = vor.u32 %v3024_v36, %v3021_v35  ;;  %v3040_v53 = vrot.slane %v3038_v37, 5  ;;  %v8905_v55 = vcombine.low %v3007_v22, %v3017_v50  ;;  %v967_v59 = vshll.u32 %v891_v28, 16  ;;  %v2458_v36 = vld [vmem:[#allocation2 + $0x30] sm:$0xe]  ;;  %v9687_v37 = vld [vmem:[%s12988_s1 + $0x40] sm:$0xff]  }
  0x63   : > { %v3035_v56 = vor.u32 %v3034_v44, %v3030_v43  ;;  %v966_v57 = vrot.slane %v964_v49, 4  ;;  %v973_v61 = vshll.u32 %v892_v39, 16  ;;  %v977_v62 = vshrl.u32 %v892_v39, 16  ;;  %v2460_v49 = vld [vmem:[#allocation2 + $0x38] sm:$0x1]  ;;  %9312 = vmatprep.subr.bf16.mxu0 %v9687_v37 }
  0x64   : > { %2707 = vrot.lane.b32.xlu0 %v8874_v45, %s9900_s26  ;;  %1697 = vrot.lane.b32.xlu1 %v8810_v16, %s9899_s25  ;;  %v3026_v60 = vrot.slane %v3025_v52, 4  ;;  %v983_v63 = vshll.u32 %v893_v48, 16  ;;  %v969_v45 = vrot.slane %v967_v59, 5  ;;  %v3043_v5 = vshrl.u32 %v2952_v54, 16  ;;  %v2459_v48 = vld [vmem:[#allocation2 + $0x34] sm:$0xf] }
  0x65   : > { %v3036_v3 = vrot.slane %v3035_v56, 4  ;;  %v3046_v6 = vshll.u32 %v2952_v54, 16  ;;  %v975_v9 = vrot.slane %v973_v61, 5  ;;  %v979_v10 = vrot.slane %v977_v62, 4  ;;  %v897_v54 = vld [vmem:[#allocation2 + $0x24] sm:$0xf] }
  0x66   : > { %v3031_v8 = vsel %vm10084_vm12, %v3026_v60, %v3030_v43  ;;  %v985_v11 = vrot.slane %v983_v63, 5  ;;  %v970_v14 = vor.u32 %v969_v45, %v966_v57  ;;  %v3045_v15 = vrot.slane %v3043_v5, 4  ;;  %v898_v60 = vld [vmem:[#allocation2 + $0x28] sm:$0xf] }
  0x67   : > { %v3041_v13 = vsel %vm10084_vm12, %v3036_v3, %v3040_v53  ;;  %v3048_v16 = vrot.slane %v3046_v6, 5  ;;  %v980_v19 = vor.u32 %v979_v10, %v975_v9  ;;  %v3052_v20 = vshll.u32 %v2953_v2, 16  ;;  %v899_v3 = vld [vmem:[#allocation2 + $0x2c] sm:$0x1] }
  0x68   : > { %2709 = vrot.lane.b32.xlu0 %v8875_v47, %s9900_s26  ;;  %1699 = vrot.lane.b32.xlu1 %v8811_v51, %s9899_s25  ;;  %v8906_v18 = vcombine.low %v3031_v8, %v3041_v13  ;;  %v3056_v27 = vshrl.u32 %v2953_v2, 16  ;;  %v971_v47 = vrot.slane %v970_v14, 4  ;;  %v3062_v22 = vshll.u32 %v2954_v4, 16 }
  0x69   : > { %v3049_v21 = vor.u32 %v3048_v16, %v3045_v15  ;;  %v988_v24 = vshrl.u32 %v894_v12, 16  ;;  %v981_v25 = vrot.slane %v980_v19, 4  ;;  %v3054_v26 = vrot.slane %v3052_v20, 5  ;;  %v1445_v16 = vld [vmem:[#allocation2 + $0x24] sm:$0xe] }
  0x6a   : > { %v3058_v28 = vrot.slane %v3056_v27, 4  ;;  %v991_v30 = vshll.u32 %v894_v12, 16  ;;  %v976_v31 = vsel %vm10084_vm12, %v971_v47, %v975_v9  ;;  %v3064_v34 = vrot.slane %v3062_v22, 5  ;;  %v1446_v47 = vld [vmem:[#allocation2 + $0x28] sm:$0xf] }
  0x6b   : > { %v3050_v32 = vrot.slane %v3049_v21, 4  ;;  %v990_v35 = vrot.slane %v988_v24, 4  ;;  %v986_v39 = vsel %vm10084_vm12, %v981_v25, %v985_v11  ;;  %v997_v44 = vshll.u32 %v895_v38, 16  ;;  %v1447_v21 = vld [vmem:[#allocation2 + $0x2c] sm:$0x1] }
  0x6c   : > { %3426 = vrot.lane.b32.xlu0 %v8905_v55, %s9901_s27  ;;  %v3059_v40 = vor.u32 %v3058_v28, %v3054_v26  ;;  %v993_v43 = vrot.slane %v991_v30, 5  ;;  %v8778_v50 = vcombine.low %v976_v31, %v986_v39  ;;  %v1001_v52 = vshrl.u32 %v895_v38, 16  ;;  %v9690_v22 = vld [vmem:[%s12988_s1 + $0x48] sm:$0xff]   ;;  %v900_v30 = vld [vmem:[#allocation2 + $0x30] sm:$0xf] }
  0x6d   : > { %v3055_v51 = vsel %vm10084_vm12, %v3050_v32, %v3054_v26  ;;  %v1007_v53 = vshll.u32 %v896_v29, 16  ;;  %v999_v57 = vrot.slane %v997_v44, 5  ;;  %v8860_v59 = vrot.slane %v2458_v36, 9  ;;  %v659_v29 = vld [vmem:[#allocation2 + $0x3c] sm:$0xf] }
  0x6e   : > { %v3060_v55 = vrot.slane %v3059_v40, 4  ;;  %v994_v56 = vor.u32 %v993_v43, %v990_v35  ;;  %1373 = vrot.lane.b32.xlu1 %v8778_v50, %s9900_s26  ;;  %v1003_v61 = vrot.slane %v1001_v52, 4  ;;  %v2568_v63 = vrot.slane %v2459_v48, 5  ;;  %v901_v43 = vld [vmem:[#allocation2 + $0x34] sm:$0xf] }
  0x6f   : > { %v1009_v62 = vrot.slane %v1007_v53, 5  ;;  %v2571_v2 = vrot.slane %v2460_v49, 5  ;;  %v1012_v5 = vshrl.u32 %v897_v54, 16  ;;  %v1015_v6 = vshll.u32 %v897_v54, 16  ;;  %v9692_v54 = vld [vmem:[%s12988_s1 + $0x50] sm:$0xff]  }
  0x70   : > { %3428 = vrot.lane.b32.xlu0 %v8906_v18, %s9901_s27  ;;  %v3065_v45 = vsel %vm10084_vm12, %v3060_v55, %v3064_v34  ;;  %v995_v4 = vrot.slane %v994_v56, 4  ;;  %v1004_v9 = vor.u32 %v1003_v61, %v999_v57  ;;  %v2569_v10 = vsel %vm10064_vm8, %v8860_v59, %v2568_v63  ;;  %v9688_v18 = vld [vmem:[%s12988_s1] sm:$0xff]  }
  0x71   : > { %v8907_v8 = vcombine.low %v3055_v51, %v3065_v45  ;;  %v2570_v11 = vrot.slane %v2568_v63, 4  ;;  %v1014_v13 = vrot.slane %v1012_v5, 4  ;;  %v1017_v14 = vrot.slane %v1015_v6, 5  ;;  %9313 = vmatpush3.bf16.msra.mxu0 %v9688_v18  ;;  %v9694_v6 = vld [vmem:[%s12988_s1 + $0x10] sm:$0xff]  }
  0x72   : > { %v1000_v12 = vsel %vm10084_vm12, %v995_v4, %v999_v57  ;;  %v1021_v15 = vshll.u32 %v898_v60, 16  ;;  %v1005_v19 = vrot.slane %v1004_v9, 4  ;;  %v1025_v27 = vshrl.u32 %v898_v60, 16  ;;  %9314 = vmatprep.subr.bf16.mxu0 %v9690_v22  ;;  %v663_v57 = vld [vmem:[#allocation2 + $0x44] sm:$0x1] }
  0x73   : > { %v2572_v20 = vsel %vm10064_vm8, %v2570_v11, %v2571_v2  ;;  %v1031_v38 = vshll.u32 %v899_v3, 16  ;;  %v1018_v25 = vor.u32 %v1017_v14, %v1014_v13  ;;  %v379_v28 = vrot.slane %v377_v23, 7  ;;  %v9691_v23 = vld [vmem:[%s12988_s1 + $0x8] sm:$0xff]   ;;  %v902_v3 = vld [vmem:[#allocation2 + $0x38] sm:$0x1] }
  0x74   : > { %3430 = vrot.lane.b32.xlu0 %v8907_v8, %s9901_s27  ;;  %v8876_v24 = vcombine.low %v2569_v10, %v2572_v20  ;;  %v1023_v26 = vrot.slane %v1021_v15, 5  ;;  %v1010_v31 = vsel %vm10084_vm12, %v1005_v19, %v1009_v62  ;;  %v1027_v32 = vrot.slane %v1025_v27, 4  ;;  %v10266_v18 = vld [vmem:[#allocation2 + $0x34] sm:$0xf] }
  0x75   : > { %v1033_v34 = vrot.slane %v1031_v38, 5  ;;  %v380_v35 = vshll.u32 %v10139_v7, 16  ;;  %v8779_v36 = vcombine.low %v1000_v12, %v1010_v31  ;;  %v1019_v37 = vrot.slane %v1018_v25, 4  ;;  %9315 = vmatpush3.bf16.msra.mxu0 %v9691_v23  ;;  %v10263_v12 = vld [vmem:[#allocation2 + $0x30] sm:$0xe] }
  0x76   : > { %v383_v39 = vrot.slane %v379_v28, 4  ;;  %v385_v40 = vshrl.u32 %v10159_v33, 16  ;;  %v1028_v44 = vor.u32 %v1027_v32, %v1023_v26  ;;  %v388_v49 = vshll.u32 %v10159_v33, 16  ;;  %9316 = vmatprep.subr.bf16.mxu0 %v9692_v54  ;;  %v666_v25 = vld [vmem:[#allocation2 + $0x48] sm:$0xf] }
  0x77   : > { %v382_v48 = vor.u32 %v380_v35, %v379_v28  ;;  %v8796_v50 = vrot.slane %v1445_v16, 9  ;;  %1375 = vrot.lane.b32.xlu1 %v8779_v36, %s9900_s26  ;;  %v1024_v7 = vsel %vm10084_vm12, %v1019_v37, %v1023_v26  ;;  %v1558_v52 = vrot.slane %v1446_v47, 5  ;;  %v9695_v47 = vld [vmem:[%s12988_s1 + $0x58] sm:$0xff]   ;;  %v9674_v28 = vld [vmem:[#allocation2 + $0x30] sm:$0xff]  }
  0x78   : > { %2711 = vrot.lane.b32.xlu0 %v8876_v24, %s9900_s26  ;;  %v387_v51 = vrot.slane %v385_v40, 7  ;;  %v1561_v53 = vrot.slane %v1447_v21, 5  ;;  %v1029_v55 = vrot.slane %v1028_v44, 4  ;;  %v1036_v33 = vshrl.u32 %v900_v30, 16 }
  0x79   : > { %v660_v56 = vsel %vm10091_vm13, %v382_v48, %v659_v29  ;;  %v1039_v59 = vshll.u32 %v900_v30, 16  ;;  %v1559_v62 = vsel %vm10064_vm8, %v8796_v50, %v1558_v52  ;;  %v1560_v63 = vrot.slane %v1558_v52, 4  ;;  %9317 = vmatpush3.bf16.msra.mxu0 %v9694_v6  ;;  %v1450_v50 = vld [vmem:[#allocation2 + $0x38] sm:$0x1] }
  0x7a   : > { %v390_v60 = vor.u32 %v388_v49, %v387_v51  ;;  %v392_v61 = vrot.slane %v387_v51, 4  ;;  %661 = vst [vmem:[#allocation2 + $0x3c] sm:$0xf] %v660_v56  ;;  %v1034_v2 = vsel %vm10084_vm12, %v1029_v55, %v1033_v34  ;;  %v1038_v45 = vrot.slane %v1036_v33, 4  ;;  %9318 = vmatprep.subr.bf16.mxu0 %v9695_v47 }
  0x7b   : > { %v1041_v4 = vrot.slane %v1039_v59, 5  ;;  %v1045_v5 = vshll.u32 %v901_v43, 16  ;;  %v8780_v8 = vcombine.low %v1024_v7, %v1034_v2  ;;  %v1562_v10 = vsel %vm10064_vm8, %v1560_v63, %v1561_v53  ;;  %v670_v7 = vld [vmem:[#allocation2 + $0x50] sm:$0x1] }
  0x7c   : > { %v391_v9 = vsel %vm10102_vm14, %v383_v39, %v390_v60  ;;  %v664_v11 = vsel %vm9977_vm3, %v392_v61, %v663_v57  ;;  %v8812_v13 = vcombine.low %v1559_v62, %v1562_v10  ;;  %v1049_v16 = vshrl.u32 %v901_v43, 16  ;;  %v9696_v43 = vld [vmem:[%s12988_s1 + $0x18] sm:$0xff]  }
  0x7d   : > { %662 = vst.msk [vmem:[#allocation2 + $0x40] sm:$0xf] %vm48_vm0, %v391_v9  ;;  %665 = vst [vmem:[#allocation2 + $0x44] sm:$0x1] %v664_v11  ;;  %v1042_v14 = vor.u32 %v1041_v4, %v1038_v45  ;;  %v1047_v15 = vrot.slane %v1045_v5, 5  ;;  %1377 = vrot.lane.b32.xlu1 %v8780_v8, %s9900_s26  ;;  %v1055_v19 = vshll.u32 %v902_v3, 16  ;;  %9319 = vmatpush3.bf16.msra.mxu0 %v9696_v43 }
  0x7e   : > { %v394_v20 = vshrl.u32 %v10165_v41, 16  ;;  %v397_v27 = vshll.u32 %v10165_v41, 16  ;;  %v402_v38 = vshrl.u32 %v10167_v42, 16  ;;  %v1051_v22 = vrot.slane %v1049_v16, 4  ;;  %v9698_v9 = vld [vmem:[%s12988_s1 + $0x60] sm:$0xff]   ;;  %v193_v43 = vld [vmem:[%s10075_s24 + $0x78] sm:$0xff] }
  0x7f   : > { %v1043_v21 = vrot.slane %v1042_v14, 4  ;;  %v405_v24 = vshll.u32 %v10167_v42, 16  ;;  %v8797_v26 = vrot.slane %v10263_v12, 9  ;;  %v1057_v29 = vrot.slane %v1055_v19, 5  ;;  %9320 = vmatprep.subr.bf16.mxu0 %v9698_v9 }
  0x80   : > { %v396_v30 = vrot.slane %v394_v20, 7  ;;  %v404_v31 = vrot.slane %v402_v38, 7  ;;  %v1565_v32 = vrot.slane %v10266_v18, 5  ;;  %v1052_v36 = vor.u32 %v1051_v22, %v1047_v15  ;;  %v191_v38 = vld [vmem:[%s10075_s24 + $0x68] sm:$0xff] }
  0x81   : > { %v2955_v41 = vld [vmem:[#allocation2 + $0x3c] sm:$0xf]  ;;  %v1048_v35 = vsel %vm10084_vm12, %v1043_v21, %v1047_v15  ;;  %1701 = vrot.lane.b32.xlu1 %v8812_v13, %s9899_s25  ;;  %v1568_v12 = vrot.slane %v1450_v50, 5  ;;  %v9699_v15 = vld [vmem:[%s12988_s1 + $0x20] sm:$0xff]   ;;  %vm1419_vm15 = vcmask 523520   ;;  %vm871_vm1 = vcmask 261120  }
  0x82   : > { %v10278_v34 = vld [vmem:[#allocation2 + $0x3c] sm:$0xe]  ;;  %v3067_v42 = vshrl.u32 %v2955_v41, 16  ;;  %v3070_v37 = vshll.u32 %v2955_v41, 16  ;;  %v399_v40 = vor.u32 %v397_v27, %v396_v30  ;;  %v1053_v23 = vrot.slane %v1052_v36, 4  ;;  %v190_v27 = vld [vmem:[%s10075_s24 + $0x60] sm:$0xff]  ;;  %9321 = vmatpush3.bf16.msra.mxu0 %v9699_v15 }
  0x83   : > { %v8861_v39 = vrot.slane %v10278_v34, 9  ;;  %v400_v44 = vrot.slane %v396_v30, 4  ;;  %v407_v48 = vor.u32 %v405_v24, %v404_v31  ;;  %v409_v49 = vrot.slane %v404_v31, 4  ;;  %v10291_v60 = vld [vmem:[#allocation2 + $0x3c] sm:$0xf] }
  0x84   : > { %v9673_v51 = vld [vmem:[#allocation2 + $0x3c] sm:$0xff]   ;;  %v3069_v53 = vrot.slane %v3067_v42, 4  ;;  %v667_v54 = vsel %vm10091_vm13, %v399_v40, %v666_v25  ;;  %v2957_v55 = vld [vmem:[#allocation2 + $0x44] sm:$0x1]  ;;  %v3072_v56 = vrot.slane %v3070_v37, 5  ;;  %v1058_v59 = vsel %vm10084_vm12, %v1053_v23, %v1057_v29  ;;  %v192_v29 = vld [vmem:[%s10075_s24 + $0x70] sm:$0xff] }
  0x85   : > { %v2956_v52 = vld [vmem:[#allocation2 + $0x40] sm:$0xf]  ;;  %668 = vst [vmem:[#allocation2 + $0x48] sm:$0xf] %v667_v54  ;;  %2888 = vrot.lane.b32.xlu0 %v9673_v51, %s9899_s25  ;;  %v3086_v61 = vshll.u32 %v2957_v55, 16  ;;  %1878 = vrot.lane.b32.xlu1 %v9674_v28, %s9901_s27  ;;  %v8781_v2 = vcombine.low %v1048_v35, %v1058_v59  ;;  %v408_v3 = vsel %vm10102_vm14, %v400_v44, %v407_v48  ;;  %v1567_v45 = vrot.slane %v1565_v32, 4 }
  0x86   : > { %v3076_v57 = vshll.u32 %v2956_v52, 16  ;;  %v3080_v33 = vshrl.u32 %v2956_v52, 16  ;;  %v2462_v62 = vld [vmem:[#allocation2 + $0x40] sm:$0xf]  ;;  %v2463_v63 = vld [vmem:[#allocation2 + $0x44] sm:$0x1]  ;;  %v3073_v4 = vor.u32 %v3072_v56, %v3069_v53  ;;  %v1566_v11 = vsel %vm10064_vm8, %v8797_v26, %v1565_v32 }
  0x87   : > { %v2575_v8 = vrot.slane %v2462_v62, 5  ;;  %669 = vst.msk [vmem:[#allocation2 + $0x4c] sm:$0xf] %vm48_vm0, %v408_v3  ;;  %v3088_v10 = vrot.slane %v3086_v61, 5  ;;  %v671_v13 = vsel %vm9977_vm3, %v409_v49, %v670_v7  ;;  %v10305_v14 = vld [vmem:[#allocation2 + $0x40] sm:$0xf]  ;;  %v1569_v47 = vsel %vm10064_vm8, %v1567_v45, %v1568_v12 }
  0x88   : > { %v3078_v5 = vrot.slane %v3076_v57, 5  ;;  %v3082_v6 = vrot.slane %v3080_v33, 4  ;;  %v3074_v16 = vrot.slane %v3073_v4, 4  ;;  %v2578_v20 = vrot.slane %v2463_v63, 5  ;;  %672 = vst [vmem:[#allocation2 + $0x50] sm:$0x1] %v671_v13 }
  0x89   : > { %v2577_v19 = vrot.slane %v2575_v8, 4  ;;  %1379 = vrot.lane.b32.xlu1 %v8781_v2, %s9900_s26  ;;  %v1060_v21 = vshrl.u32 %v10291_v60, 16  ;;  %v1063_v22 = vshll.u32 %v10291_v60, 16  ;;  %v8813_v26 = vcombine.low %v1566_v11, %v1569_v47  ;;  %v9676_v40 = vld [vmem:[#allocation2 + $0x3c] sm:$0xff]   ;;  %v905_v54 = vld [vmem:[#allocation2 + $0x44] sm:$0x1] }
  0x8a   : > { %v3083_v18 = vor.u32 %v3082_v6, %v3078_v5  ;;  %v3079_v24 = vsel %vm10084_vm12, %v3074_v16, %v3078_v5  ;;  %v1069_v28 = vshll.u32 %v10305_v14, 16  ;;  %v2576_v30 = vsel %vm10064_vm8, %v8861_v39, %v2575_v8  ;;  %v9700_v11 = vld [vmem:[%s12988_s1 + $0x68] sm:$0xff]  }
  0x8b   : > { %v10323_v41 = vpack.c.bf16 %v190_v27, %v190_v27  ;;  %v10325_v34 = vpack.c.bf16 %v191_v38, %v191_v38  ;;  %v2579_v36 = vsel %vm10064_vm8, %v2577_v19, %v2578_v20  ;;  %v1062_v48 = vrot.slane %v1060_v21, 4  ;;  %v1451_v19 = vld [vmem:[#allocation2 + $0x3c] sm:$0xe]  ;;  %v1452_v21 = vld [vmem:[#allocation2 + $0x40] sm:$0xf]  ;;  %9322 = vmatprep.subr.bf16.mxu0 %v9700_v11 }
  0x8c   : > { %v3084_v25 = vrot.slane %v3083_v18, 4  ;;  %v2958_v31 = vld [vmem:[#allocation2 + $0x48] sm:$0xf]  ;;  %v10333_v49 = vpack.c.bf16 %v192_v29, %v192_v29  ;;  %v8877_v55 = vcombine.low %v2576_v30, %v2579_v36  ;;  %v1065_v59 = vrot.slane %v1063_v22, 5  ;;  %v1453_v22 = vld [vmem:[#allocation2 + $0x44] sm:$0x1] }
  0x8d   : > { %v2464_v32 = vld [vmem:[#allocation2 + $0x48] sm:$0xe]  ;;  %v3091_v42 = vshrl.u32 %v2958_v31, 16  ;;  %v3094_v37 = vshll.u32 %v2958_v31, 16  ;;  %1703 = vrot.lane.b32.xlu1 %v8813_v26, %s9899_s25  ;;  %v10336_v60 = vpack.c.bf16 %v193_v43, %v193_v43  ;;  %v1073_v16 = vshrl.u32 %v10305_v14, 16 }
  0x8e   : > { %v3089_v35 = vsel %vm10084_vm12, %v3084_v25, %v3088_v10  ;;  %v2959_v39 = vld [vmem:[#allocation2 + $0x4c] sm:$0xf]  ;;  %v8862_v44 = vrot.slane %v2464_v32, 9  ;;  %v1066_v5 = vor.u32 %v1065_v59, %v1062_v48  ;;  %v1071_v10 = vrot.slane %v1069_v28, 5  ;;  %v673_v28 = vld [vmem:[#allocation2 + $0x54] sm:$0xf] }
  0x8f   : > { %v8908_v23 = vcombine.low %v3079_v24, %v3089_v35  ;;  %v3093_v50 = vrot.slane %v3091_v42, 4  ;;  %v3096_v7 = vrot.slane %v3094_v37, 5  ;;  %v3100_v51 = vshll.u32 %v2959_v39, 16  ;;  %v2465_v53 = vld [vmem:[#allocation2 + $0x4c] sm:$0xf]  ;;  %v9703_v37 = vld [vmem:[%s12988_s1 + $0x70] sm:$0xff]  }
  0x90   : > { %v3104_v52 = vshrl.u32 %v2959_v39, 16  ;;  %v2960_v56 = vld [vmem:[#allocation2 + $0x50] sm:$0x1]  ;;  %v2582_v33 = vrot.slane %v2465_v53, 5  ;;  %v9675_v12 = vld [vmem:[#allocation2 + $0x48] sm:$0xff]   ;;  %v1067_v15 = vrot.slane %v1066_v5, 4 }
  0x91   : > { %3432 = vrot.lane.b32.xlu0 %v8908_v23, %s9901_s27  ;;  %v2466_v57 = vld [vmem:[#allocation2 + $0x50] sm:$0x1]  ;;  %v3097_v61 = vor.u32 %v3096_v7, %v3093_v50  ;;  %v3102_v62 = vrot.slane %v3100_v51, 5  ;;  %v3110_v2 = vshll.u32 %v2960_v56, 16  ;;  %1880 = vrot.lane.b32.xlu1 %v9676_v40, %s9901_s27  ;;  %v1079_v18 = vshll.u32 %v905_v54, 16  ;;  %v9702_v30 = vld [vmem:[%s12988_s1 + $0x28] sm:$0xff]  }
  0x92   : > { %v3106_v63 = vrot.slane %v3104_v52, 4  ;;  %v10341_v3 = vsel %vm10064_vm8, %v8862_v44, %v2582_v33  ;;  %v2584_v45 = vrot.slane %v2582_v33, 4  ;;  %v2585_v4 = vrot.slane %v2466_v57, 5  ;;  %v906_v29 = vld [vmem:[#allocation2 + $0x48] sm:$0xf]  ;;  %9323 = vmatpush3.bf16.msra.mxu0 %v9702_v30 }
  0x93   : > { %v3098_v6 = vrot.slane %v3097_v61, 4  ;;  %v3112_v9 = vrot.slane %v3110_v2, 5  ;;  %v411_v47 = vshrl.u32 %v10323_v41, 16  ;;  %v1072_v24 = vsel %vm10084_vm12, %v1067_v15, %v1071_v10  ;;  %v907_v42 = vld [vmem:[#allocation2 + $0x4c] sm:$0xf]  ;;  %9324 = vmatprep.subr.bf16.mxu0 %v9703_v37  ;;  %v194_v2 = vld [vmem:[%s10075_s24 + $0x80] sm:$0xff] }
  0x94   : > { %v3107_v8 = vor.u32 %v3106_v63, %v3102_v62  ;;  %v10349_v13 = vsel %vm10064_vm8, %v2584_v45, %v2585_v4  ;;  %v1075_v25 = vrot.slane %v1073_v16, 4  ;;  %v1081_v26 = vrot.slane %v1079_v18, 5  ;;  %v677_v39 = vld [vmem:[#allocation2 + $0x5c] sm:$0x1]  ;;  %v908_v57 = vld [vmem:[#allocation2 + $0x50] sm:$0x1] }
  0x95   : > { %2713 = vrot.lane.b32.xlu0 %v8877_v55, %s9900_s26  ;;  %v3103_v20 = vsel %vm10084_vm12, %v3098_v6, %v3102_v62  ;;  %v8878_v38 = vcombine.low %v10341_v3, %v10349_v13  ;;  %v414_v14 = vshll.u32 %v10323_v41, 16  ;;  %v413_v32 = vrot.slane %v411_v47, 7  ;;  %v10385_v5 = vld [vmem:[#allocation2 + $0x48] sm:$0xe]  ;;  %v10390_v11 = vld [vmem:[#allocation2 + $0x4c] sm:$0xf] }
  0x96   : > { %v3108_v27 = vrot.slane %v3107_v8, 4  ;;  %v419_v35 = vshrl.u32 %v10325_v34, 16  ;;  %v422_v36 = vshll.u32 %v10325_v34, 16  ;;  %v1076_v40 = vor.u32 %v1075_v25, %v1071_v10  ;;  %v195_v18 = vld [vmem:[%s10075_s24 + $0x88] sm:$0xff]  ;;  %v10398_v47 = vld [vmem:[#allocation2 + $0x50] sm:$0x1] }
  0x97   : > { %v8798_v43 = vrot.slane %v1451_v19, 9  ;;  %v1572_v23 = vrot.slane %v1452_v21, 5  ;;  %v416_v44 = vor.u32 %v414_v14, %v413_v32  ;;  %v417_v48 = vrot.slane %v413_v32, 4  ;;  %v9704_v21 = vld [vmem:[%s12988_s1 + $0x30] sm:$0xff]   ;;  %v9705_v32 = vld [vmem:[%s12988_s1 + $0x80] sm:$0xff]  }
  0x98   : > { %v3113_v31 = vsel %vm10084_vm12, %v3108_v27, %v3112_v9  ;;  %v421_v50 = vrot.slane %v419_v35, 7  ;;  %v1575_v7 = vrot.slane %v1453_v22, 5  ;;  %v1077_v34 = vrot.slane %v1076_v40, 4  ;;  %v680_v27 = vld [vmem:[#allocation2 + $0x60] sm:$0xf]  ;;  %v9678_v22 = vld [vmem:[#allocation2 + $0x48] sm:$0xff]   ;;  %9325 = vmatpush3.bf16.msra.mxu0 %v9704_v21  ;;  %9572 = vmatprep.subr.bf16.mxu1 %v9705_v32 }
  0x99   : > { %2890 = vrot.lane.b32.xlu0 %v9675_v12, %s9899_s25  ;;  %v8909_v41 = vcombine.low %v3103_v20, %v3113_v31  ;;  %v1573_v51 = vsel %vm10064_vm8, %v8798_v43, %v1572_v23  ;;  %v1574_v52 = vrot.slane %v1572_v23, 4  ;;  %v1084_v53 = vshrl.u32 %v906_v29, 16  ;;  %v196_v14 = vld [vmem:[%s10075_s24 + $0x90] sm:$0xff]  ;;  %9573 = vmatpush3.bf16.msra.mxu1 %v9705_v32 }
  0x9a   : > { %v424_v54 = vor.u32 %v422_v36, %v421_v50  ;;  %v426_v55 = vrot.slane %v421_v50, 4  ;;  %v674_v56 = vsel %vm10091_vm13, %v416_v44, %v673_v28  ;;  %v1087_v33 = vshll.u32 %v906_v29, 16  ;;  %v197_v28 = vld [vmem:[%s10075_s24 + $0x98] sm:$0xff] }
  0x9b   : > { %v1082_v59 = vsel %vm10084_vm12, %v1077_v34, %v1081_v26  ;;  %675 = vst [vmem:[#allocation2 + $0x54] sm:$0xf] %v674_v56  ;;  %v1576_v61 = vsel %vm10064_vm8, %v1574_v52, %v1575_v7  ;;  %v1086_v62 = vrot.slane %v1084_v53, 4  ;;  %v1093_v63 = vshll.u32 %v907_v42, 16 }
  0x9c   : > { %v8782_v3 = vcombine.low %v1072_v24, %v1082_v59  ;;  %v425_v45 = vsel %vm10102_vm14, %v417_v48, %v424_v54  ;;  %v678_v4 = vsel %vm9977_vm3, %v426_v55, %v677_v39  ;;  %v1089_v6 = vrot.slane %v1087_v33, 5 }
  0x9d   : > { %3434 = vrot.lane.b32.xlu0 %v8909_v41, %s9901_s27  ;;  %676 = vst.msk [vmem:[#allocation2 + $0x58] sm:$0xf] %vm48_vm0, %v425_v45  ;;  %679 = vst [vmem:[#allocation2 + $0x5c] sm:$0x1] %v678_v4  ;;  %v10388_v8 = vrot.slane %v1093_v63, 5  ;;  %v1097_v9 = vshrl.u32 %v907_v42, 16  ;;  %v8814_v12 = vcombine.low %v1573_v51, %v1576_v61  ;;  %v10406_v26 = vpack.c.bf16 %v194_v2, %v194_v2 }
  0x9e   : > { %v1103_v10 = vshll.u32 %v908_v57, 16  ;;  %1381 = vrot.lane.b32.xlu1 %v8782_v3, %s9900_s26  ;;  %v428_v13 = vshrl.u32 %v10333_v49, 16  ;;  %v431_v15 = vshll.u32 %v10333_v49, 16  ;;  %v436_v16 = vshrl.u32 %v10336_v60, 16 }
  0x9f   : > { %v1090_v19 = vor.u32 %v1089_v6, %v1086_v62  ;;  %v1099_v20 = vrot.slane %v1097_v9, 4  ;;  %v439_v49 = vshll.u32 %v10336_v60, 16  ;;  %v8799_v31 = vrot.slane %v10385_v5, 9 }
  0xa0   : > { %v430_v24 = vrot.slane %v428_v13, 7  ;;  %v10403_v25 = vrot.slane %v436_v16, 7  ;;  %v1105_v30 = vrot.slane %v1103_v10, 5  ;;  %v1579_v60 = vrot.slane %v10390_v11, 5 }
  0xa1   : > { %2715 = vrot.lane.b32.xlu0 %v8878_v38, %s9900_s26  ;;  %v1091_v38 = vrot.slane %v1090_v19, 4  ;;  %v1100_v29 = vor.u32 %v1099_v20, %v10388_v8  ;;  %v1582_v42 = vrot.slane %v10398_v47, 5  ;;  %v10418_v37 = vpack.c.bf16 %v195_v18, %v195_v18  ;;  %v684_v18 = vld [vmem:[#allocation2 + $0x68] sm:$0x1] }
  0xa2   : > { %1705 = vrot.lane.b32.xlu1 %v8814_v12, %s9899_s25  ;;  %v2961_v35 = vld [vmem:[#allocation2 + $0x54] sm:$0xf]  ;;  %v433_v36 = vor.u32 %v431_v15, %v430_v24  ;;  %v10420_v23 = vpack.c.bf16 %v196_v14, %v196_v14  ;;  %v10422_v39 = vpack.c.bf16 %v197_v28, %v197_v28  ;;  %v441_v34 = vor.u32 %v439_v49, %v10403_v25 }
  0xa3   : > { %v3115_v41 = vshrl.u32 %v2961_v35, 16  ;;  %v3118_v40 = vshll.u32 %v2961_v35, 16  ;;  %v2467_v43 = vld [vmem:[#allocation2 + $0x54] sm:$0xe]  ;;  %v1096_v50 = vsel %vm10084_vm12, %v1091_v38, %v10388_v8  ;;  %v1101_v7 = vrot.slane %v1100_v29, 4 }
  0xa4   : > { %v9677_v44 = vld [vmem:[#allocation2 + $0x54] sm:$0xff]   ;;  %v681_v51 = vsel %vm10091_vm13, %v433_v36, %v680_v27  ;;  %v2963_v52 = vld [vmem:[#allocation2 + $0x5c] sm:$0x1]  ;;  %v434_v62 = vrot.slane %v430_v24, 4  ;;  %v1580_v63 = vsel %vm10064_vm8, %v8799_v31, %v1579_v60  ;;  %v8863_v5 = vrot.slane %v2467_v43, 9 }
  0xa5   : > { %v2962_v48 = vld [vmem:[#allocation2 + $0x58] sm:$0xf]  ;;  %v3117_v53 = vrot.slane %v3115_v41, 4  ;;  %v3120_v54 = vrot.slane %v3118_v40, 5  ;;  %682 = vst [vmem:[#allocation2 + $0x60] sm:$0xf] %v681_v51  ;;  %2892 = vrot.lane.b32.xlu0 %v9677_v44, %s9899_s25  ;;  %v1106_v61 = vsel %vm10084_vm12, %v1101_v7, %v1105_v30 }
  0xa6   : > { %v3124_v55 = vshll.u32 %v2962_v48, 16  ;;  %v3128_v56 = vshrl.u32 %v2962_v48, 16  ;;  %v3134_v57 = vshll.u32 %v2963_v52, 16  ;;  %1882 = vrot.lane.b32.xlu1 %v9678_v22, %s9901_s27  ;;  %v2468_v33 = vld [vmem:[#allocation2 + $0x58] sm:$0xf]  ;;  %v8783_v8 = vcombine.low %v1096_v50, %v1106_v61 }
  0xa7   : > { %v2469_v59 = vld [vmem:[#allocation2 + $0x5c] sm:$0x1]  ;;  %v3121_v2 = vor.u32 %v3120_v54, %v3117_v53  ;;  %v2589_v4 = vrot.slane %v2468_v33, 5  ;;  %v442_v9 = vsel %vm10102_vm14, %v434_v62, %v441_v34  ;;  %v909_v10 = vld [vmem:[#allocation2 + $0x54] sm:$0xf]  ;;  %v443_v19 = vrot.slane %v10403_v25, 4 }
  0xa8   : > { %v3126_v3 = vrot.slane %v3124_v55, 5  ;;  %v3130_v45 = vrot.slane %v3128_v56, 4  ;;  %v2592_v6 = vrot.slane %v2469_v59, 5  ;;  %v910_v11 = vld [vmem:[#allocation2 + $0x58] sm:$0xf]  ;;  %v3136_v15 = vrot.slane %v3134_v57, 5 }
  0xa9   : > { %v3122_v12 = vrot.slane %v3121_v2, 4  ;;  %v2591_v16 = vrot.slane %v2589_v4, 4  ;;  %683 = vst.msk [vmem:[#allocation2 + $0x64] sm:$0xf] %vm48_vm0, %v442_v9  ;;  %v1581_v20 = vrot.slane %v1579_v60, 4  ;;  %v1108_v27 = vshrl.u32 %v909_v10, 16 }
  0xaa   : > { %v3131_v13 = vor.u32 %v3130_v45, %v3126_v3  ;;  %1383 = vrot.lane.b32.xlu1 %v8783_v8, %s9900_s26  ;;  %v1111_v47 = vshll.u32 %v909_v10, 16  ;;  %v1117_v24 = vshll.u32 %v910_v11, 16  ;;  %v445_v49 = vshrl.u32 %v10406_v26, 16  ;;  %v911_v30 = vld [vmem:[#allocation2 + $0x5c] sm:$0x1]  ;;  %v9680_v40 = vld [vmem:[#allocation2 + $0x54] sm:$0xff]  }
  0xab   : > { %v3127_v21 = vsel %vm10084_vm12, %v3122_v12, %v3126_v3  ;;  %v2590_v14 = vsel %vm10064_vm8, %v8863_v5, %v2589_v4  ;;  %v2593_v28 = vsel %vm10064_vm8, %v2591_v16, %v2592_v6  ;;  %v1583_v38 = vsel %vm10064_vm8, %v1581_v20, %v1582_v42  ;;  %v9708_v42 = vld [vmem:[%s12988_s1 + $0x78] sm:$0xff]   ;;  %v687_v45 = vld [vmem:[#allocation2 + $0x6c] sm:$0xf]  ;;  %v1457_v10 = vld [vmem:[#allocation2 + $0x54] sm:$0xe] }
  0xac   : > { %v3132_v22 = vrot.slane %v3131_v13, 4  ;;  %v685_v25 = vsel %vm9977_vm3, %v443_v19, %v684_v18  ;;  %v2964_v29 = vld [vmem:[#allocation2 + $0x60] sm:$0xf]  ;;  %v8815_v32 = vcombine.low %v1580_v63, %v1583_v38  ;;  %v1110_v43 = vrot.slane %v1108_v27, 4  ;;  %9326 = vmatprep.subr.bf16.mxu0 %v9708_v42  ;;  %v1458_v20 = vld [vmem:[#allocation2 + $0x58] sm:$0xf] }
  0xad   : > { %686 = vst [vmem:[#allocation2 + $0x68] sm:$0x1] %v685_v25  ;;  %v3139_v35 = vshrl.u32 %v2964_v29, 16  ;;  %v3142_v36 = vshll.u32 %v2964_v29, 16  ;;  %v2470_v60 = vld [vmem:[#allocation2 + $0x60] sm:$0xe]  ;;  %v8879_v52 = vcombine.low %v2590_v14, %v2593_v28 }
  0xae   : > { %v3137_v31 = vsel %vm10084_vm12, %v3132_v22, %v3136_v15  ;;  %v1113_v44 = vrot.slane %v1111_v47, 5  ;;  %v448_v48 = vshll.u32 %v10406_v26, 16  ;;  %1707 = vrot.lane.b32.xlu1 %v8815_v32, %s9899_s25  ;;  %v10459_v34 = vrot.slane %v1117_v24, 5  ;;  %v9710_v27 = vld [vmem:[%s12988_s1 + $0x88] sm:$0xff]   ;;  %v912_v14 = vld [vmem:[#allocation2 + $0x60] sm:$0xf] }
  0xaf   : > { %v8910_v41 = vcombine.low %v3127_v21, %v3137_v31  ;;  %v3141_v50 = vrot.slane %v3139_v35, 4  ;;  %v3144_v7 = vrot.slane %v3142_v36, 5  ;;  %v1121_v51 = vshrl.u32 %v910_v11, 16  ;;  %v9709_v11 = vld [vmem:[%s12988_s1 + $0x38] sm:$0xff]   ;;  %9574 = vmatprep.subr.bf16.mxu1 %v9710_v27 }
  0xb0   : > { %v2965_v53 = vld [vmem:[#allocation2 + $0x64] sm:$0xf]  ;;  %v8864_v54 = vrot.slane %v2470_v60, 9  ;;  %v1114_v55 = vor.u32 %v1113_v44, %v1110_v43  ;;  %v1127_v56 = vshll.u32 %v911_v30, 16  ;;  %v447_v3 = vrot.slane %v445_v49, 7  ;;  %9327 = vmatpush3.bf16.msra.mxu0 %v9709_v11  ;;  %9575 = vmatpush3.bf16.msra.mxu1 %v9710_v27 }
  0xb1   : > { %3436 = vrot.lane.b32.xlu0 %v8910_v41, %s9901_s27  ;;  %v3145_v26 = vor.u32 %v3144_v7, %v3141_v50  ;;  %v3148_v57 = vshll.u32 %v2965_v53, 16  ;;  %v3152_v33 = vshrl.u32 %v2965_v53, 16  ;;  %v2471_v59 = vld [vmem:[#allocation2 + $0x64] sm:$0xf]  ;;  %v1123_v61 = vrot.slane %v1121_v51, 4 }
  0xb2   : > { %v2596_v62 = vrot.slane %v2471_v59, 5  ;;  %v1115_v63 = vrot.slane %v1114_v55, 4  ;;  %v1129_v2 = vrot.slane %v1127_v56, 5  ;;  %v9679_v4 = vld [vmem:[#allocation2 + $0x60] sm:$0xff]   ;;  %1884 = vrot.lane.b32.xlu1 %v9680_v40, %s9901_s27  ;;  %v450_v19 = vor.u32 %v448_v48, %v447_v3  ;;  %v1459_v49 = vld [vmem:[#allocation2 + $0x5c] sm:$0x1] }
  0xb3   : > { %v3146_v5 = vrot.slane %v3145_v26, 4  ;;  %v3150_v6 = vrot.slane %v3148_v57, 5  ;;  %v3154_v8 = vrot.slane %v3152_v33, 4  ;;  %v1124_v9 = vor.u32 %v1123_v61, %v10459_v34  ;;  %v913_v30 = vld [vmem:[#allocation2 + $0x64] sm:$0xf] }
  0xb4   : > { %v2966_v12 = vld [vmem:[#allocation2 + $0x68] sm:$0x1]  ;;  %v10470_v15 = vsel %vm10064_vm8, %v8864_v54, %v2596_v62  ;;  %v2598_v16 = vrot.slane %v2596_v62, 4  ;;  %v1120_v18 = vsel %vm10084_vm12, %v1115_v63, %v10459_v34  ;;  %v451_v38 = vrot.slane %v447_v3, 4  ;;  %v691_v60 = vld [vmem:[#allocation2 + $0x74] sm:$0x1] }
  0xb5   : > { %2717 = vrot.lane.b32.xlu0 %v8879_v52, %s9900_s26  ;;  %v2472_v13 = vld [vmem:[#allocation2 + $0x68] sm:$0x1]  ;;  %v3151_v47 = vsel %vm10084_vm12, %v3146_v5, %v3150_v6  ;;  %v3155_v21 = vor.u32 %v3154_v8, %v3150_v6  ;;  %v3158_v22 = vshll.u32 %v2966_v12, 16  ;;  %v1125_v28 = vrot.slane %v1124_v9, 4 }
  0xb6   : > { %v2599_v24 = vrot.slane %v2472_v13, 5  ;;  %v453_v25 = vshrl.u32 %v10418_v37, 16  ;;  %v456_v29 = vshll.u32 %v10418_v37, 16  ;;  %v688_v36 = vsel %vm10091_vm13, %v450_v19, %v687_v45  ;;  %v914_v44 = vld [vmem:[#allocation2 + $0x68] sm:$0x1]  ;;  %v10503_v45 = vpop.permute.xlu1 %1695  ;;  %v9682_v13 = vld [vmem:[#allocation2 + $0x60] sm:$0xff]  }
  0xb7   : > { %v3156_v31 = vrot.slane %v3155_v21, 4  ;;  %v3160_v32 = vrot.slane %v3158_v22, 5  ;;  %v1130_v40 = vsel %vm10084_vm12, %v1125_v28, %v1129_v2  ;;  %689 = vst [vmem:[#allocation2 + $0x6c] sm:$0xf] %v688_v36  ;;  %v8800_v43 = vrot.slane %v1457_v10, 9  ;;  %v10506_v10 = vpop.permute.xlu0 %1371 }
  0xb8   : > { %v2600_v35 = vsel %vm10064_vm8, %v2598_v16, %v2599_v24  ;;  %v455_v37 = vrot.slane %v453_v25, 7  ;;  %v8784_v42 = vcombine.low %v1120_v18, %v1130_v40  ;;  %v1586_v50 = vrot.slane %v1458_v20, 5  ;;  %v694_v25 = vld [vmem:[#allocation2 + $0x78] sm:$0xf] }
  0xb9   : > { %2894 = vrot.lane.b32.xlu0 %v9679_v4, %s9899_s25  ;;  %v8880_v41 = vcombine.low %v10470_v15, %v2600_v35  ;;  %v3161_v48 = vsel %vm10084_vm12, %v3156_v31, %v3160_v32  ;;  %v1589_v7 = vrot.slane %v1459_v49, 5  ;;  %v1132_v53 = vshrl.u32 %v912_v14, 16 }
  0xba   : > { %v8911_v34 = vcombine.low %v3151_v47, %v3161_v48  ;;  %v458_v51 = vor.u32 %v456_v29, %v455_v37  ;;  %v460_v52 = vrot.slane %v455_v37, 4  ;;  %1385 = vrot.lane.b32.xlu1 %v8784_v42, %s9900_s26  ;;  %v1587_v54 = vsel %vm10064_vm8, %v8800_v43, %v1586_v50  ;;  %v1460_v29 = vld [vmem:[#allocation2 + $0x60] sm:$0xe]  ;;  %v698_v42 = vld [vmem:[#allocation2 + $0x80] sm:$0x1] }
  0xbb   : > { %v1588_v55 = vrot.slane %v1586_v50, 4  ;;  %v1135_v56 = vshll.u32 %v912_v14, 16  ;;  %v1141_v26 = vshll.u32 %v913_v30, 16  ;;  %v1134_v59 = vrot.slane %v1132_v53, 4 }
  0xbc   : > { %v459_v57 = vsel %vm10102_vm14, %v451_v38, %v458_v51  ;;  %v692_v33 = vsel %vm9977_vm3, %v460_v52, %v691_v60  ;;  %v1145_v61 = vshrl.u32 %v913_v30, 16  ;;  %v1151_v3 = vshll.u32 %v914_v44, 16  ;;  %v1462_v60 = vld [vmem:[#allocation2 + $0x68] sm:$0x1] }
  0xbd   : > { %3438 = vrot.lane.b32.xlu0 %v8911_v34, %s9901_s27  ;;  %690 = vst.msk [vmem:[#allocation2 + $0x70] sm:$0xf] %vm48_vm0, %v459_v57  ;;  %v1590_v62 = vsel %vm10064_vm8, %v1588_v55, %v1589_v7  ;;  %693 = vst [vmem:[#allocation2 + $0x74] sm:$0x1] %v692_v33  ;;  %v1137_v63 = vrot.slane %v1135_v56, 5  ;;  %v1143_v2 = vrot.slane %v1141_v26, 5 }
  0xbe   : > { %v8816_v4 = vcombine.low %v1587_v54, %v1590_v62  ;;  %v1147_v5 = vrot.slane %v1145_v61, 4  ;;  %v462_v6 = vshrl.u32 %v10420_v23, 16  ;;  %v2967_v8 = vld [vmem:[#allocation2 + $0x6c] sm:$0xf]  ;;  %v465_v16 = vshll.u32 %v10420_v23, 16  ;;  %v198_v33 = vld [vmem:[%s10075_s24 + $0xa0] sm:$0xff] }
  0xbf   : > { %v1138_v9 = vor.u32 %v1137_v63, %v1134_v59  ;;  %v3163_v11 = vshrl.u32 %v2967_v8, 16  ;;  %v3166_v12 = vshll.u32 %v2967_v8, 16  ;;  %v1153_v19 = vrot.slane %v1151_v3, 5  ;;  %v2473_v49 = vld [vmem:[#allocation2 + $0x6c] sm:$0xe] }
  0xc0   : > { %1709 = vrot.lane.b32.xlu1 %v8816_v4, %s9899_s25  ;;  %v1148_v15 = vor.u32 %v1147_v5, %v1143_v2  ;;  %v464_v20 = vrot.slane %v462_v6, 7  ;;  %v470_v27 = vshrl.u32 %v10422_v39, 16  ;;  %v473_v24 = vshll.u32 %v10422_v39, 16  ;;  %v1461_v39 = vld [vmem:[#allocation2 + $0x64] sm:$0xf]  ;;  %v10520_v7 = vpop.permute.xlu0 %2884 }
  0xc1   : > { %2719 = vrot.lane.b32.xlu0 %v8880_v41, %s9900_s26  ;;  %v1139_v18 = vrot.slane %v1138_v9, 4  ;;  %v3165_v47 = vrot.slane %v3163_v11, 4  ;;  %v3168_v21 = vrot.slane %v3166_v12, 5  ;;  %v915_v50 = vld [vmem:[#allocation2 + $0x6c] sm:$0xf]  ;;  %v8801_v54 = vrot.slane %v1460_v29, 9 }
  0xc2   : > { %v1149_v22 = vrot.slane %v1148_v15, 4  ;;  %v468_v28 = vrot.slane %v464_v20, 4  ;;  %v472_v38 = vrot.slane %v470_v27, 7  ;;  %v467_v36 = vor.u32 %v465_v16, %v464_v20  ;;  %v200_v29 = vld [vmem:[%s10075_s24 + $0xb0] sm:$0xff] }
  0xc3   : > { %v1144_v14 = vsel %vm10084_vm12, %v1139_v18, %v1143_v2  ;;  %v10515_v30 = vpop.permute.xlu1 %2882  ;;  %v3169_v32 = vor.u32 %v3168_v21, %v3165_v47  ;;  %v8865_v61 = vrot.slane %v2473_v49, 9  ;;  %v1593_v4 = vrot.slane %v1461_v39, 5  ;;  %v199_v49 = vld [vmem:[%s10075_s24 + $0xa8] sm:$0xff] }
  0xc4   : > { %v9681_v23 = vld [vmem:[#allocation2 + $0x6c] sm:$0xff]   ;;  %1886 = vrot.lane.b32.xlu1 %v9682_v13, %s9901_s27  ;;  %v1154_v35 = vsel %vm10084_vm12, %v1149_v22, %v1153_v19  ;;  %v2969_v41 = vld [vmem:[#allocation2 + $0x74] sm:$0x1]  ;;  %v475_v48 = vor.u32 %v473_v24, %v472_v38  ;;  %v477_v53 = vrot.slane %v472_v38, 4  ;;  %v695_v63 = vsel %vm10091_vm13, %v467_v36, %v694_v25 }
  0xc5   : > { %v2968_v31 = vld [vmem:[#allocation2 + $0x70] sm:$0xf]  ;;  %v8785_v44 = vcombine.low %v1144_v14, %v1154_v35  ;;  %2896 = vrot.lane.b32.xlu0 %v9681_v23, %s9899_s25  ;;  %v3182_v34 = vshll.u32 %v2969_v41, 16  ;;  %v2475_v51 = vld [vmem:[#allocation2 + $0x74] sm:$0x1]  ;;  %v3170_v55 = vrot.slane %v3169_v32, 4  ;;  %v10536_v13 = vpack.c.bf16 %v198_v33, %v198_v33 }
  0xc6   : > { %v3172_v40 = vshll.u32 %v2968_v31, 16  ;;  %v3176_v37 = vshrl.u32 %v2968_v31, 16  ;;  %v2474_v43 = vld [vmem:[#allocation2 + $0x70] sm:$0xf]  ;;  %v476_v57 = vsel %vm10102_vm14, %v468_v28, %v475_v48  ;;  %v2606_v62 = vrot.slane %v2475_v51, 5 }
  0xc7   : > { %v2603_v52 = vrot.slane %v2474_v43, 5  ;;  %v3184_v59 = vrot.slane %v3182_v34, 5  ;;  %697 = vst.msk [vmem:[#allocation2 + $0x7c] sm:$0xf] %vm48_vm0, %v476_v57  ;;  %696 = vst [vmem:[#allocation2 + $0x78] sm:$0xf] %v695_v63  ;;  %v699_v9 = vsel %vm9977_vm3, %v477_v53, %v698_v42  ;;  %v1594_v18 = vsel %vm10064_vm8, %v8801_v54, %v1593_v4  ;;  %v10542_v27 = vpop.permute.xlu0 %2886 }
  0xc8   : > { %v3174_v56 = vrot.slane %v3172_v40, 5  ;;  %v3178_v26 = vrot.slane %v3176_v37, 4  ;;  %1387 = vrot.lane.b32.xlu1 %v8785_v44, %s9900_s26  ;;  %v1596_v5 = vrot.slane %v1462_v60, 5  ;;  %v10530_v6 = vld [vmem:[#allocation2 + $0x70] sm:$0xf]  ;;  %v1156_v11 = vshrl.u32 %v915_v50, 16 }
  0xc9   : > { %v2605_v3 = vrot.slane %v2603_v52, 4  ;;  %v1159_v12 = vshll.u32 %v915_v50, 16  ;;  %v1595_v19 = vrot.slane %v1593_v4, 4  ;;  %700 = vst [vmem:[#allocation2 + $0x80] sm:$0x1] %v699_v9  ;;  %v2604_v47 = vsel %vm10064_vm8, %v8865_v61, %v2603_v52  ;;  %v9684_v35 = vld [vmem:[#allocation2 + $0x6c] sm:$0xff]  }
  0xca   : > { %v3179_v2 = vor.u32 %v3178_v26, %v3174_v56  ;;  %v10532_v8 = vpop.permute.xlu1 %1872  ;;  %v3175_v15 = vsel %vm10084_vm12, %v3170_v55, %v3174_v56  ;;  %v917_v20 = vld [vmem:[#allocation2 + $0x74] sm:$0x1]  ;;  %v1158_v21 = vrot.slane %v1156_v11, 4  ;;  %v1165_v24 = vshll.u32 %v10530_v6, 16  ;;  %v201_v60 = vld [vmem:[%s10075_s24 + $0xb8] sm:$0xff] }
  0xcb   : > { %v1161_v22 = vrot.slane %v1159_v12, 5  ;;  %v2607_v28 = vsel %vm10064_vm8, %v2605_v3, %v2606_v62  ;;  %v1597_v38 = vsel %vm10064_vm8, %v1595_v19, %v1596_v5  ;;  %v1169_v25 = vshrl.u32 %v10530_v6, 16 }
  0xcc   : > { %v3180_v16 = vrot.slane %v3179_v2, 4  ;;  %v8817_v32 = vcombine.low %v1594_v18, %v1597_v38  ;;  %v1175_v36 = vshll.u32 %v917_v20, 16  ;;  %v479_v39 = vshrl.u32 %v10536_v13, 16  ;;  %v9711_v38 = vld [vmem:[#allocation2 + $0x18] sm:$0xff]  }
  0xcd   : > { %v10560_v37 = vpack.c.bf16 %v199_v49, %v199_v49  ;;  %v8881_v43 = vcombine.low %v2604_v47, %v2607_v28  ;;  %v1162_v42 = vor.u32 %v1161_v22, %v1158_v21  ;;  %v10564_v50 = vrot.slane %v1165_v24, 5  ;;  %v1463_v49 = vld [vmem:[#allocation2 + $0x6c] sm:$0xe]  ;;  %874 = vst.msk [vmem:[#allocation3 + $0x30] sm:$0xff] %vm871_vm1, %v9711_v38 }
  0xce   : > { %v3185_v14 = vsel %vm10084_vm12, %v3180_v16, %v3184_v59  ;;  %v10556_v23 = vpop.permute.xlu1 %1874  ;;  %v2971_v41 = vld [vmem:[#allocation2 + $0x7c] sm:$0xf]  ;;  %1711 = vrot.lane.b32.xlu1 %v8817_v32, %s9899_s25  ;;  %v2970_v44 = vld [vmem:[#allocation2 + $0x78] sm:$0xf]  ;;  %v10570_v61 = vpack.c.bf16 %v200_v29, %v200_v29  ;;  %v10572_v62 = vpack.c.bf16 %v201_v60, %v201_v60  ;;  %v1171_v19 = vrot.slane %v1169_v25, 4  ;;  %v9707_v28 = vld [vmem:[#allocation2 + $0xc] sm:$0xff]  }
  0xcf   : > { %v8912_v31 = vcombine.low %v3175_v15, %v3185_v14  ;;  %v2477_v40 = vld [vmem:[#allocation2 + $0x7c] sm:$0xf]  ;;  %v3196_v48 = vshll.u32 %v2971_v41, 16  ;;  %v3187_v34 = vshrl.u32 %v2970_v44, 16  ;;  %v3190_v51 = vshll.u32 %v2970_v44, 16  ;;  %v9686_v14 = vld [vmem:[#allocation2] sm:$0xff]  }
  0xd0   : > { %v3200_v52 = vshrl.u32 %v2971_v41, 16  ;;  %v2476_v53 = vld [vmem:[#allocation2 + $0x78] sm:$0xe]  ;;  %v2610_v54 = vrot.slane %v2477_v40, 5  ;;  %v2972_v26 = vld [vmem:[#allocation2 + $0x80] sm:$0x1]  ;;  %v1172_v32 = vor.u32 %v1171_v19, %v10564_v50 }
  0xd1   : > { %3440 = vrot.lane.b32.xlu0 %v8912_v31, %s9901_s27  ;;  %v3198_v57 = vrot.slane %v3196_v48, 5  ;;  %v2478_v33 = vld [vmem:[#allocation2 + $0x80] sm:$0x1]  ;;  %v8866_v59 = vrot.slane %v2476_v53, 9  ;;  %v3189_v63 = vrot.slane %v3187_v34, 4  ;;  %v3192_v2 = vrot.slane %v3190_v51, 5 }
  0xd2   : > { %v10566_v55 = vpop.permute.xlu0 %2705  ;;  %v10568_v56 = vpop.permute.xlu1 %1876  ;;  %v3202_v3 = vrot.slane %v3200_v52, 4  ;;  %v3206_v4 = vshll.u32 %v2972_v26, 16  ;;  %v9683_v5 = vld [vmem:[#allocation2 + $0x78] sm:$0xff]   ;;  %1888 = vrot.lane.b32.xlu1 %v9684_v35, %s9901_s27  ;;  %v2612_v9 = vrot.slane %v2610_v54, 4  ;;  %v2613_v11 = vrot.slane %v2478_v33, 5  ;;  %v9713_v48 = vld [vmem:[#allocation2 + $0x24] sm:$0xff]  }
  0xd3   : > { %v10578_v6 = vsel %vm10064_vm8, %v8866_v59, %v2610_v54  ;;  %v1163_v12 = vrot.slane %v1162_v42, 4  ;;  %v3193_v15 = vor.u32 %v3192_v2, %v3189_v63  ;;  %v1177_v22 = vrot.slane %v1175_v36, 5  ;;  %v701_v35 = vld [vmem:[#allocation2 + $0x84] sm:$0xf]  ;;  %v1464_v60 = vld [vmem:[#allocation2 + $0x70] sm:$0xf] }
  0xd4   : > { %v3203_v16 = vor.u32 %v3202_v3, %v3198_v57  ;;  %v3208_v18 = vrot.slane %v3206_v4, 5  ;;  %v10584_v47 = vsel %vm10064_vm8, %v2612_v9, %v2613_v11  ;;  %v481_v24 = vrot.slane %v479_v39, 7  ;;  %v1465_v41 = vld [vmem:[#allocation2 + $0x74] sm:$0x1]  ;;  %v705_v53 = vld [vmem:[#allocation2 + $0x8c] sm:$0x1] }
  0xd5   : > { %2721 = vrot.lane.b32.xlu0 %v8881_v43, %s9900_s26  ;;  %v1168_v21 = vsel %vm10084_vm12, %v1163_v12, %v10564_v50  ;;  %v3194_v29 = vrot.slane %v3193_v15, 4  ;;  %v8882_v25 = vcombine.low %v10578_v6, %v10584_v47  ;;  %v482_v36 = vshll.u32 %v10536_v13, 16  ;;  %v9716_v42 = vld [vmem:[#allocation2 + $0x30] sm:$0xff]   ;;  %v918_v54 = vld [vmem:[#allocation2 + $0x78] sm:$0xf]  ;;  %872 = vst.msk [vmem:[#allocation3] sm:$0xff] %vm871_vm1, %v9686_v14 }
  0xd6   : > { %v10580_v20 = vpop.permute.xlu1 %1697  ;;  %v3204_v31 = vrot.slane %v3203_v16, 4  ;;  %v10592_v40 = vpop.permute.xlu0 %2707  ;;  %v485_v39 = vrot.slane %v481_v24, 4  ;;  %v487_v43 = vshrl.u32 %v10560_v37, 16  ;;  %v490_v44 = vshll.u32 %v10560_v37, 16  ;;  %v919_v63 = vld [vmem:[#allocation2 + $0x7c] sm:$0xf] }
  0xd7   : > { %v3199_v34 = vsel %vm10084_vm12, %v3194_v29, %v3198_v57  ;;  %v1173_v51 = vrot.slane %v1172_v32, 4  ;;  %v8802_v52 = vrot.slane %v1463_v49, 9  ;;  %v484_v33 = vor.u32 %v482_v36, %v481_v24  ;;  %v920_v9 = vld [vmem:[#allocation2 + $0x80] sm:$0x1]  ;;  %873 = vst.msk [vmem:[#allocation3 + $0x18] sm:$0xff] %vm871_vm1, %v9707_v28  ;;  %875 = vst.msk [vmem:[#allocation3 + $0x48] sm:$0xff] %vm871_vm1, %v9713_v48 }
  0xd8   : > { %v3209_v50 = vsel %vm10084_vm12, %v3204_v31, %v3208_v18  ;;  %v489_v13 = vrot.slane %v487_v43, 7  ;;  %v1600_v59 = vrot.slane %v1464_v60, 5  ;;  %v1603_v3 = vrot.slane %v1465_v41, 5  ;;  %876 = vst.msk [vmem:[#allocation3 + $0x60] sm:$0xff] %vm871_vm1, %v9716_v42  ;;  %v9719_v19 = vld [vmem:[#allocation2 + $0x3c] sm:$0xff]   ;;  %v203_v43 = vld [vmem:[%s10075_s24 + $0xc8] sm:$0xff] }
  0xd9   : > { %2898 = vrot.lane.b32.xlu0 %v9683_v5, %s9899_s25  ;;  %v8913_v26 = vcombine.low %v3199_v34, %v3209_v50  ;;  %v1178_v37 = vsel %vm10084_vm12, %v1173_v51, %v1177_v22  ;;  %v702_v6 = vsel %vm10091_vm13, %v484_v33, %v701_v35  ;;  %1420 = vst.msk [vmem:[#allocation3] sm:$0xff] %vm1419_vm15, %v10506_v10  ;;  %v1180_v15 = vshrl.u32 %v918_v54, 16  ;;  %v1466_v38 = vld [vmem:[#allocation2 + $0x78] sm:$0xe]  ;;  %v10632_v35 = vld [vmem:[#allocation2 + $0x7c] sm:$0xf] }
  0xda   : > { %v10602_v2 = vpop.permute.xlu1 %1699  ;;  %v8786_v57 = vcombine.low %v1168_v21, %v1178_v37  ;;  %v492_v4 = vor.u32 %v490_v44, %v489_v13  ;;  %v494_v5 = vrot.slane %v489_v13, 4  ;;  %703 = vst [vmem:[#allocation2 + $0x84] sm:$0xf] %v702_v6  ;;  %v1601_v11 = vsel %vm10064_vm8, %v8802_v52, %v1600_v59  ;;  %v10618_v18 = vpop.permute.xlu0 %2709  ;;  %877 = vst.msk [vmem:[#allocation3 + $0x78] sm:$0xff] %vm871_vm1, %v9719_v19  ;;  %v708_v51 = vld [vmem:[#allocation2 + $0x90] sm:$0xf] }
  0xdb   : > { %v1602_v12 = vrot.slane %v1600_v59, 4  ;;  %v1183_v16 = vshll.u32 %v918_v54, 16  ;;  %v1189_v22 = vshll.u32 %v919_v63, 16  ;;  %v1193_v24 = vshrl.u32 %v919_v63, 16 }
  0xdc   : > { %1389 = vrot.lane.b32.xlu1 %v8786_v57, %s9900_s26  ;;  %v493_v47 = vsel %vm10102_vm14, %v485_v39, %v492_v4  ;;  %v706_v21 = vsel %vm9977_vm3, %v494_v5, %v705_v53  ;;  %v1182_v49 = vrot.slane %v1180_v15, 4  ;;  %v1199_v28 = vshll.u32 %v920_v9, 16  ;;  %v202_v39 = vld [vmem:[%s10075_s24 + $0xc0] sm:$0xff] }
  0xdd   : > { %3442 = vrot.lane.b32.xlu0 %v8913_v26, %s9901_s27  ;;  %704 = vst.msk [vmem:[#allocation2 + $0x88] sm:$0xf] %vm48_vm0, %v493_v47  ;;  %v1604_v10 = vsel %vm10064_vm8, %v1602_v12, %v1603_v3  ;;  %707 = vst [vmem:[#allocation2 + $0x8c] sm:$0x1] %v706_v21  ;;  %v1185_v14 = vrot.slane %v1183_v16, 5  ;;  %v10630_v31 = vrot.slane %v1189_v22, 5  ;;  %v10657_v33 = vpack.c.bf16 %v203_v43, %v203_v43 }
  0xde   : > { %v8818_v29 = vcombine.low %v1601_v11, %v1604_v10  ;;  %v1195_v32 = vrot.slane %v1193_v24, 4  ;;  %vm1743_vm5 = vcmask 785920   ;;  %vm1920_vm6 = vcmask 1048320   ;;  %v10651_v54 = vpop.permute.xlu0 %3426  ;;  %v1468_v15 = vld [vmem:[#allocation2 + $0x80] sm:$0x1] }
  0xdf   : > { %v1186_v41 = vor.u32 %v1185_v14, %v1182_v49  ;;  %1744 = vst.msk [vmem:[#allocation3] sm:$0xff] %vm1743_vm5, %v10503_v45  ;;  %v496_v36 = vshrl.u32 %v10570_v61, 16  ;;  %v1201_v48 = vrot.slane %v1199_v28, 5  ;;  %v499_v42 = vshll.u32 %v10570_v61, 16 }
  0xe0   : > { %v1374_v60 = vpop.permute.xlu1 %1373  ;;  %1713 = vrot.lane.b32.xlu1 %v8818_v29, %s9899_s25  ;;  %v1196_v44 = vor.u32 %v1195_v32, %v10630_v31  ;;  %1921 = vst.msk [vmem:[#allocation3] sm:$0xff] %vm1920_vm6, %v10532_v8  ;;  %v504_v45 = vshrl.u32 %v10572_v62, 16  ;;  %v8803_v52 = vrot.slane %v1466_v38, 9  ;;  %v1607_v53 = vrot.slane %v10632_v35, 5 }
  0xe1   : > { %2723 = vrot.lane.b32.xlu0 %v8882_v25, %s9900_s26  ;;  %1421 = vst.msk [vmem:[#allocation3 + $0x18] sm:$0xff] %vm1419_vm15, %v1374_v60  ;;  %v9689_v25 = vld [vmem:[#allocation2 + $0x78] sm:$0xff]   ;;  %v1187_v34 = vrot.slane %v1186_v41, 4  ;;  %v10648_v50 = vrot.slane %v496_v36, 7  ;;  %v2973_v8 = vld [vmem:[#allocation2 + $0x84] sm:$0xf]  ;;  %v10655_v61 = vpack.c.bf16 %v202_v39, %v202_v39 }
  0xe2   : > { %1745 = vst.msk [vmem:[#allocation3 + $0x18] sm:$0xff] %vm1743_vm5, %v10580_v20  ;;  %v2479_v26 = vld [vmem:[#allocation2 + $0x84] sm:$0xe]  ;;  %v3211_v13 = vshrl.u32 %v2973_v8, 16  ;;  %v3214_v20 = vshll.u32 %v2973_v8, 16  ;;  %v507_v63 = vshll.u32 %v10572_v62, 16  ;;  %v10667_v5 = vsel %vm10064_vm8, %v8803_v52, %v1607_v53  ;;  %v10675_v38 = vpop.permute.xlu0 %3428 }
  0xe3   : > { %1922 = vst.msk [vmem:[#allocation3 + $0x18] sm:$0xff] %vm1920_vm6, %v10556_v23  ;;  %v8867_v59 = vrot.slane %v2479_v26, 9  ;;  %v1192_v57 = vsel %vm10084_vm12, %v1187_v34, %v10630_v31  ;;  %v1197_v23 = vrot.slane %v1196_v44, 4  ;;  %v501_v4 = vor.u32 %v499_v42, %v10648_v50  ;;  %v1938_v41 = vld [vmem:[#allocation2 + $0x10] sm:$0xf] }
  0xe4   : > { %v9685_v37 = vld [vmem:[#allocation2 + $0x84] sm:$0xff]   ;;  %1890 = vrot.lane.b32.xlu1 %v9689_v25, %s9901_s27  ;;  %v2975_v6 = vld [vmem:[#allocation2 + $0x8c] sm:$0x1]  ;;  %v3213_v9 = vrot.slane %v3211_v13, 4  ;;  %v3216_v11 = vrot.slane %v3214_v20, 5  ;;  %v502_v22 = vrot.slane %v10648_v50, 4 }
  0xe5   : > { %v2974_v3 = vld [vmem:[#allocation2 + $0x88] sm:$0xf]  ;;  %2900 = vrot.lane.b32.xlu0 %v9685_v37, %s9899_s25  ;;  %v3230_v16 = vshll.u32 %v2975_v6, 16  ;;  %v2481_v47 = vld [vmem:[#allocation2 + $0x8c] sm:$0x1]  ;;  %v1202_v21 = vsel %vm10084_vm12, %v1197_v23, %v1201_v48  ;;  %v709_v24 = vsel %vm10091_vm13, %v501_v4, %v708_v51  ;;  %v506_v60 = vrot.slane %v504_v45, 7 }
  0xe6   : > { %v3220_v12 = vshll.u32 %v2974_v3, 16  ;;  %v3224_v62 = vshrl.u32 %v2974_v3, 16  ;;  %v2480_v19 = vld [vmem:[#allocation2 + $0x88] sm:$0xf]  ;;  %v3217_v10 = vor.u32 %v3216_v11, %v3213_v9  ;;  %710 = vst [vmem:[#allocation2 + $0x90] sm:$0xf] %v709_v24  ;;  %v8787_v35 = vcombine.low %v1192_v57, %v1202_v21  ;;  %v10702_v4 = vpop.permute.xlu0 %3430 }
  0xe7   : > { %v2617_v28 = vrot.slane %v2480_v19, 5  ;;  %v3232_v31 = vrot.slane %v3230_v16, 5  ;;  %v2620_v32 = vrot.slane %v2481_v47, 5  ;;  %v509_v44 = vor.u32 %v507_v63, %v506_v60  ;;  %v1939_v45 = vld [vmem:[#allocation2 + $0x14] sm:$0x1]  ;;  %v9697_v47 = vld [vmem:[#allocation2 + $0x84] sm:$0xff]  }
  0xe8   : > { %v3222_v49 = vrot.slane %v3220_v12, 5  ;;  %v3226_v14 = vrot.slane %v3224_v62, 4  ;;  %v3218_v36 = vrot.slane %v3217_v10, 4  ;;  %1391 = vrot.lane.b32.xlu1 %v8787_v35, %s9900_s26  ;;  %v511_v48 = vrot.slane %v506_v60, 4  ;;  %v1937_v26 = vld [vmem:[#allocation2 + $0xc] sm:$0xf] }
  0xe9   : > { %v1376_v29 = vpop.permute.xlu1 %1375  ;;  %v10680_v43 = vsel %vm10064_vm8, %v8867_v59, %v2617_v28  ;;  %v2619_v25 = vrot.slane %v2617_v28, 4  ;;  %v1609_v42 = vrot.slane %v1607_v53, 4  ;;  %v1610_v34 = vrot.slane %v1468_v15, 5  ;;  %v1941_v23 = vld [vmem:[#allocation2 + $0x1c] sm:$0xf]  ;;  %v9722_v15 = vld [vmem:[#allocation2 + $0x48] sm:$0xff]  }
  0xea   : > { %1422 = vst.msk [vmem:[#allocation3 + $0x30] sm:$0xff] %vm1419_vm15, %v1376_v29  ;;  %v3227_v39 = vor.u32 %v3226_v14, %v3222_v49  ;;  %v3223_v50 = vsel %vm10084_vm12, %v3218_v36, %v3222_v49  ;;  %v1995_v8 = vshll.u32 %v1938_v41, 16  ;;  %v510_v53 = vsel %vm10102_vm14, %v502_v22, %v509_v44  ;;  %v204_v24 = vld [vmem:[%s10075_s24 + $0xd0] sm:$0xff]  ;;  %v1942_v29 = vld [vmem:[#allocation2 + $0x20] sm:$0x1] }
  0xeb   : > { %1746 = vst.msk [vmem:[#allocation3 + $0x30] sm:$0xff] %vm1743_vm5, %v10602_v2  ;;  %v2621_v52 = vsel %vm10064_vm8, %v2619_v25, %v2620_v32  ;;  %v712_v2 = vld [vmem:[#allocation2 + $0x98] sm:$0x1]  ;;  %v1611_v20 = vsel %vm10064_vm8, %v1609_v42, %v1610_v34  ;;  %v1999_v59 = vshrl.u32 %v1938_v41, 16  ;;  %v2005_v57 = vshll.u32 %v1939_v45, 16 }
  0xec   : > { %1923 = vst.msk [vmem:[#allocation3 + $0x30] sm:$0xff] %vm1920_vm6, %v10568_v56  ;;  %v3228_v51 = vrot.slane %v3227_v39, 4  ;;  %v8883_v13 = vcombine.low %v10680_v43, %v2621_v52  ;;  %v1940_v56 = vld [vmem:[#allocation2 + $0x18] sm:$0xf]  ;;  %v8819_v37 = vcombine.low %v10667_v5, %v1611_v20  ;;  %v10700_v3 = vrot.slane %v1995_v8, 5 }
  0xed   : > { %711 = vst.msk [vmem:[#allocation2 + $0x94] sm:$0xf] %vm48_vm0, %v510_v53  ;;  %v2001_v11 = vrot.slane %v1999_v59, 4  ;;  %v1986_v12 = vshrl.u32 %v1937_v26, 16  ;;  %v1989_v62 = vshll.u32 %v1937_v26, 16  ;;  %v2007_v16 = vrot.slane %v2005_v57, 5 }
  0xee   : > { %v3233_v63 = vsel %vm10084_vm12, %v3228_v51, %v3232_v31  ;;  %1715 = vrot.lane.b32.xlu1 %v8819_v37, %s9899_s25  ;;  %v713_v5 = vsel %vm9977_vm3, %v511_v48, %v712_v2  ;;  %v2976_v19 = vld [vmem:[#allocation2 + $0x90] sm:$0xf]  ;;  %v2010_v21 = vshrl.u32 %v1940_v56, 16  ;;  %v2013_v22 = vshll.u32 %v1940_v56, 16  ;;  %v205_v31 = vld [vmem:[%s10075_s24 + $0xd8] sm:$0xff]  ;;  %878 = vst.msk [vmem:[#allocation3 + $0x90] sm:$0xff] %vm871_vm1, %v9722_v15  ;;  %v10717_v51 = vpop.permute.xlu0 %2711 }
  0xef   : > { %v1378_v6 = vpop.permute.xlu1 %1377  ;;  %v8914_v9 = vcombine.low %v3223_v50, %v3233_v63  ;;  %v2002_v10 = vor.u32 %v2001_v11, %v10700_v3  ;;  %v1988_v49 = vrot.slane %v1986_v12, 4  ;;  %v1991_v14 = vrot.slane %v1989_v62, 5  ;;  %714 = vst [vmem:[#allocation2 + $0x98] sm:$0x1] %v713_v5  ;;  %v2482_v50 = vld [vmem:[#allocation2 + $0x90] sm:$0xe] }
  0xf0   : > { %1423 = vst.msk [vmem:[#allocation3 + $0x48] sm:$0xff] %vm1419_vm15, %v1378_v6  ;;  %v3235_v28 = vshrl.u32 %v2976_v19, 16  ;;  %v3238_v32 = vshll.u32 %v2976_v19, 16  ;;  %v2012_v35 = vrot.slane %v2010_v21, 4  ;;  %v2015_v60 = vrot.slane %v2013_v22, 5  ;;  %v9724_v62 = vld [vmem:[#allocation2 + $0x54] sm:$0xff]  }
  0xf1   : > { %3444 = vrot.lane.b32.xlu0 %v8914_v9, %s9901_s27  ;;  %v2019_v41 = vshll.u32 %v1941_v23, 16  ;;  %v2003_v39 = vrot.slane %v2002_v10, 4  ;;  %v1992_v43 = vor.u32 %v1991_v14, %v1988_v49  ;;  %v2023_v44 = vshrl.u32 %v1941_v23, 16  ;;  %v921_v53 = vld [vmem:[#allocation2 + $0x84] sm:$0xf]  ;;  %879 = vst.msk [vmem:[#allocation3 + $0xa8] sm:$0xff] %vm871_vm1, %v9724_v62 }
  0xf2   : > { %v3237_v25 = vrot.slane %v3235_v28, 4  ;;  %v3240_v48 = vrot.slane %v3238_v32, 5  ;;  %1892 = vrot.lane.b32.xlu1 %v9697_v47, %s9901_s27  ;;  %v2016_v42 = vor.u32 %v2015_v60, %v2012_v35  ;;  %v2029_v45 = vshll.u32 %v1942_v29, 16  ;;  %v922_v49 = vld [vmem:[#allocation2 + $0x88] sm:$0xf] }
  0xf3   : > { %v1702_v36 = vpop.permute.xlu1 %1701  ;;  %v10715_v34 = vrot.slane %v2019_v41, 5  ;;  %v2008_v8 = vsel %vm10084_vm12, %v2003_v39, %v2007_v16  ;;  %v1993_v26 = vrot.slane %v1992_v43, 4  ;;  %v10722_v20 = vpack.c.bf16 %v204_v24, %v204_v24 }
  0xf4   : > { %1747 = vst.msk [vmem:[#allocation3 + $0x48] sm:$0xff] %vm1743_vm5, %v1702_v36  ;;  %v9693_v52 = vld [vmem:[#allocation2 + $0x90] sm:$0xff]   ;;  %v10724_v59 = vpack.c.bf16 %v205_v31, %v205_v31  ;;  %v3241_v56 = vor.u32 %v3240_v48, %v3237_v25  ;;  %v2017_v57 = vrot.slane %v2016_v42, 4  ;;  %v2025_v9 = vrot.slane %v2023_v44, 4  ;;  %v923_v31 = vld [vmem:[#allocation2 + $0x8c] sm:$0x1] }
  0xf5   : > { %2725 = vrot.lane.b32.xlu0 %v8883_v13, %s9900_s26  ;;  %v2977_v2 = vld [vmem:[#allocation2 + $0x94] sm:$0xf]  ;;  %v1998_v13 = vsel %vm10084_vm12, %v1993_v26, %v10700_v3  ;;  %v2031_v11 = vrot.slane %v2029_v45, 5  ;;  %v8868_v12 = vrot.slane %v2482_v50, 9  ;;  %v1204_v32 = vshrl.u32 %v921_v53, 16 }
  0xf6   : > { %v3244_v63 = vshll.u32 %v2977_v2, 16  ;;  %v3248_v37 = vshrl.u32 %v2977_v2, 16  ;;  %v2483_v23 = vld [vmem:[#allocation2 + $0x94] sm:$0xf]  ;;  %v8841_v15 = vcombine.low %v1998_v13, %v2008_v8  ;;  %v2978_v16 = vld [vmem:[#allocation2 + $0x98] sm:$0x1]  ;;  %v2022_v22 = vsel %vm10084_vm12, %v2017_v57, %v10715_v34 }
  0xf7   : > { %v1879_v6 = vpop.permute.xlu1 %1878  ;;  %v3242_v5 = vrot.slane %v3241_v56, 4  ;;  %v3254_v21 = vshll.u32 %v2978_v16, 16  ;;  %v2026_v3 = vor.u32 %v2025_v9, %v10715_v34  ;;  %v2484_v24 = vld [vmem:[#allocation2 + $0x98] sm:$0x1]  ;;  %v2624_v10 = vrot.slane %v2483_v23, 5  ;;  %v10739_v35 = vpop.permute.xlu0 %2888  ;;  %v9725_v13 = vld [vmem:[#allocation2 + $0x60] sm:$0xff]  }
  0xf8   : > { %1924 = vst.msk [vmem:[#allocation3 + $0x48] sm:$0xff] %vm1920_vm6, %v1879_v6  ;;  %v3246_v19 = vrot.slane %v3244_v63, 5  ;;  %v3250_v47 = vrot.slane %v3248_v37, 4  ;;  %v2627_v29 = vrot.slane %v2484_v24, 5  ;;  %v1206_v44 = vrot.slane %v1204_v32, 4 }
  0xf9   : > { %2902 = vrot.lane.b32.xlu0 %v9693_v52, %s9899_s25  ;;  %2433 = vst.msk [vmem:[#allocation3 + $0x8] sm:$0xff] %vm871_vm1, %v8841_v15  ;;  %v3256_v41 = vrot.slane %v3254_v21, 5  ;;  %v2027_v36 = vrot.slane %v2026_v3, 4  ;;  %v10745_v39 = vsel %vm10064_vm8, %v8868_v12, %v2624_v10  ;;  %v2626_v43 = vrot.slane %v2624_v10, 4  ;;  %v1943_v52 = vld [vmem:[#allocation2 + $0x24] sm:$0xf] }
  0xfa   : > { %v3247_v14 = vsel %vm10084_vm12, %v3242_v5, %v3246_v19  ;;  %v3251_v28 = vor.u32 %v3250_v47, %v3246_v19  ;;  %2753 = vst.msk [vmem:[#allocation3 + $0x8] sm:$0xff] %vm1419_vm15, %v10566_v55  ;;  %v1207_v48 = vshll.u32 %v921_v53, 16  ;;  %v1213_v42 = vshll.u32 %v922_v49, 16  ;;  %v1944_v8 = vld [vmem:[#allocation2 + $0x28] sm:$0xf]  ;;  %v9726_v47 = vld [vmem:[#allocation2 + $0x6c] sm:$0xff]  }
  0xfb   : > { %v1380_v60 = vpop.permute.xlu1 %1379  ;;  %2930 = vst.msk [vmem:[#allocation3 + $0x8] sm:$0xff] %vm1743_vm5, %v10515_v30  ;;  %v2032_v34 = vsel %vm10084_vm12, %v2027_v36, %v2031_v11  ;;  %v2628_v55 = vsel %vm10064_vm8, %v2626_v43, %v2627_v29  ;;  %v1217_v45 = vshrl.u32 %v922_v49, 16  ;;  %v1223_v50 = vshll.u32 %v923_v31, 16  ;;  %v1945_v56 = vld [vmem:[#allocation2 + $0x2c] sm:$0x1] }
  0xfc   : > { %1424 = vst.msk [vmem:[#allocation3 + $0x60] sm:$0xff] %vm1419_vm15, %v1380_v60  ;;  %v3252_v25 = vrot.slane %v3251_v28, 4  ;;  %v8842_v26 = vcombine.low %v2022_v22, %v2032_v34  ;;  %v8884_v2 = vcombine.low %v10745_v39, %v2628_v55  ;;  %v1209_v53 = vrot.slane %v1207_v48, 5  ;;  %v1469_v10 = vld [vmem:[#allocation2 + $0x84] sm:$0xe] }
  0xfd   : > { %3474 = vst.msk [vmem:[#allocation3 + $0x8] sm:$0xff] %vm1920_vm6, %v10651_v54  ;;  %v1215_v57 = vrot.slane %v1213_v42, 5  ;;  %v1219_v23 = vrot.slane %v1217_v45, 4  ;;  %v1225_v6 = vrot.slane %v1223_v50, 5  ;;  %v2034_v54 = vshrl.u32 %v1943_v52, 16 }
  0xfe   : > { %v3257_v30 = vsel %vm10084_vm12, %v3252_v25, %v3256_v41  ;;  %2434 = vst.msk [vmem:[#allocation3 + $0x20] sm:$0xff] %vm871_vm1, %v8842_v26  ;;  %v1210_v9 = vor.u32 %v1209_v53, %v1206_v44  ;;  %v2037_v11 = vshll.u32 %v1943_v52, 16  ;;  %v2043_v12 = vshll.u32 %v1944_v8, 16  ;;  %880 = vst.msk [vmem:[#allocation3 + $0xc0] sm:$0xff] %vm871_vm1, %v9725_v13  ;;  %v715_v31 = vld [vmem:[#allocation2 + $0x9c] sm:$0xf] }
  0xff   : > { %v1704_v63 = vpop.permute.xlu1 %1703  ;;  %v8915_v37 = vcombine.low %v3247_v14, %v3257_v30  ;;  %2754 = vst.msk [vmem:[#allocation3 + $0x20] sm:$0xff] %vm1419_vm15, %v10592_v40  ;;  %v1220_v15 = vor.u32 %v1219_v23, %v1215_v57  ;;  %v2047_v16 = vshrl.u32 %v1944_v8, 16  ;;  %v2053_v5 = vshll.u32 %v1945_v56, 16  ;;  %v1470_v32 = vld [vmem:[#allocation2 + $0x88] sm:$0xf]  ;;  %v3778_v25 = vld [vmem:[#allocation3] sm:$0xff] }
 0x100   : > { %1748 = vst.msk [vmem:[#allocation3 + $0x60] sm:$0xff] %vm1743_vm5, %v1704_v63  ;;  %v513_v19 = vshrl.u32 %v10655_v61, 16  ;;  %2931 = vst.msk [vmem:[#allocation3 + $0x20] sm:$0xff] %vm1743_vm5, %v10520_v7  ;;  %v1211_v21 = vrot.slane %v1210_v9, 4  ;;  %v2036_v22 = vrot.slane %v2034_v54, 4  ;;  %v2039_v3 = vrot.slane %v2037_v11, 5 }
 0x101   : > { %3446 = vrot.lane.b32.xlu0 %v8915_v37, %s9901_s27  ;;  %v2045_v24 = vrot.slane %v2043_v12, 5  ;;  %v1221_v14 = vrot.slane %v1220_v15, 4  ;;  %v2049_v28 = vrot.slane %v2047_v16, 4  ;;  %v2055_v40 = vrot.slane %v2053_v5, 5  ;;  %3475 = vst.msk [vmem:[#allocation3 + $0x20] sm:$0xff] %vm1920_vm6, %v10675_v38 }
 0x102   : > { %v515_v29 = vrot.slane %v513_v19, 7  ;;  %881 = vst.msk [vmem:[#allocation3 + $0xd8] sm:$0xff] %vm871_vm1, %v9726_v47  ;;  %v1216_v7 = vsel %vm10084_vm12, %v1211_v21, %v1215_v57  ;;  %v2040_v60 = vor.u32 %v2039_v3, %v2036_v22  ;;  %v516_v41 = vshll.u32 %v10655_v61, 16  ;;  %v1471_v39 = vld [vmem:[#allocation2 + $0x8c] sm:$0x1] }
 0x103   : > { %v10761_v62 = vpop.permute.xlu0 %3432  ;;  %v1881_v49 = vpop.permute.xlu1 %1880  ;;  %v521_v36 = vshrl.u32 %v10657_v33, 16  ;;  %v1226_v38 = vsel %vm10084_vm12, %v1221_v14, %v1225_v6  ;;  %v2050_v44 = vor.u32 %v2049_v28, %v2045_v24  ;;  %v524_v42 = vshll.u32 %v10657_v33, 16  ;;  %v924_v61 = vld [vmem:[#allocation2 + $0x90] sm:$0xf]  ;;  %v719_v53 = vld [vmem:[#allocation2 + $0xa4] sm:$0x1] }
 0x104   : > { %1925 = vst.msk [vmem:[#allocation3 + $0x60] sm:$0xff] %vm1920_vm6, %v1881_v49  ;;  %v3779_v43 = vld [vmem:[#allocation3 + $0x8] sm:$0xff]  ;;  %v519_v48 = vrot.slane %v515_v29, 4  ;;  %v8788_v34 = vcombine.low %v1216_v7, %v1226_v38  ;;  %v2041_v55 = vrot.slane %v2040_v60, 4  ;;  %v518_v45 = vor.u32 %v516_v41, %v515_v29  ;;  %v925_v57 = vld [vmem:[#allocation2 + $0x94] sm:$0xf] }
 0x105   : > { %2727 = vrot.lane.b32.xlu0 %v8884_v2, %s9900_s26  ;;  %4057 = vmatprep.mubr.bf16.mxu0 %v3779_v43  ;;  %v523_v50 = vrot.slane %v521_v36, 7  ;;  %v2051_v8 = vrot.slane %v2050_v44, 4  ;;  %v8804_v30 = vrot.slane %v1469_v10, 9  ;;  %v1614_v26 = vrot.slane %v1470_v32, 5  ;;  %v3490_v23 = vld [vmem:[#allocation2 + $0x18] sm:$0xe] }
 0x106   : > { %4058 = vmatmul.mubr.bf16.vlgmr.msra.gmra.mrb[0].mxu0 %v3778_v25  ;;  %v1617_v2 = vrot.slane %v1471_v39, 5  ;;  %1393 = vrot.lane.b32.xlu1 %v8788_v34, %s9900_s26  ;;  %v2046_v56 = vsel %vm10084_vm12, %v2041_v55, %v2045_v24  ;;  %v716_v37 = vsel %vm10091_vm13, %v518_v45, %v715_v31  ;;  %v926_v54 = vld [vmem:[#allocation2 + $0x98] sm:$0x1]  ;;  %v1228_v11 = vshrl.u32 %v924_v61, 16  ;;  %v3491_v19 = vld [vmem:[#allocation2 + $0x1c] sm:$0xf] }
 0x107   : > { %v10782_v52 = vpop.permute.xlu0 %2713  ;;  %v526_v33 = vor.u32 %v524_v42, %v523_v50  ;;  %v528_v63 = vrot.slane %v523_v50, 4  ;;  %v2056_v6 = vsel %vm10084_vm12, %v2051_v8, %v2055_v40  ;;  %717 = vst [vmem:[#allocation2 + $0x9c] sm:$0xf] %v716_v37  ;;  %v1615_v13 = vsel %vm10064_vm8, %v8804_v30, %v1614_v26  ;;  %v3492_v10 = vld [vmem:[#allocation2 + $0x20] sm:$0x1]  ;;  %v9727_v49 = vld [vmem:[#allocation2 + $0x78] sm:$0xff]  }
 0x108   : > { %v1616_v9 = vrot.slane %v1614_v26, 4  ;;  %v8843_v12 = vcombine.low %v2046_v56, %v2056_v6  ;;  %v1231_v5 = vshll.u32 %v924_v61, 16  ;;  %v3782_v47 = vld [vmem:[#allocation3 + $0x20] sm:$0xff]  ;;  %v1230_v22 = vrot.slane %v1228_v11, 4  ;;  %v3781_v41 = vld [vmem:[#allocation3 + $0x18] sm:$0xff]  ;;  %882 = vst.msk [vmem:[#allocation3 + $0xf0] sm:$0xff] %vm871_vm1, %v9727_v49 }
 0x109   : > { %v527_v15 = vsel %vm10102_vm14, %v519_v48, %v526_v33  ;;  %v720_v16 = vsel %vm9977_vm3, %v528_v63, %v719_v53  ;;  %v1237_v3 = vshll.u32 %v925_v57, 16  ;;  %v1241_v24 = vshrl.u32 %v925_v57, 16  ;;  %4065 = vmatprep.mubr.bf16.mxu0 %v3782_v47  ;;  %v9706_v36 = vld [vmem:[#allocation2 + $0x90] sm:$0xff]  }
 0x10a   : > { %718 = vst.msk [vmem:[#allocation2 + $0xa0] sm:$0xf] %vm48_vm0, %v527_v15  ;;  %v1618_v21 = vsel %vm10064_vm8, %v1616_v9, %v1617_v2  ;;  %721 = vst [vmem:[#allocation2 + $0xa4] sm:$0x1] %v720_v16  ;;  %v1233_v28 = vrot.slane %v1231_v5, 5  ;;  %v1247_v40 = vshll.u32 %v926_v54, 16 }
 0x10b   : > { %2435 = vst.msk [vmem:[#allocation3 + $0x38] sm:$0xff] %vm871_vm1, %v8843_v12  ;;  %v8820_v14 = vcombine.low %v1615_v13, %v1618_v21  ;;  %v8921_v29 = vrot.slane %v3490_v23, 9  ;;  %v10801_v31 = vpop.permute.xlu0 %2890  ;;  %v1239_v32 = vrot.slane %v1237_v3, 5  ;;  %v1243_v7 = vrot.slane %v1241_v24, 4  ;;  %v10827_v15 = vld [vmem:[#allocation2 + $0x24] sm:$0xe] }
 0x10c   : > { %2755 = vst.msk [vmem:[#allocation3 + $0x38] sm:$0xff] %vm1419_vm15, %v10618_v18  ;;  %v3588_v60 = vrot.slane %v3491_v19, 5  ;;  %v1234_v39 = vor.u32 %v1233_v28, %v1230_v22  ;;  %v1249_v43 = vrot.slane %v1247_v40, 5  ;;  %v3591_v25 = vrot.slane %v3492_v10, 5  ;;  %v722_v21 = vld [vmem:[#allocation2 + $0xa8] sm:$0xf] }
 0x10d   : > { %2932 = vst.msk [vmem:[#allocation3 + $0x38] sm:$0xff] %vm1743_vm5, %v10542_v27  ;;  %1717 = vrot.lane.b32.xlu1 %v8820_v14, %s9899_s25  ;;  %v530_v38 = vshrl.u32 %v10722_v20, 16  ;;  %v1244_v44 = vor.u32 %v1243_v7, %v1239_v32  ;;  %v533_v48 = vshll.u32 %v10722_v20, 16  ;;  %v538_v42 = vshrl.u32 %v10724_v59, 16  ;;  %v9728_v22 = vld [vmem:[#allocation2 + $0x84] sm:$0xff]  }
 0x10e   : > { %4066 = vmatmul.mubr.bf16.gmra.mrb[4].mxu0 %v3781_v41  ;;  %3476 = vst.msk [vmem:[#allocation3 + $0x38] sm:$0xff] %vm1920_vm6, %v10702_v4  ;;  %v3590_v18 = vrot.slane %v3588_v60, 4  ;;  %v2979_v27 = vld [vmem:[#allocation2 + $0x9c] sm:$0xf]  ;;  %v3589_v45 = vsel %vm10064_vm8, %v8921_v29, %v3588_v60  ;;  %v1235_v30 = vrot.slane %v1234_v39, 4  ;;  %v3784_v41 = vld [vmem:[#allocation3 + $0x30] sm:$0xff] }
 0x10f   : > { %v2485_v55 = vld [vmem:[#allocation2 + $0x9c] sm:$0xe]  ;;  %v3259_v50 = vshrl.u32 %v2979_v27, 16  ;;  %v3262_v61 = vshll.u32 %v2979_v27, 16  ;;  %v1245_v4 = vrot.slane %v1244_v44, 4  ;;  %v10820_v53 = vpop.permute.xlu0 %3434  ;;  %v532_v49 = vrot.slane %v530_v38, 7 }
 0x110   : > { %v1382_v34 = vpop.permute.xlu1 %1381  ;;  %v8869_v8 = vrot.slane %v2485_v55, 9  ;;  %v3592_v20 = vsel %vm10064_vm8, %v3590_v18, %v3591_v25  ;;  %v1240_v54 = vsel %vm10084_vm12, %v1235_v30, %v1239_v32  ;;  %v3494_v14 = vld [vmem:[#allocation2 + $0x28] sm:$0xf]  ;;  %v3495_v60 = vld [vmem:[#allocation2 + $0x2c] sm:$0x1]  ;;  %883 = vst.msk [vmem:[#allocation3 + $0x108] sm:$0xff] %vm871_vm1, %v9728_v22 }
 0x111   : > { %1425 = vst.msk [vmem:[#allocation3 + $0x78] sm:$0xff] %vm1419_vm15, %v1382_v34  ;;  %v9701_v26 = vld [vmem:[#allocation2 + $0x9c] sm:$0xff]   ;;  %1894 = vrot.lane.b32.xlu1 %v9706_v36, %s9901_s27  ;;  %v2981_v56 = vld [vmem:[#allocation2 + $0xa4] sm:$0x1]  ;;  %v3261_v33 = vrot.slane %v3259_v50, 4  ;;  %v3264_v63 = vrot.slane %v3262_v61, 5  ;;  %v1250_v11 = vsel %vm10084_vm12, %v1245_v4, %v1249_v43  ;;  %v8937_v12 = vcombine.low %v3589_v45, %v3592_v20 }
 0x112   : > { %v2980_v2 = vld [vmem:[#allocation2 + $0xa0] sm:$0xf]  ;;  %2904 = vrot.lane.b32.xlu0 %v9701_v26, %s9899_s25  ;;  %v3278_v6 = vshll.u32 %v2981_v56, 16  ;;  %v2487_v9 = vld [vmem:[#allocation2 + $0xa4] sm:$0x1]  ;;  %v8789_v10 = vcombine.low %v1240_v54, %v1250_v11  ;;  %v535_v39 = vor.u32 %v533_v48, %v532_v49  ;;  %v536_v43 = vrot.slane %v532_v49, 4 }
 0x113   : > { %v3268_v37 = vshll.u32 %v2980_v2, 16  ;;  %v3272_v57 = vshrl.u32 %v2980_v2, 16  ;;  %v2486_v13 = vld [vmem:[#allocation2 + $0xa0] sm:$0xf]  ;;  %v3265_v16 = vor.u32 %v3264_v63, %v3261_v33  ;;  %v2634_v24 = vrot.slane %v2487_v9, 5  ;;  %3762 = vst.msk [vmem:[#allocation3 + $0x10] sm:$0xff] %vm871_vm1, %v8937_v12  ;;  %v10838_v18 = vpop.permute.xlu0 %2715 }
 0x114   : > { %v1706_v23 = vpop.permute.xlu1 %1705  ;;  %v2631_v47 = vrot.slane %v2486_v13, 5  ;;  %v3280_v3 = vrot.slane %v3278_v6, 5  ;;  %v540_v25 = vrot.slane %v538_v42, 7  ;;  %v541_v38 = vshll.u32 %v10724_v59, 16  ;;  %v1472_v44 = vld [vmem:[#allocation2 + $0x90] sm:$0xe] }
 0x115   : > { %1749 = vst.msk [vmem:[#allocation3 + $0x78] sm:$0xff] %vm1743_vm5, %v1706_v23  ;;  %v3270_v5 = vrot.slane %v3268_v37, 5  ;;  %v3274_v19 = vrot.slane %v3272_v57, 4  ;;  %v3785_v28 = vld [vmem:[#allocation3 + $0x38] sm:$0xff]  ;;  %v3266_v40 = vrot.slane %v3265_v16, 4  ;;  %1395 = vrot.lane.b32.xlu1 %v8789_v10, %s9900_s26  ;;  %v8922_v45 = vrot.slane %v10827_v15, 9 }
 0x116   : > { %v10833_v32 = vsel %vm10064_vm8, %v8869_v8, %v2631_v47  ;;  %v2633_v7 = vrot.slane %v2631_v47, 4  ;;  %4073 = vmatprep.mubr.bf16.mxu0 %v3785_v28  ;;  %v1473_v48 = vld [vmem:[#allocation2 + $0x94] sm:$0xf]  ;;  %v1474_v50 = vld [vmem:[#allocation2 + $0x98] sm:$0x1]  ;;  %v543_v59 = vor.u32 %v541_v38, %v540_v25  ;;  %v545_v61 = vrot.slane %v540_v25, 4 }
 0x117   : > { %v3275_v29 = vor.u32 %v3274_v19, %v3270_v5  ;;  %4074 = vmatmul.mubr.bf16.gmra.mrb[8].mxu0 %v3784_v41  ;;  %v3271_v34 = vsel %vm10084_vm12, %v3266_v40, %v3270_v5  ;;  %v723_v8 = vsel %vm10091_vm13, %v535_v39, %v722_v21  ;;  %v1946_v30 = vld [vmem:[#allocation2 + $0x30] sm:$0xf]  ;;  %v1947_v26 = vld [vmem:[#allocation2 + $0x34] sm:$0xf]  ;;  %v3595_v20 = vrot.slane %v3494_v14, 5  ;;  %v10862_v22 = vpop.permute.xlu0 %2892  ;;  %v9714_v39 = vld [vmem:[#allocation2 + $0x9c] sm:$0xff]  }
 0x118   : > { %v1883_v36 = vpop.permute.xlu1 %1882  ;;  %v2635_v55 = vsel %vm10064_vm8, %v2633_v7, %v2634_v24  ;;  %v9729_v2 = vld [vmem:[#allocation2 + $0x90] sm:$0xff]   ;;  %724 = vst [vmem:[#allocation2 + $0xa8] sm:$0xf] %v723_v8  ;;  %v3598_v56 = vrot.slane %v3495_v60, 5  ;;  %v8805_v33 = vrot.slane %v1472_v44, 9  ;;  %v544_v23 = vsel %vm10102_vm14, %v536_v43, %v543_v59 }
 0x119   : > { %1926 = vst.msk [vmem:[#allocation3 + $0x78] sm:$0xff] %vm1920_vm6, %v1883_v36  ;;  %v3276_v27 = vrot.slane %v3275_v29, 4  ;;  %v8885_v42 = vcombine.low %v10833_v32, %v2635_v55  ;;  %v1948_v63 = vld [vmem:[#allocation2 + $0x38] sm:$0x1]  ;;  %v1621_v6 = vrot.slane %v1473_v48, 5  ;;  %v1624_v13 = vrot.slane %v1474_v50, 5 }
 0x11a   : > { %884 = vst.msk [vmem:[#allocation3 + $0x120] sm:$0xff] %vm871_vm1, %v9729_v2  ;;  %v3780_v9 = vld [vmem:[#allocation3 + $0x10] sm:$0xff]  ;;  %v3596_v54 = vsel %vm10064_vm8, %v8922_v45, %v3595_v20  ;;  %v3597_v11 = vrot.slane %v3595_v20, 4  ;;  %v2058_v12 = vshrl.u32 %v1946_v30, 16  ;;  %v2061_v15 = vshll.u32 %v1946_v30, 16  ;;  %v206_v20 = vld [vmem:[%s10075_s24 + $0xe0] sm:$0xff] }
 0x11b   : > { %v3281_v4 = vsel %vm10084_vm12, %v3276_v27, %v3280_v3  ;;  %725 = vst.msk [vmem:[#allocation2 + $0xac] sm:$0xf] %vm48_vm0, %v544_v23  ;;  %9576 = vmatprep.mubr.msk.bf16.mxu1 %vm871_vm1, %v3780_v9  ;;  %v1622_v16 = vsel %vm10064_vm8, %v8805_v33, %v1621_v6  ;;  %v1623_v5 = vrot.slane %v1621_v6, 4  ;;  %v2067_v19 = vshll.u32 %v1947_v26, 16  ;;  %v726_v21 = vld [vmem:[#allocation2 + $0xb0] sm:$0x1] }
 0x11c   : > { %v1384_v37 = vpop.permute.xlu1 %1383  ;;  %v8916_v57 = vcombine.low %v3271_v34, %v3281_v4  ;;  %v2071_v47 = vshrl.u32 %v1947_v26, 16  ;;  %v3599_v3 = vsel %vm10064_vm8, %v3597_v11, %v3598_v56  ;;  %v2060_v24 = vrot.slane %v2058_v12, 4  ;;  %v927_v43 = vld [vmem:[#allocation2 + $0x9c] sm:$0xf]  ;;  %v928_v9 = vld [vmem:[#allocation2 + $0xa0] sm:$0xf] }
 0x11d   : > { %1426 = vst.msk [vmem:[#allocation3 + $0x90] sm:$0xff] %vm1419_vm15, %v1384_v37  ;;  %v2063_v10 = vrot.slane %v2061_v15, 5  ;;  %v2077_v49 = vshll.u32 %v1948_v63, 16  ;;  %v8938_v14 = vcombine.low %v3596_v54, %v3599_v3  ;;  %v1625_v28 = vsel %vm10064_vm8, %v1623_v5, %v1624_v13  ;;  %v929_v15 = vld [vmem:[#allocation2 + $0xa4] sm:$0x1]  ;;  %v9730_v5 = vld [vmem:[#allocation2 + $0x9c] sm:$0xff]  }
 0x11e   : > { %3448 = vrot.lane.b32.xlu0 %v8916_v57, %s9901_s27  ;;  %v2069_v40 = vrot.slane %v2067_v19, 5  ;;  %v2073_v29 = vrot.slane %v2071_v47, 4  ;;  %v8821_v7 = vcombine.low %v1622_v16, %v1625_v28  ;;  %v727_v36 = vsel %vm9977_vm3, %v545_v61, %v726_v21  ;;  %v207_v57 = vld [vmem:[%s10075_s24 + $0xe8] sm:$0xff]  ;;  %885 = vst.msk [vmem:[#allocation3 + $0x138] sm:$0xff] %vm871_vm1, %v9730_v5 }
 0x11f   : > { %v2064_v60 = vor.u32 %v2063_v10, %v2060_v24  ;;  %v2079_v41 = vrot.slane %v2077_v49, 5  ;;  %3763 = vst.msk [vmem:[#allocation3 + $0x28] sm:$0xff] %vm871_vm1, %v8938_v14  ;;  %728 = vst [vmem:[#allocation2 + $0xb0] sm:$0x1] %v727_v36  ;;  %v2982_v38 = vld [vmem:[#allocation2 + $0xa8] sm:$0xf]  ;;  %v9276_v10 = vpack.c.bf16 %v206_v20, %v206_v20  ;;  %v10890_v49 = vpack.c.bf16 %v207_v57, %v207_v57 }
 0x120   : > { %v1708_v32 = vpop.permute.xlu1 %1707  ;;  %v2074_v25 = vor.u32 %v2073_v29, %v2069_v40  ;;  %v2488_v44 = vld [vmem:[#allocation2 + $0xa8] sm:$0xe]  ;;  %1719 = vrot.lane.b32.xlu1 %v8821_v7, %s9899_s25  ;;  %v3283_v27 = vshrl.u32 %v2982_v38, 16  ;;  %v3286_v55 = vshll.u32 %v2982_v38, 16  ;;  %v1252_v37 = vshrl.u32 %v927_v43, 16 }
 0x121   : > { %1750 = vst.msk [vmem:[#allocation3 + $0x90] sm:$0xff] %vm1743_vm5, %v1708_v32  ;;  %v2065_v34 = vrot.slane %v2064_v60, 4  ;;  %v8870_v45 = vrot.slane %v2488_v44, 9  ;;  %v1255_v54 = vshll.u32 %v927_v43, 16  ;;  %v1261_v60 = vshll.u32 %v928_v9, 16 }
 0x122   : > { %2729 = vrot.lane.b32.xlu0 %v8885_v42, %s9900_s26  ;;  %v9712_v48 = vld [vmem:[#allocation2 + $0xa8] sm:$0xff]   ;;  %v2075_v50 = vrot.slane %v2074_v25, 4  ;;  %v3285_v30 = vrot.slane %v3283_v27, 4  ;;  %v3288_v26 = vrot.slane %v3286_v55, 5  ;;  %v1254_v16 = vrot.slane %v1252_v37, 4 }
 0x123   : > { %v2983_v59 = vld [vmem:[#allocation2 + $0xac] sm:$0xf]  ;;  %v10874_v61 = vpop.permute.xlu0 %3436  ;;  %v2070_v8 = vsel %vm10084_vm12, %v2065_v34, %v2069_v40  ;;  %v1257_v29 = vrot.slane %v1255_v54, 5  ;;  %v1271_v36 = vshll.u32 %v929_v15, 16  ;;  %v1475_v38 = vld [vmem:[#allocation2 + $0x9c] sm:$0xe] }
 0x124   : > { %v1885_v42 = vpop.permute.xlu1 %1884  ;;  %v3292_v2 = vshll.u32 %v2983_v59, 16  ;;  %v2489_v4 = vld [vmem:[#allocation2 + $0xac] sm:$0xf]  ;;  %v2080_v56 = vsel %vm10084_vm12, %v2075_v50, %v2079_v41  ;;  %v3296_v33 = vshrl.u32 %v2983_v59, 16  ;;  %v3289_v6 = vor.u32 %v3288_v26, %v3285_v30  ;;  %1896 = vrot.lane.b32.xlu1 %v9714_v39, %s9901_s27  ;;  %v10906_v44 = vld [vmem:[#allocation2 + $0x3c] sm:$0xf] }
 0x125   : > { %1927 = vst.msk [vmem:[#allocation3 + $0x90] sm:$0xff] %vm1920_vm6, %v1885_v42  ;;  %v2638_v63 = vrot.slane %v2489_v4, 5  ;;  %v8844_v23 = vcombine.low %v2070_v8, %v2080_v56  ;;  %v1265_v41 = vshrl.u32 %v928_v9, 16  ;;  %v1258_v25 = vor.u32 %v1257_v29, %v1254_v16  ;;  %v1477_v30 = vld [vmem:[#allocation2 + $0xa4] sm:$0x1] }
 0x126   : > { %2906 = vrot.lane.b32.xlu0 %v9712_v48, %s9899_s25  ;;  %v3294_v13 = vrot.slane %v3292_v2, 5  ;;  %v3298_v11 = vrot.slane %v3296_v33, 4  ;;  %v3783_v19 = vld [vmem:[#allocation3 + $0x28] sm:$0xff]  ;;  %v2984_v47 = vld [vmem:[#allocation2 + $0xb0] sm:$0x1]  ;;  %v3290_v21 = vrot.slane %v3289_v6, 4 }
 0x127   : > { %v2640_v12 = vrot.slane %v2638_v63, 4  ;;  %2436 = vst.msk [vmem:[#allocation3 + $0x50] sm:$0xff] %vm871_vm1, %v8844_v23  ;;  %v2490_v3 = vld [vmem:[#allocation2 + $0xb0] sm:$0x1]  ;;  %v10888_v24 = vsel %vm10064_vm8, %v8870_v45, %v2638_v63  ;;  %9577 = vmatmul.mubr.msk.bf16.vlgmr.msra.gmra.mrb[0].mxu1 %vm871_vm1, %v3783_v19  ;;  %v3302_v28 = vshll.u32 %v2984_v47, 16  ;;  %v10895_v32 = vpop.permute.xlu0 %2717  ;;  %v1263_v55 = vrot.slane %v1261_v60, 5 }
 0x128   : > { %2756 = vst.msk [vmem:[#allocation3 + $0x50] sm:$0xff] %vm1419_vm15, %v10717_v51  ;;  %v3299_v14 = vor.u32 %v3298_v11, %v3294_v13  ;;  %v2641_v40 = vrot.slane %v2490_v3, 5  ;;  %v3295_v7 = vsel %vm10084_vm12, %v3290_v21, %v3294_v13  ;;  %v1273_v45 = vrot.slane %v1271_v36, 5  ;;  %v1476_v48 = vld [vmem:[#allocation2 + $0xa0] sm:$0xf] }
 0x129   : > { %2933 = vst.msk [vmem:[#allocation3 + $0x50] sm:$0xff] %vm1743_vm5, %v10739_v35  ;;  %v3304_v43 = vrot.slane %v3302_v28, 5  ;;  %v1267_v35 = vrot.slane %v1265_v41, 4  ;;  %v1259_v59 = vrot.slane %v1258_v25, 4  ;;  %v547_v42 = vshrl.u32 %v9276_v10, 16 }
 0x12a   : > { %v3300_v39 = vrot.slane %v3299_v14, 4  ;;  %v2642_v51 = vsel %vm10064_vm8, %v2640_v12, %v2641_v40  ;;  %3477 = vst.msk [vmem:[#allocation3 + $0x50] sm:$0xff] %vm1920_vm6, %v10761_v62  ;;  %v550_v8 = vshll.u32 %v9276_v10, 16  ;;  %v555_v2 = vshrl.u32 %v10890_v49, 16  ;;  %v729_v20 = vld [vmem:[#allocation2 + $0xb4] sm:$0xf] }
 0x12b   : > { %v8886_v27 = vcombine.low %v10888_v24, %v2642_v51  ;;  %v1268_v26 = vor.u32 %v1267_v35, %v1263_v55  ;;  %v558_v4 = vshll.u32 %v10890_v49, 16  ;;  %v1264_v56 = vsel %vm10084_vm12, %v1259_v59, %v1263_v55  ;;  %v1950_v57 = vld [vmem:[#allocation2 + $0x40] sm:$0xf]  ;;  %v10916_v23 = vpop.permute.xlu0 %2894  ;;  %v1951_v54 = vld [vmem:[#allocation2 + $0x44] sm:$0x1] }
 0x12c   : > { %v1386_v34 = vpop.permute.xlu1 %1385  ;;  %v3305_v50 = vsel %vm10084_vm12, %v3300_v39, %v3304_v43  ;;  %v549_v33 = vrot.slane %v547_v42, 7  ;;  %v8806_v63 = vrot.slane %v1475_v38, 9  ;;  %v1628_v37 = vrot.slane %v1476_v48, 5  ;;  %v733_v12 = vld [vmem:[#allocation2 + $0xbc] sm:$0x1]  ;;  %v3787_v10 = vld [vmem:[#allocation3 + $0x48] sm:$0xff] }
 0x12d   : > { %1427 = vst.msk [vmem:[#allocation3 + $0xa8] sm:$0xff] %vm1419_vm15, %v1386_v34  ;;  %v8917_v62 = vcombine.low %v3295_v7, %v3305_v50  ;;  %v1269_v6 = vrot.slane %v1268_v26, 4  ;;  %v557_v13 = vrot.slane %v555_v2, 7  ;;  %v1631_v9 = vrot.slane %v1477_v30, 5  ;;  %v3496_v15 = vld [vmem:[#allocation2 + $0x30] sm:$0xe] }
 0x12e   : > { %v2082_v11 = vshrl.u32 %v10906_v44, 16  ;;  %v552_v5 = vor.u32 %v550_v8, %v549_v33  ;;  %v553_v19 = vrot.slane %v549_v33, 4  ;;  %v1629_v47 = vsel %vm10064_vm8, %v8806_v63, %v1628_v37  ;;  %v3497_v3 = vld [vmem:[#allocation2 + $0x34] sm:$0xf]  ;;  %v3498_v24 = vld [vmem:[#allocation2 + $0x38] sm:$0x1] }
 0x12f   : > { %3450 = vrot.lane.b32.xlu0 %v8917_v62, %s9901_s27  ;;  %v1630_v21 = vrot.slane %v1628_v37, 4  ;;  %v1274_v49 = vsel %vm10084_vm12, %v1269_v6, %v1273_v45  ;;  %v560_v14 = vor.u32 %v558_v4, %v557_v13  ;;  %v562_v28 = vrot.slane %v557_v13, 4  ;;  %v3499_v39 = vld [vmem:[#allocation2 + $0x3c] sm:$0xe]  ;;  %v3500_v43 = vld [vmem:[#allocation2 + $0x40] sm:$0xf]  ;;  %v10937_v50 = vpop.permute.xlu0 %3438 }
 0x130   : > { %v2084_v40 = vrot.slane %v2082_v11, 4  ;;  %v8790_v7 = vcombine.low %v1264_v56, %v1274_v49  ;;  %v730_v60 = vsel %vm10091_vm13, %v552_v5, %v729_v20  ;;  %v2085_v36 = vshll.u32 %v10906_v44, 16  ;;  %v3501_v55 = vld [vmem:[#allocation2 + $0x44] sm:$0x1]  ;;  %v10940_v62 = vld [vmem:[#allocation2 + $0xa8] sm:$0xf] }
 0x131   : > { %v3788_v29 = vld [vmem:[#allocation3 + $0x50] sm:$0xff]  ;;  %v1632_v41 = vsel %vm10064_vm8, %v1630_v21, %v1631_v9  ;;  %v561_v51 = vsel %vm10102_vm14, %v553_v19, %v560_v14  ;;  %731 = vst [vmem:[#allocation2 + $0xb4] sm:$0xf] %v730_v60  ;;  %v2091_v38 = vshll.u32 %v1950_v57, 16  ;;  %v2095_v34 = vshrl.u32 %v1950_v57, 16  ;;  %v209_v21 = vld [vmem:[%s10075_s24 + $0xf8] sm:$0xff] }
 0x132   : > { %v1710_v16 = vpop.permute.xlu1 %1709  ;;  %4081 = vmatprep.mubr.bf16.mxu0 %v3788_v29  ;;  %v8822_v25 = vcombine.low %v1629_v47, %v1632_v41  ;;  %1397 = vrot.lane.b32.xlu1 %v8790_v7, %s9900_s26  ;;  %732 = vst.msk [vmem:[#allocation2 + $0xb8] sm:$0xf] %vm48_vm0, %v561_v51  ;;  %v2087_v44 = vrot.slane %v2085_v36, 5  ;;  %v2101_v45 = vshll.u32 %v1951_v54, 16  ;;  %v734_v48 = vsel %vm9977_vm3, %v562_v28, %v733_v12  ;;  %v10942_v56 = vld [vmem:[#allocation2 + $0xac] sm:$0xf] }
 0x133   : > { %1751 = vst.msk [vmem:[#allocation3 + $0xa8] sm:$0xff] %vm1743_vm5, %v1710_v16  ;;  %2731 = vrot.lane.b32.xlu0 %v8886_v27, %s9900_s26  ;;  %4082 = vmatmul.mubr.bf16.gmra.mrb[12].mxu0 %v3787_v10  ;;  %v8923_v27 = vrot.slane %v3496_v15, 9  ;;  %v2093_v59 = vrot.slane %v2091_v38, 5  ;;  %v2097_v42 = vrot.slane %v2095_v34, 4  ;;  %735 = vst [vmem:[#allocation2 + $0xbc] sm:$0x1] %v734_v48  ;;  %v10961_v28 = vpop.permute.xlu0 %2719  ;;  %v10971_v48 = vpack.c.bf16 %v209_v21, %v209_v21 }
 0x134   : > { %v3602_v8 = vrot.slane %v3497_v3, 5  ;;  %v3605_v30 = vrot.slane %v3498_v24, 5  ;;  %v2088_v26 = vor.u32 %v2087_v44, %v2084_v40  ;;  %v2103_v2 = vrot.slane %v2101_v45, 5  ;;  %v9717_v9 = vld [vmem:[#allocation2 + $0xa8] sm:$0xff]   ;;  %v208_v47 = vld [vmem:[%s10075_s24 + $0xf0] sm:$0xff] }
 0x135   : > { %v8924_v4 = vrot.slane %v3499_v39, 9  ;;  %v3609_v20 = vrot.slane %v3500_v43, 5  ;;  %v2098_v33 = vor.u32 %v2097_v42, %v2093_v59  ;;  %v3612_v57 = vrot.slane %v3501_v55, 5  ;;  %v932_v38 = vld [vmem:[#allocation2 + $0xb0] sm:$0x1] }
 0x136   : > { %v1887_v35 = vpop.permute.xlu1 %1886  ;;  %v3603_v63 = vsel %vm10064_vm8, %v8923_v27, %v3602_v8  ;;  %v3604_v37 = vrot.slane %v3602_v8, 4  ;;  %1721 = vrot.lane.b32.xlu1 %v8822_v25, %s9899_s25  ;;  %v2089_v13 = vrot.slane %v2088_v26, 4  ;;  %v1276_v12 = vshrl.u32 %v10940_v62, 16 }
 0x137   : > { %1928 = vst.msk [vmem:[#allocation3 + $0xa8] sm:$0xff] %vm1920_vm6, %v1887_v35  ;;  %v3610_v54 = vsel %vm10064_vm8, %v8924_v4, %v3609_v20  ;;  %v3611_v11 = vrot.slane %v3609_v20, 4  ;;  %v2099_v15 = vrot.slane %v2098_v33, 4  ;;  %v1279_v5 = vshll.u32 %v10940_v62, 16 }
 0x138   : > { %v3606_v16 = vsel %vm10064_vm8, %v3604_v37, %v3605_v30  ;;  %v1285_v19 = vshll.u32 %v10942_v56, 16  ;;  %v2094_v3 = vsel %vm10084_vm12, %v2089_v13, %v2093_v59  ;;  %v2985_v24 = vld [vmem:[#allocation2 + $0xb4] sm:$0xf]  ;;  %v10969_v45 = vpack.c.bf16 %v208_v47, %v208_v47 }
 0x139   : > { %v8939_v10 = vcombine.low %v3603_v63, %v3606_v16  ;;  %v3613_v49 = vsel %vm10064_vm8, %v3611_v11, %v3612_v57  ;;  %v2491_v14 = vld [vmem:[#allocation2 + $0xb4] sm:$0xe]  ;;  %v2104_v29 = vsel %vm10084_vm12, %v2099_v15, %v2103_v2  ;;  %v2986_v7 = vld [vmem:[#allocation2 + $0xb8] sm:$0xf]  ;;  %v3307_v60 = vshrl.u32 %v2985_v24, 16  ;;  %v10980_v57 = vpop.permute.xlu0 %2896  ;;  %v9731_v16 = vld [vmem:[#allocation2 + $0xa8] sm:$0xff]  }
 0x13a   : > { %v1388_v6 = vpop.permute.xlu1 %1387  ;;  %v9715_v40 = vld [vmem:[#allocation2 + $0xb4] sm:$0xff]   ;;  %v8940_v41 = vcombine.low %v3610_v54, %v3613_v49  ;;  %v8845_v36 = vcombine.low %v2094_v3, %v2104_v29  ;;  %v2987_v39 = vld [vmem:[#allocation2 + $0xbc] sm:$0x1]  ;;  %v3310_v43 = vshll.u32 %v2985_v24, 16  ;;  %v3316_v51 = vshll.u32 %v2986_v7, 16  ;;  %1898 = vrot.lane.b32.xlu1 %v9717_v9, %s9901_s27  ;;  %886 = vst.msk [vmem:[#allocation3 + $0x150] sm:$0xff] %vm871_vm1, %v9731_v16 }
 0x13b   : > { %1428 = vst.msk [vmem:[#allocation3 + $0xc0] sm:$0xff] %vm1419_vm15, %v1388_v6  ;;  %v3320_v25 = vshrl.u32 %v2986_v7, 16  ;;  %2908 = vrot.lane.b32.xlu0 %v9715_v40, %s9899_s25  ;;  %v3309_v34 = vrot.slane %v3307_v60, 4  ;;  %v3326_v55 = vshll.u32 %v2987_v39, 16  ;;  %v2492_v35 = vld [vmem:[#allocation2 + $0xb8] sm:$0xf] }
 0x13c   : > { %3764 = vst.msk [vmem:[#allocation3 + $0x40] sm:$0xff] %vm871_vm1, %v8939_v10  ;;  %3765 = vst.msk [vmem:[#allocation3 + $0x58] sm:$0xff] %vm871_vm1, %v8940_v41  ;;  %v2493_v44 = vld [vmem:[#allocation2 + $0xbc] sm:$0x1]  ;;  %v3312_v27 = vrot.slane %v3310_v43, 5  ;;  %v3318_v59 = vrot.slane %v3316_v51, 5 }
 0x13d   : > { %2437 = vst.msk [vmem:[#allocation3 + $0x68] sm:$0xff] %vm871_vm1, %v8845_v36  ;;  %v3322_v42 = vrot.slane %v3320_v25, 4  ;;  %v8871_v8 = vrot.slane %v2491_v14, 9  ;;  %v3328_v30 = vrot.slane %v3326_v55, 5  ;;  %v2645_v62 = vrot.slane %v2492_v35, 5 }
 0x13e   : > { %2757 = vst.msk [vmem:[#allocation3 + $0x68] sm:$0xff] %vm1419_vm15, %v10782_v52  ;;  %v2648_v26 = vrot.slane %v2493_v44, 5  ;;  %v1278_v2 = vrot.slane %v1276_v12, 4  ;;  %v3313_v20 = vor.u32 %v3312_v27, %v3309_v34  ;;  %v1281_v63 = vrot.slane %v1279_v5, 5  ;;  %v1478_v15 = vld [vmem:[#allocation2 + $0xa8] sm:$0xe] }
 0x13f   : > { %v3323_v33 = vor.u32 %v3322_v42, %v3318_v59  ;;  %2934 = vst.msk [vmem:[#allocation3 + $0x68] sm:$0xff] %vm1743_vm5, %v10801_v31  ;;  %v10978_v37 = vrot.slane %v1285_v19, 5  ;;  %v10985_v52 = vsel %vm10064_vm8, %v8871_v8, %v2645_v62  ;;  %v2647_v6 = vrot.slane %v2645_v62, 4  ;;  %v736_v29 = vld [vmem:[#allocation2 + $0xc0] sm:$0xf]  ;;  %v3790_v8 = vld [vmem:[#allocation3 + $0x60] sm:$0xff] }
 0x140   : > { %v1712_v4 = vpop.permute.xlu1 %1711  ;;  %v1289_v13 = vshrl.u32 %v10942_v56, 16  ;;  %v1295_v9 = vshll.u32 %v932_v38, 16  ;;  %3478 = vst.msk [vmem:[#allocation3 + $0x68] sm:$0xff] %vm1920_vm6, %v10820_v53  ;;  %v3314_v54 = vrot.slane %v3313_v20, 4  ;;  %v1282_v11 = vor.u32 %v1281_v63, %v1278_v2  ;;  %v1479_v56 = vld [vmem:[#allocation2 + $0xac] sm:$0xf] }
 0x141   : > { %1752 = vst.msk [vmem:[#allocation3 + $0xc0] sm:$0xff] %vm1743_vm5, %v1712_v4  ;;  %v3324_v31 = vrot.slane %v3323_v33, 4  ;;  %v564_v12 = vshrl.u32 %v10969_v45, 16  ;;  %v2649_v19 = vsel %vm10064_vm8, %v2647_v6, %v2648_v26  ;;  %v567_v3 = vshll.u32 %v10969_v45, 16  ;;  %v1480_v39 = vld [vmem:[#allocation2 + $0xb0] sm:$0x1] }
 0x142   : > { %v1291_v47 = vrot.slane %v1289_v13, 4  ;;  %v1297_v21 = vrot.slane %v1295_v9, 5  ;;  %v3319_v53 = vsel %vm10084_vm12, %v3314_v54, %v3318_v59  ;;  %v8887_v14 = vcombine.low %v10985_v52, %v2649_v19  ;;  %v1952_v43 = vld [vmem:[#allocation2 + $0x48] sm:$0xf]  ;;  %v1953_v55 = vld [vmem:[#allocation2 + $0x4c] sm:$0xf] }
 0x143   : > { %v3786_v5 = vld [vmem:[#allocation3 + $0x40] sm:$0xff]  ;;  %v3329_v10 = vsel %vm10084_vm12, %v3324_v31, %v3328_v30  ;;  %v3789_v49 = vld [vmem:[#allocation3 + $0x58] sm:$0xff]  ;;  %v1283_v40 = vrot.slane %v1282_v11, 4  ;;  %v566_v41 = vrot.slane %v564_v12, 7  ;;  %v572_v36 = vshrl.u32 %v10971_v48, 16  ;;  %v11009_v35 = vpop.permute.xlu0 %3440 }
 0x144   : > { %v1889_v24 = vpop.permute.xlu1 %1888  ;;  %9580 = vmatprep.mubr.msk.bf16.mxu1 %vm871_vm1, %v3786_v5  ;;  %v8918_v7 = vcombine.low %v3319_v53, %v3329_v10  ;;  %v1292_v60 = vor.u32 %v1291_v47, %v10978_v37  ;;  %v575_v25 = vshll.u32 %v10971_v48, 16  ;;  %v8807_v38 = vrot.slane %v1478_v15, 9  ;;  %v1954_v42 = vld [vmem:[#allocation2 + $0x50] sm:$0x1]  ;;  %v740_v48 = vld [vmem:[#allocation2 + $0xc8] sm:$0x1] }
 0x145   : > { %1929 = vst.msk [vmem:[#allocation3 + $0xc0] sm:$0xff] %vm1920_vm6, %v1889_v24  ;;  %9581 = vmatmul.mubr.msk.bf16.gmra.mrb[4].mxu1 %vm871_vm1, %v3789_v49  ;;  %v1288_v51 = vsel %vm10084_vm12, %v1283_v40, %v10978_v37  ;;  %v1635_v34 = vrot.slane %v1479_v56, 5  ;;  %v569_v45 = vor.u32 %v567_v3, %v566_v41  ;;  %v570_v27 = vrot.slane %v566_v41, 4  ;;  %v933_v52 = vld [vmem:[#allocation2 + $0xb4] sm:$0xf] }
 0x146   : > { %3452 = vrot.lane.b32.xlu0 %v8918_v7, %s9901_s27  ;;  %v1293_v44 = vrot.slane %v1292_v60, 4  ;;  %v574_v59 = vrot.slane %v572_v36, 7  ;;  %v1638_v26 = vrot.slane %v1480_v39, 5  ;;  %v2106_v2 = vshrl.u32 %v1952_v43, 16  ;;  %v934_v6 = vld [vmem:[#allocation2 + $0xb8] sm:$0xf] }
 0x147   : > { %v1636_v30 = vsel %vm10064_vm8, %v8807_v38, %v1635_v34  ;;  %v1637_v62 = vrot.slane %v1635_v34, 4  ;;  %v3791_v4 = vld [vmem:[#allocation3 + $0x68] sm:$0xff]  ;;  %v737_v37 = vsel %vm10091_vm13, %v569_v45, %v736_v29  ;;  %v2109_v31 = vshll.u32 %v1952_v43, 16  ;;  %v3502_v5 = vld [vmem:[#allocation2 + $0x48] sm:$0xe]  ;;  %v11027_v24 = vpop.permute.xlu0 %2721  ;;  %v9720_v34 = vld [vmem:[#allocation2 + $0xb4] sm:$0xff]  }
 0x148   : > { %v1298_v20 = vsel %vm10084_vm12, %v1293_v44, %v1297_v21  ;;  %v577_v33 = vor.u32 %v575_v25, %v574_v59  ;;  %v579_v63 = vrot.slane %v574_v59, 4  ;;  %4089 = vmatprep.mubr.bf16.mxu0 %v3791_v4  ;;  %738 = vst [vmem:[#allocation2 + $0xc0] sm:$0xf] %v737_v37  ;;  %v2108_v54 = vrot.slane %v2106_v2, 4  ;;  %v935_v3 = vld [vmem:[#allocation2 + $0xbc] sm:$0x1] }
 0x149   : > { %v8791_v13 = vcombine.low %v1288_v51, %v1298_v20  ;;  %v1639_v9 = vsel %vm10064_vm8, %v1637_v62, %v1638_v26  ;;  %4090 = vmatmul.mubr.bf16.gmra.mrb[16].mxu0 %v3790_v8  ;;  %v2115_v15 = vshll.u32 %v1953_v55, 16  ;;  %v2119_v16 = vshrl.u32 %v1953_v55, 16  ;;  %v11029_v40 = vld [vmem:[#allocation2 + $0x4c] sm:$0xf] }
 0x14a   : > { %2733 = vrot.lane.b32.xlu0 %v8887_v14, %s9900_s26  ;;  %v578_v11 = vsel %vm10102_vm14, %v570_v27, %v577_v33  ;;  %v8823_v12 = vcombine.low %v1636_v30, %v1639_v9  ;;  %v2111_v19 = vrot.slane %v2109_v31, 5  ;;  %v2125_v47 = vshll.u32 %v1954_v42, 16 }
 0x14b   : > { %1399 = vrot.lane.b32.xlu1 %v8791_v13, %s9900_s26  ;;  %739 = vst.msk [vmem:[#allocation2 + $0xc4] sm:$0xf] %vm48_vm0, %v578_v11  ;;  %v741_v21 = vsel %vm9977_vm3, %v579_v63, %v740_v48  ;;  %v1300_v56 = vshrl.u32 %v933_v52, 16  ;;  %v2117_v53 = vrot.slane %v2115_v15, 5  ;;  %v2121_v10 = vrot.slane %v2119_v16, 4  ;;  %v11038_v48 = vpop.permute.xlu0 %2898 }
 0x14c   : > { %742 = vst [vmem:[#allocation2 + $0xc8] sm:$0x1] %v741_v21  ;;  %v1303_v49 = vshll.u32 %v933_v52, 16  ;;  %v1309_v14 = vshll.u32 %v934_v6, 16  ;;  %v2112_v7 = vor.u32 %v2111_v19, %v2108_v54  ;;  %v2127_v60 = vrot.slane %v2125_v47, 5 }
 0x14d   : > { %v1302_v41 = vrot.slane %v1300_v56, 4  ;;  %v1313_v36 = vshrl.u32 %v934_v6, 16  ;;  %v2122_v39 = vor.u32 %v2121_v10, %v2117_v53  ;;  %v1319_v25 = vshll.u32 %v935_v3, 16  ;;  %v3504_v11 = vld [vmem:[#allocation2 + $0x50] sm:$0x1] }
 0x14e   : > { %v1390_v29 = vpop.permute.xlu1 %1389  ;;  %v1305_v43 = vrot.slane %v1303_v49, 5  ;;  %v11032_v51 = vrot.slane %v1309_v14, 5  ;;  %v2113_v38 = vrot.slane %v2112_v7, 4  ;;  %v8925_v44 = vrot.slane %v3502_v5, 9  ;;  %v3505_v47 = vld [vmem:[#allocation2 + $0x54] sm:$0xe] }
 0x14f   : > { %1429 = vst.msk [vmem:[#allocation3 + $0xd8] sm:$0xff] %vm1419_vm15, %v1390_v29  ;;  %1723 = vrot.lane.b32.xlu1 %v8823_v12, %s9899_s25  ;;  %v1315_v55 = vrot.slane %v1313_v36, 4  ;;  %v3616_v45 = vrot.slane %v11029_v40, 5  ;;  %v2123_v27 = vrot.slane %v2122_v39, 4  ;;  %v2988_v59 = vld [vmem:[#allocation2 + $0xc0] sm:$0xf] }
 0x150   : > { %v1321_v42 = vrot.slane %v1319_v25, 5  ;;  %v2118_v30 = vsel %vm10084_vm12, %v2113_v38, %v2117_v53  ;;  %v3331_v62 = vshrl.u32 %v2988_v59, 16  ;;  %v3334_v26 = vshll.u32 %v2988_v59, 16  ;;  %v2494_v2 = vld [vmem:[#allocation2 + $0xc0] sm:$0xe]  ;;  %v11058_v38 = vpop.permute.xlu0 %3442 }
 0x151   : > { %v2128_v20 = vsel %vm10084_vm12, %v2123_v27, %v2127_v60  ;;  %v8872_v63 = vrot.slane %v2494_v2, 9  ;;  %v1306_v37 = vor.u32 %v1305_v43, %v1302_v41  ;;  %v1316_v52 = vor.u32 %v1315_v55, %v11032_v51  ;;  %v3506_v49 = vld [vmem:[#allocation2 + $0x58] sm:$0xf]  ;;  %v3507_v60 = vld [vmem:[#allocation2 + $0x5c] sm:$0x1] }
 0x152   : > { %v1714_v8 = vpop.permute.xlu1 %1713  ;;  %v9718_v4 = vld [vmem:[#allocation2 + $0xc0] sm:$0xff]   ;;  %v8846_v6 = vcombine.low %v2118_v30, %v2128_v20  ;;  %v3333_v9 = vrot.slane %v3331_v62, 4  ;;  %v3336_v54 = vrot.slane %v3334_v26, 5  ;;  %v3617_v19 = vsel %vm10064_vm8, %v8925_v44, %v3616_v45  ;;  %v1481_v25 = vld [vmem:[#allocation2 + $0xb4] sm:$0xe] }
 0x153   : > { %1753 = vst.msk [vmem:[#allocation3 + $0xd8] sm:$0xff] %vm1743_vm5, %v1714_v8  ;;  %v2989_v33 = vld [vmem:[#allocation2 + $0xc4] sm:$0xf]  ;;  %v2990_v13 = vld [vmem:[#allocation2 + $0xc8] sm:$0x1]  ;;  %1900 = vrot.lane.b32.xlu1 %v9720_v34, %s9901_s27  ;;  %2910 = vrot.lane.b32.xlu0 %v9718_v4, %s9899_s25  ;;  %v1307_v29 = vrot.slane %v1306_v37, 4 }
 0x154   : > { %v3340_v31 = vshll.u32 %v2989_v33, 16  ;;  %v3344_v12 = vshrl.u32 %v2989_v33, 16  ;;  %v3350_v15 = vshll.u32 %v2990_v13, 16  ;;  %v2495_v16 = vld [vmem:[#allocation2 + $0xc4] sm:$0xf]  ;;  %2438 = vst.msk [vmem:[#allocation3 + $0x80] sm:$0xff] %vm871_vm1, %v8846_v6  ;;  %v3337_v3 = vor.u32 %v3336_v54, %v3333_v9 }
 0x155   : > { %v2496_v5 = vld [vmem:[#allocation2 + $0xc8] sm:$0x1]  ;;  %v2652_v53 = vrot.slane %v2495_v16, 5  ;;  %2758 = vst.msk [vmem:[#allocation3 + $0x80] sm:$0xff] %vm1419_vm15, %v10838_v18  ;;  %v1317_v7 = vrot.slane %v1316_v52, 4  ;;  %v3618_v43 = vrot.slane %v3616_v45, 4  ;;  %v1312_v55 = vsel %vm10084_vm12, %v1307_v29, %v11032_v51 }
 0x156   : > { %v1891_v21 = vpop.permute.xlu1 %1890  ;;  %v3342_v56 = vrot.slane %v3340_v31, 5  ;;  %v2655_v10 = vrot.slane %v2496_v5, 5  ;;  %v3346_v14 = vrot.slane %v3344_v12, 4  ;;  %v3352_v40 = vrot.slane %v3350_v15, 5  ;;  %2935 = vst.msk [vmem:[#allocation3 + $0x80] sm:$0xff] %vm1743_vm5, %v10862_v22  ;;  %v9732_v34 = vld [vmem:[#allocation2 + $0xb4] sm:$0xff]  }
 0x157   : > { %1930 = vst.msk [vmem:[#allocation3 + $0xd8] sm:$0xff] %vm1920_vm6, %v1891_v21  ;;  %v3338_v41 = vrot.slane %v3337_v3, 4  ;;  %v11056_v36 = vsel %vm10064_vm8, %v8872_v63, %v2652_v53  ;;  %v2654_v39 = vrot.slane %v2652_v53, 4  ;;  %v1322_v44 = vsel %vm10084_vm12, %v1317_v7, %v1321_v42  ;;  %3479 = vst.msk [vmem:[#allocation3 + $0x80] sm:$0xff] %vm1920_vm6, %v10874_v61  ;;  %v1482_v27 = vld [vmem:[#allocation2 + $0xb8] sm:$0xf] }
 0x158   : > { %v3347_v18 = vor.u32 %v3346_v14, %v3342_v56  ;;  %v3619_v22 = vrot.slane %v3504_v11, 5  ;;  %v8792_v8 = vcombine.low %v1312_v55, %v1322_v44  ;;  %v8926_v30 = vrot.slane %v3505_v47, 9  ;;  %v1483_v62 = vld [vmem:[#allocation2 + $0xbc] sm:$0x1]  ;;  %887 = vst.msk [vmem:[#allocation3 + $0x168] sm:$0xff] %vm871_vm1, %v9732_v34 }
 0x159   : > { %v3343_v45 = vsel %vm10084_vm12, %v3338_v41, %v3342_v56  ;;  %v11071_v59 = vsel %vm10064_vm8, %v2654_v39, %v2655_v10  ;;  %v3623_v26 = vrot.slane %v3506_v49, 5  ;;  %v1955_v2 = vld [vmem:[#allocation2 + $0x54] sm:$0xf]  ;;  %v1956_v4 = vld [vmem:[#allocation2 + $0x58] sm:$0xf]  ;;  %v3626_v63 = vrot.slane %v3507_v60, 5 }
 0x15a   : > { %v3348_v51 = vrot.slane %v3347_v18, 4  ;;  %v8888_v42 = vcombine.low %v11056_v36, %v11071_v59  ;;  %v3620_v61 = vsel %vm10064_vm8, %v3618_v43, %v3619_v22  ;;  %v1392_v20 = vpop.permute.xlu1 %1391  ;;  %1401 = vrot.lane.b32.xlu1 %v8792_v8, %s9900_s26  ;;  %v8808_v37 = vrot.slane %v1481_v25, 9  ;;  %v1957_v31 = vld [vmem:[#allocation2 + $0x5c] sm:$0x1]  ;;  %v2991_v5 = vld [vmem:[#allocation2 + $0xcc] sm:$0xf] }
 0x15b   : > { %v8941_v33 = vcombine.low %v3617_v19, %v3620_v61  ;;  %v1642_v52 = vrot.slane %v1482_v27, 5  ;;  %1430 = vst.msk [vmem:[#allocation3 + $0xf0] sm:$0xff] %vm1419_vm15, %v1392_v20  ;;  %v3624_v13 = vsel %vm10064_vm8, %v8926_v30, %v3623_v26  ;;  %v3625_v9 = vrot.slane %v3623_v26, 4  ;;  %v11087_v19 = vpop.permute.xlu0 %2723  ;;  %v2992_v53 = vld [vmem:[#allocation2 + $0xd0] sm:$0xf] }
 0x15c   : > { %v3353_v6 = vsel %vm10084_vm12, %v3348_v51, %v3352_v40  ;;  %v1645_v54 = vrot.slane %v1483_v62, 5  ;;  %v2130_v16 = vshrl.u32 %v1955_v2, 16  ;;  %v2133_v21 = vshll.u32 %v1955_v2, 16  ;;  %v3793_v10 = vld [vmem:[#allocation3 + $0x78] sm:$0xff]  ;;  %v1958_v34 = vld [vmem:[#allocation2 + $0x60] sm:$0xf] }
 0x15d   : > { %v8919_v11 = vcombine.low %v3343_v45, %v3353_v6  ;;  %3766 = vst.msk [vmem:[#allocation3 + $0x70] sm:$0xff] %vm871_vm1, %v8941_v33  ;;  %v1643_v12 = vsel %vm10064_vm8, %v8808_v37, %v1642_v52  ;;  %v1644_v15 = vrot.slane %v1642_v52, 4  ;;  %v3627_v47 = vsel %vm10064_vm8, %v3625_v9, %v3626_v63  ;;  %v2993_v7 = vld [vmem:[#allocation2 + $0xd4] sm:$0x1]  ;;  %v9721_v27 = vld [vmem:[#allocation2 + $0xcc] sm:$0xff]   ;;  %v9723_v62 = vld [vmem:[#allocation2 + $0xc0] sm:$0xff]  }
 0x15e   : > { %v2139_v3 = vshll.u32 %v1956_v4, 16  ;;  %v2143_v56 = vshrl.u32 %v1956_v4, 16  ;;  %v8942_v49 = vcombine.low %v3624_v13, %v3627_v47  ;;  %v2132_v40 = vrot.slane %v2130_v16, 4  ;;  %v3794_v60 = vld [vmem:[#allocation3 + $0x80] sm:$0xff]  ;;  %v1959_v51 = vld [vmem:[#allocation2 + $0x64] sm:$0xf] }
 0x15f   : > { %3454 = vrot.lane.b32.xlu0 %v8919_v11, %s9901_s27  ;;  %v1646_v14 = vsel %vm10064_vm8, %v1644_v15, %v1645_v54  ;;  %v2149_v29 = vshll.u32 %v1957_v31, 16  ;;  %v2135_v39 = vrot.slane %v2133_v21, 5  ;;  %4097 = vmatprep.mubr.bf16.mxu0 %v3794_v60  ;;  %v3355_v55 = vshrl.u32 %v2991_v5, 16  ;;  %v1960_v4 = vld [vmem:[#allocation2 + $0x68] sm:$0x1]  ;;  %v11098_v63 = vpop.permute.xlu0 %2900 }
 0x160   : > { %v1716_v41 = vpop.permute.xlu1 %1715  ;;  %v8824_v36 = vcombine.low %v1643_v12, %v1646_v14  ;;  %v2141_v43 = vrot.slane %v2139_v3, 5  ;;  %v2145_v25 = vrot.slane %v2143_v56, 4  ;;  %3767 = vst.msk [vmem:[#allocation3 + $0x88] sm:$0xff] %vm871_vm1, %v8942_v49  ;;  %v3358_v44 = vshll.u32 %v2991_v5, 16  ;;  %4098 = vmatmul.mubr.bf16.gmra.mrb[20].mxu0 %v3793_v10  ;;  %v3508_v33 = vld [vmem:[#allocation2 + $0x60] sm:$0xe] }
 0x161   : > { %1754 = vst.msk [vmem:[#allocation3 + $0xf0] sm:$0xff] %vm1743_vm5, %v1716_v41  ;;  %v2151_v18 = vrot.slane %v2149_v29, 5  ;;  %v3364_v22 = vshll.u32 %v2992_v53, 16  ;;  %v2136_v45 = vor.u32 %v2135_v39, %v2132_v40  ;;  %v3368_v8 = vshrl.u32 %v2992_v53, 16  ;;  %v3509_v31 = vld [vmem:[#allocation2 + $0x64] sm:$0xf] }
 0x162   : > { %1725 = vrot.lane.b32.xlu1 %v8824_v36, %s9899_s25  ;;  %v2146_v59 = vor.u32 %v2145_v25, %v2141_v43  ;;  %v3374_v30 = vshll.u32 %v2993_v7, 16  ;;  %v3357_v61 = vrot.slane %v3355_v55, 4  ;;  %v3360_v26 = vrot.slane %v3358_v44, 5  ;;  %v3510_v11 = vld [vmem:[#allocation2 + $0x68] sm:$0x1] }
 0x163   : > { %2735 = vrot.lane.b32.xlu0 %v8888_v42, %s9900_s26  ;;  %v3366_v2 = vrot.slane %v3364_v22, 5  ;;  %v2154_v20 = vshrl.u32 %v1958_v34, 16  ;;  %v2137_v6 = vrot.slane %v2136_v45, 4  ;;  %v3370_v9 = vrot.slane %v3368_v8, 4  ;;  %v3511_v5 = vld [vmem:[#allocation2 + $0x6c] sm:$0xe]  ;;  %v11112_v22 = vpop.permute.xlu0 %3444 }
 0x164   : > { %v1893_v37 = vpop.permute.xlu1 %1892  ;;  %v3792_v52 = vld [vmem:[#allocation3 + $0x70] sm:$0xff]  ;;  %v2147_v13 = vrot.slane %v2146_v59, 4  ;;  %v3376_v54 = vrot.slane %v3374_v30, 5  ;;  %v3361_v42 = vor.u32 %v3360_v26, %v3357_v61  ;;  %v2157_v15 = vshll.u32 %v1958_v34, 16  ;;  %v3512_v40 = vld [vmem:[#allocation2 + $0x70] sm:$0xf] }
 0x165   : > { %1931 = vst.msk [vmem:[#allocation3 + $0xf0] sm:$0xff] %vm1920_vm6, %v1893_v37  ;;  %9584 = vmatprep.mubr.msk.bf16.mxu1 %vm871_vm1, %v3792_v52  ;;  %v2156_v12 = vrot.slane %v2154_v20, 4  ;;  %v2163_v16 = vshll.u32 %v1959_v51, 16  ;;  %v2142_v47 = vsel %vm10084_vm12, %v2137_v6, %v2141_v43  ;;  %v3371_v3 = vor.u32 %v3370_v9, %v3366_v2  ;;  %v3513_v29 = vld [vmem:[#allocation2 + $0x74] sm:$0x1] }
 0x166   : > { %v2152_v21 = vsel %vm10084_vm12, %v2147_v13, %v2151_v18  ;;  %1902 = vrot.lane.b32.xlu1 %v9723_v62, %s9901_s27  ;;  %v2167_v56 = vshrl.u32 %v1959_v51, 16  ;;  %v3362_v10 = vrot.slane %v3361_v42, 4  ;;  %v2159_v49 = vrot.slane %v2157_v15, 5  ;;  %v1961_v7 = vld [vmem:[#allocation2 + $0x6c] sm:$0xf] }
 0x167   : > { %2912 = vrot.lane.b32.xlu0 %v9721_v27, %s9899_s25  ;;  %v8847_v53 = vcombine.low %v2142_v47, %v2152_v21  ;;  %v2165_v14 = vrot.slane %v2163_v16, 5  ;;  %v3795_v60 = vld [vmem:[#allocation3 + $0x88] sm:$0xff]  ;;  %v3372_v41 = vrot.slane %v3371_v3, 4  ;;  %v2173_v39 = vshll.u32 %v1960_v4, 16  ;;  %v1962_v25 = vld [vmem:[#allocation2 + $0x70] sm:$0xf]  ;;  %v11135_v21 = vpop.permute.xlu0 %2725 }
 0x168   : > { %v2169_v36 = vrot.slane %v2167_v56, 4  ;;  %v8927_v43 = vrot.slane %v3508_v33, 9  ;;  %9585 = vmatmul.mubr.msk.bf16.gmra.mrb[8].mxu1 %vm871_vm1, %v3795_v60  ;;  %v3367_v34 = vsel %vm10084_vm12, %v3362_v10, %v3366_v2  ;;  %v2160_v18 = vor.u32 %v2159_v49, %v2156_v12  ;;  %v1963_v26 = vld [vmem:[#allocation2 + $0x74] sm:$0x1]  ;;  %v1964_v2 = vld [vmem:[#allocation2 + $0x78] sm:$0xf] }
 0x169   : > { %2439 = vst.msk [vmem:[#allocation3 + $0x98] sm:$0xff] %vm871_vm1, %v8847_v53  ;;  %v3630_v55 = vrot.slane %v3509_v31, 5  ;;  %v3633_v44 = vrot.slane %v3510_v11, 5  ;;  %v3377_v27 = vsel %vm10084_vm12, %v3372_v41, %v3376_v54  ;;  %v2175_v59 = vrot.slane %v2173_v39, 5  ;;  %v1965_v37 = vld [vmem:[#allocation2 + $0x7c] sm:$0xf] }
 0x16a   : > { %2759 = vst.msk [vmem:[#allocation3 + $0x98] sm:$0xff] %vm1419_vm15, %v10895_v32  ;;  %v2170_v45 = vor.u32 %v2169_v36, %v2165_v14  ;;  %v8928_v8 = vrot.slane %v3511_v5, 9  ;;  %v8920_v30 = vcombine.low %v3367_v34, %v3377_v27  ;;  %v2161_v62 = vrot.slane %v2160_v18, 4  ;;  %v1966_v11 = vld [vmem:[#allocation2 + $0x80] sm:$0x1]  ;;  %v3796_v3 = vld [vmem:[#allocation3 + $0x90] sm:$0xff] }
 0x16b   : > { %2936 = vst.msk [vmem:[#allocation3 + $0x98] sm:$0xff] %vm1743_vm5, %v10916_v23  ;;  %v3631_v51 = vsel %vm10064_vm8, %v8927_v43, %v3630_v55  ;;  %v3632_v61 = vrot.slane %v3630_v55, 4  ;;  %v3637_v4 = vrot.slane %v3512_v40, 5  ;;  %v3640_v20 = vrot.slane %v3513_v29, 5  ;;  %v3514_v5 = vld [vmem:[#allocation2 + $0x78] sm:$0xe] }
 0x16c   : > { %3480 = vst.msk [vmem:[#allocation3 + $0x98] sm:$0xff] %vm1920_vm6, %v10937_v50  ;;  %v2171_v32 = vrot.slane %v2170_v45, 4  ;;  %v2178_v33 = vshrl.u32 %v1961_v7, 16  ;;  %3456 = vrot.lane.b32.xlu0 %v8920_v30, %s9901_s27  ;;  %v2166_v23 = vsel %vm10084_vm12, %v2161_v62, %v2165_v14  ;;  %v2181_v6 = vshll.u32 %v1961_v7, 16  ;;  %v3515_v47 = vld [vmem:[#allocation2 + $0x7c] sm:$0xf] }
 0x16d   : > { %v3634_v52 = vsel %vm10064_vm8, %v3632_v61, %v3633_v44  ;;  %v2187_v13 = vshll.u32 %v1962_v25, 16  ;;  %v3638_v50 = vsel %vm10064_vm8, %v8928_v8, %v3637_v4  ;;  %v3639_v31 = vrot.slane %v3637_v4, 4  ;;  %v3516_v14 = vld [vmem:[#allocation2 + $0x80] sm:$0x1]  ;;  %v3517_v34 = vld [vmem:[#allocation2 + $0x84] sm:$0xe] }
 0x16e   : > { %v2176_v9 = vsel %vm10084_vm12, %v2171_v32, %v2175_v59  ;;  %v8943_v54 = vcombine.low %v3631_v51, %v3634_v52  ;;  %v2180_v12 = vrot.slane %v2178_v33, 4  ;;  %v2183_v15 = vrot.slane %v2181_v6, 5  ;;  %v3518_v18 = vld [vmem:[#allocation2 + $0x88] sm:$0xf]  ;;  %v11143_v55 = vld [vmem:[#allocation2 + $0x8c] sm:$0x1]  ;;  %v11154_v32 = vpop.permute.xlu0 %2902 }
 0x16f   : > { %v8848_v42 = vcombine.low %v2166_v23, %v2176_v9  ;;  %v11133_v16 = vrot.slane %v2187_v13, 5  ;;  %v3641_v56 = vsel %vm10064_vm8, %v3639_v31, %v3640_v20  ;;  %v2191_v53 = vshrl.u32 %v1962_v25, 16  ;;  %v1967_v8 = vld [vmem:[#allocation2 + $0x84] sm:$0xf]  ;;  %v1969_v23 = vld [vmem:[#allocation2 + $0x8c] sm:$0x1] }
 0x170   : > { %3768 = vst.msk [vmem:[#allocation3 + $0xa0] sm:$0xff] %vm871_vm1, %v8943_v54  ;;  %v2197_v10 = vshll.u32 %v1963_v26, 16  ;;  %v2202_v49 = vshrl.u32 %v1964_v2, 16  ;;  %v8944_v40 = vcombine.low %v3638_v50, %v3641_v56  ;;  %v2184_v29 = vor.u32 %v2183_v15, %v2180_v12  ;;  %v1970_v50 = vld [vmem:[#allocation2 + $0x90] sm:$0xf] }
 0x171   : > { %2440 = vst.msk [vmem:[#allocation3 + $0xb0] sm:$0xff] %vm871_vm1, %v8848_v42  ;;  %v2205_v7 = vshll.u32 %v1964_v2, 16  ;;  %v2211_v60 = vshll.u32 %v1965_v37, 16  ;;  %v2193_v41 = vrot.slane %v2191_v53, 4  ;;  %v2215_v43 = vshrl.u32 %v1965_v37, 16 }
 0x172   : > { %2760 = vst.msk [vmem:[#allocation3 + $0xb0] sm:$0xff] %vm1419_vm15, %v10961_v28  ;;  %v2199_v36 = vrot.slane %v2197_v10, 5  ;;  %v2204_v39 = vrot.slane %v2202_v49, 4  ;;  %v2185_v44 = vrot.slane %v2184_v29, 4  ;;  %v2221_v59 = vshll.u32 %v1966_v11, 16  ;;  %v3799_v10 = vld [vmem:[#allocation3 + $0xa8] sm:$0xff] }
 0x173   : > { %2937 = vst.msk [vmem:[#allocation3 + $0xb0] sm:$0xff] %vm1743_vm5, %v10980_v57  ;;  %v3797_v25 = vld [vmem:[#allocation3 + $0x98] sm:$0xff]  ;;  %v2207_v27 = vrot.slane %v2205_v7, 5  ;;  %v2213_v45 = vrot.slane %v2211_v60, 5  ;;  %v2194_v28 = vor.u32 %v2193_v41, %v11133_v16  ;;  %v2217_v30 = vrot.slane %v2215_v43, 4 }
 0x174   : > { %3769 = vst.msk [vmem:[#allocation3 + $0xb8] sm:$0xff] %vm871_vm1, %v8944_v40  ;;  %4105 = vmatprep.mubr.bf16.mxu0 %v3797_v25  ;;  %v8929_v62 = vrot.slane %v3514_v5, 9  ;;  %v3644_v51 = vrot.slane %v3515_v47, 5  ;;  %v2190_v57 = vsel %vm10084_vm12, %v2185_v44, %v11133_v16  ;;  %v2223_v26 = vrot.slane %v2221_v59, 5  ;;  %v1968_v37 = vld [vmem:[#allocation2 + $0x88] sm:$0xf] }
 0x175   : > { %3481 = vst.msk [vmem:[#allocation3 + $0xb0] sm:$0xff] %vm1920_vm6, %v11009_v35  ;;  %4106 = vmatmul.mubr.bf16.gmra.mrb[24].mxu0 %v3796_v3  ;;  %v2208_v61 = vor.u32 %v2207_v27, %v2204_v39  ;;  %v3647_v2 = vrot.slane %v3516_v14, 5  ;;  %v2195_v4 = vrot.slane %v2194_v28, 4  ;;  %v2218_v20 = vor.u32 %v2217_v30, %v2213_v45  ;;  %v1971_v56 = vld [vmem:[#allocation2 + $0x94] sm:$0xf] }
 0x176   : > { %v3645_v35 = vsel %vm10064_vm8, %v8929_v62, %v3644_v51  ;;  %v3646_v33 = vrot.slane %v3644_v51, 4  ;;  %v8930_v13 = vrot.slane %v3517_v34, 9  ;;  %v3651_v9 = vrot.slane %v3518_v18, 5  ;;  %v1972_v7 = vld [vmem:[#allocation2 + $0x98] sm:$0x1]  ;;  %v11174_v18 = vpop.permute.xlu0 %3446 }
 0x177   : > { %v3798_v52 = vld [vmem:[#allocation3 + $0xa0] sm:$0xff]  ;;  %v2209_v6 = vrot.slane %v2208_v61, 4  ;;  %v3654_v54 = vrot.slane %v11143_v55, 5  ;;  %v2200_v11 = vsel %vm10084_vm12, %v2195_v4, %v2199_v36  ;;  %v2219_v42 = vrot.slane %v2218_v20, 4  ;;  %v3520_v60 = vld [vmem:[#allocation2 + $0x90] sm:$0xe] }
 0x178   : > { %v1394_v31 = vpop.permute.xlu1 %1393  ;;  %9588 = vmatprep.mubr.msk.bf16.mxu1 %vm871_vm1, %v3798_v52  ;;  %v3648_v12 = vsel %vm10064_vm8, %v3646_v33, %v3647_v2  ;;  %v2226_v15 = vshrl.u32 %v1967_v8, 16  ;;  %v8849_v16 = vcombine.low %v2190_v57, %v2200_v11  ;;  %v3652_v3 = vsel %vm10064_vm8, %v8930_v13, %v3651_v9  ;;  %v3521_v55 = vld [vmem:[#allocation2 + $0x94] sm:$0xf]  ;;  %v3522_v59 = vld [vmem:[#allocation2 + $0x98] sm:$0x1] }
 0x179   : > { %1431 = vst.msk [vmem:[#allocation3 + $0x108] sm:$0xff] %vm1419_vm15, %v1394_v31  ;;  %v2214_v5 = vsel %vm10084_vm12, %v2209_v6, %v2213_v45  ;;  %v8945_v47 = vcombine.low %v3645_v35, %v3648_v12  ;;  %v2224_v49 = vsel %vm10084_vm12, %v2219_v42, %v2223_v26  ;;  %v3653_v14 = vrot.slane %v3651_v9, 4  ;;  %v3524_v2 = vld [vmem:[#allocation2 + $0xa0] sm:$0xf]  ;;  %v3525_v33 = vld [vmem:[#allocation2 + $0xa4] sm:$0x1] }
 0x17a   : > { %v2228_v40 = vrot.slane %v2226_v15, 4  ;;  %v2229_v29 = vshll.u32 %v1967_v8, 16  ;;  %2441 = vst.msk [vmem:[#allocation3 + $0xc8] sm:$0xff] %vm871_vm1, %v8849_v16  ;;  %v8850_v36 = vcombine.low %v2214_v5, %v2224_v49  ;;  %v2235_v39 = vshll.u32 %v1968_v37, 16  ;;  %v1973_v31 = vld [vmem:[#allocation2 + $0x9c] sm:$0xf] }
 0x17b   : > { %v3801_v53 = vld [vmem:[#allocation3 + $0xb8] sm:$0xff]  ;;  %3770 = vst.msk [vmem:[#allocation3 + $0xd0] sm:$0xff] %vm871_vm1, %v8945_v47  ;;  %v2239_v43 = vshrl.u32 %v1968_v37, 16  ;;  %v2245_v34 = vshll.u32 %v1969_v23, 16  ;;  %v3655_v25 = vsel %vm10064_vm8, %v3653_v14, %v3654_v54  ;;  %v2250_v27 = vshrl.u32 %v1970_v50, 16  ;;  %v11193_v54 = vpop.permute.xlu0 %2727 }
 0x17c   : > { %9589 = vmatmul.mubr.msk.bf16.gmra.mrb[12].mxu1 %vm871_vm1, %v3801_v53  ;;  %v3800_v41 = vld [vmem:[#allocation3 + $0xb0] sm:$0xff]  ;;  %2761 = vst.msk [vmem:[#allocation3 + $0xc8] sm:$0xff] %vm1419_vm15, %v11027_v24  ;;  %v2231_v44 = vrot.slane %v2229_v29, 5  ;;  %v2253_v45 = vshll.u32 %v1970_v50, 16  ;;  %v8946_v8 = vcombine.low %v3652_v3, %v3655_v25  ;;  %v2237_v28 = vrot.slane %v2235_v39, 5 }
 0x17d   : > { %4113 = vmatprep.mubr.bf16.mxu0 %v3800_v41  ;;  %2938 = vst.msk [vmem:[#allocation3 + $0xc8] sm:$0xff] %vm1743_vm5, %v11038_v48  ;;  %v2241_v30 = vrot.slane %v2239_v43, 4  ;;  %v2247_v62 = vrot.slane %v2245_v34, 5  ;;  %v2252_v57 = vrot.slane %v2250_v27, 4  ;;  %v2259_v26 = vshll.u32 %v1971_v56, 16 }
 0x17e   : > { %4114 = vmatmul.mubr.bf16.gmra.mrb[28].mxu0 %v3799_v10  ;;  %2442 = vst.msk [vmem:[#allocation3 + $0xe0] sm:$0xff] %vm871_vm1, %v8850_v36  ;;  %v2232_v24 = vor.u32 %v2231_v44, %v2228_v40  ;;  %v2255_v61 = vrot.slane %v2253_v45, 5  ;;  %v3523_v48 = vld [vmem:[#allocation2 + $0x9c] sm:$0xe]  ;;  %3771 = vst.msk [vmem:[#allocation3 + $0xe8] sm:$0xff] %vm871_vm1, %v8946_v8  ;;  %v2263_v20 = vshrl.u32 %v1971_v56, 16 }
 0x17f   : > { %v1718_v51 = vpop.permute.xlu1 %1717  ;;  %3482 = vst.msk [vmem:[#allocation3 + $0xc8] sm:$0xff] %vm1920_vm6, %v11058_v38  ;;  %v2242_v4 = vor.u32 %v2241_v30, %v2237_v28  ;;  %v2269_v35 = vshll.u32 %v1972_v7, 16  ;;  %v8931_v38 = vrot.slane %v3520_v60, 9  ;;  %v2261_v23 = vrot.slane %v2259_v26, 5  ;;  %v1974_v11 = vld [vmem:[#allocation2 + $0xa0] sm:$0xf] }
 0x180   : > { %2762 = vst.msk [vmem:[#allocation3 + $0xe0] sm:$0xff] %vm1419_vm15, %v11087_v19  ;;  %v2233_v19 = vrot.slane %v2232_v24, 4  ;;  %v2256_v37 = vor.u32 %v2255_v61, %v2252_v57  ;;  %v3658_v52 = vrot.slane %v3521_v55, 5  ;;  %v2265_v13 = vrot.slane %v2263_v20, 4  ;;  %v1975_v5 = vld [vmem:[#allocation2 + $0xa4] sm:$0x1] }
 0x181   : > { %1755 = vst.msk [vmem:[#allocation3 + $0x108] sm:$0xff] %vm1743_vm5, %v1718_v51  ;;  %2939 = vst.msk [vmem:[#allocation3 + $0xe0] sm:$0xff] %vm1743_vm5, %v11098_v63  ;;  %v2243_v6 = vrot.slane %v2242_v4, 4  ;;  %v2271_v9 = vrot.slane %v2269_v35, 5  ;;  %v3661_v63 = vrot.slane %v3522_v59, 5  ;;  %v8932_v56 = vrot.slane %v3523_v48, 9 }
 0x182   : > { %3483 = vst.msk [vmem:[#allocation3 + $0xe0] sm:$0xff] %vm1920_vm6, %v11112_v22  ;;  %v3804_v42 = vld [vmem:[#allocation3 + $0xd0] sm:$0xff]  ;;  %v2238_v12 = vsel %vm10084_vm12, %v2233_v19, %v2237_v28  ;;  %v2257_v15 = vrot.slane %v2256_v37, 4  ;;  %v3659_v22 = vsel %vm10064_vm8, %v8931_v38, %v3658_v52  ;;  %v3660_v16 = vrot.slane %v3658_v52, 4  ;;  %v3802_v10 = vld [vmem:[#allocation3 + $0xc0] sm:$0xff] }
 0x183   : > { %v1895_v50 = vpop.permute.xlu1 %1894  ;;  %9592 = vmatprep.mubr.msk.bf16.mxu1 %vm871_vm1, %v3804_v42  ;;  %v2248_v47 = vsel %vm10084_vm12, %v2243_v6, %v2247_v62  ;;  %v2266_v3 = vor.u32 %v2265_v13, %v2261_v23  ;;  %v3665_v53 = vrot.slane %v3524_v2, 5  ;;  %v3668_v29 = vrot.slane %v3525_v33, 5  ;;  %v1976_v7 = vld [vmem:[#allocation2 + $0xa8] sm:$0xf]  ;;  %v1977_v34 = vld [vmem:[#allocation2 + $0xac] sm:$0xf] }
 0x184   : > { %1932 = vst.msk [vmem:[#allocation3 + $0x108] sm:$0xff] %vm1920_vm6, %v1895_v50  ;;  %v8851_v49 = vcombine.low %v2238_v12, %v2248_v47  ;;  %v2262_v14 = vsel %vm10084_vm12, %v2257_v15, %v2261_v23  ;;  %v3662_v40 = vsel %vm10064_vm8, %v3660_v16, %v3661_v63  ;;  %v2274_v25 = vshrl.u32 %v1973_v31, 16  ;;  %v2905_v28 = vpop.permute.xlu0 %2904  ;;  %v1978_v24 = vld [vmem:[#allocation2 + $0xb0] sm:$0x1]  ;;  %v3526_v2 = vld [vmem:[#allocation2 + $0xa8] sm:$0xe] }
 0x185   : > { %v2267_v41 = vrot.slane %v2266_v3, 4  ;;  %v8947_v36 = vcombine.low %v3659_v22, %v3662_v40  ;;  %v3666_v39 = vsel %vm10064_vm8, %v8932_v56, %v3665_v53  ;;  %v3667_v43 = vrot.slane %v3665_v53, 4  ;;  %v3807_v55 = vld [vmem:[#allocation3 + $0xe8] sm:$0xff]  ;;  %v3527_v4 = vld [vmem:[#allocation2 + $0xac] sm:$0xf] }
 0x186   : > { %v3803_v60 = vld [vmem:[#allocation3 + $0xc8] sm:$0xff]  ;;  %2443 = vst.msk [vmem:[#allocation3 + $0xf8] sm:$0xff] %vm871_vm1, %v8851_v49  ;;  %v2277_v44 = vshll.u32 %v1973_v31, 16  ;;  %v2283_v27 = vshll.u32 %v1974_v11, 16  ;;  %v2287_v45 = vshrl.u32 %v1974_v11, 16  ;;  %9593 = vmatmul.mubr.msk.bf16.gmra.mrb[16].mxu1 %vm871_vm1, %v3807_v55  ;;  %v2293_v62 = vshll.u32 %v1975_v5, 16 }
 0x187   : > { %4121 = vmatprep.mubr.bf16.mxu0 %v3803_v60  ;;  %2763 = vst.msk [vmem:[#allocation3 + $0xf8] sm:$0xff] %vm1419_vm15, %v11135_v21  ;;  %v2272_v8 = vsel %vm10084_vm12, %v2267_v41, %v2271_v9  ;;  %v3669_v30 = vsel %vm10064_vm8, %v3667_v43, %v3668_v29  ;;  %v1396_v51 = vpop.permute.xlu1 %1395  ;;  %v2298_v57 = vshrl.u32 %v1976_v7, 16  ;;  %v2276_v26 = vrot.slane %v2274_v25, 4  ;;  %v3528_v19 = vld [vmem:[#allocation2 + $0xb0] sm:$0x1] }
 0x188   : > { %4122 = vmatmul.mubr.bf16.gmra.mrb[32].mxu0 %v3802_v10  ;;  %3772 = vst.msk [vmem:[#allocation3 + $0x100] sm:$0xff] %vm871_vm1, %v8947_v36  ;;  %v8852_v61 = vcombine.low %v2262_v14, %v2272_v8  ;;  %v8948_v21 = vcombine.low %v3666_v39, %v3669_v30  ;;  %v2279_v48 = vrot.slane %v2277_v44, 5  ;;  %v2285_v20 = vrot.slane %v2283_v27, 5  ;;  %v3529_v6 = vld [vmem:[#allocation2 + $0xb4] sm:$0xe] }
 0x189   : > { %v3806_v59 = vld [vmem:[#allocation3 + $0xe0] sm:$0xff]  ;;  %2940 = vst.msk [vmem:[#allocation3 + $0xf8] sm:$0xff] %vm1743_vm5, %v11154_v32  ;;  %v2289_v35 = vrot.slane %v2287_v45, 4  ;;  %v2295_v38 = vrot.slane %v2293_v62, 5  ;;  %v2300_v33 = vrot.slane %v2298_v57, 4  ;;  %v2301_v37 = vshll.u32 %v1976_v7, 16 }
 0x18a   : > { %4129 = vmatprep.mubr.bf16.mxu0 %v3806_v59  ;;  %1432 = vst.msk [vmem:[#allocation3 + $0x120] sm:$0xff] %vm1419_vm15, %v1396_v51  ;;  %v2280_v32 = vor.u32 %v2279_v48, %v2276_v26  ;;  %v2307_v23 = vshll.u32 %v1977_v34, 16  ;;  %v2311_v52 = vshrl.u32 %v1977_v34, 16  ;;  %v3530_v13 = vld [vmem:[#allocation2 + $0xb8] sm:$0xf]  ;;  %v8933_v63 = vrot.slane %v3526_v2, 9 }
 0x18b   : > { %3484 = vst.msk [vmem:[#allocation3 + $0xf8] sm:$0xff] %vm1920_vm6, %v11174_v18  ;;  %v2290_v9 = vor.u32 %v2289_v35, %v2285_v20  ;;  %v2317_v18 = vshll.u32 %v1978_v24, 16  ;;  %v3672_v50 = vrot.slane %v3527_v4, 5  ;;  %v3531_v31 = vld [vmem:[#allocation2 + $0xbc] sm:$0x1]  ;;  %v3805_v11 = vld [vmem:[#allocation3 + $0xd8] sm:$0xff] }
 0x18c   : > { %2444 = vst.msk [vmem:[#allocation3 + $0x110] sm:$0xff] %vm871_vm1, %v8852_v61  ;;  %3773 = vst.msk [vmem:[#allocation3 + $0x118] sm:$0xff] %vm871_vm1, %v8948_v21  ;;  %v2281_v42 = vrot.slane %v2280_v32, 4  ;;  %v2303_v12 = vrot.slane %v2301_v37, 5  ;;  %v2309_v15 = vrot.slane %v2307_v23, 5  ;;  %v2313_v22 = vrot.slane %v2311_v52, 4 }
 0x18d   : > { %2764 = vst.msk [vmem:[#allocation3 + $0x110] sm:$0xff] %vm1419_vm15, %v11193_v54  ;;  %v2291_v5 = vrot.slane %v2290_v9, 4  ;;  %v2319_v47 = vrot.slane %v2317_v18, 5  ;;  %v3673_v3 = vsel %vm10064_vm8, %v8933_v63, %v3672_v50  ;;  %v3674_v56 = vrot.slane %v3672_v50, 4  ;;  %v1979_v40 = vld [vmem:[#allocation2 + $0xb4] sm:$0xf] }
 0x18e   : > { %2941 = vst.msk [vmem:[#allocation3 + $0x110] sm:$0xff] %vm1743_vm5, %v2905_v28  ;;  %v2286_v53 = vsel %vm10084_vm12, %v2281_v42, %v2285_v20  ;;  %v2304_v10 = vor.u32 %v2303_v12, %v2300_v33  ;;  %v2314_v49 = vor.u32 %v2313_v22, %v2309_v15  ;;  %v3675_v14 = vrot.slane %v3528_v19, 5  ;;  %v1980_v36 = vld [vmem:[#allocation2 + $0xb8] sm:$0xf]  ;;  %v1981_v28 = vld [vmem:[#allocation2 + $0xbc] sm:$0x1] }
 0x18f   : > { %v3810_v54 = vld [vmem:[#allocation3 + $0x100] sm:$0xff]  ;;  %v2296_v29 = vsel %vm10084_vm12, %v2291_v5, %v2295_v38  ;;  %v8934_v7 = vrot.slane %v3529_v6, 9  ;;  %v3679_v60 = vrot.slane %v3530_v13, 5  ;;  %v3682_v41 = vrot.slane %v3531_v31, 5  ;;  %v1982_v21 = vld [vmem:[#allocation2 + $0xc0] sm:$0xf] }
 0x190   : > { %v3449_v16 = vpop.permute.xlu0 %3448  ;;  %4130 = vmatmul.mubr.bf16.gmra.mrb[36].mxu0 %v3805_v11  ;;  %9596 = vmatprep.mubr.msk.bf16.mxu1 %vm871_vm1, %v3810_v54  ;;  %v8853_v43 = vcombine.low %v2286_v53, %v2296_v29  ;;  %v2305_v34 = vrot.slane %v2304_v10, 4  ;;  %v2315_v55 = vrot.slane %v2314_v49, 4  ;;  %v3676_v25 = vsel %vm10064_vm8, %v3674_v56, %v3675_v14  ;;  %v1983_v26 = vld [vmem:[#allocation2 + $0xc4] sm:$0xf]  ;;  %v1984_v35 = vld [vmem:[#allocation2 + $0xc8] sm:$0x1] }
 0x191   : > { %3485 = vst.msk [vmem:[#allocation3 + $0x110] sm:$0xff] %vm1920_vm6, %v3449_v16  ;;  %v8949_v45 = vcombine.low %v3673_v3, %v3676_v25  ;;  %v3680_v59 = vsel %vm10064_vm8, %v8934_v7, %v3679_v60  ;;  %v3681_v8 = vrot.slane %v3679_v60, 4  ;;  %v2322_v30 = vshrl.u32 %v1979_v40, 16  ;;  %v3532_v38 = vld [vmem:[#allocation2 + $0xc0] sm:$0xe]  ;;  %v3808_v33 = vld [vmem:[#allocation3 + $0xf0] sm:$0xff] }
 0x192   : > { %v3809_v39 = vld [vmem:[#allocation3 + $0xf8] sm:$0xff]  ;;  %2445 = vst.msk [vmem:[#allocation3 + $0x128] sm:$0xff] %vm871_vm1, %v8853_v43  ;;  %v1720_v62 = vpop.permute.xlu1 %1719  ;;  %v2310_v51 = vsel %vm10084_vm12, %v2305_v34, %v2309_v15  ;;  %v2320_v24 = vsel %vm10084_vm12, %v2315_v55, %v2319_v47  ;;  %v2325_v57 = vshll.u32 %v1979_v40, 16  ;;  %v2331_v61 = vshll.u32 %v1980_v36, 16  ;;  %v3533_v52 = vld [vmem:[#allocation2 + $0xc4] sm:$0xf] }
 0x193   : > { %4137 = vmatprep.mubr.bf16.mxu0 %v3809_v39  ;;  %v3813_v44 = vld [vmem:[#allocation3 + $0x118] sm:$0xff]  ;;  %1756 = vst.msk [vmem:[#allocation3 + $0x120] sm:$0xff] %vm1743_vm5, %v1720_v62  ;;  %v8854_v48 = vcombine.low %v2310_v51, %v2320_v24  ;;  %v3683_v2 = vsel %vm10064_vm8, %v3681_v8, %v3682_v41  ;;  %v2324_v4 = vrot.slane %v2322_v30, 4  ;;  %v2335_v20 = vshrl.u32 %v1980_v36, 16  ;;  %v3534_v6 = vld [vmem:[#allocation2 + $0xc8] sm:$0x1] }
 0x194   : > { %v2730_v27 = vpop.permute.xlu0 %2729  ;;  %9597 = vmatmul.mubr.msk.bf16.gmra.mrb[20].mxu1 %vm871_vm1, %v3813_v44  ;;  %3774 = vst.msk [vmem:[#allocation3 + $0x130] sm:$0xff] %vm871_vm1, %v8949_v45  ;;  %v8950_v19 = vcombine.low %v3680_v59, %v3683_v2  ;;  %v2327_v32 = vrot.slane %v2325_v57, 5  ;;  %v2333_v37 = vrot.slane %v2331_v61, 5  ;;  %v2341_v23 = vshll.u32 %v1981_v28, 16  ;;  %v3535_v16 = vld [vmem:[#allocation2 + $0xcc] sm:$0xe] }
 0x195   : > { %2765 = vst.msk [vmem:[#allocation3 + $0x128] sm:$0xff] %vm1419_vm15, %v2730_v27  ;;  %v2337_v18 = vrot.slane %v2335_v20, 4  ;;  %v2346_v63 = vshrl.u32 %v1982_v21, 16  ;;  %v2349_v50 = vshll.u32 %v1982_v21, 16  ;;  %v2355_v31 = vshll.u32 %v1983_v26, 16  ;;  %v3811_v28 = vld [vmem:[#allocation3 + $0x108] sm:$0xff] }
 0x196   : > { %2446 = vst.msk [vmem:[#allocation3 + $0x140] sm:$0xff] %vm871_vm1, %v8854_v48  ;;  %v1897_v11 = vpop.permute.xlu1 %1896  ;;  %3775 = vst.msk [vmem:[#allocation3 + $0x148] sm:$0xff] %vm871_vm1, %v8950_v19  ;;  %v2328_v42 = vor.u32 %v2327_v32, %v2324_v4  ;;  %v2343_v12 = vrot.slane %v2341_v23, 5  ;;  %v2359_v15 = vshrl.u32 %v1983_v26, 16  ;;  %v2365_v22 = vshll.u32 %v1984_v35, 16 }
 0x197   : > { %1933 = vst.msk [vmem:[#allocation3 + $0x120] sm:$0xff] %vm1920_vm6, %v1897_v11  ;;  %v2338_v5 = vor.u32 %v2337_v18, %v2333_v37  ;;  %v2348_v47 = vrot.slane %v2346_v63, 4  ;;  %v2351_v3 = vrot.slane %v2349_v50, 5  ;;  %v2357_v56 = vrot.slane %v2355_v31, 5  ;;  %v3536_v54 = vld [vmem:[#allocation2 + $0xd0] sm:$0xf] }
 0x198   : > { %v2907_v13 = vpop.permute.xlu0 %2906  ;;  %v3812_v9 = vld [vmem:[#allocation3 + $0x110] sm:$0xff]  ;;  %4138 = vmatmul.mubr.bf16.gmra.mrb[40].mxu0 %v3808_v33  ;;  %v2329_v53 = vrot.slane %v2328_v42, 4  ;;  %v2361_v10 = vrot.slane %v2359_v15, 4  ;;  %v2367_v49 = vrot.slane %v2365_v22, 5  ;;  %v8935_v14 = vrot.slane %v3532_v38, 9 }
 0x199   : > { %2942 = vst.msk [vmem:[#allocation3 + $0x128] sm:$0xff] %vm1743_vm5, %v2907_v13  ;;  %4145 = vmatprep.mubr.bf16.mxu0 %v3812_v9  ;;  %v2339_v40 = vrot.slane %v2338_v5, 4  ;;  %v2352_v29 = vor.u32 %v2351_v3, %v2348_v47  ;;  %v3686_v7 = vrot.slane %v3533_v52, 5  ;;  %v3689_v60 = vrot.slane %v3534_v6, 5  ;;  %v3537_v43 = vld [vmem:[#allocation2 + $0xd4] sm:$0x1] }
 0x19a   : > { %v2334_v36 = vsel %vm10084_vm12, %v2329_v53, %v2333_v37  ;;  %v2362_v39 = vor.u32 %v2361_v10, %v2357_v56  ;;  %v8936_v34 = vrot.slane %v3535_v16, 9  ;;  %v3693_v55 = vrot.slane %v3536_v54, 5  ;;  %v7688_v59 = vld [vmem:[#allocation2 + $0xcc] sm:$0xe]  ;;  %v7689_v8 = vld [vmem:[#allocation2 + $0xd0] sm:$0xf] }
 0x19b   : > { %v3816_v41 = vld [vmem:[#allocation3 + $0x130] sm:$0xff]  ;;  %v2344_v25 = vsel %vm10084_vm12, %v2339_v40, %v2343_v12  ;;  %v2353_v44 = vrot.slane %v2352_v29, 4  ;;  %v3687_v27 = vsel %vm10064_vm8, %v8935_v14, %v3686_v7  ;;  %v3688_v45 = vrot.slane %v3686_v7, 4  ;;  %v7690_v24 = vld [vmem:[#allocation2 + $0xd4] sm:$0x1] }
 0x19c   : > { %9600 = vmatprep.mubr.msk.bf16.mxu1 %vm871_vm1, %v3816_v41  ;;  %v8855_v30 = vcombine.low %v2334_v36, %v2344_v25  ;;  %v2363_v62 = vrot.slane %v2362_v39, 4  ;;  %v3695_v51 = vrot.slane %v3693_v55, 4  ;;  %v3694_v26 = vsel %vm10064_vm8, %v8936_v34, %v3693_v55  ;;  %v5051_v6 = vld [vmem:[#allocation2] sm:$0xf]  ;;  %v5052_v13 = vld [vmem:[#allocation2 + $0x4] sm:$0xf] }
 0x19d   : > { %v3819_v57 = vld [vmem:[#allocation3 + $0x148] sm:$0xff]  ;;  %v2358_v61 = vsel %vm10084_vm12, %v2353_v44, %v2357_v56  ;;  %v3690_v21 = vsel %vm10064_vm8, %v3688_v45, %v3689_v60  ;;  %v3696_v48 = vrot.slane %v3537_v43, 5  ;;  %v9195_v20 = vrot.slane %v7688_v59, 9  ;;  %v5053_v5 = vld [vmem:[#allocation2 + $0x8] sm:$0x1] }
 0x19e   : > { %9601 = vmatmul.mubr.msk.bf16.gmra.mrb[24].mxu1 %vm871_vm1, %v3819_v57  ;;  %2447 = vst.msk [vmem:[#allocation3 + $0x158] sm:$0xff] %vm871_vm1, %v8855_v30  ;;  %v2368_v2 = vsel %vm10084_vm12, %v2363_v62, %v2367_v49  ;;  %v8951_v4 = vcombine.low %v3687_v27, %v3690_v21  ;;  %v7846_v35 = vrot.slane %v7689_v8, 5  ;;  %v7849_v19 = vrot.slane %v7690_v24, 5  ;;  %v3814_v3 = vld [vmem:[#allocation3 + $0x120] sm:$0xff]  ;;  %v5595_v60 = vld [vmem:[#allocation2] sm:$0xe] }
 0x19f   : > { %v8856_v38 = vcombine.low %v2358_v61, %v2368_v2  ;;  %v3697_v33 = vsel %vm10064_vm8, %v3695_v51, %v3696_v48  ;;  %v5100_v18 = vshrl.u32 %v5051_v6, 16  ;;  %v5103_v63 = vshll.u32 %v5051_v6, 16  ;;  %v5596_v36 = vld [vmem:[#allocation2 + $0x4] sm:$0xf]  ;;  %v5597_v39 = vld [vmem:[#allocation2 + $0x8] sm:$0x1] }
 0x1a0   : > { %4146 = vmatmul.mubr.bf16.gmra.mrb[44].mxu0 %v3811_v28  ;;  %3776 = vst.msk [vmem:[#allocation3 + $0x160] sm:$0xff] %vm871_vm1, %v8951_v4  ;;  %v8952_v37 = vcombine.low %v3694_v26, %v3697_v33  ;;  %v7848_v23 = vrot.slane %v7846_v35, 4  ;;  %v7847_v52 = vsel %vm10064_vm8, %v9195_v20, %v7846_v35  ;;  %v5109_v50 = vshll.u32 %v5052_v13, 16  ;;  %v9737_v4 = vld [vmem:[%s12990_s3 + $0x80] sm:$0xff]   ;;  %v9739_v35 = vld [vmem:[%s12990_s3 + $0x88] sm:$0xff]  }
 0x1a1   : > { %v3451_v32 = vpop.permute.xlu0 %3450  ;;  %2448 = vst.msk [vmem:[#allocation3 + $0x170] sm:$0xff] %vm871_vm1, %v8856_v38  ;;  %v5113_v11 = vshrl.u32 %v5052_v13, 16  ;;  %v5102_v12 = vrot.slane %v5100_v18, 4  ;;  %v5105_v15 = vrot.slane %v5103_v63, 5  ;;  %v5119_v53 = vshll.u32 %v5053_v5, 16  ;;  %9608 = vmatprep.subr.bf16.mxu0 %v9737_v4 }
 0x1a2   : > { %3486 = vst.msk [vmem:[#allocation3 + $0x128] sm:$0xff] %vm1920_vm6, %v3451_v32  ;;  %v7850_v9 = vsel %vm10064_vm8, %v7848_v23, %v7849_v19  ;;  %v5111_v22 = vrot.slane %v5109_v50, 5  ;;  %v9052_v43 = vrot.slane %v5595_v60, 9  ;;  %v5693_v55 = vrot.slane %v5596_v36, 5  ;;  %9609 = vmatpush3.bf16.msra.mxu0 %v9737_v4 }
 0x1a3   : > { %3777 = vst.msk [vmem:[#allocation3 + $0x178] sm:$0xff] %vm871_vm1, %v8952_v37  ;;  %v9211_v16 = vcombine.low %v7847_v52, %v7850_v9  ;;  %v5115_v47 = vrot.slane %v5113_v11, 4  ;;  %v5106_v54 = vor.u32 %v5105_v15, %v5102_v12  ;;  %v5121_v7 = vrot.slane %v5119_v53, 5  ;;  %9610 = vmatprep.subr.bf16.mxu0 %v9739_v35 }
 0x1a4   : > { %v1398_v42 = vpop.permute.xlu1 %1397  ;;  %v5696_v25 = vrot.slane %v5597_v39, 5  ;;  %v5694_v59 = vsel %vm10064_vm8, %v9052_v43, %v5693_v55  ;;  %v5695_v8 = vrot.slane %v5693_v55, 4 }
 0x1a5   : > { %v2732_v31 = vpop.permute.xlu0 %2731  ;;  %1433 = vst.msk [vmem:[#allocation3 + $0x138] sm:$0xff] %vm1419_vm15, %v1398_v42  ;;  %v5116_v49 = vor.u32 %v5115_v47, %v5111_v22  ;;  %v5107_v29 = vrot.slane %v5106_v54, 4 }
 0x1a6   : > { %2766 = vst.msk [vmem:[#allocation3 + $0x140] sm:$0xff] %vm1419_vm15, %v2732_v31  ;;  %v5697_v30 = vsel %vm10064_vm8, %v5695_v8, %v5696_v25  ;;  %9611 = vmatpush3.bf16.msra.mxu0 %v9739_v35  ;;  %v4795_v35 = vld [vmem:[#allocation2 + $0xc] sm:$0xf] }
 0x1a7   : > { %v3822_v56 = vld [vmem:[#allocation3 + $0x160] sm:$0xff]  ;;  %v5117_v41 = vrot.slane %v5116_v49, 4  ;;  %v5112_v34 = vsel %vm10084_vm12, %v5107_v29, %v5111_v22  ;;  %v9068_v62 = vcombine.low %v5694_v59, %v5697_v30 }
 0x1a8   : > { %9604 = vmatprep.mubr.msk.bf16.mxu1 %vm871_vm1, %v3822_v56  ;;  %v1722_v14 = vpop.permute.xlu1 %1721 }
 0x1a9   : > { %v3815_v10 = vld [vmem:[#allocation3 + $0x128] sm:$0xff]  ;;  %1757 = vst.msk [vmem:[#allocation3 + $0x138] sm:$0xff] %vm1743_vm5, %v1722_v14  ;;  %v5122_v44 = vsel %vm10084_vm12, %v5117_v41, %v5121_v7 }
 0x1aa   : > { %4153 = vmatprep.mubr.bf16.mxu0 %v3815_v10  ;;  %v3825_v40 = vld [vmem:[#allocation3 + $0x178] sm:$0xff]  ;;  %v9036_v45 = vcombine.low %v5112_v34, %v5122_v44  ;;  %v11326_v14 = vld [vmem:[%s12989_s2] ss:$0 sm:$0xff] }
 0x1ab   : > { %4154 = vmatmul.mubr.bf16.gmra.mrb[48].mxu0 %v3814_v3  ;;  %9605 = vmatmul.mubr.msk.bf16.gmra.mrb[28].mxu1 %vm871_vm1, %v3825_v40  ;;  %7930 = vst.msk [vmem:[#allocation3 + $0x178] sm:$0xff] %vm871_vm1, %v9211_v16 }
 0x1ac   : > { %v1899_v27 = vpop.permute.xlu1 %1898  ;;  %5531 = vrot.lane.b32.xlu1 %v9036_v45, %s9900_s26 }
 0x1ad   : > { %v2909_v28 = vpop.permute.xlu0 %2908  ;;  %1934 = vst.msk [vmem:[#allocation3 + $0x138] sm:$0xff] %vm1920_vm6, %v1899_v27 }
 0x1ae   : > { %2943 = vst.msk [vmem:[#allocation3 + $0x140] sm:$0xff] %vm1743_vm5, %v2909_v28 }
 0x1b0   : > { %5851 = vrot.lane.b32.xlu1 %v9068_v62, %s9899_s25 }
 0x1b4   : > { %v3817_v61 = vld [vmem:[#allocation3 + $0x138] sm:$0xff] }
 0x1b8   : > { %v3453_v51 = vpop.permute.xlu0 %3452 }
 0x1b9   : > { %3487 = vst.msk [vmem:[#allocation3 + $0x140] sm:$0xff] %vm1920_vm6, %v3453_v51 }
 0x1bc   : > { %v2734_v24 = vpop.permute.xlu0 %2733 }
 0x1bd   : > { %2767 = vst.msk [vmem:[#allocation3 + $0x158] sm:$0xff] %vm1419_vm15, %v2734_v24  ;;  %v1400_v57 = vpop.permute.xlu1 %1399 }
 0x1be   : > { %1434 = vst.msk [vmem:[#allocation3 + $0x150] sm:$0xff] %vm1419_vm15, %v1400_v57 }
 0x1c0   : > { %v3818_v21 = vld [vmem:[#allocation3 + $0x140] sm:$0xff] }
 0x1c1   : > { %v1724_v26 = vpop.permute.xlu1 %1723  ;;  %4161 = vmatprep.mubr.bf16.mxu0 %v3818_v21 }
 0x1c2   : > { %1758 = vst.msk [vmem:[#allocation3 + $0x150] sm:$0xff] %vm1743_vm5, %v1724_v26  ;;  %4162 = vmatmul.mubr.bf16.gmra.mrb[52].mxu0 %v3817_v61 }
 0x1c5   : > { %v1901_v48 = vpop.permute.xlu1 %1900  ;;  %v2911_v2 = vpop.permute.xlu0 %2910 }
 0x1c6   : > { %1935 = vst.msk [vmem:[#allocation3 + $0x150] sm:$0xff] %vm1920_vm6, %v1901_v48 }
 0x1c7   : > { %2944 = vst.msk [vmem:[#allocation3 + $0x158] sm:$0xff] %vm1743_vm5, %v2911_v2 }
 0x1cc   : > { %v1402_v20 = vpop.permute.xlu1 %1401 }
 0x1cd   : > { %1435 = vst.msk [vmem:[#allocation3 + $0x168] sm:$0xff] %vm1419_vm15, %v1402_v20  ;;  %v3820_v23 = vld [vmem:[#allocation3 + $0x150] sm:$0xff]  ;;  %v4802_v20 = vld [vmem:[#allocation2 + $0x18] sm:$0xf] }
 0x1d1   : > { %v3455_v38 = vpop.permute.xlu0 %3454 }
 0x1d2   : > { %3488 = vst.msk [vmem:[#allocation3 + $0x158] sm:$0xff] %vm1920_vm6, %v3455_v38 }
 0x1d4   : > { %v1726_v33 = vpop.permute.xlu1 %1725 }
 0x1d5   : > { %v2736_v19 = vpop.permute.xlu0 %2735  ;;  %1759 = vst.msk [vmem:[#allocation3 + $0x168] sm:$0xff] %vm1743_vm5, %v1726_v33 }
 0x1d6   : > { %2768 = vst.msk [vmem:[#allocation3 + $0x170] sm:$0xff] %vm1419_vm15, %v2736_v19 }
 0x1d8   : > { %v1903_v52 = vpop.permute.xlu1 %1902 }
 0x1d9   : > { %v9328_v32 = vpop.f32.mrb[0].mxu0  ;;  %v2913_v9 = vpop.permute.xlu0 %2912  ;;  %v3821_v18 = vld [vmem:[#allocation3 + $0x158] sm:$0xff]  ;;  %1936 = vst.msk [vmem:[#allocation3 + $0x168] sm:$0xff] %vm1920_vm6, %v1903_v52 }
 0x1da   : > { %v9329_v37 = vpop.f32.mrb[1].mxu0  ;;  %2945 = vst.msk [vmem:[#allocation3 + $0x170] sm:$0xff] %vm1743_vm5, %v2913_v9  ;;  %4169 = vmatprep.mubr.bf16.mxu0 %v3821_v18  ;;  %v4799_v18 = vld [vmem:[#allocation2 + $0x14] sm:$0x1] }
 0x1db   : > { %v9330_v6 = vadd.f32 %v9329_v37, %v9328_v32  ;;  %v9331_v13 = vpop.f32.mrb[2].mxu0  ;;  %4170 = vmatmul.mubr.bf16.gmra.mrb[56].mxu0 %v3820_v23 }
 0x1dc   : > { %v9332_v63 = vpop.f32.mrb[3].mxu0 }
 0x1dd   : > { %v9333_v50 = vadd.f32 %v9332_v63, %v9331_v13  ;;  %v4060_v29 = vadd.f32 %v9330_v6, %v11326_v14  ;;  %v4806_v13 = vld [vmem:[#allocation2 + $0x20] sm:$0x1] }
 0x1de   : > { %v3457_v11 = vpop.permute.xlu0 %3456 }
 0x1df   : > { %3489 = vst.msk [vmem:[#allocation3 + $0x170] sm:$0xff] %vm1920_vm6, %v3457_v11  ;;  %v4063_v41 = vadd.f32 %v9333_v50, %v11326_v14 }
 0x1e0   : > { %v3823_v5 = vld [vmem:[#allocation3 + $0x168] sm:$0xff] }
 0x1e1   : > { %v9334_v31 = vpop.f32.mrb[4].mxu0 }
 0x1e2   : > { %v9335_v42 = vpop.f32.mrb[5].mxu0 }
 0x1e3   : > { %v9336_v12 = vadd.f32 %v9335_v42, %v9334_v31  ;;  %v9337_v15 = vpop.f32.mrb[6].mxu0 }
 0x1e4   : > { %v9338_v22 = vpop.f32.mrb[7].mxu0 }
 0x1e5   : > { %v9339_v16 = vadd.f32 %v9338_v22, %v9337_v15  ;;  %v4068_v40 = vadd.f32 %v9336_v12, %v11326_v14 }
 0x1e6   : > { %v3824_v47 = vld [vmem:[#allocation3 + $0x170] sm:$0xff] }
 0x1e7   : > { %4177 = vmatprep.mubr.bf16.mxu0 %v3824_v47  ;;  %v4071_v7 = vadd.f32 %v9339_v16, %v11326_v14 }
 0x1e8   : > { %4178 = vmatmul.mubr.bf16.gmra.mrb[60].mxu0 %v3823_v5 }
 0x1ea   : > { %v9340_v3 = vpop.f32.mrb[8].mxu0 }
 0x1eb   : > { %v9341_v56 = vpop.f32.mrb[9].mxu0 }
 0x1ec   : > { %v11319_v54 = vadd.f32 %v9341_v56, %v9340_v3  ;;  %v9343_v53 = vpop.f32.mrb[10].mxu0 }
 0x1ed   : > { %v9344_v10 = vpop.f32.mrb[11].mxu0 }
 0x1ee   : > { %v11321_v49 = vadd.f32 %v9344_v10, %v9343_v53 }
 0x1fa   : > { %v9578_v60 = vpop.f32.mrb[0].mxu1 }
 0x1fb   : > { %v4220_v36 = vpop.f32.mrb[1].mxu1  ;;  %v4229_v39 = vadd.f32 %v9578_v60, %v4068_v40 }
 0x1fc   : > { %v4221_v43 = vadd.f32 %v4220_v36, %v4060_v29  ;;  %v9579_v34 = vpop.f32.mrb[2].mxu1 }
 0x1fd   : > { %v4223_v55 = vpop.f32.mrb[3].mxu1  ;;  %v4349_v25 = vmax.f32 %v4229_v39, 0.0  ;;  %v4232_v44 = vadd.f32 %v9579_v34, %v4071_v7 }
 0x1fe   : > { %v4347_v27 = vmax.f32 %v4221_v43, 0.0  ;;  %v4224_v45 = vadd.f32 %v4223_v55, %v4063_v41  ;;  %v4076_v55 = vadd.f32 %v11319_v54, %v11326_v14 }
 0x1ff   : > { %v9282_v59 = vpack.c.bf16 %v4349_v25, %v4349_v25  ;;  %v4350_v8 = vmax.f32 %v4232_v44, 0.0 }
 0x200   : > { %v9280_v28 = vpack.c.bf16 %v4347_v27, %v4347_v27  ;;  %v4348_v30 = vmax.f32 %v4224_v45, 0.0 }
 0x201   : > { %v4493_v62 = vshrl.u32 %v9282_v59, 16  ;;  %v9283_v51 = vpack.c.bf16 %v4350_v8, %v4350_v8  ;;  %v4496_v21 = vshll.u32 %v9282_v59, 16  ;;  %v4079_v59 = vadd.f32 %v11321_v49, %v11326_v14 }
 0x202   : > { %v4476_v24 = vshrl.u32 %v9280_v28, 16  ;;  %v9281_v57 = vpack.c.bf16 %v4348_v30, %v4348_v30  ;;  %v4479_v2 = vshll.u32 %v9280_v28, 16 }
 0x203   : > { %v4495_v61 = vrot.slane %v4493_v62, 7  ;;  %v4501_v26 = vshrl.u32 %v9283_v51, 16  ;;  %v4504_v19 = vshll.u32 %v9283_v51, 16 }
 0x204   : > { %v4478_v48 = vrot.slane %v4476_v24, 7  ;;  %v4484_v4 = vshrl.u32 %v9281_v57, 16  ;;  %v4487_v52 = vshll.u32 %v9281_v57, 16 }
 0x205   : > { %v4498_v38 = vor.u32 %v4496_v21, %v4495_v61  ;;  %v4503_v33 = vrot.slane %v4501_v26, 7  ;;  %v4499_v6 = vrot.slane %v4495_v61, 4 }
 0x206   : > { %v9346_v32 = vpop.f32.mrb[12].mxu0  ;;  %v4481_v37 = vor.u32 %v4479_v2, %v4478_v48  ;;  %v4486_v23 = vrot.slane %v4484_v4, 7  ;;  %v4482_v12 = vrot.slane %v4478_v48, 4 }
 0x207   : > { %v9347_v9 = vpop.f32.mrb[13].mxu0  ;;  %v4803_v63 = vsel %vm10091_vm13, %v4498_v38, %v4802_v20  ;;  %v4506_v50 = vor.u32 %v4504_v19, %v4503_v33  ;;  %v4508_v31 = vrot.slane %v4503_v33, 4 }
 0x208   : > { %v9348_v11 = vadd.f32 %v9347_v9, %v9346_v32  ;;  %v9349_v42 = vpop.f32.mrb[14].mxu0  ;;  %v4796_v15 = vsel %vm10091_vm13, %v4481_v37, %v4795_v35  ;;  %v4489_v22 = vor.u32 %v4487_v52, %v4486_v23  ;;  %v4491_v16 = vrot.slane %v4486_v23, 4  ;;  %4804 = vst [vmem:[#allocation2 + $0x18] sm:$0xf] %v4803_v63 }
 0x209   : > { %v9350_v5 = vpop.f32.mrb[15].mxu0  ;;  %4797 = vst [vmem:[#allocation2 + $0xc] sm:$0xf] %v4796_v15  ;;  %v4507_v47 = vsel %vm10102_vm14, %v4499_v6, %v4506_v50  ;;  %v4807_v3 = vsel %vm9977_vm3, %v4508_v31, %v4806_v13 }
 0x20a   : > { %v9351_v56 = vadd.f32 %v9350_v5, %v9349_v42  ;;  %v4490_v53 = vsel %vm10102_vm14, %v4482_v12, %v4489_v22  ;;  %v4800_v10 = vsel %vm9977_vm3, %v4491_v16, %v4799_v18  ;;  %4808 = vst [vmem:[#allocation2 + $0x20] sm:$0x1] %v4807_v3  ;;  %4805 = vst.msk [vmem:[#allocation2 + $0x1c] sm:$0xf] %vm48_vm0, %v4507_v47 }
 0x20b   : > { %4798 = vst.msk [vmem:[#allocation2 + $0x10] sm:$0xf] %vm48_vm0, %v4490_v53  ;;  %4801 = vst [vmem:[#allocation2 + $0x14] sm:$0x1] %v4800_v10  ;;  %v4084_v25 = vadd.f32 %v9348_v11, %v11326_v14 }
 0x20c   : > { %v4087_v8 = vadd.f32 %v9351_v56, %v11326_v14 }
 0x20f   : > { %v6606_v7 = vld [vmem:[#allocation2 + $0x18] sm:$0xe] }
 0x210   : > { %v6603_v40 = vld [vmem:[#allocation2 + $0xc] sm:$0xe]  ;;  %v9117_v61 = vrot.slane %v6606_v7, 9 }
 0x211   : > { %v5598_v29 = vld [vmem:[#allocation2 + $0xc] sm:$0xe]  ;;  %v9116_v39 = vrot.slane %v6603_v40, 9  ;;  %v6607_v62 = vld [vmem:[#allocation2 + $0x1c] sm:$0xf] }
 0x212   : > { %v9733_v60 = vld [vmem:[#allocation2 + $0xc] sm:$0xff]   ;;  %v6605_v36 = vld [vmem:[#allocation2 + $0x14] sm:$0x1]  ;;  %v9053_v27 = vrot.slane %v5598_v29, 9  ;;  %v6608_v51 = vld [vmem:[#allocation2 + $0x20] sm:$0x1] }
 0x213   : > { %v6604_v41 = vld [vmem:[#allocation2 + $0x10] sm:$0xf]  ;;  %6027 = vrot.lane.b32.xlu1 %v9733_v60, %s9901_s27  ;;  %v5600_v44 = vld [vmem:[#allocation2 + $0x14] sm:$0x1]  ;;  %v6704_v30 = vrot.slane %v6605_v36, 5  ;;  %v6708_v54 = vrot.slane %v6607_v62, 5 }
 0x214   : > { %v6701_v43 = vrot.slane %v6604_v41, 5  ;;  %v5599_v34 = vld [vmem:[#allocation2 + $0x10] sm:$0xf]  ;;  %v5703_v57 = vrot.slane %v5600_v44, 5  ;;  %v5054_v21 = vld [vmem:[#allocation2 + $0xc] sm:$0xf] }
 0x215   : > { %v5700_v45 = vrot.slane %v5599_v34, 5  ;;  %v5055_v4 = vld [vmem:[#allocation2 + $0x10] sm:$0xf]  ;;  %v5124_v20 = vshrl.u32 %v5054_v21, 16  ;;  %v6711_v32 = vrot.slane %v6608_v51, 5  ;;  %v6710_v6 = vrot.slane %v6708_v54, 4 }
 0x216   : > { %v6703_v28 = vrot.slane %v6701_v43, 4  ;;  %v6702_v48 = vsel %vm10064_vm8, %v9116_v39, %v6701_v43  ;;  %v5127_v50 = vshll.u32 %v5054_v21, 16  ;;  %v5133_v31 = vshll.u32 %v5055_v4, 16  ;;  %v9734_v47 = vld [vmem:[#allocation2 + $0x18] sm:$0xff]   ;;  %v4813_v21 = vld [vmem:[#allocation2 + $0x2c] sm:$0x1] }
 0x217   : > { %v5702_v24 = vrot.slane %v5700_v45, 4  ;;  %v5701_v49 = vsel %vm10064_vm8, %v9053_v27, %v5700_v45  ;;  %v5126_v13 = vrot.slane %v5124_v20, 4  ;;  %v6712_v12 = vsel %vm10064_vm8, %v6710_v6, %v6711_v32  ;;  %v9735_v29 = vld [vmem:[#allocation2 + $0x18] sm:$0xff]   ;;  %v4809_v45 = vld [vmem:[#allocation2 + $0x24] sm:$0xf] }
 0x218   : > { %v9582_v26 = vpop.f32.mrb[4].mxu1  ;;  %v6705_v2 = vsel %vm10064_vm8, %v6703_v28, %v6704_v30  ;;  %v5137_v15 = vshrl.u32 %v5055_v4, 16  ;;  %v6709_v3 = vsel %vm10064_vm8, %v9117_v61, %v6708_v54  ;;  %v5129_v56 = vrot.slane %v5127_v50, 5  ;;  %v4816_v28 = vld [vmem:[#allocation2 + $0x30] sm:$0xf] }
 0x219   : > { %v4236_v35 = vpop.f32.mrb[5].mxu1  ;;  %v4245_v38 = vadd.f32 %v9582_v26, %v4084_v25  ;;  %v9132_v33 = vcombine.low %v6702_v48, %v6705_v2  ;;  %v5704_v19 = vsel %vm10064_vm8, %v5702_v24, %v5703_v57  ;;  %v9133_v7 = vcombine.low %v6709_v3, %v6712_v12  ;;  %v4820_v61 = vld [vmem:[#allocation2 + $0x38] sm:$0x1]  ;;  %v5603_v6 = vld [vmem:[#allocation2 + $0x20] sm:$0x1] }
 0x21a   : > { %v4237_v37 = vadd.f32 %v4236_v35, %v4076_v55  ;;  %v9583_v23 = vpop.f32.mrb[6].mxu1  ;;  %v9069_v52 = vcombine.low %v5701_v49, %v5704_v19  ;;  %v11370_v43 = vrot.slane %v5133_v31, 5  ;;  %v5130_v44 = vor.u32 %v5129_v56, %v5126_v13  ;;  %v5056_v49 = vld [vmem:[#allocation2 + $0x14] sm:$0x1]  ;;  %v5602_v19 = vld [vmem:[#allocation2 + $0x1c] sm:$0xf] }
 0x21b   : > { %v4239_v9 = vpop.f32.mrb[7].mxu1  ;;  %v4353_v18 = vmax.f32 %v4245_v38, 0.0  ;;  %v4248_v63 = vadd.f32 %v9583_v23, %v4087_v8  ;;  %6859 = vrot.lane.b32.xlu0 %v9132_v33, %s9900_s26  ;;  %v5139_v27 = vrot.slane %v5137_v15, 4  ;;  %v5601_v33 = vld [vmem:[#allocation2 + $0x18] sm:$0xe]  ;;  %v5143_v15 = vshll.u32 %v5056_v49, 16 }
 0x21c   : > { %v4351_v11 = vmax.f32 %v4237_v37, 0.0  ;;  %v4240_v42 = vadd.f32 %v4239_v9, %v4079_v59  ;;  %5853 = vrot.lane.b32.xlu1 %v9069_v52, %s9899_s25  ;;  %v9352_v5 = vpop.f32.mrb[16].mxu0  ;;  %v5131_v38 = vrot.slane %v5130_v44, 4  ;;  %v7643_v13 = vld [vmem:[#allocation2 + $0x18] sm:$0xe] }
 0x21d   : > { %v9286_v22 = vpack.c.bf16 %v4353_v18, %v4353_v18  ;;  %v4354_v16 = vmax.f32 %v4248_v63, 0.0  ;;  %v9353_v40 = vpop.f32.mrb[17].mxu0  ;;  %v5140_v52 = vor.u32 %v5139_v27, %v11370_v43  ;;  %v7644_v9 = vld [vmem:[#allocation2 + $0x1c] sm:$0xf]  ;;  %v7645_v3 = vld [vmem:[#allocation2 + $0x20] sm:$0x1] }
 0x21e   : > { %v9284_v53 = vpack.c.bf16 %v4351_v11, %v4351_v11  ;;  %v4352_v10 = vmax.f32 %v4240_v42, 0.0  ;;  %v11367_v36 = vadd.f32 %v9353_v40, %v9352_v5  ;;  %v9355_v39 = vpop.f32.mrb[18].mxu0  ;;  %v5136_v56 = vsel %vm10084_vm12, %v5131_v38, %v11370_v43  ;;  %v7101_v44 = vld [vmem:[#allocation2 + $0x20] sm:$0x1] }
 0x21f   : > { %v4527_v60 = vshrl.u32 %v9286_v22, 16  ;;  %v9287_v41 = vpack.c.bf16 %v4354_v16, %v4354_v16  ;;  %7035 = vrot.lane.b32.xlu0 %v9734_v47, %s9899_s25  ;;  %v9356_v25 = vpop.f32.mrb[19].mxu0  ;;  %v4530_v8 = vshll.u32 %v9286_v22, 16  ;;  %v5141_v12 = vrot.slane %v5140_v52, 4  ;;  %v7099_v22 = vld [vmem:[#allocation2 + $0x18] sm:$0xf] }
 0x220   : > { %v4510_v34 = vshrl.u32 %v9284_v53, 16  ;;  %v9285_v55 = vpack.c.bf16 %v4352_v10, %v4352_v10  ;;  %6029 = vrot.lane.b32.xlu1 %v9735_v29, %s9901_s27  ;;  %v11373_v62 = vadd.f32 %v9356_v25, %v9355_v39  ;;  %v4513_v24 = vshll.u32 %v9284_v53, 16  ;;  %v7100_v29 = vld [vmem:[#allocation2 + $0x1c] sm:$0xf] }
 0x221   : > { %v4529_v59 = vrot.slane %v4527_v60, 7  ;;  %v4535_v30 = vshrl.u32 %v9287_v41, 16  ;;  %v4538_v2 = vshll.u32 %v9287_v41, 16  ;;  %v5707_v47 = vrot.slane %v5602_v19, 5 }
 0x222   : > { %v4512_v51 = vrot.slane %v4510_v34, 7  ;;  %v4518_v57 = vshrl.u32 %v9285_v55, 16  ;;  %v4521_v54 = vshll.u32 %v9285_v55, 16  ;;  %v5145_v53 = vrot.slane %v5143_v15, 5 }
 0x223   : > { %v4532_v26 = vor.u32 %v4530_v8, %v4529_v59  ;;  %v4537_v48 = vrot.slane %v4535_v30, 7  ;;  %6861 = vrot.lane.b32.xlu0 %v9133_v7, %s9900_s26  ;;  %v4533_v35 = vrot.slane %v4529_v59, 4  ;;  %v9054_v10 = vrot.slane %v5601_v33, 9 }
 0x224   : > { %v4515_v4 = vor.u32 %v4513_v24, %v4512_v51  ;;  %v4520_v20 = vrot.slane %v4518_v57, 7  ;;  %v4516_v18 = vrot.slane %v4512_v51, 4  ;;  %v7741_v40 = vrot.slane %v7644_v9, 5 }
 0x225   : > { %v4817_v32 = vsel %vm10091_vm13, %v4532_v26, %v4816_v28  ;;  %v4540_v37 = vor.u32 %v4538_v2, %v4537_v48  ;;  %v4542_v23 = vrot.slane %v4537_v48, 4  ;;  %v5709_v7 = vrot.slane %v5707_v47, 4  ;;  %v5057_v28 = vld [vmem:[#allocation2 + $0x18] sm:$0xf]  ;;  %v5058_v48 = vld [vmem:[#allocation2 + $0x1c] sm:$0xf] }
 0x226   : > { %v4810_v63 = vsel %vm10091_vm13, %v4515_v4, %v4809_v45  ;;  %v4523_v50 = vor.u32 %v4521_v54, %v4520_v20  ;;  %v4525_v31 = vrot.slane %v4520_v20, 4  ;;  %4818 = vst [vmem:[#allocation2 + $0x30] sm:$0xf] %v4817_v32  ;;  %v5710_v60 = vrot.slane %v5603_v6, 5  ;;  %v5059_v20 = vld [vmem:[#allocation2 + $0x20] sm:$0x1] }
 0x227   : > { %4811 = vst [vmem:[#allocation2 + $0x24] sm:$0xf] %v4810_v63  ;;  %v4541_v11 = vsel %vm10102_vm14, %v4533_v35, %v4540_v37  ;;  %v4821_v42 = vsel %vm9977_vm3, %v4542_v23, %v4820_v61  ;;  %v9180_v41 = vrot.slane %v7643_v13, 9  ;;  %v7148_v39 = vshrl.u32 %v7099_v22, 16 }
 0x228   : > { %v4524_v16 = vsel %vm10102_vm14, %v4516_v18, %v4523_v50  ;;  %v4814_v5 = vsel %vm9977_vm3, %v4525_v31, %v4813_v21  ;;  %4822 = vst [vmem:[#allocation2 + $0x38] sm:$0x1] %v4821_v42  ;;  %4819 = vst.msk [vmem:[#allocation2 + $0x34] sm:$0xf] %vm48_vm0, %v4541_v11  ;;  %v5146_v34 = vsel %vm10084_vm12, %v5141_v12, %v5145_v53  ;;  %v7743_v55 = vrot.slane %v7741_v40, 4 }
 0x229   : > { %4812 = vst.msk [vmem:[#allocation2 + $0x28] sm:$0xf] %vm48_vm0, %v4524_v16  ;;  %4815 = vst [vmem:[#allocation2 + $0x2c] sm:$0x1] %v4814_v5  ;;  %v7744_v25 = vrot.slane %v7645_v3, 5  ;;  %v7151_v27 = vshll.u32 %v7099_v22, 16  ;;  %v9037_v45 = vcombine.low %v5136_v56, %v5146_v34  ;;  %v7742_v59 = vsel %vm10064_vm8, %v9180_v41, %v7741_v40 }
 0x22a   : > { %v7150_v43 = vrot.slane %v7148_v39, 4  ;;  %v7157_v8 = vshll.u32 %v7100_v29, 16  ;;  %v5711_v30 = vsel %vm10064_vm8, %v5709_v7, %v5710_v60  ;;  %v7161_v57 = vshrl.u32 %v7100_v29, 16 }
 0x22b   : > { %v7745_v51 = vsel %vm10064_vm8, %v7743_v55, %v7744_v25  ;;  %v7153_v24 = vrot.slane %v7151_v27, 5  ;;  %5533 = vrot.lane.b32.xlu1 %v9037_v45, %s9900_s26  ;;  %v5708_v61 = vsel %vm10064_vm8, %v9054_v10, %v5707_v47  ;;  %v7167_v26 = vshll.u32 %v7101_v44, 16 }
 0x22c   : > { %v9196_v54 = vcombine.low %v7742_v59, %v7745_v51  ;;  %v7159_v21 = vrot.slane %v7157_v8, 5  ;;  %v7163_v49 = vrot.slane %v7161_v57, 4  ;;  %v5148_v35 = vshrl.u32 %v5057_v28, 16 }
 0x22d   : > { %v7154_v2 = vor.u32 %v7153_v24, %v7150_v43  ;;  %v5151_v38 = vshll.u32 %v5057_v28, 16  ;;  %v11407_v33 = vadd.f32 %v11367_v36, %v11326_v14  ;;  %v9070_v32 = vcombine.low %v5708_v61, %v5711_v30 }
 0x22e   : > { %v6609_v4 = vld [vmem:[#allocation2 + $0x24] sm:$0xe]  ;;  %7915 = vst.msk [vmem:[#allocation3 + $0x10] sm:$0xff] %vm871_vm1, %v9196_v54  ;;  %v11412_v37 = vadd.f32 %v11373_v62, %v11326_v14  ;;  %v7164_v52 = vor.u32 %v7163_v49, %v7159_v21  ;;  %v7169_v6 = vrot.slane %v7167_v26, 5  ;;  %v5150_v50 = vrot.slane %v5148_v35, 4 }
 0x22f   : > { %v7155_v23 = vrot.slane %v7154_v2, 4  ;;  %5855 = vrot.lane.b32.xlu1 %v9070_v32, %s9899_s25  ;;  %v9118_v18 = vrot.slane %v6609_v4, 9  ;;  %v7646_v31 = vld [vmem:[#allocation2 + $0x24] sm:$0xe]  ;;  %v5153_v62 = vrot.slane %v5151_v38, 5  ;;  %v5157_v12 = vshll.u32 %v5058_v48, 16 }
 0x230   : > { %v9736_v19 = vld [vmem:[#allocation2 + $0x24] sm:$0xff]   ;;  %v6611_v9 = vld [vmem:[#allocation2 + $0x2c] sm:$0x1]  ;;  %v7165_v42 = vrot.slane %v7164_v52, 4  ;;  %v5161_v47 = vshrl.u32 %v5058_v48, 16  ;;  %v5167_v3 = vshll.u32 %v5059_v20, 16 }
 0x231   : > { %v6610_v13 = vld [vmem:[#allocation2 + $0x28] sm:$0xf]  ;;  %7037 = vrot.lane.b32.xlu0 %v9736_v19, %s9899_s25  ;;  %v6718_v63 = vrot.slane %v6611_v9, 5  ;;  %v7160_v11 = vsel %vm10084_vm12, %v7155_v23, %v7159_v21  ;;  %v7648_v56 = vld [vmem:[#allocation2 + $0x2c] sm:$0x1]  ;;  %v5154_v40 = vor.u32 %v5153_v62, %v5150_v50  ;;  %v5159_v29 = vrot.slane %v5157_v12, 5 }
 0x232   : > { %v6715_v36 = vrot.slane %v6610_v13, 5  ;;  %v7647_v15 = vld [vmem:[#allocation2 + $0x28] sm:$0xf]  ;;  %v7170_v10 = vsel %vm10084_vm12, %v7165_v42, %v7169_v6  ;;  %v9181_v7 = vrot.slane %v7646_v31, 9  ;;  %v5163_v34 = vrot.slane %v5161_v47, 4 }
 0x233   : > { %v9738_v22 = vld [vmem:[#allocation2 + $0x24] sm:$0xff]   ;;  %v9358_v53 = vpop.f32.mrb[20].mxu0  ;;  %v9164_v41 = vcombine.low %v7160_v11, %v7170_v10  ;;  %v5169_v55 = vrot.slane %v5167_v3, 5  ;;  %v5155_v43 = vrot.slane %v5154_v40, 4  ;;  %v7748_v8 = vrot.slane %v7647_v15, 5 }
 0x234   : > { %v6716_v16 = vsel %vm10064_vm8, %v9118_v18, %v6715_v36  ;;  %v6717_v5 = vrot.slane %v6715_v36, 4  ;;  %v9359_v60 = vpop.f32.mrb[21].mxu0  ;;  %6031 = vrot.lane.b32.xlu1 %v9738_v22, %s9901_s27  ;;  %v5604_v25 = vld [vmem:[#allocation2 + $0x24] sm:$0xe]  ;;  %v5605_v28 = vld [vmem:[#allocation2 + $0x28] sm:$0xf]  ;;  %v5164_v51 = vor.u32 %v5163_v34, %v5159_v29 }
 0x235   : > { %v9360_v44 = vadd.f32 %v9359_v60, %v9358_v53  ;;  %v9361_v27 = vpop.f32.mrb[22].mxu0  ;;  %v7933_v45 = vld [vmem:[#allocation3 + $0x10] sm:$0xff]  ;;  %7579 = vrot.lane.b32.xlu0 %v9164_v41, %s9901_s27  ;;  %v7751_v24 = vrot.slane %v7648_v56, 5  ;;  %v9055_v61 = vrot.slane %v5604_v25, 9  ;;  %v5714_v54 = vrot.slane %v5605_v28, 5 }
 0x236   : > { %v6719_v39 = vsel %vm10064_vm8, %v6717_v5, %v6718_v63  ;;  %v9362_v30 = vpop.f32.mrb[23].mxu0  ;;  %9612 = vmatprep.mubr.msk.bf16.mxu0 %vm871_vm1, %v7933_v45  ;;  %v5606_v57 = vld [vmem:[#allocation2 + $0x2c] sm:$0x1]  ;;  %v5160_v48 = vsel %vm10084_vm12, %v5155_v43, %v5159_v29  ;;  %v7749_v2 = vsel %vm10064_vm8, %v9181_v7, %v7748_v8  ;;  %v7102_v49 = vld [vmem:[#allocation2 + $0x24] sm:$0xf]  ;;  %v5165_v20 = vrot.slane %v5164_v51, 4 }
 0x237   : > { %v9134_v59 = vcombine.low %v6716_v16, %v6719_v39  ;;  %v4100_v21 = vadd.f32 %v9360_v44, %v11326_v14  ;;  %v9363_v26 = vadd.f32 %v9362_v30, %v9361_v27  ;;  %v7103_v4 = vld [vmem:[#allocation2 + $0x28] sm:$0xf]  ;;  %v7750_v35 = vrot.slane %v7748_v8, 4  ;;  %v7104_v18 = vld [vmem:[#allocation2 + $0x2c] sm:$0x1]  ;;  %v9740_v5 = vld [vmem:[#allocation2 + $0x30] sm:$0xff]  }
 0x238   : > { %v5715_v38 = vsel %vm10064_vm8, %v9055_v61, %v5714_v54  ;;  %v5716_v19 = vrot.slane %v5714_v54, 4  ;;  %v5717_v23 = vrot.slane %v5606_v57, 5  ;;  %v7172_v52 = vshrl.u32 %v7102_v49, 16  ;;  %v7649_v50 = vld [vmem:[#allocation2 + $0x30] sm:$0xe] }
 0x239   : > { %v4103_v32 = vadd.f32 %v9363_v26, %v11326_v14  ;;  %v7175_v6 = vshll.u32 %v7102_v49, 16  ;;  %6863 = vrot.lane.b32.xlu0 %v9134_v59, %s9900_s26  ;;  %v5170_v13 = vsel %vm10084_vm12, %v5165_v20, %v5169_v55  ;;  %v7752_v9 = vsel %vm10064_vm8, %v7750_v35, %v7751_v24  ;;  %v7650_v15 = vld [vmem:[#allocation2 + $0x34] sm:$0xf]  ;;  %v11456_v20 = vld [vmem:[#allocation2 + $0x30] sm:$0xe] }
 0x23a   : > { %v7181_v36 = vshll.u32 %v7103_v4, 16  ;;  %v7185_v63 = vshrl.u32 %v7103_v4, 16  ;;  %v9038_v11 = vcombine.low %v5160_v48, %v5170_v13  ;;  %v9197_v42 = vcombine.low %v7749_v2, %v7752_v9  ;;  %v9741_v4 = vld [vmem:[#allocation2 + $0x30] sm:$0xff]   ;;  %v4823_v35 = vld [vmem:[#allocation2 + $0x3c] sm:$0xf] }
 0x23b   : > { %v9586_v31 = vpop.f32.mrb[8].mxu1  ;;  %v5718_v62 = vsel %vm10064_vm8, %v5716_v19, %v5717_v23  ;;  %v7174_v12 = vrot.slane %v7172_v52, 4  ;;  %v7177_v3 = vrot.slane %v7175_v6, 5  ;;  %v7191_v29 = vshll.u32 %v7104_v18, 16  ;;  %v4830_v19 = vld [vmem:[#allocation2 + $0x48] sm:$0xf] }
 0x23c   : > { %v4252_v22 = vpop.f32.mrb[9].mxu1  ;;  %v4261_v16 = vadd.f32 %v9586_v31, %v4100_v21  ;;  %v9071_v47 = vcombine.low %v5715_v38, %v5718_v62  ;;  %v7183_v56 = vrot.slane %v7181_v36, 5  ;;  %5535 = vrot.lane.b32.xlu1 %v9038_v11, %s9900_s26  ;;  %7916 = vst.msk [vmem:[#allocation3 + $0x28] sm:$0xff] %vm871_vm1, %v9197_v42  ;;  %v7187_v40 = vrot.slane %v7185_v63, 4  ;;  %v7651_v21 = vld [vmem:[#allocation2 + $0x38] sm:$0x1] }
 0x23d   : > { %v4253_v53 = vadd.f32 %v4252_v22, %v11407_v33  ;;  %v9587_v10 = vpop.f32.mrb[10].mxu1  ;;  %v9182_v7 = vrot.slane %v7649_v50, 9  ;;  %7039 = vrot.lane.b32.xlu0 %v9740_v5, %s9899_s25  ;;  %v7178_v34 = vor.u32 %v7177_v3, %v7174_v12  ;;  %v7755_v55 = vrot.slane %v7650_v15, 5  ;;  %v4834_v36 = vld [vmem:[#allocation2 + $0x50] sm:$0x1] }
 0x23e   : > { %v4255_v60 = vpop.f32.mrb[11].mxu1  ;;  %v4357_v41 = vmax.f32 %v4261_v16, 0.0  ;;  %v4264_v39 = vadd.f32 %v9587_v10, %v4103_v32  ;;  %v7188_v27 = vor.u32 %v7187_v40, %v7183_v56  ;;  %v7193_v33 = vrot.slane %v7191_v29, 5  ;;  %v6613_v50 = vld [vmem:[#allocation2 + $0x34] sm:$0xf] }
 0x23f   : > { %v4355_v25 = vmax.f32 %v4253_v53, 0.0  ;;  %v4256_v44 = vadd.f32 %v4255_v60, %v11412_v37  ;;  %v7179_v43 = vrot.slane %v7178_v34, 4  ;;  %v11449_v8 = vsel %vm10064_vm8, %v9182_v7, %v7755_v55  ;;  %v4827_v31 = vld [vmem:[#allocation2 + $0x44] sm:$0x1]  ;;  %v6614_v12 = vld [vmem:[#allocation2 + $0x38] sm:$0x1] }
 0x240   : > { %v9290_v45 = vpack.c.bf16 %v4357_v41, %v4357_v41  ;;  %v4358_v59 = vmax.f32 %v4264_v39, 0.0  ;;  %5857 = vrot.lane.b32.xlu1 %v9071_v47, %s9899_s25  ;;  %v7189_v51 = vrot.slane %v7188_v27, 4  ;;  %v7757_v24 = vrot.slane %v7755_v55, 4  ;;  %v5061_v60 = vld [vmem:[#allocation2 + $0x28] sm:$0xf]  ;;  %v9754_v27 = vld [vmem:[#allocation2] sm:$0xff]  }
 0x241   : > { %v9288_v28 = vpack.c.bf16 %v4355_v25, %v4355_v25  ;;  %v4356_v30 = vmax.f32 %v4256_v44, 0.0  ;;  %v7184_v37 = vsel %vm10084_vm12, %v7179_v43, %v7183_v56  ;;  %v7758_v63 = vrot.slane %v7651_v21, 5  ;;  %v5060_v56 = vld [vmem:[#allocation2 + $0x24] sm:$0xf]  ;;  %v5062_v41 = vld [vmem:[#allocation2 + $0x2c] sm:$0x1] }
 0x242   : > { %v4561_v57 = vshrl.u32 %v9290_v45, 16  ;;  %v4564_v61 = vshll.u32 %v9290_v45, 16  ;;  %v9291_v54 = vpack.c.bf16 %v4358_v59, %v4358_v59  ;;  %v7194_v49 = vsel %vm10084_vm12, %v7189_v51, %v7193_v33  ;;  %5035 = vst.msk [vmem:[#allocation3] sm:$0xff] %vm871_vm1, %v9754_v27 }
 0x243   : > { %v4544_v26 = vshrl.u32 %v9288_v28, 16  ;;  %v4547_v48 = vshll.u32 %v9288_v28, 16  ;;  %v9289_v2 = vpack.c.bf16 %v4356_v30, %v4356_v30  ;;  %v7936_v52 = vld [vmem:[#allocation3 + $0x28] sm:$0xff]  ;;  %v9165_v6 = vcombine.low %v7184_v37, %v7194_v49 }
 0x244   : > { %v4563_v38 = vrot.slane %v4561_v57, 7  ;;  %v4569_v32 = vshrl.u32 %v9291_v54, 16  ;;  %v4572_v23 = vshll.u32 %v9291_v54, 16  ;;  %9613 = vmatmul.mubr.msk.bf16.vlgmr.msra.gmra.mrb[64].mxu0 %vm871_vm1, %v7936_v52  ;;  %6033 = vrot.lane.b32.xlu1 %v9741_v4, %s9901_s27  ;;  %v9119_v15 = vrot.slane %v11456_v20, 9  ;;  %v5607_v57 = vld [vmem:[#allocation2 + $0x30] sm:$0xe] }
 0x245   : > { %v4546_v13 = vrot.slane %v4544_v26, 7  ;;  %v4552_v9 = vshrl.u32 %v9289_v2, 16  ;;  %v4555_v18 = vshll.u32 %v9289_v2, 16  ;;  %7581 = vrot.lane.b32.xlu0 %v9165_v6, %s9901_s27  ;;  %v7759_v3 = vsel %vm10064_vm8, %v7757_v24, %v7758_v63 }
 0x246   : > { %v4566_v11 = vor.u32 %v4564_v61, %v4563_v38  ;;  %v4567_v42 = vrot.slane %v4563_v38, 4  ;;  %v4571_v62 = vrot.slane %v4569_v32, 7  ;;  %v9198_v7 = vcombine.low %v11449_v8, %v7759_v3  ;;  %v5532_v61 = vpop.permute.xlu1 %5531  ;;  %v5609_v38 = vld [vmem:[#allocation2 + $0x38] sm:$0x1] }
 0x247   : > { %v4549_v22 = vor.u32 %v4547_v48, %v4546_v13  ;;  %v4550_v16 = vrot.slane %v4546_v13, 4  ;;  %v4554_v5 = vrot.slane %v4552_v9, 7  ;;  %v6722_v43 = vrot.slane %v6613_v50, 5  ;;  %v5608_v48 = vld [vmem:[#allocation2 + $0x34] sm:$0xf]  ;;  %5579 = vst.msk [vmem:[#allocation3] sm:$0xff] %vm1419_vm15, %v5532_v61 }
 0x248   : > { %v9364_v47 = vpop.f32.mrb[24].mxu0  ;;  %v4831_v53 = vsel %vm10091_vm13, %v4566_v11, %v4830_v19  ;;  %v4574_v10 = vor.u32 %v4572_v23, %v4571_v62  ;;  %v4576_v40 = vrot.slane %v4571_v62, 4  ;;  %7917 = vst.msk [vmem:[#allocation3 + $0x40] sm:$0xff] %vm871_vm1, %v9198_v7  ;;  %v6725_v8 = vrot.slane %v6614_v12, 5  ;;  %v4837_v61 = vld [vmem:[#allocation2 + $0x54] sm:$0xf] }
 0x249   : > { %v9365_v29 = vpop.f32.mrb[25].mxu0  ;;  %v4824_v39 = vsel %vm10091_vm13, %v4549_v22, %v4823_v35  ;;  %v4557_v34 = vor.u32 %v4555_v18, %v4554_v5  ;;  %v4559_v55 = vrot.slane %v4554_v5, 4  ;;  %4832 = vst [vmem:[#allocation2 + $0x48] sm:$0xf] %v4831_v53  ;;  %v6723_v54 = vsel %vm10064_vm8, %v9119_v15, %v6722_v43 }
 0x24a   : > { %v9366_v25 = vadd.f32 %v9365_v29, %v9364_v47  ;;  %v9367_v44 = vpop.f32.mrb[26].mxu0  ;;  %4825 = vst [vmem:[#allocation2 + $0x3c] sm:$0xf] %v4824_v39  ;;  %v4575_v33 = vsel %vm10102_vm14, %v4567_v42, %v4574_v10  ;;  %v4835_v45 = vsel %vm9977_vm3, %v4576_v40, %v4834_v36  ;;  %v6724_v37 = vrot.slane %v6722_v43, 4  ;;  %v5852_v27 = vpop.permute.xlu1 %5851 }
 0x24b   : > { %v9368_v59 = vpop.f32.mrb[27].mxu0  ;;  %v4558_v28 = vsel %vm10102_vm14, %v4550_v16, %v4557_v34  ;;  %v4828_v30 = vsel %vm9977_vm3, %v4559_v55, %v4827_v31  ;;  %4836 = vst [vmem:[#allocation2 + $0x50] sm:$0x1] %v4835_v45  ;;  %4833 = vst.msk [vmem:[#allocation2 + $0x4c] sm:$0xf] %vm48_vm0, %v4575_v33  ;;  %v5172_v21 = vshrl.u32 %v5060_v56, 16 }
 0x24c   : > { %v9369_v51 = vadd.f32 %v9368_v59, %v9367_v44  ;;  %v4108_v24 = vadd.f32 %v9366_v25, %v11326_v14  ;;  %4826 = vst.msk [vmem:[#allocation2 + $0x40] sm:$0xf] %vm48_vm0, %v4558_v28  ;;  %4829 = vst [vmem:[#allocation2 + $0x44] sm:$0x1] %v4828_v30  ;;  %v5175_v26 = vshll.u32 %v5060_v56, 16  ;;  %v5181_v4 = vshll.u32 %v5061_v60, 16 }
 0x24d   : > { %v5185_v20 = vshrl.u32 %v5061_v60, 16  ;;  %v5191_v35 = vshll.u32 %v5062_v41, 16  ;;  %v6726_v32 = vsel %vm10064_vm8, %v6724_v37, %v6725_v8  ;;  %v5174_v23 = vrot.slane %v5172_v21, 4  ;;  %v11488_v31 = vld [vmem:[#allocation2 + $0x30] sm:$0xf]  ;;  %5899 = vst.msk [vmem:[#allocation3] sm:$0xff] %vm1743_vm5, %v5852_v27 }
 0x24e   : > { %v4111_v49 = vadd.f32 %v9369_v51, %v11326_v14  ;;  %v5177_v52 = vrot.slane %v5175_v26, 5  ;;  %v9056_v6 = vrot.slane %v5607_v57, 9  ;;  %v9135_v36 = vcombine.low %v6723_v54, %v6726_v32 }
 0x24f   : > { %v9590_v2 = vpop.f32.mrb[12].mxu1  ;;  %v5183_v63 = vrot.slane %v5181_v4, 5  ;;  %v5187_v50 = vrot.slane %v5185_v20, 4  ;;  %v5193_v62 = vrot.slane %v5191_v35, 5  ;;  %v5721_v15 = vrot.slane %v5608_v48, 5  ;;  %v7939_v47 = vld [vmem:[#allocation3 + $0x40] sm:$0xff] }
 0x250   : > { %v4268_v19 = vpop.f32.mrb[13].mxu1  ;;  %v5178_v42 = vor.u32 %v5177_v52, %v5174_v23  ;;  %v5724_v22 = vrot.slane %v5609_v38, 5  ;;  %6865 = vrot.lane.b32.xlu0 %v9135_v36, %s9900_s26  ;;  %9616 = vmatprep.mubr.msk.bf16.mxu0 %vm871_vm1, %v7939_v47  ;;  %v7196_v41 = vshrl.u32 %v11488_v31, 16  ;;  %v11505_v48 = vld [vmem:[#allocation2 + $0x34] sm:$0xf] }
 0x251   : > { %v4269_v13 = vadd.f32 %v4268_v19, %v4108_v24  ;;  %v9591_v9 = vpop.f32.mrb[14].mxu1  ;;  %v9370_v18 = vpop.f32.mrb[28].mxu0  ;;  %v5188_v3 = vor.u32 %v5187_v50, %v5183_v63  ;;  %v5722_v29 = vsel %vm10064_vm8, %v9056_v6, %v5721_v15  ;;  %v5723_v7 = vrot.slane %v5721_v15, 4  ;;  %v7652_v60 = vld [vmem:[#allocation2 + $0x3c] sm:$0xe] }
 0x252   : > { %v4271_v11 = vpop.f32.mrb[15].mxu1  ;;  %v9371_v12 = vpop.f32.mrb[29].mxu0  ;;  %v5179_v10 = vrot.slane %v5178_v42, 4  ;;  %v9183_v28 = vrot.slane %v7652_v60, 9  ;;  %v7198_v23 = vrot.slane %v7196_v41, 4  ;;  %v7199_v42 = vshll.u32 %v11488_v31, 16 }
 0x253   : > { %v4359_v16 = vmax.f32 %v4269_v13, 0.0  ;;  %v4272_v5 = vadd.f32 %v4271_v11, %v4111_v49  ;;  %v9372_v56 = vadd.f32 %v9371_v12, %v9370_v18  ;;  %v9373_v53 = vpop.f32.mrb[30].mxu0  ;;  %v5189_v55 = vrot.slane %v5188_v3, 4  ;;  %v9742_v44 = vld [vmem:[#allocation2 + $0x3c] sm:$0xff]   ;;  %v7654_v8 = vld [vmem:[#allocation2 + $0x44] sm:$0x1] }
 0x254   : > { %v9374_v40 = vpop.f32.mrb[31].mxu0  ;;  %v5184_v33 = vsel %vm10084_vm12, %v5179_v10, %v5183_v63  ;;  %v5725_v59 = vsel %vm10064_vm8, %v5723_v7, %v5724_v22  ;;  %v7653_v43 = vld [vmem:[#allocation2 + $0x40] sm:$0xf]  ;;  %7041 = vrot.lane.b32.xlu0 %v9742_v44, %s9899_s25  ;;  %v7765_v32 = vrot.slane %v7654_v8, 5  ;;  %v4841_v36 = vld [vmem:[#allocation2 + $0x5c] sm:$0x1] }
 0x255   : > { %v9292_v39 = vpack.c.bf16 %v4359_v16, %v4359_v16  ;;  %v4360_v34 = vmax.f32 %v4272_v5, 0.0  ;;  %v4116_v25 = vadd.f32 %v9372_v56, %v11326_v14  ;;  %v9375_v45 = vadd.f32 %v9374_v40, %v9373_v53  ;;  %v7107_v22 = vld [vmem:[#allocation2 + $0x38] sm:$0x1]  ;;  %v6615_v10 = vld [vmem:[#allocation2 + $0x3c] sm:$0xe] }
 0x256   : > { %v5194_v57 = vsel %vm10084_vm12, %v5189_v55, %v5193_v62  ;;  %v9072_v26 = vcombine.low %v5722_v29, %v5725_v59  ;;  %v7762_v35 = vrot.slane %v7653_v43, 5  ;;  %v7205_v16 = vshll.u32 %v11505_v48, 16  ;;  %v4844_v41 = vld [vmem:[#allocation2 + $0x60] sm:$0xf]  ;;  %v6617_v43 = vld [vmem:[#allocation2 + $0x44] sm:$0x1] }
 0x257   : > { %v4578_v30 = vshrl.u32 %v9292_v39, 16  ;;  %v4581_v51 = vshll.u32 %v9292_v39, 16  ;;  %v9293_v24 = vpack.c.bf16 %v4360_v34, %v4360_v34  ;;  %v9039_v54 = vcombine.low %v5184_v33, %v5194_v57  ;;  %v9743_v55 = vld [vmem:[#allocation2 + $0x3c] sm:$0xff]   ;;  %v4848_v8 = vld [vmem:[#allocation2 + $0x68] sm:$0x1] }
 0x258   : > { %v4277_v37 = vadd.f32 %v9590_v2, %v4116_v25  ;;  %v4119_v21 = vadd.f32 %v9375_v45, %v11326_v14  ;;  %v7763_v2 = vsel %vm10064_vm8, %v9183_v28, %v7762_v35  ;;  %v7764_v11 = vrot.slane %v7762_v35, 4  ;;  %v6616_v25 = vld [vmem:[#allocation2 + $0x40] sm:$0xf]  ;;  %v5063_v57 = vld [vmem:[#allocation2 + $0x30] sm:$0xf] }
 0x259   : > { %v4580_v49 = vrot.slane %v4578_v30, 7  ;;  %v4586_v4 = vshrl.u32 %v9293_v24, 16  ;;  %v4589_v20 = vshll.u32 %v9293_v24, 16  ;;  %5537 = vrot.lane.b32.xlu1 %v9039_v54, %s9900_s26  ;;  %v11512_v18 = vpop.f32.mrb[16].mxu1  ;;  %v7201_v34 = vrot.slane %v7199_v42, 5 }
 0x25a   : > { %v4361_v38 = vmax.f32 %v4277_v37, 0.0  ;;  %v4280_v19 = vadd.f32 %v9591_v9, %v4119_v21  ;;  %v11522_v47 = vpop.f32.mrb[17].mxu1  ;;  %v7766_v31 = vsel %vm10064_vm8, %v7764_v11, %v7765_v32  ;;  %v11538_v59 = vrot.slane %v7205_v16, 5  ;;  %v5610_v11 = vld [vmem:[#allocation2 + $0x3c] sm:$0xe] }
 0x25b   : > { %v4583_v52 = vor.u32 %v4581_v51, %v4580_v49  ;;  %v4584_v6 = vrot.slane %v4580_v49, 4  ;;  %v4588_v13 = vrot.slane %v4586_v4, 7  ;;  %v11510_v14 = vpop.f32.mrb[32].mxu0  ;;  %v11529_v29 = vpop.f32.mrb[18].mxu1  ;;  %v9199_v39 = vcombine.low %v7763_v2, %v7766_v31  ;;  %v5064_v49 = vld [vmem:[#allocation2 + $0x34] sm:$0xf] }
 0x25c   : > { %v9294_v63 = vpack.c.bf16 %v4361_v38, %v4361_v38  ;;  %v4362_v50 = vmax.f32 %v4280_v19, 0.0  ;;  %v11515_v62 = vpop.f32.mrb[33].mxu0  ;;  %v11535_v44 = vpop.f32.mrb[19].mxu1  ;;  %v7202_v28 = vor.u32 %v7201_v34, %v7198_v23  ;;  %v7209_v30 = vshrl.u32 %v11505_v48, 16  ;;  %v9757_v4 = vld [vmem:[%s12990_s3] sm:$0xff]  }
 0x25d   : > { %v4838_v9 = vsel %vm10091_vm13, %v4583_v52, %v4837_v61  ;;  %v4591_v12 = vor.u32 %v4589_v20, %v4588_v13  ;;  %v4593_v15 = vrot.slane %v4588_v13, 4  ;;  %v11520_v5 = vpop.f32.mrb[34].mxu0  ;;  %5859 = vrot.lane.b32.xlu1 %v9072_v26, %s9899_s25  ;;  %7918 = vst.msk [vmem:[#allocation3 + $0x58] sm:$0xff] %vm871_vm1, %v9199_v39  ;;  %v7215_v51 = vshll.u32 %v7107_v22, 16  ;;  %v9755_v61 = vld [vmem:[%s12990_s3 + $0x40] sm:$0xff]  }
 0x25e   : > { %4839 = vst [vmem:[#allocation2 + $0x54] sm:$0xf] %v4838_v9  ;;  %v4595_v3 = vshrl.u32 %v9294_v63, 16  ;;  %v4598_v56 = vshll.u32 %v9294_v63, 16  ;;  %v9295_v53 = vpack.c.bf16 %v4362_v50, %v4362_v50  ;;  %v11527_v40 = vpop.f32.mrb[35].mxu0  ;;  %v9120_v24 = vrot.slane %v6615_v10, 9  ;;  %9442 = vmatprep.subr.bf16.mxu1 %v9755_v61 }
 0x25f   : > { %v4592_v7 = vsel %vm10102_vm14, %v4584_v6, %v4591_v12  ;;  %v4842_v60 = vsel %vm9977_vm3, %v4593_v15, %v4841_v36  ;;  %v6729_v26 = vrot.slane %v6616_v25, 5  ;;  %v7203_v20 = vrot.slane %v7202_v28, 4  ;;  %9443 = vmatpush3.bf16.msra.mxu1 %v9757_v4  ;;  %v5065_v63 = vld [vmem:[#allocation2 + $0x38] sm:$0x1]  ;;  %v5611_v22 = vld [vmem:[#allocation2 + $0x40] sm:$0xf] }
 0x260   : > { %4840 = vst.msk [vmem:[#allocation2 + $0x58] sm:$0xf] %vm48_vm0, %v4592_v7  ;;  %4843 = vst [vmem:[#allocation2 + $0x5c] sm:$0x1] %v4842_v60  ;;  %v4597_v27 = vrot.slane %v4595_v3, 7  ;;  %v4603_v33 = vshrl.u32 %v9295_v53, 16 }
 0x261   : > { %v4606_v45 = vshll.u32 %v9295_v53, 16  ;;  %6035 = vrot.lane.b32.xlu1 %v9743_v55, %s9901_s27  ;;  %v7211_v48 = vrot.slane %v7209_v30, 4  ;;  %v7217_v35 = vrot.slane %v7215_v51, 5  ;;  %v6732_v38 = vrot.slane %v6617_v43, 5  ;;  %v5612_v16 = vld [vmem:[#allocation2 + $0x44] sm:$0x1] }
 0x262   : > { %v4600_v54 = vor.u32 %v4598_v56, %v4597_v27  ;;  %v4601_v37 = vrot.slane %v4597_v27, 4  ;;  %v4605_v21 = vrot.slane %v4603_v33, 7  ;;  %v11553_v52 = vsel %vm10064_vm8, %v9120_v24, %v6729_v26  ;;  %v7655_v10 = vld [vmem:[#allocation2 + $0x48] sm:$0xe]  ;;  %v7656_v7 = vld [vmem:[#allocation2 + $0x4c] sm:$0xf] }
 0x263   : > { %v11555_v6 = vpop.f32.mrb[36].mxu0  ;;  %v7208_v13 = vsel %vm10084_vm12, %v7203_v20, %v11538_v59  ;;  %v7212_v2 = vor.u32 %v7211_v48, %v11538_v59  ;;  %v6731_v36 = vrot.slane %v6729_v26, 4  ;;  %v5196_v50 = vshrl.u32 %v5063_v57, 16 }
 0x264   : > { %v4845_v19 = vsel %vm10091_vm13, %v4600_v54, %v4844_v41  ;;  %v4608_v32 = vor.u32 %v4606_v45, %v4605_v21  ;;  %v4610_v23 = vrot.slane %v4605_v21, 4  ;;  %v5199_v12 = vshll.u32 %v5063_v57, 16  ;;  %v11568_v60 = vpop.f32.mrb[37].mxu0  ;;  %v7942_v41 = vld [vmem:[#allocation3 + $0x58] sm:$0xff] }
 0x265   : > { %4846 = vst [vmem:[#allocation2 + $0x60] sm:$0xf] %v4845_v19  ;;  %v5205_v15 = vshll.u32 %v5064_v49, 16  ;;  %v7213_v3 = vrot.slane %v7212_v2, 4  ;;  %v6733_v56 = vsel %vm10064_vm8, %v6731_v36, %v6732_v38  ;;  %v5198_v53 = vrot.slane %v5196_v50, 4  ;;  %v11571_v27 = vpop.f32.mrb[38].mxu0  ;;  %9617 = vmatmul.mubr.msk.bf16.gmra.mrb[68].mxu0 %vm871_vm1, %v7942_v41 }
 0x266   : > { %v4609_v42 = vsel %vm10102_vm14, %v4601_v37, %v4608_v32  ;;  %v4849_v9 = vsel %vm9977_vm3, %v4610_v23, %v4848_v8  ;;  %v5209_v31 = vshrl.u32 %v5064_v49, 16  ;;  %v9136_v39 = vcombine.low %v11553_v52, %v6733_v56  ;;  %v11580_v8 = vpop.f32.mrb[39].mxu0  ;;  %v11585_v37 = vld [vmem:[%s12989_s2] ss:$0 sm:$0xff]  ;;  %v6618_v56 = vld [vmem:[#allocation2 + $0x48] sm:$0xe] }
 0x267   : > { %4850 = vst [vmem:[#allocation2 + $0x68] sm:$0x1] %v4849_v9  ;;  %4847 = vst.msk [vmem:[#allocation2 + $0x64] sm:$0xf] %vm48_vm0, %v4609_v42  ;;  %v5201_v34 = vrot.slane %v5199_v12, 5  ;;  %v5207_v55 = vrot.slane %v5205_v15, 5  ;;  %v7218_v33 = vsel %vm10084_vm12, %v7213_v3, %v7217_v35  ;;  %v9378_v59 = vadd.f32 %v11515_v62, %v11510_v14 }
 0x268   : > { %v5215_v25 = vshll.u32 %v5065_v63, 16  ;;  %v5211_v45 = vrot.slane %v5209_v31, 4  ;;  %v9381_v43 = vadd.f32 %v11527_v40, %v11520_v5  ;;  %v9166_v28 = vcombine.low %v7208_v13, %v7218_v33  ;;  %v7657_v5 = vld [vmem:[#allocation2 + $0x50] sm:$0x1]  ;;  %v7108_v35 = vld [vmem:[#allocation2 + $0x3c] sm:$0xf] }
 0x269   : > { %v5202_v30 = vor.u32 %v5201_v34, %v5198_v53  ;;  %v9057_v24 = vrot.slane %v5610_v11, 9  ;;  %v5728_v61 = vrot.slane %v5611_v22, 5  ;;  %v5731_v54 = vrot.slane %v5612_v16, 5  ;;  %v7109_v52 = vld [vmem:[#allocation2 + $0x40] sm:$0xf]  ;;  %v9744_v11 = vld [vmem:[#allocation2 + $0x48] sm:$0xff]  }
 0x26a   : > { %v5217_v51 = vrot.slane %v5215_v25, 5  ;;  %v5212_v57 = vor.u32 %v5211_v45, %v5207_v55  ;;  %v4124_v21 = vadd.f32 %v11585_v37, %v9378_v59  ;;  %7583 = vrot.lane.b32.xlu0 %v9166_v28, %s9901_s27  ;;  %v4127_v62 = vadd.f32 %v11585_v37, %v9381_v43  ;;  %v7110_v22 = vld [vmem:[#allocation2 + $0x44] sm:$0x1]  ;;  %v6619_v41 = vld [vmem:[#allocation2 + $0x4c] sm:$0xf]  ;;  %v11610_v59 = vpop.f32.mrb[20].mxu1 }
 0x26b   : > { %v5203_v14 = vrot.slane %v5202_v30, 4  ;;  %v9184_v40 = vrot.slane %v7655_v10, 9  ;;  %v7769_v26 = vrot.slane %v7656_v7, 5  ;;  %v5729_v4 = vsel %vm10064_vm8, %v9057_v24, %v5728_v61  ;;  %v11598_v13 = vpop.f32.mrb[40].mxu0  ;;  %v4851_v43 = vld [vmem:[#allocation2 + $0x6c] sm:$0xf] }
 0x26c   : > { %v5213_v49 = vrot.slane %v5212_v57, 4  ;;  %v5730_v20 = vrot.slane %v5728_v61, 4  ;;  %v4285_v48 = vadd.f32 %v11522_v47, %v4124_v21  ;;  %v4288_v19 = vadd.f32 %v11535_v44, %v4127_v62  ;;  %v11608_v45 = vpop.f32.mrb[41].mxu0  ;;  %v5066_v57 = vld [vmem:[#allocation2 + $0x3c] sm:$0xf] }
 0x26d   : > { %v5208_v38 = vsel %vm10084_vm12, %v5203_v14, %v5207_v55  ;;  %v7770_v32 = vsel %vm10064_vm8, %v9184_v40, %v7769_v26  ;;  %v7771_v23 = vrot.slane %v7769_v26, 4  ;;  %v7772_v63 = vrot.slane %v7657_v5, 5  ;;  %v11614_v61 = vpop.f32.mrb[42].mxu0 }
 0x26e   : > { %v5218_v2 = vsel %vm10084_vm12, %v5213_v49, %v5217_v51  ;;  %v5732_v36 = vsel %vm10064_vm8, %v5730_v20, %v5731_v54  ;;  %v4363_v47 = vmax.f32 %v4285_v48, 0.0  ;;  %6867 = vrot.lane.b32.xlu0 %v9136_v39, %s9900_s26  ;;  %v4364_v42 = vmax.f32 %v4288_v19, 0.0  ;;  %v6620_v39 = vld [vmem:[#allocation2 + $0x50] sm:$0x1]  ;;  %v11616_v5 = vpop.f32.mrb[43].mxu0  ;;  %v11619_v20 = vpop.f32.mrb[21].mxu1 }
 0x26f   : > { %v9040_v50 = vcombine.low %v5208_v38, %v5218_v2  ;;  %v9073_v44 = vcombine.low %v5729_v4, %v5732_v36  ;;  %v7220_v9 = vshrl.u32 %v7108_v35, 16  ;;  %v7773_v15 = vsel %vm10064_vm8, %v7771_v23, %v7772_v63  ;;  %v4855_v38 = vld [vmem:[#allocation2 + $0x74] sm:$0x1]  ;;  %v5067_v63 = vld [vmem:[#allocation2 + $0x40] sm:$0xf] }
 0x270   : > { %v9296_v12 = vpack.c.bf16 %v4363_v47, %v4363_v47  ;;  %v7223_v16 = vshll.u32 %v7108_v35, 16  ;;  %v7229_v3 = vshll.u32 %v7109_v52, 16  ;;  %v9297_v53 = vpack.c.bf16 %v4364_v42, %v4364_v42  ;;  %v5068_v42 = vld [vmem:[#allocation2 + $0x44] sm:$0x1] }
 0x271   : > { %5539 = vrot.lane.b32.xlu1 %v9040_v50, %s9900_s26  ;;  %v9200_v31 = vcombine.low %v7770_v32, %v7773_v15  ;;  %v7222_v10 = vrot.slane %v7220_v9, 4  ;;  %v7233_v7 = vshrl.u32 %v7109_v52, 16  ;;  %v7239_v24 = vshll.u32 %v7110_v22, 16  ;;  %v9745_v32 = vld [vmem:[#allocation2 + $0x48] sm:$0xff]   ;;  %v11623_v50 = vpop.f32.mrb[22].mxu1 }
 0x272   : > { %v4612_v34 = vshrl.u32 %v9296_v12, 16  ;;  %v4615_v55 = vshll.u32 %v9296_v12, 16  ;;  %v7225_v25 = vrot.slane %v7223_v16, 5  ;;  %v7231_v33 = vrot.slane %v7229_v3, 5  ;;  %7043 = vrot.lane.b32.xlu0 %v9744_v11, %s9899_s25  ;;  %v11629_v15 = vpop.f32.mrb[23].mxu1 }
 0x273   : > { %v4620_v28 = vshrl.u32 %v9297_v53, 16  ;;  %v4623_v30 = vshll.u32 %v9297_v53, 16  ;;  %7919 = vst.msk [vmem:[#allocation3 + $0x70] sm:$0xff] %vm871_vm1, %v9200_v31  ;;  %v7235_v51 = vrot.slane %v7233_v7, 4  ;;  %v9121_v14 = vrot.slane %v6618_v56, 9 }
 0x274   : > { %v4614_v54 = vrot.slane %v4612_v34, 7  ;;  %v7226_v21 = vor.u32 %v7225_v25, %v7222_v10  ;;  %v6736_v62 = vrot.slane %v6619_v41, 5  ;;  %v7241_v49 = vrot.slane %v7239_v24, 5  ;;  %v5613_v53 = vld [vmem:[#allocation2 + $0x48] sm:$0xe] }
 0x275   : > { %5861 = vrot.lane.b32.xlu1 %v9073_v44, %s9899_s25  ;;  %v4622_v40 = vrot.slane %v4620_v28, 7  ;;  %v7236_v26 = vor.u32 %v7235_v51, %v7231_v33  ;;  %v6739_v4 = vrot.slane %v6620_v39, 5  ;;  %v5220_v9 = vshrl.u32 %v5066_v57, 16  ;;  %v5614_v31 = vld [vmem:[#allocation2 + $0x4c] sm:$0xf] }
 0x276   : > { %v4617_v48 = vor.u32 %v4615_v55, %v4614_v54  ;;  %v4618_v35 = vrot.slane %v4614_v54, 4  ;;  %v7227_v19 = vrot.slane %v7226_v21, 4  ;;  %v6737_v23 = vsel %vm10064_vm8, %v9121_v14, %v6736_v62  ;;  %v5615_v55 = vld [vmem:[#allocation2 + $0x50] sm:$0x1]  ;;  %v7658_v25 = vld [vmem:[#allocation2 + $0x54] sm:$0xe] }
 0x277   : > { %v4625_v52 = vor.u32 %v4623_v30, %v4622_v40  ;;  %v4627_v2 = vrot.slane %v4622_v40, 4  ;;  %v7237_v36 = vrot.slane %v7236_v26, 4  ;;  %v6738_v47 = vrot.slane %v6736_v62, 4  ;;  %v7659_v24 = vld [vmem:[#allocation2 + $0x58] sm:$0xf] }
 0x278   : > { %v4852_v11 = vsel %vm10091_vm13, %v4617_v48, %v4851_v43  ;;  %v7232_v44 = vsel %vm10084_vm12, %v7227_v19, %v7231_v33  ;;  %v5223_v12 = vshll.u32 %v5066_v57, 16  ;;  %v5222_v39 = vrot.slane %v5220_v9, 4  ;;  %v11641_v33 = vpop.f32.mrb[44].mxu0  ;;  %v7660_v48 = vld [vmem:[#allocation2 + $0x5c] sm:$0x1] }
 0x279   : > { %4853 = vst [vmem:[#allocation2 + $0x6c] sm:$0xf] %v4852_v11  ;;  %v4626_v22 = vsel %vm10102_vm14, %v4618_v35, %v4625_v52  ;;  %v4856_v16 = vsel %vm9977_vm3, %v4627_v2, %v4855_v38  ;;  %v7242_v3 = vsel %vm10084_vm12, %v7237_v36, %v7241_v49  ;;  %6037 = vrot.lane.b32.xlu1 %v9745_v32, %s9901_s27  ;;  %v5229_v43 = vshll.u32 %v5067_v63, 16  ;;  %v11646_v57 = vpop.f32.mrb[45].mxu0  ;;  %v7111_v32 = vld [vmem:[#allocation2 + $0x48] sm:$0xf] }
 0x27a   : > { %v6740_v56 = vsel %vm10064_vm8, %v6738_v47, %v6739_v4  ;;  %4854 = vst.msk [vmem:[#allocation2 + $0x70] sm:$0xf] %vm48_vm0, %v4626_v22  ;;  %4857 = vst [vmem:[#allocation2 + $0x74] sm:$0x1] %v4856_v16  ;;  %v7945_v10 = vld [vmem:[#allocation3 + $0x70] sm:$0xff]  ;;  %v9167_v7 = vcombine.low %v7232_v44, %v7242_v3  ;;  %v5225_v34 = vrot.slane %v5223_v12, 5  ;;  %v9384_v51 = vadd.f32 %v11568_v60, %v11555_v6 }
 0x27b   : > { %v9137_v41 = vcombine.low %v6737_v23, %v6740_v56  ;;  %9620 = vmatprep.mubr.msk.bf16.mxu0 %vm871_vm1, %v7945_v10  ;;  %v5233_v28 = vshrl.u32 %v5067_v63, 16  ;;  %v5239_v30 = vshll.u32 %v5068_v42, 16  ;;  %v9387_v21 = vadd.f32 %v11580_v8, %v11571_v27  ;;  %v11652_v35 = vpop.f32.mrb[46].mxu0  ;;  %v7112_v11 = vld [vmem:[#allocation2 + $0x4c] sm:$0xf]  ;;  %v11666_v42 = vpop.f32.mrb[24].mxu1 }
 0x27c   : > { %7585 = vrot.lane.b32.xlu0 %v9167_v7, %s9901_s27  ;;  %v5226_v54 = vor.u32 %v5225_v34, %v5222_v39  ;;  %v9058_v14 = vrot.slane %v5613_v53, 9  ;;  %v5735_v62 = vrot.slane %v5614_v31, 5  ;;  %v5231_v40 = vrot.slane %v5229_v43, 5  ;;  %v11664_v44 = vpop.f32.mrb[47].mxu0  ;;  %v9746_v3 = vld [vmem:[#allocation2 + $0x54] sm:$0xff]  }
 0x27d   : > { %v5235_v26 = vrot.slane %v5233_v28, 4  ;;  %v5241_v49 = vrot.slane %v5239_v30, 5  ;;  %v4132_v4 = vadd.f32 %v11585_v37, %v9384_v51  ;;  %v4135_v60 = vadd.f32 %v11585_v37, %v9387_v21  ;;  %v7113_v7 = vld [vmem:[#allocation2 + $0x50] sm:$0x1]  ;;  %v6621_v28 = vld [vmem:[#allocation2 + $0x54] sm:$0xe] }
 0x27e   : > { %v5227_v6 = vrot.slane %v5226_v54, 4  ;;  %v11657_v38 = vsel %vm10064_vm8, %v9058_v14, %v5735_v62  ;;  %v5737_v19 = vrot.slane %v5735_v62, 4  ;;  %v5738_v23 = vrot.slane %v5615_v55, 5  ;;  %v6622_v30 = vld [vmem:[#allocation2 + $0x58] sm:$0xf]  ;;  %v11678_v62 = vpop.f32.mrb[48].mxu0 }
 0x27f   : > { %v5236_v27 = vor.u32 %v5235_v26, %v5231_v40  ;;  %v4293_v8 = vadd.f32 %v11512_v18, %v4132_v4  ;;  %v9185_v52 = vrot.slane %v7658_v25, 9  ;;  %v4296_v36 = vadd.f32 %v11529_v29, %v4135_v60  ;;  %v6623_v14 = vld [vmem:[#allocation2 + $0x5c] sm:$0x1] }
 0x280   : > { %6869 = vrot.lane.b32.xlu0 %v9137_v41, %s9900_s26  ;;  %v5232_v2 = vsel %vm10084_vm12, %v5227_v6, %v5231_v40  ;;  %v7776_v47 = vrot.slane %v7659_v24, 5  ;;  %v7779_v63 = vrot.slane %v7660_v48, 5  ;;  %v5739_v18 = vsel %vm10064_vm8, %v5737_v19, %v5738_v23  ;;  %v4858_v40 = vld [vmem:[#allocation2 + $0x78] sm:$0xf] }
 0x281   : > { %v5237_v9 = vrot.slane %v5236_v27, 4  ;;  %v4365_v12 = vmax.f32 %v4293_v8, 0.0  ;;  %v7244_v22 = vshrl.u32 %v7111_v32, 16  ;;  %v4366_v16 = vmax.f32 %v4296_v36, 0.0  ;;  %v11682_v8 = vpop.f32.mrb[49].mxu0 }
 0x282   : > { %v9074_v56 = vcombine.low %v11657_v38, %v5739_v18  ;;  %v7777_v29 = vsel %vm10064_vm8, %v9185_v52, %v7776_v47  ;;  %v7778_v53 = vrot.slane %v7776_v47, 4  ;;  %v7247_v39 = vshll.u32 %v7111_v32, 16  ;;  %v4862_v38 = vld [vmem:[#allocation2 + $0x80] sm:$0x1]  ;;  %v5069_v47 = vld [vmem:[#allocation2 + $0x48] sm:$0xf] }
 0x283   : > { %v5242_v31 = vsel %vm10084_vm12, %v5237_v9, %v5241_v49  ;;  %v9298_v10 = vpack.c.bf16 %v4365_v12, %v4365_v12  ;;  %v7246_v41 = vrot.slane %v7244_v22, 4  ;;  %v9299_v55 = vpack.c.bf16 %v4366_v16, %v4366_v16  ;;  %v11685_v18 = vpop.f32.mrb[50].mxu0 }
 0x284   : > { %v9041_v34 = vcombine.low %v5232_v2, %v5242_v31  ;;  %7045 = vrot.lane.b32.xlu0 %v9746_v3, %s9899_s25  ;;  %v7780_v25 = vsel %vm10064_vm8, %v7778_v53, %v7779_v63  ;;  %v7253_v43 = vshll.u32 %v7112_v11, 16  ;;  %v7249_v21 = vrot.slane %v7247_v39, 5  ;;  %v5070_v53 = vld [vmem:[#allocation2 + $0x4c] sm:$0xf]  ;;  %v11692_v31 = vpop.f32.mrb[51].mxu0 }
 0x285   : > { %v4629_v51 = vshrl.u32 %v9298_v10, 16  ;;  %v4632_v24 = vshll.u32 %v9298_v10, 16  ;;  %v9201_v54 = vcombine.low %v7777_v29, %v7780_v25  ;;  %v4637_v26 = vshrl.u32 %v9299_v55, 16  ;;  %v6028_v6 = vpop.permute.xlu1 %6027  ;;  %v5071_v39 = vld [vmem:[#allocation2 + $0x50] sm:$0x1] }
 0x286   : > { %5541 = vrot.lane.b32.xlu1 %v9041_v34, %s9900_s26  ;;  %v4640_v49 = vshll.u32 %v9299_v55, 16  ;;  %v7255_v4 = vrot.slane %v7253_v43, 5  ;;  %v7257_v48 = vshrl.u32 %v7112_v11, 16  ;;  %v7250_v19 = vor.u32 %v7249_v21, %v7246_v41  ;;  %6075 = vst.msk [vmem:[#allocation3] sm:$0xff] %vm1920_vm6, %v6028_v6  ;;  %v9747_v43 = vld [vmem:[#allocation2 + $0x54] sm:$0xff]  }
 0x287   : > { %v4631_v60 = vrot.slane %v4629_v51, 7  ;;  %7920 = vst.msk [vmem:[#allocation3 + $0x88] sm:$0xff] %vm871_vm1, %v9201_v54  ;;  %v7263_v32 = vshll.u32 %v7113_v7, 16  ;;  %v9122_v27 = vrot.slane %v6621_v28, 9  ;;  %v4639_v23 = vrot.slane %v4637_v26, 7 }
 0x288   : > { %v7259_v52 = vrot.slane %v7257_v48, 4  ;;  %v6743_v2 = vrot.slane %v6622_v30, 5  ;;  %v6746_v36 = vrot.slane %v6623_v14, 5  ;;  %v7251_v11 = vrot.slane %v7250_v19, 4  ;;  %v5616_v30 = vld [vmem:[#allocation2 + $0x54] sm:$0xe] }
 0x289   : > { %v4634_v63 = vor.u32 %v4632_v24, %v4631_v60  ;;  %v4635_v9 = vrot.slane %v4631_v60, 4  ;;  %v7265_v12 = vrot.slane %v7263_v32, 5  ;;  %v4642_v22 = vor.u32 %v4640_v49, %v4639_v23  ;;  %v5617_v14 = vld [vmem:[#allocation2 + $0x58] sm:$0xf]  ;;  %v5618_v60 = vld [vmem:[#allocation2 + $0x5c] sm:$0x1] }
 0x28a   : > { %v4644_v16 = vrot.slane %v4639_v23, 4  ;;  %5863 = vrot.lane.b32.xlu1 %v9074_v56, %s9899_s25  ;;  %v7260_v3 = vor.u32 %v7259_v52, %v7255_v4  ;;  %v11690_v29 = vsel %vm10064_vm8, %v9122_v27, %v6743_v2  ;;  %v7256_v7 = vsel %vm10084_vm12, %v7251_v11, %v7255_v4  ;;  %v7661_v52 = vld [vmem:[#allocation2 + $0x60] sm:$0xe] }
 0x28b   : > { %v4859_v10 = vsel %vm10091_vm13, %v4634_v63, %v4858_v40  ;;  %v6745_v41 = vrot.slane %v6743_v2, 4  ;;  %v5244_v34 = vshrl.u32 %v5069_v47, 16  ;;  %v4643_v56 = vsel %vm10102_vm14, %v4635_v9, %v4642_v22  ;;  %v11705_v40 = vpop.f32.mrb[25].mxu1  ;;  %v7662_v2 = vld [vmem:[#allocation2 + $0x64] sm:$0xf] }
 0x28c   : > { %4860 = vst [vmem:[#allocation2 + $0x78] sm:$0xf] %v4859_v10  ;;  %v4863_v55 = vsel %vm9977_vm3, %v4644_v16, %v4862_v38  ;;  %v7261_v25 = vrot.slane %v7260_v3, 4  ;;  %v5247_v28 = vshll.u32 %v5069_v47, 16  ;;  %4861 = vst.msk [vmem:[#allocation2 + $0x7c] sm:$0xf] %vm48_vm0, %v4643_v56  ;;  %v9390_v23 = vadd.f32 %v11608_v45, %v11598_v13 }
 0x28d   : > { %4864 = vst [vmem:[#allocation2 + $0x80] sm:$0x1] %v4863_v55  ;;  %v6747_v51 = vsel %vm10064_vm8, %v6745_v41, %v6746_v36  ;;  %v5246_v24 = vrot.slane %v5244_v34, 4  ;;  %v5253_v54 = vshll.u32 %v5070_v53, 16  ;;  %v5257_v21 = vshrl.u32 %v5070_v53, 16  ;;  %v11711_v38 = vpop.f32.mrb[26].mxu1 }
 0x28e   : > { %v7948_v26 = vld [vmem:[#allocation3 + $0x88] sm:$0xff]  ;;  %v7266_v49 = vsel %vm10084_vm12, %v7261_v25, %v7265_v12  ;;  %6039 = vrot.lane.b32.xlu1 %v9747_v43, %s9901_s27  ;;  %v9138_v4 = vcombine.low %v11690_v29, %v6747_v51  ;;  %v5249_v48 = vrot.slane %v5247_v28, 5  ;;  %v5263_v6 = vshll.u32 %v5071_v39, 16  ;;  %v11718_v11 = vpop.f32.mrb[27].mxu1  ;;  %v9758_v12 = vld [vmem:[%s12990_s3 + $0x48] sm:$0xff]  }
 0x28f   : > { %9621 = vmatmul.mubr.msk.bf16.gmra.mrb[72].mxu0 %vm871_vm1, %v7948_v26  ;;  %v9168_v19 = vcombine.low %v7256_v7, %v7266_v49  ;;  %v5255_v32 = vrot.slane %v5253_v54, 5  ;;  %v5259_v27 = vrot.slane %v5257_v21, 4  ;;  %v9393_v63 = vadd.f32 %v11616_v5, %v11614_v61  ;;  %v7663_v53 = vld [vmem:[#allocation2 + $0x68] sm:$0x1]  ;;  %9444 = vmatprep.subr.bf16.mxu1 %v9758_v12  ;;  %v7114_v56 = vld [vmem:[#allocation2 + $0x54] sm:$0xf] }
 0x290   : > { %v5250_v36 = vor.u32 %v5249_v48, %v5246_v24  ;;  %v5265_v47 = vrot.slane %v5263_v6, 5  ;;  %v9059_v9 = vrot.slane %v5616_v30, 9  ;;  %v5742_v16 = vrot.slane %v5617_v14, 5  ;;  %v9760_v5 = vld [vmem:[%s12990_s3 + $0x8] sm:$0xff]   ;;  %v7115_v30 = vld [vmem:[#allocation2 + $0x58] sm:$0xf] }
 0x291   : > { %7587 = vrot.lane.b32.xlu0 %v9168_v19, %s9901_s27  ;;  %v5260_v22 = vor.u32 %v5259_v27, %v5255_v32  ;;  %v5745_v3 = vrot.slane %v5618_v60, 5  ;;  %v4140_v13 = vadd.f32 %v11585_v37, %v9390_v23  ;;  %v4143_v29 = vadd.f32 %v11585_v37, %v9393_v63  ;;  %9445 = vmatpush3.bf16.msra.mxu1 %v9760_v5  ;;  %v9748_v48 = vld [vmem:[#allocation2 + $0x60] sm:$0xff]  }
 0x292   : > { %v5251_v45 = vrot.slane %v5250_v36, 4  ;;  %v9186_v10 = vrot.slane %v7661_v52, 9  ;;  %v7783_v61 = vrot.slane %v7662_v2, 5  ;;  %v5743_v41 = vsel %vm10064_vm8, %v9059_v9, %v5742_v16  ;;  %v6624_v36 = vld [vmem:[#allocation2 + $0x60] sm:$0xe] }
 0x293   : > { %v5261_v7 = vrot.slane %v5260_v22, 4  ;;  %v5744_v39 = vrot.slane %v5742_v16, 4  ;;  %v4301_v34 = vadd.f32 %v11619_v20, %v4140_v13  ;;  %v4304_v25 = vadd.f32 %v11629_v15, %v4143_v29  ;;  %v6626_v16 = vld [vmem:[#allocation2 + $0x68] sm:$0x1] }
 0x294   : > { %v5256_v55 = vsel %vm10084_vm12, %v5251_v45, %v5255_v32  ;;  %v7784_v43 = vsel %vm10064_vm8, %v9186_v10, %v7783_v61  ;;  %v7785_v28 = vrot.slane %v7783_v61, 4  ;;  %v7786_v54 = vrot.slane %v7663_v53, 5  ;;  %v11751_v10 = vpop.permute.xlu1 %5853  ;;  %v9761_v61 = vld [vmem:[%s12990_s3 + $0x50] sm:$0xff]  }
 0x295   : > { %6871 = vrot.lane.b32.xlu0 %v9138_v4, %s9900_s26  ;;  %v5266_v51 = vsel %vm10084_vm12, %v5261_v7, %v5265_v47  ;;  %v5746_v20 = vsel %vm10064_vm8, %v5744_v39, %v5745_v3  ;;  %v4367_v24 = vmax.f32 %v4301_v34, 0.0  ;;  %v4368_v26 = vmax.f32 %v4304_v25, 0.0  ;;  %v11742_v49 = vpop.f32.mrb[52].mxu0  ;;  %v7116_v4 = vld [vmem:[#allocation2 + $0x5c] sm:$0x1]  ;;  %9446 = vmatprep.subr.bf16.mxu1 %v9761_v61 }
 0x296   : > { %v9042_v21 = vcombine.low %v5256_v55, %v5266_v51  ;;  %v9075_v14 = vcombine.low %v5743_v41, %v5746_v20  ;;  %v7268_v15 = vshrl.u32 %v7114_v56, 16  ;;  %v7787_v60 = vsel %vm10064_vm8, %v7785_v28, %v7786_v54  ;;  %v6625_v47 = vld [vmem:[#allocation2 + $0x64] sm:$0xf]  ;;  %v11749_v53 = vpop.f32.mrb[53].mxu0  ;;  %v4869_v54 = vld [vmem:[#allocation2 + $0x8c] sm:$0x1] }
 0x297   : > { %v9300_v6 = vpack.c.bf16 %v4367_v24, %v4367_v24  ;;  %v7271_v19 = vshll.u32 %v7114_v56, 16  ;;  %v7277_v32 = vshll.u32 %v7115_v30, 16  ;;  %v9301_v27 = vpack.c.bf16 %v4368_v26, %v4368_v26  ;;  %v4865_v7 = vld [vmem:[#allocation2 + $0x84] sm:$0xf]  ;;  %v11756_v56 = vpop.f32.mrb[54].mxu0 }
 0x298   : > { %5543 = vrot.lane.b32.xlu1 %v9042_v21, %s9900_s26  ;;  %v9202_v23 = vcombine.low %v7784_v43, %v7787_v60  ;;  %v7270_v52 = vrot.slane %v7268_v15, 4  ;;  %v7281_v2 = vshrl.u32 %v7115_v30, 16  ;;  %v7287_v29 = vshll.u32 %v7116_v4, 16  ;;  %v5072_v30 = vld [vmem:[#allocation2 + $0x54] sm:$0xf]  ;;  %v11759_v51 = vpop.f32.mrb[55].mxu0 }
 0x299   : > { %7047 = vrot.lane.b32.xlu0 %v9748_v48, %s9899_s25  ;;  %v4646_v63 = vshrl.u32 %v9300_v6, 16  ;;  %v4649_v9 = vshll.u32 %v9300_v6, 16  ;;  %v7273_v12 = vrot.slane %v7271_v19, 5  ;;  %v7279_v22 = vrot.slane %v7277_v32, 5  ;;  %v9762_v4 = vld [vmem:[%s12990_s3 + $0x10] sm:$0xff]  }
 0x29a   : > { %v4654_v3 = vshrl.u32 %v9301_v27, 16  ;;  %v4657_v13 = vshll.u32 %v9301_v27, 16  ;;  %7921 = vst.msk [vmem:[#allocation3 + $0xa0] sm:$0xff] %vm871_vm1, %v9202_v23  ;;  %v7283_v45 = vrot.slane %v7281_v2, 4  ;;  %v9123_v39 = vrot.slane %v6624_v36, 9  ;;  %9447 = vmatpush3.bf16.msra.mxu1 %v9762_v4 }
 0x29b   : > { %v4648_v5 = vrot.slane %v4646_v63, 7  ;;  %v7274_v41 = vor.u32 %v7273_v12, %v7270_v52  ;;  %v6750_v34 = vrot.slane %v6625_v47, 5  ;;  %v7289_v43 = vrot.slane %v7287_v29, 5  ;;  %v5073_v27 = vld [vmem:[#allocation2 + $0x58] sm:$0xf] }
 0x29c   : > { %5865 = vrot.lane.b32.xlu1 %v9075_v14, %s9899_s25  ;;  %v4656_v55 = vrot.slane %v4654_v3, 7  ;;  %v7284_v25 = vor.u32 %v7283_v45, %v7279_v22  ;;  %v6753_v28 = vrot.slane %v6626_v16, 5  ;;  %v9749_v14 = vld [vmem:[#allocation2 + $0x60] sm:$0xff]   ;;  %v5074_v23 = vld [vmem:[#allocation2 + $0x5c] sm:$0x1]  ;;  %v5268_v52 = vshrl.u32 %v5072_v30, 16  ;;  %v11781_v16 = vpop.permute.xlu1 %6029 }
 0x29d   : > { %v4651_v20 = vor.u32 %v4649_v9, %v4648_v5  ;;  %v4652_v24 = vrot.slane %v4648_v5, 4  ;;  %v7275_v21 = vrot.slane %v7274_v41, 4  ;;  %v11763_v26 = vsel %vm10064_vm8, %v9123_v39, %v6750_v34  ;;  %v5619_v12 = vld [vmem:[#allocation2 + $0x60] sm:$0xe]  ;;  %v5621_v5 = vld [vmem:[#allocation2 + $0x68] sm:$0x1] }
 0x29e   : > { %v4659_v15 = vor.u32 %v4657_v13, %v4656_v55  ;;  %v4661_v48 = vrot.slane %v4656_v55, 4  ;;  %v7285_v6 = vrot.slane %v7284_v25, 4  ;;  %v6752_v60 = vrot.slane %v6750_v34, 4  ;;  %v7664_v25 = vld [vmem:[#allocation2 + $0x6c] sm:$0xe] }
 0x29f   : > { %v4866_v19 = vsel %vm10091_vm13, %v4651_v20, %v4865_v7  ;;  %v7280_v32 = vsel %vm10084_vm12, %v7275_v21, %v7279_v22  ;;  %v5271_v2 = vshll.u32 %v5072_v30, 16  ;;  %v5620_v22 = vld [vmem:[#allocation2 + $0x64] sm:$0xf]  ;;  %v5270_v29 = vrot.slane %v5268_v52, 4  ;;  %v11785_v7 = vpop.f32.mrb[28].mxu1 }
 0x2a0   : > { %4867 = vst [vmem:[#allocation2 + $0x84] sm:$0xf] %v4866_v19  ;;  %v4660_v36 = vsel %vm10102_vm14, %v4652_v24, %v4659_v15  ;;  %v4870_v47 = vsel %vm9977_vm3, %v4661_v48, %v4869_v54  ;;  %v7290_v63 = vsel %vm10084_vm12, %v7285_v6, %v7289_v43  ;;  %6041 = vrot.lane.b32.xlu1 %v9749_v14, %s9901_s27  ;;  %v5277_v41 = vshll.u32 %v5073_v27, 16  ;;  %v9763_v43 = vld [vmem:[%s12990_s3 + $0x58] sm:$0xff]   ;;  %v7665_v54 = vld [vmem:[#allocation2 + $0x70] sm:$0xf] }
 0x2a1   : > { %v6754_v9 = vsel %vm10064_vm8, %v6752_v60, %v6753_v28  ;;  %4868 = vst.msk [vmem:[#allocation2 + $0x88] sm:$0xf] %vm48_vm0, %v4660_v36  ;;  %4871 = vst [vmem:[#allocation2 + $0x8c] sm:$0x1] %v4870_v47  ;;  %v7951_v3 = vld [vmem:[#allocation3 + $0xa0] sm:$0xff]  ;;  %v9169_v13 = vcombine.low %v7280_v32, %v7290_v63  ;;  %v5273_v61 = vrot.slane %v5271_v2, 5  ;;  %v9396_v55 = vadd.f32 %v11646_v57, %v11641_v33  ;;  %v5534_v36 = vpop.permute.xlu1 %5533 }
 0x2a2   : > { %v9139_v45 = vcombine.low %v11763_v26, %v6754_v9  ;;  %9624 = vmatprep.mubr.msk.bf16.mxu0 %vm871_vm1, %v7951_v3  ;;  %v5281_v39 = vshrl.u32 %v5073_v27, 16  ;;  %v5287_v34 = vshll.u32 %v5074_v23, 16  ;;  %v9399_v30 = vadd.f32 %v11664_v44, %v11652_v35  ;;  %v11796_v21 = vpop.f32.mrb[29].mxu1  ;;  %v9765_v33 = vld [vmem:[%s12990_s3 + $0x18] sm:$0xff]   ;;  %v7666_v6 = vld [vmem:[#allocation2 + $0x74] sm:$0x1]  ;;  %9448 = vmatprep.subr.bf16.mxu1 %v9763_v43 }
 0x2a3   : > { %7589 = vrot.lane.b32.xlu0 %v9169_v13, %s9901_s27  ;;  %v5274_v28 = vor.u32 %v5273_v61, %v5270_v29  ;;  %v9060_v20 = vrot.slane %v5619_v12, 9  ;;  %v5749_v24 = vrot.slane %v5620_v22, 5  ;;  %v5279_v57 = vrot.slane %v5277_v41, 5  ;;  %v11802_v14 = vpop.f32.mrb[30].mxu1  ;;  %v7117_v19 = vld [vmem:[#allocation2 + $0x60] sm:$0xf]  ;;  %9449 = vmatpush3.bf16.msra.mxu1 %v9765_v33 }
 0x2a4   : > { %v5283_v26 = vrot.slane %v5281_v39, 4  ;;  %v5289_v15 = vrot.slane %v5287_v34, 5  ;;  %v4148_v48 = vadd.f32 %v11585_v37, %v9396_v55  ;;  %v4151_v35 = vadd.f32 %v11585_v37, %v9399_v30  ;;  %v9766_v2 = vld [vmem:[#allocation2 + $0xc] sm:$0xff]   ;;  %v11810_v47 = vpop.f32.mrb[31].mxu1  ;;  %v7118_v22 = vld [vmem:[#allocation2 + $0x64] sm:$0xf] }
 0x2a5   : > { %v5275_v60 = vrot.slane %v5274_v28, 4  ;;  %v11807_v44 = vsel %vm10064_vm8, %v9060_v20, %v5749_v24  ;;  %v5751_v4 = vrot.slane %v5749_v24, 4  ;;  %v5752_v23 = vrot.slane %v5621_v5, 5  ;;  %5036 = vst.msk [vmem:[#allocation3 + $0x18] sm:$0xff] %vm871_vm1, %v9766_v2  ;;  %v9750_v5 = vld [vmem:[#allocation2 + $0x6c] sm:$0xff]  }
 0x2a6   : > { %v5284_v32 = vor.u32 %v5283_v26, %v5279_v57  ;;  %v4309_v27 = vadd.f32 %v11610_v59, %v4148_v48  ;;  %v9187_v52 = vrot.slane %v7664_v25, 9  ;;  %v4312_v63 = vadd.f32 %v11623_v50, %v4151_v35  ;;  %v7119_v50 = vld [vmem:[#allocation2 + $0x68] sm:$0x1]  ;;  %5580 = vst.msk [vmem:[#allocation3 + $0x18] sm:$0xff] %vm1419_vm15, %v5534_v36  ;;  %v6628_v33 = vld [vmem:[#allocation2 + $0x70] sm:$0xf] }
 0x2a7   : > { %6873 = vrot.lane.b32.xlu0 %v9139_v45, %s9900_s26  ;;  %v5280_v37 = vsel %vm10084_vm12, %v5275_v60, %v5279_v57  ;;  %v7790_v9 = vrot.slane %v7665_v54, 5  ;;  %v7793_v12 = vrot.slane %v7666_v6, 5  ;;  %v5753_v59 = vsel %vm10064_vm8, %v5751_v4, %v5752_v23  ;;  %5900 = vst.msk [vmem:[#allocation3 + $0x18] sm:$0xff] %vm1743_vm5, %v11751_v10  ;;  %v6627_v54 = vld [vmem:[#allocation2 + $0x6c] sm:$0xe]  ;;  %v9767_v10 = vld [vmem:[%s12990_s3 + $0x60] sm:$0xff]   ;;  %v11835_v60 = vpop.permute.xlu1 %5855 }
 0x2a8   : > { %v5285_v3 = vrot.slane %v5284_v32, 4  ;;  %v4369_v13 = vmax.f32 %v4309_v27, 0.0  ;;  %v7292_v29 = vshrl.u32 %v7117_v19, 16  ;;  %v4370_v61 = vmax.f32 %v4312_v63, 0.0  ;;  %6076 = vst.msk [vmem:[#allocation3 + $0x18] sm:$0xff] %vm1920_vm6, %v11781_v16  ;;  %9450 = vmatprep.subr.bf16.mxu1 %v9767_v10  ;;  %v9751_v10 = vld [vmem:[#allocation2 + $0x6c] sm:$0xff]  }
 0x2a9   : > { %v9076_v45 = vcombine.low %v11807_v44, %v5753_v59  ;;  %v7791_v41 = vsel %vm10064_vm8, %v9187_v52, %v7790_v9  ;;  %v7792_v39 = vrot.slane %v7790_v9, 4  ;;  %v7295_v43 = vshll.u32 %v7117_v19, 16  ;;  %v6629_v6 = vld [vmem:[#allocation2 + $0x74] sm:$0x1]  ;;  %v4872_v35 = vld [vmem:[#allocation2 + $0x90] sm:$0xf] }
 0x2aa   : > { %v5290_v34 = vsel %vm10084_vm12, %v5285_v3, %v5289_v15  ;;  %v9302_v55 = vpack.c.bf16 %v4369_v13, %v4369_v13  ;;  %v7294_v25 = vrot.slane %v7292_v29, 4  ;;  %v9303_v30 = vpack.c.bf16 %v4370_v61, %v4370_v61  ;;  %v5075_v2 = vld [vmem:[#allocation2 + $0x60] sm:$0xf]  ;;  %v4876_v29 = vld [vmem:[#allocation2 + $0x98] sm:$0x1] }
 0x2ab   : > { %v9043_v28 = vcombine.low %v5280_v37, %v5290_v34  ;;  %7049 = vrot.lane.b32.xlu0 %v9750_v5, %s9899_s25  ;;  %v7794_v20 = vsel %vm10064_vm8, %v7792_v39, %v7793_v12  ;;  %v7301_v24 = vshll.u32 %v7118_v22, 16  ;;  %v7297_v48 = vrot.slane %v7295_v43, 5  ;;  %v11856_v43 = vpop.permute.xlu0 %6859 }
 0x2ac   : > { %v4663_v57 = vshrl.u32 %v9302_v55, 16  ;;  %v4666_v26 = vshll.u32 %v9302_v55, 16  ;;  %v9203_v15 = vcombine.low %v7791_v41, %v7794_v20  ;;  %v4671_v44 = vshrl.u32 %v9303_v30, 16 }
 0x2ad   : > { %5545 = vrot.lane.b32.xlu1 %v9043_v28, %s9900_s26  ;;  %v4674_v4 = vshll.u32 %v9303_v30, 16  ;;  %v11838_v19 = vrot.slane %v7301_v24, 5  ;;  %v7305_v32 = vshrl.u32 %v7118_v22, 16  ;;  %v7298_v27 = vor.u32 %v7297_v48, %v7294_v25  ;;  %v9769_v22 = vld [vmem:[%s12990_s3 + $0x20] sm:$0xff]   ;;  %v5077_v24 = vld [vmem:[#allocation2 + $0x68] sm:$0x1] }
 0x2ae   : > { %v4665_v16 = vrot.slane %v4663_v57, 7  ;;  %7922 = vst.msk [vmem:[#allocation3 + $0xb8] sm:$0xff] %vm871_vm1, %v9203_v15  ;;  %v7311_v23 = vshll.u32 %v7119_v50, 16  ;;  %v9124_v52 = vrot.slane %v6627_v54, 9  ;;  %v11841_v36 = vpop.f32.mrb[56].mxu0  ;;  %v4673_v37 = vrot.slane %v4671_v44, 7  ;;  %9451 = vmatpush3.bf16.msra.mxu1 %v9769_v22 }
 0x2af   : > { %v7307_v63 = vrot.slane %v7305_v32, 4  ;;  %v6757_v9 = vrot.slane %v6628_v33, 5  ;;  %v6760_v12 = vrot.slane %v6629_v6, 5  ;;  %v11843_v3 = vpop.f32.mrb[57].mxu0  ;;  %v7299_v61 = vrot.slane %v7298_v27, 4  ;;  %v9770_v33 = vld [vmem:[%s12990_s3 + $0x68] sm:$0xff]  }
 0x2b0   : > { %v4668_v13 = vor.u32 %v4666_v26, %v4665_v16  ;;  %v4669_v59 = vrot.slane %v4665_v16, 4  ;;  %v7313_v5 = vrot.slane %v7311_v23, 5  ;;  %v11848_v41 = vpop.f32.mrb[58].mxu0  ;;  %v4676_v39 = vor.u32 %v4674_v4, %v4673_v37  ;;  %v5076_v25 = vld [vmem:[#allocation2 + $0x64] sm:$0xf]  ;;  %v9771_v57 = vld [vmem:[%s12990_s3 + $0x28] sm:$0xff]   ;;  %v11871_v26 = vpop.permute.xlu1 %6031  ;;  %9452 = vmatprep.subr.bf16.mxu1 %v9770_v33 }
 0x2b1   : > { %v4678_v50 = vrot.slane %v4673_v37, 4  ;;  %5867 = vrot.lane.b32.xlu1 %v9076_v45, %s9899_s25  ;;  %v7308_v34 = vor.u32 %v7307_v63, %v11838_v19  ;;  %v11854_v55 = vsel %vm10064_vm8, %v9124_v52, %v6757_v9  ;;  %v11858_v28 = vpop.f32.mrb[59].mxu0  ;;  %v7304_v20 = vsel %vm10084_vm12, %v7299_v61, %v11838_v19  ;;  %v5622_v44 = vld [vmem:[#allocation2 + $0x6c] sm:$0xe]  ;;  %v5623_v27 = vld [vmem:[#allocation2 + $0x70] sm:$0xf] }
 0x2b2   : > { %v4873_v30 = vsel %vm10091_vm13, %v4668_v13, %v4872_v35  ;;  %v6759_v45 = vrot.slane %v6757_v9, 4  ;;  %v5292_v54 = vshrl.u32 %v5075_v2, 16  ;;  %v4677_v15 = vsel %vm10102_vm14, %v4669_v59, %v4676_v39  ;;  %v9772_v23 = vld [vmem:[%s12990_s3 + $0x70] sm:$0xff]   ;;  %9453 = vmatpush3.bf16.msra.mxu1 %v9771_v57  ;;  %v7668_v39 = vld [vmem:[#allocation2 + $0x7c] sm:$0xf] }
 0x2b3   : > { %4874 = vst [vmem:[#allocation2 + $0x90] sm:$0xf] %v4873_v30  ;;  %v4877_v48 = vsel %vm9977_vm3, %v4678_v50, %v4876_v29  ;;  %v7309_v6 = vrot.slane %v7308_v34, 4  ;;  %v5295_v35 = vshll.u32 %v5075_v2, 16  ;;  %4875 = vst.msk [vmem:[#allocation2 + $0x94] sm:$0xf] %vm48_vm0, %v4677_v15  ;;  %v9402_v61 = vadd.f32 %v11682_v8, %v11678_v62  ;;  %9454 = vmatprep.subr.bf16.mxu1 %v9772_v23  ;;  %v11895_v30 = vpop.permute.xlu0 %7035 }
 0x2b4   : > { %4878 = vst [vmem:[#allocation2 + $0x98] sm:$0x1] %v4877_v48  ;;  %v6761_v4 = vsel %vm10064_vm8, %v6759_v45, %v6760_v12  ;;  %v5294_v19 = vrot.slane %v5292_v54, 4  ;;  %v5301_v32 = vshll.u32 %v5076_v25, 16  ;;  %v5305_v16 = vshrl.u32 %v5076_v25, 16  ;;  %v9774_v22 = vld [vmem:[%s12990_s3 + $0x30] sm:$0xff]   ;;  %v5536_v54 = vpop.permute.xlu1 %5535 }
 0x2b5   : > { %v7954_v52 = vld [vmem:[#allocation3 + $0xb8] sm:$0xff]  ;;  %v7314_v2 = vsel %vm10084_vm12, %v7309_v6, %v7313_v5  ;;  %6043 = vrot.lane.b32.xlu1 %v9751_v10, %s9901_s27  ;;  %v9140_v37 = vcombine.low %v11854_v55, %v6761_v4  ;;  %v5297_v63 = vrot.slane %v5295_v35, 5  ;;  %v5311_v9 = vshll.u32 %v5077_v24, 16  ;;  %v7667_v5 = vld [vmem:[#allocation2 + $0x78] sm:$0xe] }
 0x2b6   : > { %v5624_v12 = vld [vmem:[#allocation2 + $0x74] sm:$0x1]  ;;  %9625 = vmatmul.mubr.msk.bf16.gmra.mrb[76].mxu0 %vm871_vm1, %v7954_v52  ;;  %v9170_v13 = vcombine.low %v7304_v20, %v7314_v2  ;;  %v5303_v59 = vrot.slane %v5301_v32, 5  ;;  %v5307_v29 = vrot.slane %v5305_v16, 4  ;;  %v9405_v55 = vadd.f32 %v11692_v31, %v11685_v18  ;;  %v11901_v62 = vld [vmem:[%s12989_s2] ss:$0 sm:$0xff]  ;;  %9455 = vmatpush3.bf16.msra.mxu1 %v9774_v22 }
 0x2b7   : > { %v5298_v50 = vor.u32 %v5297_v63, %v5294_v19  ;;  %v5313_v34 = vrot.slane %v5311_v9, 5  ;;  %v9061_v25 = vrot.slane %v5622_v44, 9  ;;  %v5756_v20 = vrot.slane %v5623_v27, 5  ;;  %v9775_v33 = vld [vmem:[#allocation2 + $0x18] sm:$0xff]   ;;  %v7669_v15 = vld [vmem:[#allocation2 + $0x80] sm:$0x1] }
 0x2b8   : > { %7591 = vrot.lane.b32.xlu0 %v9170_v13, %s9901_s27  ;;  %v5308_v45 = vor.u32 %v5307_v29, %v5303_v59  ;;  %v5759_v24 = vrot.slane %v5624_v12, 5  ;;  %v4156_v8 = vadd.f32 %v11901_v62, %v9402_v61  ;;  %v9776_v18 = vld [vmem:[%s12990_s3 + $0x78] sm:$0xff]   ;;  %v4159_v57 = vadd.f32 %v11901_v62, %v9405_v55  ;;  %v7120_v32 = vld [vmem:[#allocation2 + $0x6c] sm:$0xf]  ;;  %5037 = vst.msk [vmem:[#allocation3 + $0x30] sm:$0xff] %vm871_vm1, %v9775_v33 }
 0x2b9   : > { %v5299_v31 = vrot.slane %v5298_v50, 4  ;;  %v9188_v48 = vrot.slane %v7667_v5, 9  ;;  %v7797_v6 = vrot.slane %v7668_v39, 5  ;;  %v9778_v10 = vld [vmem:[%s12990_s3 + $0x38] sm:$0xff]   ;;  %v11913_v44 = vsel %vm10064_vm8, %v9061_v25, %v5756_v20  ;;  %9456 = vmatprep.subr.bf16.mxu1 %v9776_v18  ;;  %v7121_v2 = vld [vmem:[#allocation2 + $0x70] sm:$0xf]  ;;  %v11931_v5 = vpop.permute.xlu0 %6861  ;;  %v11948_v18 = vpop.permute.xlu1 %5857 }
 0x2ba   : > { %v5309_v35 = vrot.slane %v5308_v45, 4  ;;  %v5758_v4 = vrot.slane %v5756_v20, 4  ;;  %v4317_v19 = vadd.f32 %v11705_v40, %v4156_v8  ;;  %v4320_v27 = vadd.f32 %v11718_v11, %v4159_v57  ;;  %5581 = vst.msk [vmem:[#allocation3 + $0x30] sm:$0xff] %vm1419_vm15, %v5536_v54  ;;  %v7122_v22 = vld [vmem:[#allocation2 + $0x74] sm:$0x1]  ;;  %v9752_v13 = vld [vmem:[#allocation2 + $0x78] sm:$0xff]   ;;  %9457 = vmatpush3.bf16.msra.mxu1 %v9778_v10 }
 0x2bb   : > { %v5304_v16 = vsel %vm10084_vm12, %v5299_v31, %v5303_v59  ;;  %v7798_v23 = vsel %vm10064_vm8, %v9188_v48, %v7797_v6  ;;  %v7799_v52 = vrot.slane %v7797_v6, 4  ;;  %v7800_v12 = vrot.slane %v7669_v15, 5  ;;  %5901 = vst.msk [vmem:[#allocation3 + $0x30] sm:$0xff] %vm1743_vm5, %v11835_v60  ;;  %v6630_v55 = vld [vmem:[#allocation2 + $0x78] sm:$0xe]  ;;  %v11942_v45 = vld [vmem:[%s12990_s3 + $0x80] sm:$0xff]  }
 0x2bc   : > { %6875 = vrot.lane.b32.xlu0 %v9140_v37, %s9900_s26  ;;  %v5314_v40 = vsel %vm10084_vm12, %v5309_v35, %v5313_v34  ;;  %v5760_v63 = vsel %vm10064_vm8, %v5758_v4, %v5759_v24  ;;  %v4371_v9 = vmax.f32 %v4317_v19, 0.0  ;;  %v4372_v29 = vmax.f32 %v4320_v27, 0.0  ;;  %v11933_v37 = vpop.f32.mrb[60].mxu0  ;;  %6077 = vst.msk [vmem:[#allocation3 + $0x30] sm:$0xff] %vm1920_vm6, %v11871_v26  ;;  %v6631_v25 = vld [vmem:[#allocation2 + $0x7c] sm:$0xf]  ;;  %9644 = vmatprep.subr.bf16.mxu1 %v11942_v45 }
 0x2bd   : > { %v9044_v11 = vcombine.low %v5304_v16, %v5314_v40  ;;  %v9077_v59 = vcombine.low %v11913_v44, %v5760_v63  ;;  %v7316_v61 = vshrl.u32 %v7120_v32, 16  ;;  %v7801_v50 = vsel %vm10064_vm8, %v7799_v52, %v7800_v12  ;;  %v6632_v54 = vld [vmem:[#allocation2 + $0x80] sm:$0x1]  ;;  %v11946_v33 = vpop.f32.mrb[61].mxu0  ;;  %v9780_v31 = vld [vmem:[#allocation2 + $0x24] sm:$0xff]   ;;  %v9783_v16 = vld [vmem:[#allocation2 + $0x30] sm:$0xff]  }
 0x2be   : > { %v9304_v39 = vpack.c.bf16 %v4371_v9, %v4371_v9  ;;  %v7319_v34 = vshll.u32 %v7120_v32, 16  ;;  %v7325_v60 = vshll.u32 %v7121_v2, 16  ;;  %v9305_v20 = vpack.c.bf16 %v4372_v29, %v4372_v29  ;;  %v11951_v10 = vpop.f32.mrb[62].mxu0  ;;  %5038 = vst.msk [vmem:[#allocation3 + $0x48] sm:$0xff] %vm871_vm1, %v9780_v31  ;;  %v9786_v63 = vld [vmem:[#allocation2 + $0x3c] sm:$0xff]   ;;  %5039 = vst.msk [vmem:[#allocation3 + $0x60] sm:$0xff] %vm871_vm1, %v9783_v16 }
 0x2bf   : > { %5547 = vrot.lane.b32.xlu1 %v9044_v11, %s9900_s26  ;;  %v9204_v26 = vcombine.low %v7798_v23, %v7801_v50  ;;  %v7318_v24 = vrot.slane %v7316_v61, 4  ;;  %v7329_v8 = vshrl.u32 %v7121_v2, 16  ;;  %v7335_v19 = vshll.u32 %v7122_v22, 16  ;;  %v11954_v32 = vpop.f32.mrb[63].mxu0  ;;  %v4879_v23 = vld [vmem:[#allocation2 + $0x9c] sm:$0xf]  ;;  %v11958_v61 = vpop.permute.xlu0 %7037 }
 0x2c0   : > { %7051 = vrot.lane.b32.xlu0 %v9752_v13, %s9899_s25  ;;  %v4680_v57 = vshrl.u32 %v9304_v39, 16  ;;  %v4683_v15 = vshll.u32 %v9304_v39, 16  ;;  %v7321_v48 = vrot.slane %v7319_v34, 5  ;;  %v7327_v6 = vrot.slane %v7325_v60, 5  ;;  %v5078_v29 = vld [vmem:[#allocation2 + $0x6c] sm:$0xf] }
 0x2c1   : > { %v4688_v35 = vshrl.u32 %v9305_v20, 16  ;;  %v4691_v44 = vshll.u32 %v9305_v20, 16  ;;  %7923 = vst.msk [vmem:[#allocation3 + $0xd0] sm:$0xff] %vm871_vm1, %v9204_v26  ;;  %v7331_v4 = vrot.slane %v7329_v8, 4  ;;  %v9125_v2 = vrot.slane %v6630_v55, 9  ;;  %v9788_v22 = vld [vmem:[#allocation2 + $0x48] sm:$0xff]   ;;  %v6034_v8 = vpop.permute.xlu1 %6033 }
 0x2c2   : > { %v4682_v27 = vrot.slane %v4680_v57, 7  ;;  %v7322_v52 = vor.u32 %v7321_v48, %v7318_v24  ;;  %v6764_v40 = vrot.slane %v6631_v25, 5  ;;  %v7337_v11 = vrot.slane %v7335_v19, 5  ;;  %v4883_v34 = vld [vmem:[#allocation2 + $0xa4] sm:$0x1]  ;;  %5040 = vst.msk [vmem:[#allocation3 + $0x78] sm:$0xff] %vm871_vm1, %v9786_v63 }
 0x2c3   : > { %5869 = vrot.lane.b32.xlu1 %v9077_v59, %s9899_s25  ;;  %v4690_v9 = vrot.slane %v4688_v35, 7  ;;  %v7332_v12 = vor.u32 %v7331_v4, %v7327_v6  ;;  %v6767_v13 = vrot.slane %v6632_v54, 5  ;;  %v9753_v26 = vld [vmem:[#allocation2 + $0x78] sm:$0xff]   ;;  %5041 = vst.msk [vmem:[#allocation3 + $0x90] sm:$0xff] %vm871_vm1, %v9788_v22  ;;  %v5079_v57 = vld [vmem:[#allocation2 + $0x70] sm:$0xf] }
 0x2c4   : > { %v4685_v39 = vor.u32 %v4683_v15, %v4682_v27  ;;  %v4686_v50 = vrot.slane %v4682_v27, 4  ;;  %v7323_v60 = vrot.slane %v7322_v52, 4  ;;  %v6765_v55 = vsel %vm10064_vm8, %v9125_v2, %v6764_v40  ;;  %v5080_v15 = vld [vmem:[#allocation2 + $0x74] sm:$0x1]  ;;  %v5626_v27 = vld [vmem:[#allocation2 + $0x7c] sm:$0xf] }
 0x2c5   : > { %v4693_v59 = vor.u32 %v4691_v44, %v4690_v9  ;;  %v4695_v25 = vrot.slane %v4690_v9, 4  ;;  %v7333_v20 = vrot.slane %v7332_v12, 4  ;;  %v6766_v24 = vrot.slane %v6764_v40, 4  ;;  %v5627_v22 = vld [vmem:[#allocation2 + $0x80] sm:$0x1] }
 0x2c6   : > { %v4880_v54 = vsel %vm10091_vm13, %v4685_v39, %v4879_v23  ;;  %v7328_v31 = vsel %vm10084_vm12, %v7323_v60, %v7327_v6  ;;  %v5316_v48 = vshrl.u32 %v5078_v29, 16  ;;  %v5319_v35 = vshll.u32 %v5078_v29, 16  ;;  %v5625_v6 = vld [vmem:[#allocation2 + $0x78] sm:$0xe] }
 0x2c7   : > { %4881 = vst [vmem:[#allocation2 + $0x9c] sm:$0xf] %v4880_v54  ;;  %v4694_v44 = vsel %vm10102_vm14, %v4686_v50, %v4693_v59  ;;  %v4884_v4 = vsel %vm9977_vm3, %v4695_v25, %v4883_v34  ;;  %v7338_v19 = vsel %vm10084_vm12, %v7333_v20, %v7337_v11  ;;  %6045 = vrot.lane.b32.xlu1 %v9753_v26, %s9901_s27  ;;  %v5325_v9 = vshll.u32 %v5079_v57, 16  ;;  %v7671_v59 = vld [vmem:[#allocation2 + $0x88] sm:$0xf] }
 0x2c8   : > { %v6768_v16 = vsel %vm10064_vm8, %v6766_v24, %v6767_v13  ;;  %4882 = vst.msk [vmem:[#allocation2 + $0xa0] sm:$0xf] %vm48_vm0, %v4694_v44  ;;  %4885 = vst [vmem:[#allocation2 + $0xa4] sm:$0x1] %v4884_v4  ;;  %v7957_v23 = vld [vmem:[#allocation3 + $0xd0] sm:$0xff]  ;;  %v9171_v52 = vcombine.low %v7328_v31, %v7338_v19  ;;  %v5318_v40 = vrot.slane %v5316_v48, 4  ;;  %v9408_v29 = vadd.f32 %v11749_v53, %v11742_v49  ;;  %v11982_v13 = vpop.permute.xlu0 %7579 }
 0x2c9   : > { %v9141_v2 = vcombine.low %v6765_v55, %v6768_v16  ;;  %v5321_v63 = vrot.slane %v5319_v35, 5  ;;  %9628 = vmatprep.mubr.msk.bf16.mxu0 %vm871_vm1, %v7957_v23  ;;  %v5329_v12 = vshrl.u32 %v5079_v57, 16  ;;  %v5335_v11 = vshll.u32 %v5080_v15, 16  ;;  %v7670_v55 = vld [vmem:[#allocation2 + $0x84] sm:$0xe] }
 0x2ca   : > { %7593 = vrot.lane.b32.xlu0 %v9171_v52, %s9901_s27  ;;  %v9411_v50 = vadd.f32 %v11759_v51, %v11756_v56  ;;  %v9062_v34 = vrot.slane %v5625_v6, 9  ;;  %v5763_v60 = vrot.slane %v5626_v27, 5  ;;  %v5327_v25 = vrot.slane %v5325_v9, 5  ;;  %v7672_v54 = vld [vmem:[#allocation2 + $0x8c] sm:$0x1] }
 0x2cb   : > { %v5322_v39 = vor.u32 %v5321_v63, %v5318_v40  ;;  %v5331_v20 = vrot.slane %v5329_v12, 4  ;;  %v5337_v26 = vrot.slane %v5335_v11, 5  ;;  %v4164_v24 = vadd.f32 %v11901_v62, %v9408_v29  ;;  %v5538_v49 = vpop.permute.xlu1 %5537  ;;  %v7123_v56 = vld [vmem:[#allocation2 + $0x78] sm:$0xf]  ;;  %v7124_v27 = vld [vmem:[#allocation2 + $0x7c] sm:$0xf] }
 0x2cc   : > { %v4167_v31 = vadd.f32 %v11901_v62, %v9411_v50  ;;  %v11991_v57 = vsel %vm10064_vm8, %v9062_v34, %v5763_v60  ;;  %v5765_v15 = vrot.slane %v5763_v60, 4  ;;  %5582 = vst.msk [vmem:[#allocation3 + $0x48] sm:$0xff] %vm1419_vm15, %v5538_v49  ;;  %v5766_v35 = vrot.slane %v5627_v22, 5  ;;  %v12004_v63 = vpop.permute.xlu0 %6863  ;;  %v7125_v60 = vld [vmem:[#allocation2 + $0x80] sm:$0x1] }
 0x2cd   : > { %v5323_v53 = vrot.slane %v5322_v39, 4  ;;  %v5332_v51 = vor.u32 %v5331_v20, %v5327_v25  ;;  %v4325_v48 = vadd.f32 %v11666_v42, %v4164_v24  ;;  %v9189_v44 = vrot.slane %v7670_v55, 9  ;;  %5902 = vst.msk [vmem:[#allocation3 + $0x48] sm:$0xff] %vm1743_vm5, %v11948_v18  ;;  %v6093_v49 = vld [vmem:[#allocation2 + $0x14] sm:$0x1] }
 0x2ce   : > { %6877 = vrot.lane.b32.xlu0 %v9141_v2, %s9900_s26  ;;  %v4328_v19 = vadd.f32 %v11711_v38, %v4167_v31  ;;  %v7804_v16 = vrot.slane %v7671_v59, 5  ;;  %v7807_v6 = vrot.slane %v7672_v54, 5  ;;  %6078 = vst.msk [vmem:[#allocation3 + $0x48] sm:$0xff] %vm1920_vm6, %v6034_v8  ;;  %v5767_v42 = vsel %vm10064_vm8, %v5765_v15, %v5766_v35  ;;  %v9756_v2 = vld [vmem:[#allocation2 + $0x84] sm:$0xff]   ;;  %v6092_v59 = vld [vmem:[#allocation2 + $0x10] sm:$0xf] }
 0x2cf   : > { %v5328_v4 = vsel %vm10084_vm12, %v5323_v53, %v5327_v25  ;;  %v5333_v23 = vrot.slane %v5332_v51, 4  ;;  %v4373_v52 = vmax.f32 %v4325_v48, 0.0  ;;  %v7340_v40 = vshrl.u32 %v7123_v56, 16  ;;  %v9790_v53 = vld [vmem:[#allocation2 + $0x54] sm:$0xff]   ;;  %v4886_v51 = vld [vmem:[#allocation2 + $0xa8] sm:$0xf] }
 0x2d0   : > { %v4374_v18 = vmax.f32 %v4328_v19, 0.0  ;;  %v9078_v9 = vcombine.low %v11991_v57, %v5767_v42  ;;  %v7805_v38 = vsel %vm10064_vm8, %v9189_v44, %v7804_v16  ;;  %v7806_v12 = vrot.slane %v7804_v16, 4  ;;  %5042 = vst.msk [vmem:[#allocation3 + $0xa8] sm:$0xff] %vm871_vm1, %v9790_v53  ;;  %v4890_v16 = vld [vmem:[#allocation2 + $0xb0] sm:$0x1] }
 0x2d1   : > { %v5338_v11 = vsel %vm10084_vm12, %v5333_v23, %v5337_v26  ;;  %v9306_v8 = vpack.c.bf16 %v4373_v52, %v4373_v52  ;;  %v7342_v29 = vrot.slane %v7340_v40, 4  ;;  %v7343_v22 = vshll.u32 %v7123_v56, 16 }
 0x2d2   : > { %v9045_v39 = vcombine.low %v5328_v4, %v5338_v11  ;;  %v9307_v50 = vpack.c.bf16 %v4374_v18, %v4374_v18  ;;  %7053 = vrot.lane.b32.xlu0 %v9756_v2, %s9899_s25  ;;  %v7808_v34 = vsel %vm10064_vm8, %v7806_v12, %v7807_v6  ;;  %v7349_v55 = vshll.u32 %v7124_v27, 16  ;;  %v12016_v4 = vpop.permute.xlu0 %7039  ;;  %v6091_v2 = vld [vmem:[#allocation2 + $0xc] sm:$0xf] }
 0x2d3   : > { %v4697_v25 = vshrl.u32 %v9306_v8, 16  ;;  %v4700_v20 = vshll.u32 %v9306_v8, 16  ;;  %v9205_v24 = vcombine.low %v7805_v38, %v7808_v34  ;;  %v7345_v54 = vrot.slane %v7343_v22, 5  ;;  %v12019_v38 = vpop.permute.xlu1 %5859  ;;  %v6633_v22 = vld [vmem:[#allocation2 + $0x84] sm:$0xe] }
 0x2d4   : > { %5549 = vrot.lane.b32.xlu1 %v9045_v39, %s9900_s26  ;;  %v4705_v26 = vshrl.u32 %v9307_v50, 16  ;;  %v4708_v31 = vshll.u32 %v9307_v50, 16  ;;  %v7351_v57 = vrot.slane %v7349_v55, 5  ;;  %v7353_v15 = vshrl.u32 %v7124_v27, 16  ;;  %v6634_v39 = vld [vmem:[#allocation2 + $0x88] sm:$0xf] }
 0x2d5   : > { %v4699_v56 = vrot.slane %v4697_v25, 7  ;;  %7924 = vst.msk [vmem:[#allocation3 + $0xe8] sm:$0xff] %vm871_vm1, %v9205_v24  ;;  %v7346_v48 = vor.u32 %v7345_v54, %v7342_v29  ;;  %v7359_v35 = vshll.u32 %v7125_v60, 16  ;;  %v6149_v44 = vshll.u32 %v6092_v59, 16  ;;  %v5081_v25 = vld [vmem:[#allocation2 + $0x78] sm:$0xf] }
 0x2d6   : > { %v4707_v19 = vrot.slane %v4705_v26, 7  ;;  %v7355_v6 = vrot.slane %v7353_v15, 4  ;;  %v6153_v23 = vshrl.u32 %v6092_v59, 16  ;;  %v6159_v52 = vshll.u32 %v6093_v49, 16  ;;  %v6635_v59 = vld [vmem:[#allocation2 + $0x8c] sm:$0x1] }
 0x2d7   : > { %v4702_v42 = vor.u32 %v4700_v20, %v4699_v56  ;;  %v4703_v40 = vrot.slane %v4699_v56, 4  ;;  %v7347_v18 = vrot.slane %v7346_v48, 4  ;;  %v7361_v27 = vrot.slane %v7359_v35, 5  ;;  %v9759_v54 = vld [vmem:[#allocation2 + $0x84] sm:$0xff]   ;;  %v5082_v15 = vld [vmem:[#allocation2 + $0x7c] sm:$0xf]  ;;  %v12036_v56 = vpop.permute.xlu0 %7581 }
 0x2d8   : > { %v4710_v12 = vor.u32 %v4708_v31, %v4707_v19  ;;  %v4712_v11 = vrot.slane %v4707_v19, 4  ;;  %5871 = vrot.lane.b32.xlu1 %v9078_v9, %s9899_s25  ;;  %v7356_v8 = vor.u32 %v7355_v6, %v7351_v57  ;;  %v12022_v29 = vrot.slane %v6149_v44, 5 }
 0x2d9   : > { %v4887_v50 = vsel %vm10091_vm13, %v4702_v42, %v4886_v51  ;;  %v7352_v34 = vsel %vm10084_vm12, %v7347_v18, %v7351_v57  ;;  %v6155_v60 = vrot.slane %v6153_v23, 4  ;;  %v12028_v55 = vrot.slane %v6159_v52, 5  ;;  %v9791_v51 = vld [vmem:[#allocation2 + $0x60] sm:$0xff]   ;;  %v6036_v18 = vpop.permute.xlu1 %6035 }
 0x2da   : > { %4888 = vst [vmem:[#allocation2 + $0xa8] sm:$0xf] %v4887_v50  ;;  %v4711_v9 = vsel %vm10102_vm14, %v4703_v40, %v4710_v12  ;;  %v4891_v20 = vsel %vm9977_vm3, %v4712_v11, %v4890_v16  ;;  %v7357_v24 = vrot.slane %v7356_v8, 4  ;;  %v6140_v49 = vshrl.u32 %v6091_v2, 16  ;;  %v5083_v16 = vld [vmem:[#allocation2 + $0x80] sm:$0x1] }
 0x2db   : > { %4892 = vst [vmem:[#allocation2 + $0xb0] sm:$0x1] %v4891_v20  ;;  %4889 = vst.msk [vmem:[#allocation2 + $0xac] sm:$0xf] %vm48_vm0, %v4711_v9  ;;  %v6156_v53 = vor.u32 %v6155_v60, %v12022_v29  ;;  %v6143_v26 = vshll.u32 %v6091_v2, 16  ;;  %v9126_v31 = vrot.slane %v6633_v22, 9 }
 0x2dc   : > { %v6771_v57 = vrot.slane %v6634_v39, 5  ;;  %v7960_v48 = vld [vmem:[#allocation3 + $0xe8] sm:$0xff]  ;;  %v7362_v35 = vsel %vm10084_vm12, %v7357_v24, %v7361_v27  ;;  %6047 = vrot.lane.b32.xlu1 %v9759_v54, %s9901_s27  ;;  %v6142_v44 = vrot.slane %v6140_v49, 4  ;;  %v6774_v19 = vrot.slane %v6635_v59, 5  ;;  %5043 = vst.msk [vmem:[#allocation3 + $0xc0] sm:$0xff] %vm871_vm1, %v9791_v51 }
 0x2dd   : > { %v5340_v6 = vshrl.u32 %v5081_v25, 16  ;;  %9629 = vmatmul.mubr.msk.bf16.gmra.mrb[80].mxu0 %vm871_vm1, %v7960_v48  ;;  %v9172_v23 = vcombine.low %v7352_v34, %v7362_v35  ;;  %v6157_v52 = vrot.slane %v6156_v53, 4  ;;  %v6145_v42 = vrot.slane %v6143_v26, 5  ;;  %v5628_v34 = vld [vmem:[#allocation2 + $0x84] sm:$0xe] }
 0x2de   : > { %v6772_v40 = vsel %vm10064_vm8, %v9126_v31, %v6771_v57  ;;  %v6773_v2 = vrot.slane %v6771_v57, 4  ;;  %v5343_v27 = vshll.u32 %v5081_v25, 16  ;;  %v5349_v11 = vshll.u32 %v5082_v15, 16  ;;  %v5629_v60 = vld [vmem:[#allocation2 + $0x88] sm:$0xf]  ;;  %v12053_v31 = vpop.permute.xlu0 %6865 }
 0x2df   : > { %v5342_v12 = vrot.slane %v5340_v6, 4  ;;  %7595 = vrot.lane.b32.xlu0 %v9172_v23, %s9901_s27  ;;  %v6162_v8 = vsel %vm10084_vm12, %v6157_v52, %v12028_v55  ;;  %v6146_v22 = vor.u32 %v6145_v42, %v6142_v44  ;;  %v5353_v39 = vshrl.u32 %v5082_v15, 16  ;;  %v5630_v24 = vld [vmem:[#allocation2 + $0x8c] sm:$0x1]  ;;  %v6095_v48 = vld [vmem:[#allocation2 + $0x1c] sm:$0xf] }
 0x2e0   : > { %v5359_v50 = vshll.u32 %v5083_v16, 16  ;;  %v6775_v59 = vsel %vm10064_vm8, %v6773_v2, %v6774_v19  ;;  %v5345_v9 = vrot.slane %v5343_v27, 5  ;;  %v5351_v20 = vrot.slane %v5349_v11, 5  ;;  %v6096_v19 = vld [vmem:[#allocation2 + $0x20] sm:$0x1] }
 0x2e1   : > { %v9414_v25 = vadd.f32 %v11843_v3, %v11841_v36  ;;  %v6147_v54 = vrot.slane %v6146_v22, 4  ;;  %v9142_v49 = vcombine.low %v6772_v40, %v6775_v59  ;;  %v5355_v53 = vrot.slane %v5353_v39, 4  ;;  %v6094_v16 = vld [vmem:[#allocation2 + $0x18] sm:$0xf]  ;;  %v9764_v40 = vld [vmem:[#allocation2 + $0x90] sm:$0xff]  }
 0x2e2   : > { %v5361_v26 = vrot.slane %v5359_v50, 5  ;;  %v5346_v55 = vor.u32 %v5345_v9, %v5342_v12  ;;  %v9417_v57 = vadd.f32 %v11858_v28, %v11848_v41  ;;  %v9063_v15 = vrot.slane %v5628_v34, 9  ;;  %v7673_v39 = vld [vmem:[#allocation2 + $0x90] sm:$0xe]  ;;  %v7126_v50 = vld [vmem:[#allocation2 + $0x84] sm:$0xf] }
 0x2e3   : > { %v5770_v51 = vrot.slane %v5629_v60, 5  ;;  %v6152_v35 = vsel %vm10084_vm12, %v6147_v54, %v12022_v29  ;;  %6879 = vrot.lane.b32.xlu0 %v9142_v49, %s9900_s26  ;;  %v5356_v36 = vor.u32 %v5355_v53, %v5351_v20  ;;  %v5773_v3 = vrot.slane %v5630_v24, 5  ;;  %v5540_v6 = vpop.permute.xlu1 %5539  ;;  %v7674_v59 = vld [vmem:[#allocation2 + $0x94] sm:$0xf]  ;;  %v7675_v9 = vld [vmem:[#allocation2 + $0x98] sm:$0x1] }
 0x2e4   : > { %v4172_v44 = vadd.f32 %v11901_v62, %v9414_v25  ;;  %v9100_v23 = vcombine.low %v6152_v35, %v6162_v8  ;;  %v5347_v52 = vrot.slane %v5346_v55, 4  ;;  %5583 = vst.msk [vmem:[#allocation3 + $0x60] sm:$0xff] %vm1419_vm15, %v5540_v6  ;;  %v6173_v2 = vshll.u32 %v6095_v48, 16  ;;  %v9792_v54 = vld [vmem:[#allocation2 + $0x6c] sm:$0xff]  }
 0x2e5   : > { %v5771_v41 = vsel %vm10064_vm8, %v9063_v15, %v5770_v51  ;;  %v5772_v28 = vrot.slane %v5770_v51, 4  ;;  %v5357_v42 = vrot.slane %v5356_v36, 4  ;;  %v6177_v12 = vshrl.u32 %v6095_v48, 16  ;;  %5903 = vst.msk [vmem:[#allocation3 + $0x60] sm:$0xff] %vm1743_vm5, %v12019_v38 }
 0x2e6   : > { %v4333_v29 = vadd.f32 %v11796_v21, %v4172_v44  ;;  %6587 = vst.msk [vmem:[#allocation3 + $0x8] sm:$0xff] %vm871_vm1, %v9100_v23  ;;  %v5352_v27 = vsel %vm10084_vm12, %v5347_v52, %v5351_v20  ;;  %v6183_v8 = vshll.u32 %v6096_v19, 16  ;;  %v6164_v22 = vshrl.u32 %v6094_v16, 16  ;;  %v12081_v20 = vpop.permute.xlu0 %7041  ;;  %5044 = vst.msk [vmem:[#allocation3 + $0xd8] sm:$0xff] %vm871_vm1, %v9792_v54  ;;  %v7127_v19 = vld [vmem:[#allocation2 + $0x88] sm:$0xf] }
 0x2e7   : > { %v5774_v11 = vsel %vm10064_vm8, %v5772_v28, %v5773_v3  ;;  %6079 = vst.msk [vmem:[#allocation3 + $0x60] sm:$0xff] %vm1920_vm6, %v6036_v18  ;;  %v5362_v21 = vsel %vm10084_vm12, %v5357_v42, %v5361_v26  ;;  %7055 = vrot.lane.b32.xlu0 %v9764_v40, %s9899_s25  ;;  %v12079_v60 = vrot.slane %v6173_v2, 5  ;;  %v6179_v18 = vrot.slane %v6177_v12, 4  ;;  %v12094_v52 = vpop.permute.xlu1 %5861 }
 0x2e8   : > { %6907 = vst.msk [vmem:[#allocation3 + $0x8] sm:$0xff] %vm1419_vm15, %v11856_v43  ;;  %v9079_v38 = vcombine.low %v5771_v41, %v5774_v11  ;;  %v4375_v34 = vmax.f32 %v4333_v29, 0.0  ;;  %v9046_v25 = vcombine.low %v5352_v27, %v5362_v21  ;;  %v6185_v24 = vrot.slane %v6183_v8, 5  ;;  %v9793_v41 = vld [vmem:[#allocation2 + $0x78] sm:$0xff]   ;;  %v7128_v29 = vld [vmem:[#allocation2 + $0x8c] sm:$0x1] }
 0x2e9   : > { %7083 = vst.msk [vmem:[#allocation3 + $0x8] sm:$0xff] %vm1743_vm5, %v11895_v30  ;;  %v6166_v43 = vrot.slane %v6164_v22, 4  ;;  %v6167_v53 = vshll.u32 %v6094_v16, 16  ;;  %v4175_v26 = vadd.f32 %v11901_v62, %v9417_v57  ;;  %v9190_v55 = vrot.slane %v7673_v39, 9  ;;  %v4893_v57 = vld [vmem:[#allocation2 + $0xb4] sm:$0xf] }
 0x2ea   : > { %v9308_v49 = vpack.c.bf16 %v4375_v34, %v4375_v34  ;;  %7627 = vst.msk [vmem:[#allocation3 + $0x8] sm:$0xff] %vm1920_vm6, %v11982_v13  ;;  %5551 = vrot.lane.b32.xlu1 %v9046_v25, %s9900_s26  ;;  %v6180_v15 = vor.u32 %v6179_v18, %v12079_v60  ;;  %v7811_v51 = vrot.slane %v7674_v59, 5  ;;  %v7814_v48 = vrot.slane %v7675_v9, 5  ;;  %v12098_v12 = vpop.permute.xlu0 %7583  ;;  %v9768_v22 = vld [vmem:[#allocation2 + $0x90] sm:$0xff]  }
 0x2eb   : > { %v7364_v35 = vshrl.u32 %v7126_v50, 16  ;;  %v6169_v3 = vrot.slane %v6167_v53, 5  ;;  %v4336_v44 = vadd.f32 %v11810_v47, %v4175_v26  ;;  %v7367_v2 = vshll.u32 %v7126_v50, 16  ;;  %v6636_v39 = vld [vmem:[#allocation2 + $0x90] sm:$0xe]  ;;  %5045 = vst.msk [vmem:[#allocation3 + $0xf0] sm:$0xff] %vm871_vm1, %v9793_v41 }
 0x2ec   : > { %v4714_v30 = vshrl.u32 %v9308_v49, 16  ;;  %v4717_v36 = vshll.u32 %v9308_v49, 16  ;;  %v6181_v16 = vrot.slane %v6180_v15, 4  ;;  %v7812_v13 = vsel %vm10064_vm8, %v9190_v55, %v7811_v51  ;;  %v6637_v21 = vld [vmem:[#allocation2 + $0x94] sm:$0xf] }
 0x2ed   : > { %v7813_v6 = vrot.slane %v7811_v51, 4  ;;  %v7366_v23 = vrot.slane %v7364_v35, 4  ;;  %v6170_v42 = vor.u32 %v6169_v3, %v6166_v43  ;;  %v4376_v40 = vmax.f32 %v4336_v44, 0.0  ;;  %v6638_v43 = vld [vmem:[#allocation2 + $0x98] sm:$0x1]  ;;  %v12115_v3 = vpop.permute.xlu1 %6037 }
 0x2ee   : > { %v12096_v28 = vrot.slane %v4714_v30, 7  ;;  %5873 = vrot.lane.b32.xlu1 %v9079_v38, %s9899_s25  ;;  %v6186_v47 = vsel %vm10084_vm12, %v6181_v16, %v6185_v24  ;;  %v7373_v11 = vshll.u32 %v7127_v19, 16  ;;  %v7377_v8 = vshrl.u32 %v7127_v19, 16  ;;  %v5084_v15 = vld [vmem:[#allocation2 + $0x84] sm:$0xf]  ;;  %v7931_v51 = vld [vmem:[#allocation3] sm:$0xff] }
 0x2ef   : > { %v7815_v27 = vsel %vm10064_vm8, %v7813_v6, %v7814_v48  ;;  %v6171_v59 = vrot.slane %v6170_v42, 4  ;;  %v9309_v9 = vpack.c.bf16 %v4376_v40, %v4376_v40  ;;  %v7369_v25 = vrot.slane %v7367_v2, 5  ;;  %v4897_v19 = vld [vmem:[#allocation2 + $0xbc] sm:$0x1]  ;;  %v9806_v40 = vld [vmem:[%s12990_s3 + $0x88] sm:$0xff]  }
 0x2f0   : > { %v4719_v34 = vor.u32 %v4717_v36, %v12096_v28  ;;  %v4720_v50 = vrot.slane %v12096_v28, 4  ;;  %v9206_v38 = vcombine.low %v7812_v13, %v7815_v27  ;;  %v7375_v18 = vrot.slane %v7373_v11, 5  ;;  %v12117_v13 = vpop.permute.xlu0 %6867  ;;  %v5085_v28 = vld [vmem:[#allocation2 + $0x88] sm:$0xf]  ;;  %v5086_v27 = vld [vmem:[#allocation2 + $0x8c] sm:$0x1] }
 0x2f1   : > { %v7379_v24 = vrot.slane %v7377_v8, 4  ;;  %v7932_v54 = vld [vmem:[#allocation3 + $0x8] sm:$0xff]  ;;  %v6176_v53 = vsel %vm10084_vm12, %v6171_v59, %v12079_v60  ;;  %v4722_v26 = vshrl.u32 %v9309_v9, 16  ;;  %v4725_v55 = vshll.u32 %v9309_v9, 16 }
 0x2f2   : > { %v4894_v49 = vsel %vm10091_vm13, %v4719_v34, %v4893_v57  ;;  %8210 = vmatprep.mubr.bf16.mxu1 %v7932_v54  ;;  %v9101_v48 = vcombine.low %v6176_v53, %v6186_v47  ;;  %7925 = vst.msk [vmem:[#allocation3 + $0x100] sm:$0xff] %vm871_vm1, %v9206_v38  ;;  %v7370_v35 = vor.u32 %v7369_v25, %v7366_v23  ;;  %v7383_v36 = vshll.u32 %v7128_v29, 16  ;;  %v5632_v38 = vld [vmem:[#allocation2 + $0x94] sm:$0xf]  ;;  %v5633_v25 = vld [vmem:[#allocation2 + $0x98] sm:$0x1] }
 0x2f3   : > { %4895 = vst [vmem:[#allocation2 + $0xb4] sm:$0xf] %v4894_v49  ;;  %v7380_v30 = vor.u32 %v7379_v24, %v7375_v18  ;;  %6049 = vrot.lane.b32.xlu1 %v9768_v22, %s9901_s27  ;;  %8211 = vmatmul.mubr.bf16.vlgmr.msra.gmra.mrb[32].mxu1 %v7931_v51  ;;  %v4724_v44 = vrot.slane %v4722_v26, 7  ;;  %v9127_v60 = vrot.slane %v6636_v39, 9  ;;  %v6778_v57 = vrot.slane %v6637_v21, 5  ;;  %v9794_v54 = vld [vmem:[#allocation2 + $0x84] sm:$0xff]  }
 0x2f4   : > { %v6781_v16 = vrot.slane %v6638_v43, 5  ;;  %9646 = vmatpush3.bf16.msra.mxu1 %v11942_v45  ;;  %6588 = vst.msk [vmem:[#allocation3 + $0x20] sm:$0xff] %vm871_vm1, %v9101_v48  ;;  %v7371_v6 = vrot.slane %v7370_v35, 4  ;;  %v7385_v41 = vrot.slane %v7383_v36, 5  ;;  %v5364_v42 = vshrl.u32 %v5084_v15, 16  ;;  %5046 = vst.msk [vmem:[#allocation3 + $0x108] sm:$0xff] %vm871_vm1, %v9794_v54 }
 0x2f5   : > { %v7381_v23 = vrot.slane %v7380_v30, 4  ;;  %9645 = vmatprep.subr.bf16.mxu1 %v9806_v40  ;;  %6908 = vst.msk [vmem:[#allocation3 + $0x20] sm:$0xff] %vm1419_vm15, %v11931_v5  ;;  %v4727_v29 = vor.u32 %v4725_v55, %v4724_v44  ;;  %v4729_v2 = vrot.slane %v4724_v44, 4  ;;  %v6779_v45 = vsel %vm10064_vm8, %v9127_v60, %v6778_v57  ;;  %v5631_v21 = vld [vmem:[#allocation2 + $0x90] sm:$0xe] }
 0x2f6   : > { %v6780_v47 = vrot.slane %v6778_v57, 4  ;;  %v7376_v11 = vsel %vm10084_vm12, %v7371_v6, %v7375_v18  ;;  %7084 = vst.msk [vmem:[#allocation3 + $0x20] sm:$0xff] %vm1743_vm5, %v11958_v61  ;;  %v5366_v22 = vrot.slane %v5364_v42, 4  ;;  %v5367_v39 = vshll.u32 %v5084_v15, 16  ;;  %v12148_v15 = vpop.permute.xlu0 %7043  ;;  %v6097_v36 = vld [vmem:[#allocation2 + $0x24] sm:$0xf] }
 0x2f7   : > { %v7386_v8 = vsel %vm10084_vm12, %v7381_v23, %v7385_v41  ;;  %v4728_v5 = vsel %vm10102_vm14, %v4720_v50, %v4727_v29  ;;  %v4898_v34 = vsel %vm9977_vm3, %v4729_v2, %v4897_v19  ;;  %7628 = vst.msk [vmem:[#allocation3 + $0x20] sm:$0xff] %vm1920_vm6, %v12036_v56  ;;  %v5373_v24 = vshll.u32 %v5085_v28, 16  ;;  %v6098_v44 = vld [vmem:[#allocation2 + $0x28] sm:$0xf]  ;;  %v6099_v23 = vld [vmem:[#allocation2 + $0x2c] sm:$0x1] }
 0x2f8   : > { %v9173_v59 = vcombine.low %v7376_v11, %v7386_v8  ;;  %v6782_v9 = vsel %vm10064_vm8, %v6780_v47, %v6781_v16  ;;  %9647 = vmatpush3.bf16.msra.mxu1 %v9806_v40  ;;  %4896 = vst.msk [vmem:[#allocation2 + $0xb8] sm:$0xf] %vm48_vm0, %v4728_v5  ;;  %4899 = vst [vmem:[#allocation2 + $0xbc] sm:$0x1] %v4898_v34  ;;  %v5369_v18 = vrot.slane %v5367_v39, 5  ;;  %v5377_v50 = vshrl.u32 %v5085_v28, 16  ;;  %v5542_v43 = vpop.permute.xlu1 %5541 }
 0x2f9   : > { %v9143_v61 = vcombine.low %v6779_v45, %v6782_v9  ;;  %v7963_v49 = vld [vmem:[#allocation3 + $0x100] sm:$0xff]  ;;  %v5383_v53 = vshll.u32 %v5086_v27, 16  ;;  %v9420_v26 = vadd.f32 %v11946_v33, %v11933_v37  ;;  %v9423_v56 = vadd.f32 %v11954_v32, %v11951_v10  ;;  %5584 = vst.msk [vmem:[#allocation3 + $0x78] sm:$0xff] %vm1419_vm15, %v5542_v43  ;;  %v7677_v2 = vld [vmem:[#allocation2 + $0xa0] sm:$0xf]  ;;  %v7934_v47 = vld [vmem:[#allocation3 + $0x18] sm:$0xff] }
 0x2fa   : > { %7597 = vrot.lane.b32.xlu0 %v9173_v59, %s9901_s27  ;;  %v9064_v55 = vrot.slane %v5631_v21, 9  ;;  %9632 = vmatprep.mubr.msk.bf16.mxu0 %vm871_vm1, %v7963_v49  ;;  %v5370_v51 = vor.u32 %v5369_v18, %v5366_v22  ;;  %v5375_v48 = vrot.slane %v5373_v24, 5  ;;  %v5379_v35 = vrot.slane %v5377_v50, 4  ;;  %5904 = vst.msk [vmem:[#allocation3 + $0x78] sm:$0xff] %vm1743_vm5, %v12094_v52  ;;  %v7676_v28 = vld [vmem:[#allocation2 + $0x9c] sm:$0xe]  ;;  %v12173_v39 = vpop.permute.xlu0 %7585 }
 0x2fb   : > { %v5777_v30 = vrot.slane %v5632_v38, 5  ;;  %v5385_v37 = vrot.slane %v5383_v53, 5  ;;  %v4180_v33 = vadd.f32 %v11901_v62, %v9420_v26  ;;  %v4183_v10 = vadd.f32 %v11901_v62, %v9423_v56  ;;  %6080 = vst.msk [vmem:[#allocation3 + $0x78] sm:$0xff] %vm1920_vm6, %v12115_v3  ;;  %v7678_v50 = vld [vmem:[#allocation2 + $0xa4] sm:$0x1] }
 0x2fc   : > { %v5780_v32 = vrot.slane %v5633_v25, 5  ;;  %v5371_v19 = vrot.slane %v5370_v51, 4  ;;  %v5380_v60 = vor.u32 %v5379_v35, %v5375_v48  ;;  %v6188_v62 = vshrl.u32 %v6097_v36, 16  ;;  %v12170_v27 = vpop.permute.xlu1 %5863  ;;  %v4900_v51 = vld [vmem:[#allocation2 + $0xc0] sm:$0xf] }
 0x2fd   : > { %v12161_v57 = vsel %vm10064_vm8, %v9064_v55, %v5777_v30  ;;  %v5779_v16 = vrot.slane %v5777_v30, 4  ;;  %v4341_v52 = vadd.f32 %v11785_v7, %v4180_v33  ;;  %v4344_v6 = vadd.f32 %v11802_v14, %v4183_v10  ;;  %v9773_v14 = vld [vmem:[#allocation2 + $0x9c] sm:$0xff]   ;;  %v7129_v55 = vld [vmem:[#allocation2 + $0x90] sm:$0xf] }
 0x2fe   : > { %6881 = vrot.lane.b32.xlu0 %v9143_v61, %s9900_s26  ;;  %v6191_v41 = vshll.u32 %v6097_v36, 16  ;;  %v5376_v3 = vsel %vm10084_vm12, %v5371_v19, %v5375_v48  ;;  %v5381_v42 = vrot.slane %v5380_v60, 4  ;;  %v6197_v29 = vshll.u32 %v6098_v44, 16  ;;  %v7935_v45 = vld [vmem:[#allocation3 + $0x20] sm:$0xff]  ;;  %v4904_v48 = vld [vmem:[#allocation2 + $0xc8] sm:$0x1] }
 0x2ff   : > { %v5781_v40 = vsel %vm10064_vm8, %v5779_v16, %v5780_v32  ;;  %v4377_v7 = vmax.f32 %v4341_v52, 0.0  ;;  %v4378_v11 = vmax.f32 %v4344_v6, 0.0  ;;  %v6190_v22 = vrot.slane %v6188_v62, 4  ;;  %8218 = vmatprep.mubr.bf16.mxu1 %v7935_v45  ;;  %v7130_v60 = vld [vmem:[#allocation2 + $0x94] sm:$0xf] }
 0x300   : > { %v9080_v8 = vcombine.low %v12161_v57, %v5781_v40  ;;  %v5386_v21 = vsel %vm10084_vm12, %v5381_v42, %v5385_v37  ;;  %v6193_v5 = vrot.slane %v6191_v41, 5  ;;  %v6199_v34 = vrot.slane %v6197_v29, 5  ;;  %8219 = vmatmul.mubr.bf16.gmra.mrb[36].mxu1 %v7934_v47  ;;  %v12181_v33 = vpop.permute.xlu1 %6039  ;;  %v12183_v57 = vpop.permute.xlu0 %6869  ;;  %v7131_v6 = vld [vmem:[#allocation2 + $0x98] sm:$0x1]  ;;  %v9795_v41 = vld [vmem:[#allocation2 + $0x90] sm:$0xff]  }
 0x301   : > { %v6201_v59 = vshrl.u32 %v6098_v44, 16  ;;  %v9047_v9 = vcombine.low %v5376_v3, %v5386_v21  ;;  %v9310_v38 = vpack.c.bf16 %v4377_v7, %v4377_v7  ;;  %v9311_v25 = vpack.c.bf16 %v4378_v11, %v4378_v11  ;;  %v6639_v29 = vld [vmem:[#allocation2 + $0x9c] sm:$0xe]  ;;  %v5087_v45 = vld [vmem:[#allocation2 + $0x90] sm:$0xf]  ;;  %5047 = vst.msk [vmem:[#allocation3 + $0x120] sm:$0xff] %vm871_vm1, %v9795_v41 }
 0x302   : > { %7057 = vrot.lane.b32.xlu0 %v9773_v14, %s9899_s25  ;;  %v6207_v61 = vshll.u32 %v6099_v23, 16  ;;  %v6194_v18 = vor.u32 %v6193_v5, %v6190_v22  ;;  %v9191_v43 = vrot.slane %v7676_v28, 9  ;;  %v7818_v54 = vrot.slane %v7677_v2, 5  ;;  %v6640_v2 = vld [vmem:[#allocation2 + $0xa0] sm:$0xf] }
 0x303   : > { %v6203_v24 = vrot.slane %v6201_v59, 4  ;;  %5553 = vrot.lane.b32.xlu1 %v9047_v9, %s9900_s26  ;;  %v4731_v49 = vshrl.u32 %v9310_v38, 16  ;;  %v4734_v53 = vshll.u32 %v9310_v38, 16  ;;  %v4739_v26 = vshrl.u32 %v9311_v25, 16  ;;  %v6641_v22 = vld [vmem:[#allocation2 + $0xa4] sm:$0x1] }
 0x304   : > { %v4742_v56 = vshll.u32 %v9311_v25, 16  ;;  %v6195_v35 = vrot.slane %v6194_v18, 4  ;;  %v6209_v36 = vrot.slane %v6207_v61, 5  ;;  %v7819_v37 = vsel %vm10064_vm8, %v9191_v43, %v7818_v54  ;;  %v9777_v59 = vld [vmem:[#allocation2 + $0x9c] sm:$0xff]   ;;  %v5088_v9 = vld [vmem:[#allocation2 + $0x94] sm:$0xf] }
 0x305   : > { %v6204_v30 = vor.u32 %v6203_v24, %v6199_v34  ;;  %v4733_v10 = vrot.slane %v4731_v49, 7  ;;  %v4741_v32 = vrot.slane %v4739_v26, 7  ;;  %v7820_v44 = vrot.slane %v7818_v54, 4  ;;  %v5089_v24 = vld [vmem:[#allocation2 + $0x98] sm:$0x1] }
 0x306   : > { %v7821_v19 = vrot.slane %v7678_v50, 5  ;;  %v6200_v16 = vsel %vm10084_vm12, %v6195_v35, %v6199_v34  ;;  %v7388_v23 = vshrl.u32 %v7129_v55, 16  ;;  %v7391_v62 = vshll.u32 %v7129_v55, 16  ;;  %v5634_v49 = vld [vmem:[#allocation2 + $0x9c] sm:$0xe] }
 0x307   : > { %v6205_v52 = vrot.slane %v6204_v30, 4  ;;  %v4736_v28 = vor.u32 %v4734_v53, %v4733_v10  ;;  %v4737_v3 = vrot.slane %v4733_v10, 4  ;;  %v4744_v42 = vor.u32 %v4742_v56, %v4741_v32  ;;  %5875 = vrot.lane.b32.xlu1 %v9080_v8, %s9899_s25  ;;  %v12202_v53 = vpop.permute.xlu0 %7045  ;;  %v6100_v10 = vld [vmem:[#allocation2 + $0x30] sm:$0xf] }
 0x308   : > { %v4746_v40 = vrot.slane %v4741_v32, 4  ;;  %v7822_v7 = vsel %vm10064_vm8, %v7820_v44, %v7821_v19  ;;  %v7390_v11 = vrot.slane %v7388_v23, 4  ;;  %v7393_v14 = vrot.slane %v7391_v62, 5 }
 0x309   : > { %v6210_v47 = vsel %vm10084_vm12, %v6205_v52, %v6209_v36  ;;  %v4901_v21 = vsel %vm10091_vm13, %v4736_v28, %v4900_v51  ;;  %v4745_v8 = vsel %vm10102_vm14, %v4737_v3, %v4744_v42  ;;  %v9207_v38 = vcombine.low %v7819_v37, %v7822_v7  ;;  %v5636_v37 = vld [vmem:[#allocation2 + $0xa4] sm:$0x1]  ;;  %v6102_v28 = vld [vmem:[#allocation2 + $0x38] sm:$0x1] }
 0x30a   : > { %v4905_v5 = vsel %vm9977_vm3, %v4746_v40, %v4904_v48  ;;  %v9102_v34 = vcombine.low %v6200_v16, %v6210_v47  ;;  %4902 = vst [vmem:[#allocation2 + $0xc0] sm:$0xf] %v4901_v21  ;;  %4903 = vst.msk [vmem:[#allocation2 + $0xc4] sm:$0xf] %vm48_vm0, %v4745_v8  ;;  %v7394_v25 = vor.u32 %v7393_v14, %v7390_v11  ;;  %v7397_v61 = vshll.u32 %v7130_v60, 16  ;;  %v5544_v58 = vpop.permute.xlu1 %5543 }
 0x30b   : > { %4906 = vst [vmem:[#allocation2 + $0xc8] sm:$0x1] %v4905_v5  ;;  %v7401_v18 = vshrl.u32 %v7130_v60, 16  ;;  %v7407_v0 = vshll.u32 %v7131_v6, 16  ;;  %6051 = vrot.lane.b32.xlu1 %v9777_v59, %s9901_s27  ;;  %v9128_v50 = vrot.slane %v6639_v29, 9  ;;  %v6785_v43 = vrot.slane %v6640_v2, 5  ;;  %v12225_v2 = vpop.permute.xlu0 %7587 }
 0x30c   : > { %6589 = vst.msk [vmem:[#allocation3 + $0x38] sm:$0xff] %vm871_vm1, %v9102_v34  ;;  %v6788_v54 = vrot.slane %v6641_v22, 5  ;;  %7926 = vst.msk [vmem:[#allocation3 + $0x118] sm:$0xff] %vm871_vm1, %v9207_v38  ;;  %v7395_v26 = vrot.slane %v7394_v25, 4  ;;  %v7399_v56 = vrot.slane %v7397_v61, 5  ;;  %v5388_v51 = vshrl.u32 %v5087_v45, 16 }
 0x30d   : > { %5585 = vst.msk [vmem:[#allocation3 + $0x90] sm:$0xff] %vm1419_vm15, %v5544_v58  ;;  %6909 = vst.msk [vmem:[#allocation3 + $0x38] sm:$0xff] %vm1419_vm15, %v12004_v63  ;;  %v7403_v55 = vrot.slane %v7401_v18, 4  ;;  %v5635_v48 = vld [vmem:[#allocation2 + $0xa0] sm:$0xf]  ;;  %v7409_v35 = vrot.slane %v7407_v0, 5  ;;  %v12214_v30 = vsel %vm10064_vm8, %v9128_v50, %v6785_v43 }
 0x30e   : > { %5905 = vst.msk [vmem:[#allocation3 + $0x90] sm:$0xff] %vm1743_vm5, %v12170_v27  ;;  %7085 = vst.msk [vmem:[#allocation3 + $0x38] sm:$0xff] %vm1743_vm5, %v12016_v4  ;;  %v6787_v36 = vrot.slane %v6785_v43, 4  ;;  %v5391_v63 = vshll.u32 %v5087_v45, 16  ;;  %v7400_v32 = vsel %vm10084_vm12, %v7395_v26, %v7399_v56  ;;  %v5390_v27 = vrot.slane %v5388_v51, 4  ;;  %v12233_v59 = vpop.permute.xlu1 %5865  ;;  %v7937_v58 = vld [vmem:[#allocation3 + $0x30] sm:$0xff] }
 0x30f   : > { %6081 = vst.msk [vmem:[#allocation3 + $0x90] sm:$0xff] %vm1920_vm6, %v12181_v33  ;;  %v7404_v44 = vor.u32 %v7403_v55, %v7399_v56  ;;  %v5397_v19 = vshll.u32 %v5088_v9, 16  ;;  %7629 = vst.msk [vmem:[#allocation3 + $0x38] sm:$0xff] %vm1920_vm6, %v12098_v12  ;;  %v5401_v16 = vshrl.u32 %v5088_v9, 16  ;;  %v5407_v52 = vshll.u32 %v5089_v24, 16 }
 0x310   : > { %v6789_v4 = vsel %vm10064_vm8, %v6787_v36, %v6788_v54  ;;  %v5393_v60 = vrot.slane %v5391_v63, 5  ;;  %v6101_v6 = vld [vmem:[#allocation2 + $0x34] sm:$0xf]  ;;  %v9065_v41 = vrot.slane %v5634_v49, 9  ;;  %v5784_v29 = vrot.slane %v5635_v48, 5 }
 0x311   : > { %v7405_v23 = vrot.slane %v7404_v44, 4  ;;  %v9144_v62 = vcombine.low %v12214_v30, %v6789_v4  ;;  %v5399_v33 = vrot.slane %v5397_v19, 5  ;;  %v5403_v42 = vrot.slane %v5401_v16, 4  ;;  %v7679_v5 = vld [vmem:[#allocation2 + $0xa8] sm:$0xe] }
 0x312   : > { %v5394_v3 = vor.u32 %v5393_v60, %v5390_v27  ;;  %v5409_v40 = vrot.slane %v5407_v52, 5  ;;  %v5787_v45 = vrot.slane %v5636_v37, 5  ;;  %v6212_v47 = vshrl.u32 %v6100_v10, 16  ;;  %v7680_v34 = vld [vmem:[#allocation2 + $0xac] sm:$0xf] }
 0x313   : > { %v7410_v12 = vsel %vm10084_vm12, %v7405_v23, %v7409_v35  ;;  %v6215_v7 = vshll.u32 %v6100_v10, 16  ;;  %v7966_v11 = vld [vmem:[#allocation3 + $0x118] sm:$0xff]  ;;  %v5404_v21 = vor.u32 %v5403_v42, %v5399_v33  ;;  %v12231_v8 = vsel %vm10064_vm8, %v9065_v41, %v5784_v29  ;;  %v7132_v24 = vld [vmem:[#allocation2 + $0x9c] sm:$0xf]  ;;  %v7133_v48 = vld [vmem:[#allocation2 + $0xa0] sm:$0xf]  ;;  %v12244_v10 = vpop.permute.xlu0 %6871 }
 0x314   : > { %v9174_v14 = vcombine.low %v7400_v32, %v7410_v12  ;;  %v5395_v22 = vrot.slane %v5394_v3, 4  ;;  %9633 = vmatmul.mubr.msk.bf16.gmra.mrb[84].mxu0 %vm871_vm1, %v7966_v11  ;;  %v5786_v9 = vrot.slane %v5784_v29, 4  ;;  %v6214_v38 = vrot.slane %v6212_v47, 4  ;;  %v7681_v18 = vld [vmem:[#allocation2 + $0xb0] sm:$0x1]  ;;  %v9796_v12 = vld [vmem:[#allocation2 + $0x9c] sm:$0xff]  }
 0x315   : > { %v6217_v25 = vrot.slane %v6215_v7, 5  ;;  %v6221_v61 = vshll.u32 %v6101_v6, 16  ;;  %v5405_v50 = vrot.slane %v5404_v21, 4  ;;  %v6225_v43 = vshrl.u32 %v6101_v6, 16  ;;  %v7134_v37 = vld [vmem:[#allocation2 + $0xa4] sm:$0x1] }
 0x316   : > { %7599 = vrot.lane.b32.xlu0 %v9174_v14, %s9901_s27  ;;  %v5400_v0 = vsel %vm10084_vm12, %v5395_v22, %v5399_v33  ;;  %v6231_v54 = vshll.u32 %v6102_v28, 16  ;;  %v7938_v49 = vld [vmem:[#allocation3 + $0x38] sm:$0xff]  ;;  %v5788_v26 = vsel %vm10064_vm8, %v5786_v9, %v5787_v45  ;;  %v9192_v51 = vrot.slane %v7679_v5, 9  ;;  %v6642_v4 = vld [vmem:[#allocation2 + $0xa8] sm:$0xe]  ;;  %v12247_v33 = vpop.permute.xlu1 %6041  ;;  %5048 = vst.msk [vmem:[#allocation3 + $0x138] sm:$0xff] %vm871_vm1, %v9796_v12 }
 0x317   : > { %v6218_v56 = vor.u32 %v6217_v25, %v6214_v38  ;;  %v6223_v55 = vrot.slane %v6221_v61, 5  ;;  %8226 = vmatprep.mubr.bf16.mxu1 %v7938_v49  ;;  %v5410_v35 = vsel %vm10084_vm12, %v5405_v50, %v5409_v40  ;;  %v9081_v30 = vcombine.low %v12231_v8, %v5788_v26  ;;  %v6643_v23 = vld [vmem:[#allocation2 + $0xac] sm:$0xf]  ;;  %v12249_v41 = vpop.f32.mrb[64].mxu0  ;;  %v5090_v9 = vld [vmem:[#allocation2 + $0x9c] sm:$0xf] }
 0x318   : > { %v6227_v36 = vrot.slane %v6225_v43, 4  ;;  %v6233_v63 = vrot.slane %v6231_v54, 5  ;;  %8227 = vmatmul.mubr.bf16.gmra.mrb[40].mxu1 %v7937_v58  ;;  %v9048_v32 = vcombine.low %v5400_v0, %v5410_v35  ;;  %v7825_v27 = vrot.slane %v7680_v34, 5  ;;  %v12256_v29 = vpop.f32.mrb[65].mxu0  ;;  %v9779_v45 = vld [vmem:[#allocation2 + $0xa8] sm:$0xff]   ;;  %v12268_v0 = vpop.permute.xlu0 %7047 }
 0x319   : > { %v6219_v44 = vrot.slane %v6218_v56, 4  ;;  %v7828_v19 = vrot.slane %v7681_v18, 5  ;;  %v7412_v16 = vshrl.u32 %v7132_v24, 16  ;;  %v7415_v52 = vshll.u32 %v7132_v24, 16  ;;  %v12258_v22 = vpop.f32.mrb[66].mxu0  ;;  %v9797_v50 = vld [vmem:[#allocation2 + $0xa8] sm:$0xff]  }
 0x31a   : > { %6883 = vrot.lane.b32.xlu0 %v9144_v62, %s9900_s26  ;;  %v6228_v60 = vor.u32 %v6227_v36, %v6223_v55  ;;  %v7421_v6 = vshll.u32 %v7133_v48, 16  ;;  %5555 = vrot.lane.b32.xlu1 %v9048_v32, %s9900_s26  ;;  %v7826_v3 = vsel %vm10064_vm8, %v9192_v51, %v7825_v27  ;;  %v7827_v42 = vrot.slane %v7825_v27, 4  ;;  %v6644_v62 = vld [vmem:[#allocation2 + $0xb0] sm:$0x1]  ;;  %v12262_v38 = vpop.f32.mrb[67].mxu0  ;;  %v9781_v51 = vld [vmem:[#allocation2 + $0xa8] sm:$0xff]  }
 0x31b   : > { %v6224_v28 = vsel %vm10084_vm12, %v6219_v44, %v6223_v55  ;;  %v7425_v40 = vshrl.u32 %v7133_v48, 16  ;;  %v7414_v7 = vrot.slane %v7412_v16, 4  ;;  %v7417_v11 = vrot.slane %v7415_v52, 5  ;;  %v5091_v58 = vld [vmem:[#allocation2 + $0xa0] sm:$0xf]  ;;  %5049 = vst.msk [vmem:[#allocation3 + $0x150] sm:$0xff] %vm871_vm1, %v9797_v50 }
 0x31c   : > { %v6229_v47 = vrot.slane %v6228_v60, 4  ;;  %v7423_v14 = vrot.slane %v7421_v6, 5  ;;  %v7829_v21 = vsel %vm10064_vm8, %v7827_v42, %v7828_v19  ;;  %v7431_v5 = vshll.u32 %v7134_v37, 16  ;;  %v5092_v56 = vld [vmem:[#allocation2 + $0xa4] sm:$0x1] }
 0x31d   : > { %v7427_v8 = vrot.slane %v7425_v40, 4  ;;  %v9129_v34 = vrot.slane %v6642_v4, 9  ;;  %v9208_v61 = vcombine.low %v7826_v3, %v7829_v21  ;;  %v7418_v18 = vor.u32 %v7417_v11, %v7414_v7  ;;  %v5637_v19 = vld [vmem:[#allocation2 + $0xa8] sm:$0xe]  ;;  %v5638_v6 = vld [vmem:[#allocation2 + $0xac] sm:$0xf] }
 0x31e   : > { %7059 = vrot.lane.b32.xlu0 %v9779_v45, %s9899_s25  ;;  %v6234_v25 = vsel %vm10084_vm12, %v6229_v47, %v6233_v63  ;;  %v6792_v24 = vrot.slane %v6643_v23, 5  ;;  %5877 = vrot.lane.b32.xlu1 %v9081_v30, %s9899_s25  ;;  %v7433_v49 = vrot.slane %v7431_v5, 5  ;;  %v6795_v26 = vrot.slane %v6644_v62, 5  ;;  %v6103_v63 = vld [vmem:[#allocation2 + $0x3c] sm:$0xf]  ;;  %v12297_v47 = vpop.permute.xlu0 %7589 }
 0x31f   : > { %v9103_v43 = vcombine.low %v6224_v28, %v6234_v25  ;;  %v7428_v54 = vor.u32 %v7427_v8, %v7423_v14  ;;  %7927 = vst.msk [vmem:[#allocation3 + $0x130] sm:$0xff] %vm871_vm1, %v9208_v61  ;;  %v7419_v55 = vrot.slane %v7418_v18, 4  ;;  %v5412_v36 = vshrl.u32 %v5090_v9, 16  ;;  %v5546_v37 = vpop.permute.xlu1 %5545  ;;  %v5639_v23 = vld [vmem:[#allocation2 + $0xb0] sm:$0x1] }
 0x320   : > { %v12274_v48 = vsel %vm10064_vm8, %v9129_v34, %v6792_v24  ;;  %v6794_v35 = vrot.slane %v6792_v24, 4  ;;  %v5415_v32 = vshll.u32 %v5090_v9, 16  ;;  %v5421_v44 = vshll.u32 %v5091_v58, 16  ;;  %5586 = vst.msk [vmem:[#allocation3 + $0xa8] sm:$0xff] %vm1419_vm15, %v5546_v37  ;;  %v6104_v40 = vld [vmem:[#allocation2 + $0x40] sm:$0xf] }
 0x321   : > { %6590 = vst.msk [vmem:[#allocation3 + $0x50] sm:$0xff] %vm871_vm1, %v9103_v43  ;;  %v7429_v30 = vrot.slane %v7428_v54, 4  ;;  %v5425_v27 = vshrl.u32 %v5091_v58, 16  ;;  %v7424_v4 = vsel %vm10084_vm12, %v7419_v55, %v7423_v14  ;;  %v5414_v16 = vrot.slane %v5412_v36, 4  ;;  %v6105_v14 = vld [vmem:[#allocation2 + $0x44] sm:$0x1] }
 0x322   : > { %6910 = vst.msk [vmem:[#allocation3 + $0x50] sm:$0xff] %vm1419_vm15, %v12053_v31  ;;  %v6796_v60 = vsel %vm10064_vm8, %v6794_v35, %v6795_v26  ;;  %v5431_v52 = vshll.u32 %v5092_v56, 16  ;;  %6053 = vrot.lane.b32.xlu1 %v9781_v51, %s9901_s27  ;;  %v5417_v3 = vrot.slane %v5415_v32, 5  ;;  %v5423_v42 = vrot.slane %v5421_v44, 5  ;;  %v7682_v9 = vld [vmem:[#allocation2 + $0xb4] sm:$0xe] }
 0x323   : > { %5906 = vst.msk [vmem:[#allocation3 + $0xa8] sm:$0xff] %vm1743_vm5, %v12233_v59  ;;  %v7434_v28 = vsel %vm10084_vm12, %v7429_v30, %v7433_v49  ;;  %7086 = vst.msk [vmem:[#allocation3 + $0x50] sm:$0xff] %vm1743_vm5, %v12081_v20  ;;  %v9145_v31 = vcombine.low %v12274_v48, %v6796_v60  ;;  %v5427_v12 = vrot.slane %v5425_v27, 4  ;;  %v9066_v59 = vrot.slane %v5637_v19, 9  ;;  %v12300_v25 = vpop.permute.xlu1 %5867  ;;  %v7683_v50 = vld [vmem:[#allocation2 + $0xb8] sm:$0xf]  ;;  %v12312_v27 = vpop.permute.xlu0 %6873 }
 0x324   : > { %6082 = vst.msk [vmem:[#allocation3 + $0xa8] sm:$0xff] %vm1920_vm6, %v12247_v33  ;;  %v9175_v62 = vcombine.low %v7424_v4, %v7434_v28  ;;  %v5433_v45 = vrot.slane %v5431_v52, 5  ;;  %7630 = vst.msk [vmem:[#allocation3 + $0x50] sm:$0xff] %vm1920_vm6, %v12173_v39  ;;  %v5418_v7 = vor.u32 %v5417_v3, %v5414_v16  ;;  %v5791_v11 = vrot.slane %v5638_v6, 5  ;;  %v7684_v56 = vld [vmem:[#allocation2 + $0xbc] sm:$0x1] }
 0x325   : > { %v5794_v20 = vrot.slane %v5639_v23, 5  ;;  %v6236_v21 = vshrl.u32 %v6103_v63, 16  ;;  %v5428_v8 = vor.u32 %v5427_v12, %v5423_v42  ;;  %v6239_v5 = vshll.u32 %v6103_v63, 16  ;;  %v7135_v36 = vld [vmem:[#allocation2 + $0xa8] sm:$0xf]  ;;  %v9782_v23 = vld [vmem:[#allocation2 + $0xb4] sm:$0xff]  }
 0x326   : > { %7601 = vrot.lane.b32.xlu0 %v9175_v62, %s9901_s27  ;;  %v6245_v34 = vshll.u32 %v6104_v40, 16  ;;  %v6249_v33 = vshrl.u32 %v6104_v40, 16  ;;  %v7969_v61 = vld [vmem:[#allocation3 + $0x130] sm:$0xff]  ;;  %v5419_v18 = vrot.slane %v5418_v7, 4  ;;  %v5792_v39 = vsel %vm10064_vm8, %v9066_v59, %v5791_v11  ;;  %v7137_v52 = vld [vmem:[#allocation2 + $0xb0] sm:$0x1] }
 0x327   : > { %v5793_v24 = vrot.slane %v5791_v11, 4  ;;  %v6238_v58 = vrot.slane %v6236_v21, 4  ;;  %9636 = vmatprep.mubr.msk.bf16.mxu0 %vm871_vm1, %v7969_v61  ;;  %v5429_v43 = vrot.slane %v5428_v8, 4  ;;  %v6241_v54 = vrot.slane %v6239_v5, 5  ;;  %v7136_v44 = vld [vmem:[#allocation2 + $0xac] sm:$0xf]  ;;  %v6044_v12 = vpop.permute.xlu1 %6043 }
 0x328   : > { %v6247_v49 = vrot.slane %v6245_v34, 5  ;;  %v6251_v26 = vrot.slane %v6249_v33, 4  ;;  %v5424_v55 = vsel %vm10084_vm12, %v5419_v18, %v5423_v42  ;;  %v6255_v48 = vshll.u32 %v6105_v14, 16  ;;  %v5093_v40 = vld [vmem:[#allocation2 + $0xa8] sm:$0xf]  ;;  %v7940_v62 = vld [vmem:[#allocation3 + $0x48] sm:$0xff] }
 0x329   : > { %v5795_v51 = vsel %vm10064_vm8, %v5793_v24, %v5794_v20  ;;  %v9193_v35 = vrot.slane %v7682_v9, 9  ;;  %v5434_v63 = vsel %vm10084_vm12, %v5429_v43, %v5433_v45  ;;  %v6242_v30 = vor.u32 %v6241_v54, %v6238_v58  ;;  %v6645_v20 = vld [vmem:[#allocation2 + $0xb4] sm:$0xe]  ;;  %v6646_v34 = vld [vmem:[#allocation2 + $0xb8] sm:$0xf] }
 0x32a   : > { %6885 = vrot.lane.b32.xlu0 %v9145_v31, %s9900_s26  ;;  %v9082_v37 = vcombine.low %v5792_v39, %v5795_v51  ;;  %v6252_v32 = vor.u32 %v6251_v26, %v6247_v49  ;;  %v9049_v19 = vcombine.low %v5424_v55, %v5434_v63  ;;  %v6257_v4 = vrot.slane %v6255_v48, 5  ;;  %v6647_v33 = vld [vmem:[#allocation2 + $0xbc] sm:$0x1]  ;;  %v5094_v24 = vld [vmem:[#allocation2 + $0xac] sm:$0xf]  ;;  %v9798_v58 = vld [vmem:[#allocation2 + $0xb4] sm:$0xff]  }
 0x32b   : > { %v7832_v60 = vrot.slane %v7683_v50, 5  ;;  %v7835_v16 = vrot.slane %v7684_v56, 5  ;;  %v7941_v6 = vld [vmem:[#allocation3 + $0x50] sm:$0xff]  ;;  %v6243_v28 = vrot.slane %v6242_v30, 4  ;;  %v7436_v42 = vshrl.u32 %v7135_v36, 16  ;;  %5050 = vst.msk [vmem:[#allocation3 + $0x168] sm:$0xff] %vm871_vm1, %v9798_v58 }
 0x32c   : > { %v6253_v3 = vrot.slane %v6252_v32, 4  ;;  %v7439_v31 = vshll.u32 %v7135_v36, 16  ;;  %8234 = vmatprep.mubr.bf16.mxu1 %v7941_v6  ;;  %5557 = vrot.lane.b32.xlu1 %v9049_v19, %s9900_s26  ;;  %v7445_v7 = vshll.u32 %v7136_v44, 16  ;;  %v7449_v11 = vshrl.u32 %v7136_v44, 16  ;;  %v5095_v48 = vld [vmem:[#allocation2 + $0xb0] sm:$0x1] }
 0x32d   : > { %v7833_v45 = vsel %vm10064_vm8, %v9193_v35, %v7832_v60  ;;  %v7834_v59 = vrot.slane %v7832_v60, 4  ;;  %8235 = vmatmul.mubr.bf16.gmra.mrb[44].mxu1 %v7940_v62  ;;  %v6248_v14 = vsel %vm10084_vm12, %v6243_v28, %v6247_v49  ;;  %v7438_v8 = vrot.slane %v7436_v42, 4  ;;  %v12324_v49 = vpop.permute.xlu0 %7049  ;;  %v5096_v44 = vld [vmem:[#allocation2 + $0xb4] sm:$0xf] }
 0x32e   : > { %7061 = vrot.lane.b32.xlu0 %v9782_v23, %s9899_s25  ;;  %v6258_v21 = vsel %vm10084_vm12, %v6253_v3, %v6257_v4  ;;  %v7441_v5 = vrot.slane %v7439_v31, 5  ;;  %v7447_v18 = vrot.slane %v7445_v7, 5  ;;  %v7451_v39 = vrot.slane %v7449_v11, 4  ;;  %v9784_v4 = vld [vmem:[#allocation2 + $0xb4] sm:$0xff]   ;;  %v6106_v11 = vld [vmem:[#allocation2 + $0x48] sm:$0xf] }
 0x32f   : > { %v9104_v9 = vcombine.low %v6248_v14, %v6258_v21  ;;  %v7836_v61 = vsel %vm10064_vm8, %v7834_v59, %v7835_v16  ;;  %v7455_v54 = vshll.u32 %v7137_v52, 16  ;;  %v9130_v26 = vrot.slane %v6645_v20, 9  ;;  %v5097_v3 = vld [vmem:[#allocation2 + $0xb8] sm:$0xf] }
 0x330   : > { %v9209_v50 = vcombine.low %v7833_v45, %v7836_v61  ;;  %v7442_v43 = vor.u32 %v7441_v5, %v7438_v8  ;;  %5879 = vrot.lane.b32.xlu1 %v9082_v37, %s9899_s25  ;;  %v7452_v56 = vor.u32 %v7451_v39, %v7447_v18  ;;  %v6799_v55 = vrot.slane %v6646_v34, 5  ;;  %v6107_v5 = vld [vmem:[#allocation2 + $0x4c] sm:$0xf] }
 0x331   : > { %6591 = vst.msk [vmem:[#allocation3 + $0x68] sm:$0xff] %vm871_vm1, %v9104_v9  ;;  %v6802_v51 = vrot.slane %v6647_v33, 5  ;;  %v5436_v35 = vshrl.u32 %v5093_v40, 16  ;;  %v7457_v63 = vrot.slane %v7455_v54, 5  ;;  %v5439_v30 = vshll.u32 %v5093_v40, 16  ;;  %v5548_v37 = vpop.permute.xlu1 %5547  ;;  %v12349_v20 = vpop.permute.xlu0 %7591 }
 0x332   : > { %6911 = vst.msk [vmem:[#allocation3 + $0x68] sm:$0xff] %vm1419_vm15, %v12117_v13  ;;  %v7443_v36 = vrot.slane %v7442_v43, 4  ;;  %v5445_v32 = vshll.u32 %v5094_v24, 16  ;;  %v7453_v19 = vrot.slane %v7452_v56, 4  ;;  %v6800_v60 = vsel %vm10064_vm8, %v9130_v26, %v6799_v55  ;;  %5587 = vst.msk [vmem:[#allocation3 + $0xc0] sm:$0xff] %vm1419_vm15, %v5548_v37 }
 0x333   : > { %7928 = vst.msk [vmem:[#allocation3 + $0x148] sm:$0xff] %vm871_vm1, %v9209_v50  ;;  %v6801_v16 = vrot.slane %v6799_v55, 4  ;;  %v5438_v52 = vrot.slane %v5436_v35, 4  ;;  %v5441_v6 = vrot.slane %v5439_v30, 5  ;;  %v5449_v28 = vshrl.u32 %v5094_v24, 16 }
 0x334   : > { %7087 = vst.msk [vmem:[#allocation3 + $0x68] sm:$0xff] %vm1743_vm5, %v12148_v15  ;;  %v7448_v13 = vsel %vm10084_vm12, %v7443_v36, %v7447_v18  ;;  %v5447_v23 = vrot.slane %v5445_v32, 5  ;;  %5907 = vst.msk [vmem:[#allocation3 + $0xc0] sm:$0xff] %vm1743_vm5, %v12300_v25  ;;  %v7458_v15 = vsel %vm10084_vm12, %v7453_v19, %v7457_v63  ;;  %6055 = vrot.lane.b32.xlu1 %v9784_v4, %s9901_s27  ;;  %v5455_v31 = vshll.u32 %v5095_v48, 16  ;;  %v5098_v40 = vld [vmem:[#allocation2 + $0xbc] sm:$0x1] }
 0x335   : > { %7631 = vst.msk [vmem:[#allocation3 + $0x68] sm:$0xff] %vm1920_vm6, %v12225_v2  ;;  %v6803_v42 = vsel %vm10064_vm8, %v6801_v16, %v6802_v51  ;;  %v5460_v62 = vshrl.u32 %v5096_v44, 16  ;;  %6083 = vst.msk [vmem:[#allocation3 + $0xc0] sm:$0xff] %vm1920_vm6, %v6044_v12  ;;  %v9176_v45 = vcombine.low %v7448_v13, %v7458_v15  ;;  %v5442_v7 = vor.u32 %v5441_v6, %v5438_v52  ;;  %v6108_v18 = vld [vmem:[#allocation2 + $0x50] sm:$0x1]  ;;  %v12355_v30 = vpop.permute.xlu1 %5869  ;;  %v12360_v16 = vpop.permute.xlu0 %6875 }
 0x336   : > { %v9146_v59 = vcombine.low %v6800_v60, %v6803_v42  ;;  %v5451_v2 = vrot.slane %v5449_v28, 4  ;;  %v5457_v25 = vrot.slane %v5455_v31, 5  ;;  %v5463_v21 = vshll.u32 %v5096_v44, 16  ;;  %v7138_v36 = vld [vmem:[#allocation2 + $0xb4] sm:$0xf]  ;;  %v7943_v60 = vld [vmem:[#allocation3 + $0x60] sm:$0xff] }
 0x337   : > { %v5462_v14 = vrot.slane %v5460_v62, 4  ;;  %v5469_v8 = vshll.u32 %v5097_v3, 16  ;;  %7603 = vrot.lane.b32.xlu0 %v9176_v45, %s9901_s27  ;;  %v5443_v34 = vrot.slane %v5442_v7, 4  ;;  %v5473_v9 = vshrl.u32 %v5097_v3, 16  ;;  %v7139_v4 = vld [vmem:[#allocation2 + $0xb8] sm:$0xf] }
 0x338   : > { %v5452_v33 = vor.u32 %v5451_v2, %v5447_v23  ;;  %v5479_v61 = vshll.u32 %v5098_v40, 16  ;;  %v5465_v39 = vrot.slane %v5463_v21, 5  ;;  %v6260_v58 = vshrl.u32 %v6106_v11, 16  ;;  %v12362_v52 = vpop.f32.mrb[68].mxu0  ;;  %v7140_v3 = vld [vmem:[#allocation2 + $0xbc] sm:$0x1] }
 0x339   : > { %v5471_v24 = vrot.slane %v5469_v8, 5  ;;  %v6263_v50 = vshll.u32 %v6106_v11, 16  ;;  %v5448_v43 = vsel %vm10084_vm12, %v5443_v34, %v5447_v23  ;;  %v5475_v26 = vrot.slane %v5473_v9, 4  ;;  %v5640_v15 = vld [vmem:[#allocation2 + $0xb4] sm:$0xe]  ;;  %v12364_v42 = vpop.f32.mrb[69].mxu0 }
 0x33a   : > { %v7972_v12 = vld [vmem:[#allocation3 + $0x148] sm:$0xff]  ;;  %v5453_v54 = vrot.slane %v5452_v33, 4  ;;  %v5481_v56 = vrot.slane %v5479_v61, 5  ;;  %v5466_v55 = vor.u32 %v5465_v39, %v5462_v14  ;;  %v6262_v51 = vrot.slane %v6260_v58, 4  ;;  %v12366_v7 = vpop.f32.mrb[70].mxu0 }
 0x33b   : > { %9637 = vmatmul.mubr.msk.bf16.gmra.mrb[88].mxu0 %vm871_vm1, %v7972_v12  ;;  %v6265_v48 = vrot.slane %v6263_v50, 5  ;;  %v6269_v35 = vshll.u32 %v6107_v5, 16  ;;  %6887 = vrot.lane.b32.xlu0 %v9146_v59, %s9900_s26  ;;  %v5476_v44 = vor.u32 %v5475_v26, %v5471_v24  ;;  %v6273_v37 = vshrl.u32 %v6107_v5, 16  ;;  %v9785_v31 = vld [vmem:[#allocation2 + $0xc0] sm:$0xff]   ;;  %v5641_v21 = vld [vmem:[#allocation2 + $0xb8] sm:$0xf] }
 0x33c   : > { %v7944_v63 = vld [vmem:[#allocation3 + $0x68] sm:$0xff]  ;;  %v5458_v32 = vsel %vm10084_vm12, %v5453_v54, %v5457_v25  ;;  %v6279_v19 = vshll.u32 %v6108_v18, 16  ;;  %v5467_v6 = vrot.slane %v5466_v55, 4  ;;  %v7460_v59 = vshrl.u32 %v7138_v36, 16  ;;  %v12371_v8 = vpop.f32.mrb[71].mxu0 }
 0x33d   : > { %8242 = vmatprep.mubr.bf16.mxu1 %v7944_v63  ;;  %v9050_v13 = vcombine.low %v5448_v43, %v5458_v32  ;;  %v6266_v23 = vor.u32 %v6265_v48, %v6262_v51  ;;  %v6271_v28 = vrot.slane %v6269_v35, 5  ;;  %v5477_v40 = vrot.slane %v5476_v44, 4  ;;  %v5642_v61 = vld [vmem:[#allocation2 + $0xbc] sm:$0x1]  ;;  %v6648_v18 = vld [vmem:[#allocation2 + $0xc0] sm:$0xe]  ;;  %v6046_v43 = vpop.permute.xlu1 %6045  ;;  %v12378_v48 = vpop.permute.xlu0 %7051 }
 0x33e   : > { %8243 = vmatmul.mubr.bf16.gmra.mrb[48].mxu1 %v7943_v60  ;;  %v6275_v62 = vrot.slane %v6273_v37, 4  ;;  %v6281_v45 = vrot.slane %v6279_v19, 5  ;;  %v5472_v2 = vsel %vm10084_vm12, %v5467_v6, %v5471_v24  ;;  %v7463_v25 = vshll.u32 %v7138_v36, 16  ;;  %v6649_v50 = vld [vmem:[#allocation2 + $0xc4] sm:$0xf] }
 0x33f   : > { %5559 = vrot.lane.b32.xlu1 %v9050_v13, %s9900_s26  ;;  %v6267_v11 = vrot.slane %v6266_v23, 4  ;;  %v7469_v14 = vshll.u32 %v7139_v4, 16  ;;  %7063 = vrot.lane.b32.xlu0 %v9785_v31, %s9899_s25  ;;  %v5482_v5 = vsel %vm10084_vm12, %v5477_v40, %v5481_v56  ;;  %v7462_v33 = vrot.slane %v7460_v59, 4  ;;  %v6650_v63 = vld [vmem:[#allocation2 + $0xc8] sm:$0x1] }
 0x340   : > { %v6276_v34 = vor.u32 %v6275_v62, %v6271_v28  ;;  %v7473_v9 = vshrl.u32 %v7139_v4, 16  ;;  %v9051_v12 = vcombine.low %v5472_v2, %v5482_v5  ;;  %v7465_v24 = vrot.slane %v7463_v25, 5  ;;  %v7141_v60 = vld [vmem:[#allocation2 + $0xc0] sm:$0xf]  ;;  %v7143_v2 = vld [vmem:[#allocation2 + $0xc8] sm:$0x1] }
 0x341   : > { %v6272_v39 = vsel %vm10084_vm12, %v6267_v11, %v6271_v28  ;;  %v7471_v58 = vrot.slane %v7469_v14, 5  ;;  %v7479_v55 = vshll.u32 %v7140_v3, 16  ;;  %v9067_v51 = vrot.slane %v5640_v15, 9  ;;  %v7142_v3 = vld [vmem:[#allocation2 + $0xc4] sm:$0xf] }
 0x342   : > { %v6277_v54 = vrot.slane %v6276_v34, 4  ;;  %v7475_v26 = vrot.slane %v7473_v9, 4  ;;  %v7466_v56 = vor.u32 %v7465_v24, %v7462_v33  ;;  %v5798_v35 = vrot.slane %v5641_v21, 5  ;;  %v6109_v14 = vld [vmem:[#allocation2 + $0x54] sm:$0xf] }
 0x343   : > { %5561 = vrot.lane.b32.xlu1 %v9051_v12, %s9900_s26  ;;  %v5801_v36 = vrot.slane %v5642_v61, 5  ;;  %v9131_v32 = vrot.slane %v6648_v18, 9  ;;  %v7481_v19 = vrot.slane %v7479_v55, 5  ;;  %v6806_v4 = vrot.slane %v6649_v50, 5  ;;  %v6110_v61 = vld [vmem:[#allocation2 + $0x58] sm:$0xf]  ;;  %v12398_v18 = vpop.permute.xlu0 %7593 }
 0x344   : > { %v6282_v44 = vsel %vm10084_vm12, %v6277_v54, %v6281_v45  ;;  %v7476_v37 = vor.u32 %v7475_v26, %v7471_v58  ;;  %v7467_v6 = vrot.slane %v7466_v56, 4  ;;  %v5799_v23 = vsel %vm10064_vm8, %v9067_v51, %v5798_v35  ;;  %v7144_v51 = vld [vmem:[#allocation2 + $0xcc] sm:$0xf] }
 0x345   : > { %v9105_v13 = vcombine.low %v6272_v39, %v6282_v44  ;;  %v5800_v28 = vrot.slane %v5798_v35, 4  ;;  %v6807_v31 = vsel %vm10064_vm8, %v9131_v32, %v6806_v4  ;;  %v6808_v40 = vrot.slane %v6806_v4, 4 }
 0x346   : > { %v7477_v15 = vrot.slane %v7476_v37, 4  ;;  %v6809_v62 = vrot.slane %v6650_v63, 5  ;;  %v7472_v45 = vsel %vm10084_vm12, %v7467_v6, %v7471_v58  ;;  %v7484_v11 = vshrl.u32 %v7141_v60, 16  ;;  %v5550_v21 = vpop.permute.xlu1 %5549  ;;  %v6111_v58 = vld [vmem:[#allocation2 + $0x5c] sm:$0x1] }
 0x347   : > { %6592 = vst.msk [vmem:[#allocation3 + $0x80] sm:$0xff] %vm871_vm1, %v9105_v13  ;;  %v5802_v59 = vsel %vm10064_vm8, %v5800_v28, %v5801_v36  ;;  %v7487_v25 = vshll.u32 %v7141_v60, 16  ;;  %v7493_v9 = vshll.u32 %v7142_v3, 16  ;;  %v7497_v54 = vshrl.u32 %v7142_v3, 16  ;;  %v7145_v63 = vld [vmem:[#allocation2 + $0xd0] sm:$0xf] }
 0x348   : > { %6912 = vst.msk [vmem:[#allocation3 + $0x80] sm:$0xff] %vm1419_vm15, %v12183_v57  ;;  %v7482_v5 = vsel %vm10084_vm12, %v7477_v15, %v7481_v19  ;;  %v9083_v34 = vcombine.low %v5799_v23, %v5802_v59  ;;  %v6810_v33 = vsel %vm10064_vm8, %v6808_v40, %v6809_v62  ;;  %5588 = vst.msk [vmem:[#allocation3 + $0xd8] sm:$0xff] %vm1419_vm15, %v5550_v21  ;;  %v7486_v24 = vrot.slane %v7484_v11, 4  ;;  %v7146_v23 = vld [vmem:[#allocation2 + $0xd4] sm:$0x1]  ;;  %v12411_v15 = vpop.permute.xlu0 %6877 }
 0x349   : > { %v9177_v12 = vcombine.low %v7472_v45, %v7482_v5  ;;  %7088 = vst.msk [vmem:[#allocation3 + $0x80] sm:$0xff] %vm1743_vm5, %v12202_v53  ;;  %v9147_v39 = vcombine.low %v6807_v31, %v6810_v33  ;;  %v7489_v57 = vrot.slane %v7487_v25, 5  ;;  %5908 = vst.msk [vmem:[#allocation3 + $0xd8] sm:$0xff] %vm1743_vm5, %v12355_v30  ;;  %v7495_v50 = vrot.slane %v7493_v9, 5  ;;  %v9787_v30 = vld [vmem:[#allocation2 + $0xc0] sm:$0xff]  }
 0x34a   : > { %5881 = vrot.lane.b32.xlu1 %v9083_v34, %s9899_s25  ;;  %v7503_v26 = vshll.u32 %v7143_v2, 16  ;;  %v6284_v55 = vshrl.u32 %v6109_v14, 16  ;;  %7632 = vst.msk [vmem:[#allocation3 + $0x80] sm:$0xff] %vm1920_vm6, %v12297_v47  ;;  %6084 = vst.msk [vmem:[#allocation3 + $0xd8] sm:$0xff] %vm1920_vm6, %v6046_v43  ;;  %v6287_v56 = vshll.u32 %v6109_v14, 16  ;;  %v6293_v35 = vshll.u32 %v6110_v61, 16 }
 0x34b   : > { %7605 = vrot.lane.b32.xlu0 %v9177_v12, %s9901_s27  ;;  %v7490_v53 = vor.u32 %v7489_v57, %v7486_v24  ;;  %v6297_v36 = vshrl.u32 %v6110_v61, 16  ;;  %v7499_v32 = vrot.slane %v7497_v54, 4  ;;  %v6303_v19 = vshll.u32 %v6111_v58, 16  ;;  %v6112_v59 = vld [vmem:[#allocation2 + $0x60] sm:$0xf]  ;;  %v12416_v12 = vpop.permute.xlu1 %5871  ;;  %v7946_v54 = vld [vmem:[#allocation3 + $0x78] sm:$0xff] }
 0x34c   : > { %v7505_v44 = vrot.slane %v7503_v26, 5  ;;  %v6286_v37 = vrot.slane %v6284_v55, 4  ;;  %v6289_v60 = vrot.slane %v6287_v56, 5  ;;  %v6295_v13 = vrot.slane %v6293_v35, 5  ;;  %v6113_v21 = vld [vmem:[#allocation2 + $0x64] sm:$0xf] }
 0x34d   : > { %v7491_v4 = vrot.slane %v7490_v53, 4  ;;  %v6299_v6 = vrot.slane %v6297_v36, 4  ;;  %v7500_v47 = vor.u32 %v7499_v32, %v7495_v50  ;;  %v6305_v43 = vrot.slane %v6303_v19, 5  ;;  %v6114_v58 = vld [vmem:[#allocation2 + $0x68] sm:$0x1]  ;;  %v9789_v36 = vld [vmem:[#allocation2 + $0xcc] sm:$0xff]  }
 0x34e   : > { %6057 = vrot.lane.b32.xlu1 %v9787_v30, %s9901_s27  ;;  %v7508_v28 = vshrl.u32 %v7144_v51, 16  ;;  %v7511_v3 = vshll.u32 %v7144_v51, 16  ;;  %v6290_v40 = vor.u32 %v6289_v60, %v6286_v37  ;;  %v7517_v45 = vshll.u32 %v7145_v63, 16  ;;  %v6115_v56 = vld [vmem:[#allocation2 + $0x6c] sm:$0xf] }
 0x34f   : > { %6889 = vrot.lane.b32.xlu0 %v9147_v39, %s9900_s26  ;;  %v7496_v31 = vsel %vm10084_vm12, %v7491_v4, %v7495_v50  ;;  %v6300_v62 = vor.u32 %v6299_v6, %v6295_v13  ;;  %v7501_v2 = vrot.slane %v7500_v47, 4  ;;  %v7521_v14 = vshrl.u32 %v7145_v63, 16 }
 0x350   : > { %v7510_v11 = vrot.slane %v7508_v28, 4  ;;  %v7513_v25 = vrot.slane %v7511_v3, 5  ;;  %v6291_v5 = vrot.slane %v6290_v40, 4  ;;  %v7519_v33 = vrot.slane %v7517_v45, 5  ;;  %v6118_v45 = vld [vmem:[#allocation2 + $0x78] sm:$0xf] }
 0x351   : > { %v6301_v34 = vrot.slane %v6300_v62, 4  ;;  %v7527_v9 = vshll.u32 %v7146_v23, 16  ;;  %v7947_v61 = vld [vmem:[#allocation3 + $0x80] sm:$0xff]  ;;  %v7506_v39 = vsel %vm10084_vm12, %v7501_v2, %v7505_v44  ;;  %v7523_v57 = vrot.slane %v7521_v14, 4  ;;  %v12424_v44 = vpop.permute.xlu0 %7053 }
 0x352   : > { %v7514_v24 = vor.u32 %v7513_v25, %v7510_v11  ;;  %v6308_v50 = vshrl.u32 %v6112_v59, 16  ;;  %8250 = vmatprep.mubr.bf16.mxu1 %v7947_v61  ;;  %v9178_v26 = vcombine.low %v7496_v31, %v7506_v39  ;;  %v6296_v55 = vsel %vm10084_vm12, %v6291_v5, %v6295_v13  ;;  %v6116_v13 = vld [vmem:[#allocation2 + $0x70] sm:$0xf] }
 0x353   : > { %v6306_v51 = vsel %vm10084_vm12, %v6301_v34, %v6305_v43  ;;  %v7529_v53 = vrot.slane %v7527_v9, 5  ;;  %8251 = vmatmul.mubr.bf16.gmra.mrb[52].mxu1 %v7946_v54  ;;  %v7524_v30 = vor.u32 %v7523_v57, %v7519_v33  ;;  %v6311_v37 = vshll.u32 %v6112_v59, 16  ;;  %v6117_v43 = vld [vmem:[#allocation2 + $0x74] sm:$0x1]  ;;  %v6048_v59 = vpop.permute.xlu1 %6047  ;;  %v6120_v54 = vld [vmem:[#allocation2 + $0x80] sm:$0x1] }
 0x354   : > { %v9106_v35 = vcombine.low %v6296_v55, %v6306_v51  ;;  %v7515_v63 = vrot.slane %v7514_v24, 4  ;;  %v6310_v32 = vrot.slane %v6308_v50, 4  ;;  %7607 = vrot.lane.b32.xlu0 %v9178_v26, %s9901_s27  ;;  %v6317_v19 = vshll.u32 %v6113_v21, 16 }
 0x355   : > { %v6321_v4 = vshrl.u32 %v6113_v21, 16  ;;  %v6327_v60 = vshll.u32 %v6114_v58, 16  ;;  %v7525_v47 = vrot.slane %v7524_v30, 4  ;;  %v6332_v23 = vshrl.u32 %v6115_v56, 16  ;;  %v12439_v24 = vpop.permute.xlu0 %7595 }
 0x356   : > { %6593 = vst.msk [vmem:[#allocation3 + $0x98] sm:$0xff] %vm871_vm1, %v9106_v35  ;;  %v7520_v6 = vsel %vm10084_vm12, %v7515_v63, %v7519_v33  ;;  %v6335_v28 = vshll.u32 %v6115_v56, 16  ;;  %v6313_v3 = vrot.slane %v6311_v37, 5  ;;  %v6319_v31 = vrot.slane %v6317_v19, 5  ;;  %v6119_v33 = vld [vmem:[#allocation2 + $0x7c] sm:$0xf] }
 0x357   : > { %6913 = vst.msk [vmem:[#allocation3 + $0x98] sm:$0xff] %vm1419_vm15, %v12244_v10  ;;  %v6323_v40 = vrot.slane %v6321_v4, 4  ;;  %v6329_v62 = vrot.slane %v6327_v60, 5  ;;  %v7530_v2 = vsel %vm10084_vm12, %v7525_v47, %v7529_v53  ;;  %v6334_v11 = vrot.slane %v6332_v23, 4  ;;  %v6121_v35 = vld [vmem:[#allocation2 + $0x84] sm:$0xf] }
 0x358   : > { %7089 = vst.msk [vmem:[#allocation3 + $0x98] sm:$0xff] %vm1743_vm5, %v12268_v0  ;;  %v6337_v25 = vrot.slane %v6335_v28, 5  ;;  %v6341_v14 = vshll.u32 %v6116_v13, 16  ;;  %7065 = vrot.lane.b32.xlu0 %v9789_v36, %s9899_s25  ;;  %v9179_v21 = vcombine.low %v7520_v6, %v7530_v2  ;;  %v6314_v5 = vor.u32 %v6313_v3, %v6310_v32  ;;  %v6122_v32 = vld [vmem:[#allocation2 + $0x88] sm:$0xf] }
 0x359   : > { %v6324_v10 = vor.u32 %v6323_v40, %v6319_v31  ;;  %7633 = vst.msk [vmem:[#allocation3 + $0x98] sm:$0xff] %vm1920_vm6, %v12349_v20  ;;  %v6345_v34 = vshrl.u32 %v6116_v13, 16  ;;  %v6351_v39 = vshll.u32 %v6117_v43, 16  ;;  %v6356_v0 = vshrl.u32 %v6118_v45, 16  ;;  %v6123_v6 = vld [vmem:[#allocation2 + $0x8c] sm:$0x1] }
 0x35a   : > { %v6338_v9 = vor.u32 %v6337_v25, %v6334_v11  ;;  %v6343_v61 = vrot.slane %v6341_v14, 5  ;;  %v6315_v57 = vrot.slane %v6314_v5, 4  ;;  %v6359_v26 = vshll.u32 %v6118_v45, 16  ;;  %v6124_v3 = vld [vmem:[#allocation2 + $0x90] sm:$0xf]  ;;  %v12452_v11 = vpop.permute.xlu0 %6879 }
 0x35b   : > { %v6325_v58 = vrot.slane %v6324_v10, 4  ;;  %v6347_v50 = vrot.slane %v6345_v34, 4  ;;  %v6353_v51 = vrot.slane %v6351_v39, 5  ;;  %v6358_v53 = vrot.slane %v6356_v0, 4  ;;  %v6125_v10 = vld [vmem:[#allocation2 + $0x94] sm:$0xf] }
 0x35c   : > { %v6339_v55 = vrot.slane %v6338_v9, 4  ;;  %v6365_v56 = vshll.u32 %v6119_v33, 16  ;;  %7609 = vrot.lane.b32.xlu0 %v9179_v21, %s9901_s27  ;;  %v6320_v20 = vsel %vm10084_vm12, %v6315_v57, %v6319_v31  ;;  %v6361_v30 = vrot.slane %v6359_v26, 5  ;;  %v5552_v37 = vpop.permute.xlu1 %5551 }
 0x35d   : > { %v6330_v36 = vsel %vm10084_vm12, %v6325_v58, %v6329_v62  ;;  %v6348_v63 = vor.u32 %v6347_v50, %v6343_v61  ;;  %v6369_v13 = vshrl.u32 %v6119_v33, 16  ;;  %5589 = vst.msk [vmem:[#allocation3 + $0xf0] sm:$0xff] %vm1419_vm15, %v5552_v37  ;;  %v6375_v23 = vshll.u32 %v6120_v54, 16  ;;  %v6126_v50 = vld [vmem:[#allocation2 + $0x98] sm:$0x1] }
 0x35e   : > { %v9107_v19 = vcombine.low %v6320_v20, %v6330_v36  ;;  %v6344_v4 = vsel %vm10084_vm12, %v6339_v55, %v6343_v61  ;;  %v6367_v60 = vrot.slane %v6365_v56, 5  ;;  %v6362_v43 = vor.u32 %v6361_v30, %v6358_v53  ;;  %5909 = vst.msk [vmem:[#allocation3 + $0xf0] sm:$0xff] %vm1743_vm5, %v12416_v12  ;;  %v7949_v12 = vld [vmem:[#allocation3 + $0x90] sm:$0xff]  ;;  %v7056_v30 = vpop.permute.xlu0 %7055 }
 0x35f   : > { %v6349_v47 = vrot.slane %v6348_v63, 4  ;;  %v6380_v28 = vshrl.u32 %v6121_v35, 16  ;;  %v6371_v40 = vrot.slane %v6369_v13, 4  ;;  %v6383_v62 = vshll.u32 %v6121_v35, 16  ;;  %6085 = vst.msk [vmem:[#allocation3 + $0xf0] sm:$0xff] %vm1920_vm6, %v6048_v59 }
 0x360   : > { %6594 = vst.msk [vmem:[#allocation3 + $0xb0] sm:$0xff] %vm871_vm1, %v9107_v19  ;;  %v7950_v31 = vld [vmem:[#allocation3 + $0x98] sm:$0xff]  ;;  %v6389_v45 = vshll.u32 %v6122_v32, 16  ;;  %v6393_v2 = vshrl.u32 %v6122_v32, 16  ;;  %v6363_v14 = vrot.slane %v6362_v43, 4  ;;  %v6377_v21 = vrot.slane %v6375_v23, 5 }
 0x361   : > { %6914 = vst.msk [vmem:[#allocation3 + $0xb0] sm:$0xff] %vm1419_vm15, %v12312_v27  ;;  %v6354_v25 = vsel %vm10084_vm12, %v6349_v47, %v6353_v51  ;;  %8258 = vmatprep.mubr.bf16.mxu1 %v7950_v31  ;;  %v6382_v5 = vrot.slane %v6380_v28, 4  ;;  %v6372_v33 = vor.u32 %v6371_v40, %v6367_v60  ;;  %v6385_v9 = vrot.slane %v6383_v62, 5  ;;  %v6127_v35 = vld [vmem:[#allocation2 + $0x9c] sm:$0xf] }
 0x362   : > { %7090 = vst.msk [vmem:[#allocation3 + $0xb0] sm:$0xff] %vm1743_vm5, %v12324_v49  ;;  %v9108_v34 = vcombine.low %v6344_v4, %v6354_v25  ;;  %8259 = vmatmul.mubr.bf16.gmra.mrb[56].mxu1 %v7949_v12  ;;  %v6391_v59 = vrot.slane %v6389_v45, 5  ;;  %v6368_v27 = vsel %vm10084_vm12, %v6363_v14, %v6367_v60  ;;  %v6395_v61 = vrot.slane %v6393_v2, 4  ;;  %v12465_v57 = vpop.f32.mrb[72].mxu0  ;;  %v6128_v19 = vld [vmem:[#allocation2 + $0xa0] sm:$0xf]  ;;  %v12489_v25 = vpop.permute.xlu1 %5873 }
 0x363   : > { %7634 = vst.msk [vmem:[#allocation3 + $0xb0] sm:$0xff] %vm1920_vm6, %v12398_v18  ;;  %v6399_v39 = vshll.u32 %v6123_v6, 16  ;;  %v6404_v0 = vshrl.u32 %v6124_v3, 16  ;;  %v6373_v58 = vrot.slane %v6372_v33, 4  ;;  %v6386_v49 = vor.u32 %v6385_v9, %v6382_v5  ;;  %v12468_v55 = vpop.f32.mrb[73].mxu0 }
 0x364   : > { %6595 = vst.msk [vmem:[#allocation3 + $0xc8] sm:$0xff] %vm871_vm1, %v9108_v34  ;;  %v6407_v54 = vshll.u32 %v6124_v3, 16  ;;  %v6413_v26 = vshll.u32 %v6125_v10, 16  ;;  %v6396_v18 = vor.u32 %v6395_v61, %v6391_v59  ;;  %v6417_v56 = vshrl.u32 %v6125_v10, 16  ;;  %v12472_v20 = vpop.f32.mrb[74].mxu0  ;;  %v7952_v10 = vld [vmem:[#allocation3 + $0xa8] sm:$0xff] }
 0x365   : > { %6915 = vst.msk [vmem:[#allocation3 + $0xc8] sm:$0xff] %vm1419_vm15, %v12360_v16  ;;  %v6401_v51 = vrot.slane %v6399_v39, 5  ;;  %v6406_v53 = vrot.slane %v6404_v0, 4  ;;  %v6378_v36 = vsel %vm10084_vm12, %v6373_v58, %v6377_v21  ;;  %v6387_v63 = vrot.slane %v6386_v49, 4  ;;  %v12478_v4 = vpop.f32.mrb[75].mxu0 }
 0x366   : > { %7091 = vst.msk [vmem:[#allocation3 + $0xc8] sm:$0xff] %vm1743_vm5, %v12378_v48  ;;  %v6409_v32 = vrot.slane %v6407_v54, 5  ;;  %v6415_v37 = vrot.slane %v6413_v26, 5  ;;  %v9109_v16 = vcombine.low %v6368_v27, %v6378_v36  ;;  %v6397_v60 = vrot.slane %v6396_v18, 4  ;;  %v6129_v43 = vld [vmem:[#allocation2 + $0xa4] sm:$0x1] }
 0x367   : > { %7635 = vst.msk [vmem:[#allocation3 + $0xc8] sm:$0xff] %vm1920_vm6, %v12439_v24  ;;  %v6419_v13 = vrot.slane %v6417_v56, 4  ;;  %v6423_v6 = vshll.u32 %v6126_v50, 16  ;;  %v6392_v48 = vsel %vm10084_vm12, %v6387_v63, %v6391_v59  ;;  %v6428_v23 = vshrl.u32 %v6127_v35, 16  ;;  %v6130_v45 = vld [vmem:[#allocation2 + $0xa8] sm:$0xf] }
 0x368   : > { %v6410_v47 = vor.u32 %v6409_v32, %v6406_v53  ;;  %v6431_v28 = vshll.u32 %v6127_v35, 16  ;;  %6596 = vst.msk [vmem:[#allocation3 + $0xe0] sm:$0xff] %vm871_vm1, %v9109_v16  ;;  %v6402_v3 = vsel %vm10084_vm12, %v6397_v60, %v6401_v51  ;;  %v6437_v62 = vshll.u32 %v6128_v19, 16  ;;  %v6131_v5 = vld [vmem:[#allocation2 + $0xac] sm:$0xf] }
 0x369   : > { %v6420_v31 = vor.u32 %v6419_v13, %v6415_v37  ;;  %v6425_v40 = vrot.slane %v6423_v6, 5  ;;  %6916 = vst.msk [vmem:[#allocation3 + $0xe0] sm:$0xff] %vm1419_vm15, %v12411_v15  ;;  %v9110_v2 = vcombine.low %v6392_v48, %v6402_v3  ;;  %v6430_v14 = vrot.slane %v6428_v23, 4  ;;  %v6132_v49 = vld [vmem:[#allocation2 + $0xb0] sm:$0x1] }
 0x36a   : > { %v7953_v24 = vld [vmem:[#allocation3 + $0xb0] sm:$0xff]  ;;  %v6411_v12 = vrot.slane %v6410_v47, 4  ;;  %v6433_v21 = vrot.slane %v6431_v28, 5  ;;  %7092 = vst.msk [vmem:[#allocation3 + $0xe0] sm:$0xff] %vm1743_vm5, %v12424_v44  ;;  %v6439_v33 = vrot.slane %v6437_v62, 5  ;;  %v6441_v9 = vshrl.u32 %v6128_v19, 16 }
 0x36b   : > { %8266 = vmatprep.mubr.bf16.mxu1 %v7953_v24  ;;  %v6421_v34 = vrot.slane %v6420_v31, 4  ;;  %v6447_v59 = vshll.u32 %v6129_v43, 16  ;;  %6597 = vst.msk [vmem:[#allocation3 + $0xf8] sm:$0xff] %vm871_vm1, %v9110_v2  ;;  %v6452_v61 = vshrl.u32 %v6130_v45, 16  ;;  %v6455_v39 = vshll.u32 %v6130_v45, 16  ;;  %v7955_v45 = vld [vmem:[#allocation3 + $0xc0] sm:$0xff] }
 0x36c   : > { %8267 = vmatmul.mubr.bf16.gmra.mrb[60].mxu1 %v7952_v10  ;;  %v7598_v15 = vpop.permute.xlu0 %7597  ;;  %v6434_v27 = vor.u32 %v6433_v21, %v6430_v14  ;;  %6917 = vst.msk [vmem:[#allocation3 + $0xf8] sm:$0xff] %vm1419_vm15, %v12452_v11  ;;  %v6416_v44 = vsel %vm10084_vm12, %v6411_v12, %v6415_v37  ;;  %v6443_v58 = vrot.slane %v6441_v9, 4  ;;  %v6461_v50 = vshll.u32 %v6131_v5, 16  ;;  %v6133_v54 = vld [vmem:[#allocation2 + $0xb4] sm:$0xf]  ;;  %v6050_v37 = vpop.permute.xlu1 %6049 }
 0x36d   : > { %7636 = vst.msk [vmem:[#allocation3 + $0xe0] sm:$0xff] %vm1920_vm6, %v7598_v15  ;;  %v6426_v0 = vsel %vm10084_vm12, %v6421_v34, %v6425_v40  ;;  %v6454_v53 = vrot.slane %v6452_v61, 4  ;;  %v6457_v56 = vrot.slane %v6455_v39, 5  ;;  %v6134_v11 = vld [vmem:[#allocation2 + $0xb8] sm:$0xf]  ;;  %v6449_v36 = vrot.slane %v6447_v59, 5 }
 0x36e   : > { %7093 = vst.msk [vmem:[#allocation3 + $0xf8] sm:$0xff] %vm1743_vm5, %v7056_v30  ;;  %v7956_v26 = vld [vmem:[#allocation3 + $0xc8] sm:$0xff]  ;;  %v9111_v18 = vcombine.low %v6416_v44, %v6426_v0  ;;  %v6435_v51 = vrot.slane %v6434_v27, 4  ;;  %v6444_v35 = vor.u32 %v6443_v58, %v6439_v33  ;;  %v6463_v63 = vrot.slane %v6461_v50, 5  ;;  %v6135_v13 = vld [vmem:[#allocation2 + $0xbc] sm:$0x1] }
 0x36f   : > { %8274 = vmatprep.mubr.bf16.mxu1 %v7956_v26  ;;  %v6465_v32 = vshrl.u32 %v6131_v5, 16  ;;  %v6458_v16 = vor.u32 %v6457_v56, %v6454_v53  ;;  %v6471_v60 = vshll.u32 %v6132_v49, 16  ;;  %v6476_v6 = vshrl.u32 %v6133_v54, 16  ;;  %v6136_v62 = vld [vmem:[#allocation2 + $0xc0] sm:$0xf] }
 0x370   : > { %6598 = vst.msk [vmem:[#allocation3 + $0x110] sm:$0xff] %vm871_vm1, %v9111_v18  ;;  %v6882_v19 = vpop.permute.xlu0 %6881  ;;  %v6479_v30 = vshll.u32 %v6133_v54, 16  ;;  %v6440_v48 = vsel %vm10084_vm12, %v6435_v51, %v6439_v33  ;;  %v6445_v47 = vrot.slane %v6444_v35, 4  ;;  %v6485_v23 = vshll.u32 %v6134_v11, 16  ;;  %v6137_v21 = vld [vmem:[#allocation2 + $0xc4] sm:$0xf] }
 0x371   : > { %6918 = vst.msk [vmem:[#allocation3 + $0x110] sm:$0xff] %vm1419_vm15, %v6882_v19  ;;  %v6467_v43 = vrot.slane %v6465_v32, 4  ;;  %v6459_v28 = vrot.slane %v6458_v16, 4  ;;  %v6478_v3 = vrot.slane %v6476_v6, 4  ;;  %v6489_v40 = vshrl.u32 %v6134_v11, 16 }
 0x372   : > { %v6481_v31 = vrot.slane %v6479_v30, 5  ;;  %v6450_v24 = vsel %vm10084_vm12, %v6445_v47, %v6449_v36  ;;  %v6487_v12 = vrot.slane %v6485_v23, 5  ;;  %v6495_v14 = vshll.u32 %v6135_v13, 16  ;;  %v6138_v49 = vld [vmem:[#allocation2 + $0xc8] sm:$0x1] }
 0x373   : > { %v6468_v2 = vor.u32 %v6467_v43, %v6463_v63  ;;  %v9112_v34 = vcombine.low %v6440_v48, %v6450_v24  ;;  %v6473_v33 = vrot.slane %v6471_v60, 5  ;;  %v6491_v59 = vrot.slane %v6489_v40, 4  ;;  %v7686_v56 = vld [vmem:[#allocation2 + $0xc4] sm:$0xf]  ;;  %v7685_v60 = vld [vmem:[#allocation2 + $0xc0] sm:$0xe] }
 0x374   : > { %8275 = vmatmul.mubr.bf16.gmra.mrb[64].mxu1 %v7955_v45  ;;  %v7058_v5 = vpop.permute.xlu0 %7057  ;;  %v7959_v10 = vld [vmem:[#allocation3 + $0xe0] sm:$0xff]  ;;  %v6482_v9 = vor.u32 %v6481_v31, %v6478_v3  ;;  %v6497_v27 = vrot.slane %v6495_v14, 5  ;;  %v6500_v61 = vshrl.u32 %v6136_v62, 16  ;;  %v6503_v39 = vshll.u32 %v6136_v62, 16  ;;  %v7687_v13 = vld [vmem:[#allocation2 + $0xc8] sm:$0x1] }
 0x375   : > { %7094 = vst.msk [vmem:[#allocation3 + $0x110] sm:$0xff] %vm1743_vm5, %v7058_v5  ;;  %8282 = vmatprep.mubr.bf16.mxu1 %v7959_v10  ;;  %v6469_v15 = vrot.slane %v6468_v2, 4  ;;  %v5554_v44 = vpop.permute.xlu1 %5553  ;;  %v6492_v58 = vor.u32 %v6491_v59, %v6487_v12  ;;  %v6509_v50 = vshll.u32 %v6137_v21, 16  ;;  %v6513_v54 = vshrl.u32 %v6137_v21, 16 }
 0x376   : > { %6599 = vst.msk [vmem:[#allocation3 + $0x128] sm:$0xff] %vm871_vm1, %v9112_v34  ;;  %v6483_v0 = vrot.slane %v6482_v9, 4  ;;  %v6464_v26 = vsel %vm10084_vm12, %v6459_v28, %v6463_v63  ;;  %v6502_v51 = vrot.slane %v6500_v61, 4  ;;  %v6505_v53 = vrot.slane %v6503_v39, 5 }
 0x377   : > { %5590 = vst.msk [vmem:[#allocation3 + $0x108] sm:$0xff] %vm1419_vm15, %v5554_v44  ;;  %v6474_v18 = vsel %vm10084_vm12, %v6469_v15, %v6473_v33  ;;  %v6493_v36 = vrot.slane %v6492_v58, 4  ;;  %v6511_v32 = vrot.slane %v6509_v50, 5  ;;  %v6515_v16 = vrot.slane %v6513_v54, 4 }
 0x378   : > { %5910 = vst.msk [vmem:[#allocation3 + $0x108] sm:$0xff] %vm1743_vm5, %v12489_v25  ;;  %v9113_v11 = vcombine.low %v6464_v26, %v6474_v18  ;;  %v6488_v35 = vsel %vm10084_vm12, %v6483_v0, %v6487_v12  ;;  %v6506_v19 = vor.u32 %v6505_v53, %v6502_v51  ;;  %v6519_v63 = vshll.u32 %v6138_v49, 16  ;;  %v7958_v25 = vld [vmem:[#allocation3 + $0xd8] sm:$0xff] }
 0x379   : > { %6086 = vst.msk [vmem:[#allocation3 + $0x108] sm:$0xff] %vm1920_vm6, %v6050_v37  ;;  %v6498_v6 = vsel %vm10084_vm12, %v6493_v36, %v6497_v27  ;;  %v7839_v30 = vrot.slane %v7686_v56, 5  ;;  %v6516_v43 = vor.u32 %v6515_v16, %v6511_v32  ;;  %v9194_v23 = vrot.slane %v7685_v60, 9  ;;  %v5876_v14 = vpop.permute.xlu1 %5875  ;;  %v7961_v27 = vld [vmem:[#allocation3 + $0xf0] sm:$0xff] }
 0x37a   : > { %6600 = vst.msk [vmem:[#allocation3 + $0x140] sm:$0xff] %vm871_vm1, %v9113_v11  ;;  %v9114_v48 = vcombine.low %v6488_v35, %v6498_v6  ;;  %v6507_v47 = vrot.slane %v6506_v19, 4  ;;  %v7842_v3 = vrot.slane %v7687_v13, 5  ;;  %v6521_v31 = vrot.slane %v6519_v63, 5 }
 0x37b   : > { %v7841_v28 = vrot.slane %v7839_v30, 4  ;;  %v6517_v37 = vrot.slane %v6516_v43, 4  ;;  %v7840_v40 = vsel %vm10064_vm8, %v9194_v23, %v7839_v30 }
 0x37c   : > { %8283 = vmatmul.mubr.bf16.gmra.mrb[68].mxu1 %v7958_v25  ;;  %6601 = vst.msk [vmem:[#allocation3 + $0x158] sm:$0xff] %vm871_vm1, %v9114_v48  ;;  %v6512_v45 = vsel %vm10084_vm12, %v6507_v47, %v6511_v32 }
 0x37d   : > { %v7843_v62 = vsel %vm10064_vm8, %v7841_v28, %v7842_v3  ;;  %v6522_v24 = vsel %vm10084_vm12, %v6517_v37, %v6521_v31  ;;  %v6052_v21 = vpop.permute.xlu1 %6051  ;;  %v12576_v28 = vld [vmem:[%s12991_s4] ss:$0 sm:$0xff] }
 0x37e   : > { %v9210_v2 = vcombine.low %v7840_v40, %v7843_v62  ;;  %v9115_v12 = vcombine.low %v6512_v45, %v6522_v24 }
 0x380   : > { %7929 = vst.msk [vmem:[#allocation3 + $0x160] sm:$0xff] %vm871_vm1, %v9210_v2  ;;  %6602 = vst.msk [vmem:[#allocation3 + $0x170] sm:$0xff] %vm871_vm1, %v9115_v12  ;;  %v7964_v54 = vld [vmem:[#allocation3 + $0x108] sm:$0xff] }
 0x388   : > { %v7600_v5 = vpop.permute.xlu0 %7599 }
 0x389   : > { %7637 = vst.msk [vmem:[#allocation3 + $0xf8] sm:$0xff] %vm1920_vm6, %v7600_v5  ;;  %v12535_v10 = vpop.f32.mrb[76].mxu0 }
 0x38a   : > { %v12537_v17 = vpop.f32.mrb[77].mxu0 }
 0x38b   : > { %v12539_v33 = vpop.f32.mrb[78].mxu0 }
 0x38c   : > { %v6884_v34 = vpop.permute.xlu0 %6883  ;;  %v5556_v46 = vpop.permute.xlu1 %5555 }
 0x38d   : > { %6919 = vst.msk [vmem:[#allocation3 + $0x128] sm:$0xff] %vm1419_vm15, %v6884_v34  ;;  %v12542_v9 = vpop.f32.mrb[79].mxu0  ;;  %5591 = vst.msk [vmem:[#allocation3 + $0x120] sm:$0xff] %vm1419_vm15, %v5556_v46 }
 0x38e   : > { %5911 = vst.msk [vmem:[#allocation3 + $0x120] sm:$0xff] %vm1743_vm5, %v5876_v14 }
 0x38f   : > { %6087 = vst.msk [vmem:[#allocation3 + $0x120] sm:$0xff] %vm1920_vm6, %v6052_v21 }
 0x390   : > { %v7060_v59 = vpop.permute.xlu0 %7059  ;;  %v7962_v15 = vld [vmem:[#allocation3 + $0xf8] sm:$0xff]  ;;  %v5878_v61 = vpop.permute.xlu1 %5877 }
 0x391   : > { %7095 = vst.msk [vmem:[#allocation3 + $0x128] sm:$0xff] %vm1743_vm5, %v7060_v59  ;;  %8290 = vmatprep.mubr.bf16.mxu1 %v7962_v15 }
 0x392   : > { %8291 = vmatmul.mubr.bf16.gmra.mrb[72].mxu1 %v7961_v27 }
 0x394   : > { %v6054_v44 = vpop.permute.xlu1 %6053 }
 0x396   : > { %v7967_v19 = vld [vmem:[#allocation3 + $0x120] sm:$0xff] }
 0x398   : > { %v7602_v39 = vpop.permute.xlu0 %7601 }
 0x399   : > { %7638 = vst.msk [vmem:[#allocation3 + $0x110] sm:$0xff] %vm1920_vm6, %v7602_v39 }
 0x39c   : > { %v6886_v0 = vpop.permute.xlu0 %6885 }
 0x39d   : > { %6920 = vst.msk [vmem:[#allocation3 + $0x140] sm:$0xff] %vm1419_vm15, %v6886_v0 }
 0x39e   : > { %v5558_v58 = vpop.permute.xlu1 %5557 }
 0x39f   : > { %5592 = vst.msk [vmem:[#allocation3 + $0x138] sm:$0xff] %vm1419_vm15, %v5558_v58 }
 0x3a0   : > { %v7062_v49 = vpop.permute.xlu0 %7061  ;;  %v7965_v50 = vld [vmem:[#allocation3 + $0x110] sm:$0xff]  ;;  %5912 = vst.msk [vmem:[#allocation3 + $0x138] sm:$0xff] %vm1743_vm5, %v5878_v61 }
 0x3a1   : > { %7096 = vst.msk [vmem:[#allocation3 + $0x140] sm:$0xff] %vm1743_vm5, %v7062_v49  ;;  %8298 = vmatprep.mubr.bf16.mxu1 %v7965_v50 }
 0x3a2   : > { %6088 = vst.msk [vmem:[#allocation3 + $0x138] sm:$0xff] %vm1920_vm6, %v6054_v44  ;;  %8299 = vmatmul.mubr.bf16.gmra.mrb[76].mxu1 %v7964_v54  ;;  %v5880_v26 = vpop.permute.xlu1 %5879  ;;  %v7978_v54 = vld [vmem:[#allocation3 + $0x178] sm:$0xff] }
 0x3a6   : > { %v6056_v51 = vpop.permute.xlu1 %6055 }
 0x3a9   : > { %v7604_v18 = vpop.permute.xlu0 %7603  ;;  %v7970_v47 = vld [vmem:[#allocation3 + $0x138] sm:$0xff] }
 0x3aa   : > { %7639 = vst.msk [vmem:[#allocation3 + $0x128] sm:$0xff] %vm1920_vm6, %v7604_v18 }
 0x3ad   : > { %v6888_v53 = vpop.permute.xlu0 %6887 }
 0x3ae   : > { %6921 = vst.msk [vmem:[#allocation3 + $0x158] sm:$0xff] %vm1419_vm15, %v6888_v53 }
 0x3b0   : > { %v12556_v11 = vpop.f32.mrb[80].mxu0 }
 0x3b1   : > { %v5560_v56 = vpop.permute.xlu1 %5559  ;;  %v7064_v35 = vpop.permute.xlu0 %7063  ;;  %v7968_v36 = vld [vmem:[#allocation3 + $0x128] sm:$0xff] }
 0x3b2   : > { %5593 = vst.msk [vmem:[#allocation3 + $0x150] sm:$0xff] %vm1419_vm15, %v5560_v56  ;;  %v12559_v32 = vpop.f32.mrb[81].mxu0  ;;  %8306 = vmatprep.mubr.bf16.mxu1 %v7968_v36 }
 0x3b3   : > { %5913 = vst.msk [vmem:[#allocation3 + $0x150] sm:$0xff] %vm1743_vm5, %v5880_v26  ;;  %7097 = vst.msk [vmem:[#allocation3 + $0x158] sm:$0xff] %vm1743_vm5, %v7064_v35  ;;  %v12563_v16 = vpop.f32.mrb[82].mxu0  ;;  %8307 = vmatmul.mubr.bf16.gmra.mrb[80].mxu1 %v7967_v19 }
 0x3b4   : > { %6089 = vst.msk [vmem:[#allocation3 + $0x150] sm:$0xff] %vm1920_vm6, %v6056_v51  ;;  %v12566_v63 = vpop.f32.mrb[83].mxu0 }
 0x3b5   : > { %v5562_v60 = vpop.permute.xlu1 %5561 }
 0x3b6   : > { %5594 = vst.msk [vmem:[#allocation3 + $0x168] sm:$0xff] %vm1419_vm15, %v5562_v60 }
 0x3bb   : > { %v7973_v34 = vld [vmem:[#allocation3 + $0x150] sm:$0xff] }
 0x3bc   : > { %v5882_v13 = vpop.permute.xlu1 %5881 }
 0x3bd   : > { %v7606_v6 = vpop.permute.xlu0 %7605  ;;  %5914 = vst.msk [vmem:[#allocation3 + $0x168] sm:$0xff] %vm1743_vm5, %v5882_v13 }
 0x3be   : > { %7640 = vst.msk [vmem:[#allocation3 + $0x140] sm:$0xff] %vm1920_vm6, %v7606_v6 }
 0x3c0   : > { %v6058_v30 = vpop.permute.xlu1 %6057 }
 0x3c1   : > { %v6890_v25 = vpop.permute.xlu0 %6889  ;;  %6090 = vst.msk [vmem:[#allocation3 + $0x168] sm:$0xff] %vm1920_vm6, %v6058_v30 }
 0x3c2   : > { %6922 = vst.msk [vmem:[#allocation3 + $0x170] sm:$0xff] %vm1419_vm15, %v6890_v25 }
 0x3c5   : > { %v7971_v48 = vld [vmem:[#allocation3 + $0x140] sm:$0xff] }
 0x3c6   : > { %8314 = vmatprep.mubr.bf16.mxu1 %v7971_v48  ;;  %v9458_v43 = vpop.f32.mrb[32].mxu1  ;;  %v7608_v23 = vpop.permute.xlu0 %7607 }
 0x3c7   : > { %8315 = vmatmul.mubr.bf16.gmra.mrb[84].mxu1 %v7970_v47  ;;  %v9459_v3 = vpop.f32.mrb[33].mxu1  ;;  %7641 = vst.msk [vmem:[#allocation3 + $0x158] sm:$0xff] %vm1920_vm6, %v7608_v23 }
 0x3c8   : > { %v9460_v37 = vadd.f32 %v9459_v3, %v9458_v43  ;;  %v9461_v31 = vpop.f32.mrb[34].mxu1 }
 0x3c9   : > { %v9462_v40 = vpop.f32.mrb[35].mxu1 }
 0x3ca   : > { %v8213_v62 = vadd.f32 %v9460_v37, %v12576_v28  ;;  %v9463_v45 = vadd.f32 %v9462_v40, %v9461_v31  ;;  %v7066_v24 = vpop.permute.xlu0 %7065 }
 0x3cb   : > { %7098 = vst.msk [vmem:[#allocation3 + $0x170] sm:$0xff] %vm1743_vm5, %v7066_v24 }
 0x3cc   : > { %v12582_v2 = vadd.f32 %v12256_v29, %v8213_v62  ;;  %v8216_v12 = vadd.f32 %v9463_v45, %v12576_v28  ;;  %v7976_v29 = vld [vmem:[#allocation3 + $0x168] sm:$0xff] }
 0x3ce   : > { %v12586_v14 = vadd.f32 %v12262_v38, %v8216_v12  ;;  %v7610_v21 = vpop.permute.xlu0 %7609  ;;  %v7974_v5 = vld [vmem:[#allocation3 + $0x158] sm:$0xff]  ;;  %v7975_v38 = vld [vmem:[#allocation3 + $0x160] sm:$0xff] }
 0x3cf   : > { %7642 = vst.msk [vmem:[#allocation3 + $0x170] sm:$0xff] %vm1920_vm6, %v7610_v21  ;;  %8322 = vmatprep.mubr.bf16.mxu1 %v7974_v5 }
 0x3d0   : > { %8323 = vmatmul.mubr.bf16.gmra.mrb[88].mxu1 %v7973_v34 }
 0x3d3   : > { %v9464_v46 = vpop.f32.mrb[36].mxu1 }
 0x3d4   : > { %v9465_v59 = vpop.f32.mrb[37].mxu1 }
 0x3d5   : > { %v9466_v15 = vadd.f32 %v9465_v59, %v9464_v46  ;;  %v9467_v27 = vpop.f32.mrb[38].mxu1 }
 0x3d6   : > { %v7977_v61 = vld [vmem:[#allocation3 + $0x170] sm:$0xff]  ;;  %v9468_v39 = vpop.f32.mrb[39].mxu1 }
 0x3d7   : > { %8330 = vmatprep.mubr.bf16.mxu1 %v7977_v61  ;;  %v8221_v44 = vadd.f32 %v9466_v15, %v12576_v28  ;;  %v9469_v0 = vadd.f32 %v9468_v39, %v9467_v27 }
 0x3d8   : > { %8331 = vmatmul.mubr.bf16.gmra.mrb[92].mxu1 %v7976_v29 }
 0x3d9   : > { %9640 = vmatprep.mubr.msk.bf16.mxu1 %vm871_vm1, %v7975_v38  ;;  %v12592_v58 = vadd.f32 %v12249_v41, %v8221_v44  ;;  %v8224_v49 = vadd.f32 %v9469_v0, %v12576_v28 }
 0x3db   : > { %v12596_v50 = vadd.f32 %v12258_v22, %v8224_v49 }
 0x3e0   : > { %9641 = vmatmul.mubr.msk.bf16.vlgmr.msra.gmra.mrb[96].mxu1 %vm871_vm1, %v7978_v54 }
 0x3e7   : > { %v12599_v26 = vpop.f32.mrb[84].mxu0 }
 0x3e8   : > { %v12601_v18 = vpop.f32.mrb[85].mxu0 }
 0x3e9   : > { %v12603_v51 = vpop.f32.mrb[86].mxu0 }
 0x3ea   : > { %v12605_v53 = vpop.f32.mrb[87].mxu0 }
 0x3eb   : > { %v9470_v56 = vpop.f32.mrb[40].mxu1 }
 0x3ec   : > { %v9471_v35 = vpop.f32.mrb[41].mxu1 }
 0x3ed   : > { %v9472_v41 = vadd.f32 %v9471_v35, %v9470_v56  ;;  %v9473_v36 = vpop.f32.mrb[42].mxu1 }
 0x3ee   : > { %v9474_v19 = vpop.f32.mrb[43].mxu1 }
 0x3ef   : > { %v8229_v60 = vadd.f32 %v9472_v41, %v12576_v28  ;;  %v9475_v22 = vadd.f32 %v9474_v19, %v9473_v36 }
 0x3f1   : > { %v12609_v13 = vadd.f32 %v12364_v42, %v8229_v60  ;;  %v8232_v6 = vadd.f32 %v9475_v22, %v12576_v28 }
 0x3f3   : > { %v12613_v30 = vadd.f32 %v12371_v8, %v8232_v6 }
 0x400   : > { %v9476_v25 = vpop.f32.mrb[44].mxu1 }
 0x401   : > { %v9477_v48 = vpop.f32.mrb[45].mxu1 }
 0x402   : > { %v9478_v47 = vadd.f32 %v9477_v48, %v9476_v25  ;;  %v9479_v43 = vpop.f32.mrb[46].mxu1 }
 0x403   : > { %v9480_v23 = vpop.f32.mrb[47].mxu1 }
 0x404   : > { %v8237_v3 = vadd.f32 %v9478_v47, %v12576_v28  ;;  %v9481_v37 = vadd.f32 %v9480_v23, %v9479_v43 }
 0x406   : > { %v12617_v31 = vadd.f32 %v12362_v52, %v8237_v3  ;;  %v8240_v40 = vadd.f32 %v9481_v37, %v12576_v28 }
 0x408   : > { %v12621_v42 = vadd.f32 %v12366_v7, %v8240_v40 }
 0x40e   : > { %v12623_v62 = vpop.f32.mrb[88].mxu0 }
 0x40f   : > { %v12625_v8 = vpop.f32.mrb[89].mxu0 }
 0x410   : > { %v12627_v45 = vpop.f32.mrb[90].mxu0 }
 0x411   : > { %v12629_v24 = vpop.f32.mrb[91].mxu0  ;;  %v9482_v12 = vpop.f32.mrb[48].mxu1 }
 0x412   : > { %v9483_v21 = vpop.f32.mrb[49].mxu1 }
 0x413   : > { %v9484_v5 = vadd.f32 %v9483_v21, %v9482_v12  ;;  %v9485_v34 = vpop.f32.mrb[50].mxu1 }
 0x414   : > { %v9486_v46 = vpop.f32.mrb[51].mxu1 }
 0x415   : > { %v8245_v52 = vadd.f32 %v9484_v5, %v12576_v28  ;;  %v9487_v59 = vadd.f32 %v9486_v46, %v9485_v34 }
 0x417   : > { %v12633_v15 = vadd.f32 %v12468_v55, %v8245_v52  ;;  %v8248_v7 = vadd.f32 %v9487_v59, %v12576_v28 }
 0x419   : > { %v12637_v27 = vadd.f32 %v12478_v4, %v8248_v7 }
 0x426   : > { %v9488_v61 = vpop.f32.mrb[52].mxu1 }
 0x427   : > { %v9489_v39 = vpop.f32.mrb[53].mxu1 }
 0x428   : > { %v9490_v29 = vadd.f32 %v9489_v39, %v9488_v61  ;;  %v9491_v44 = vpop.f32.mrb[54].mxu1 }
 0x429   : > { %v9492_v0 = vpop.f32.mrb[55].mxu1 }
 0x42a   : > { %v8253_v38 = vadd.f32 %v9490_v29, %v12576_v28  ;;  %v9493_v49 = vadd.f32 %v9492_v0, %v9491_v44 }
 0x42c   : > { %v12641_v54 = vadd.f32 %v12465_v57, %v8253_v38  ;;  %v8256_v56 = vadd.f32 %v9493_v49, %v12576_v28 }
 0x42e   : > { %v12645_v55 = vadd.f32 %v12472_v20, %v8256_v56 }
 0x435   : > { %v9494_v35 = vpop.f32.mrb[56].mxu1 }
 0x436   : > { %v9495_v41 = vpop.f32.mrb[57].mxu1 }
 0x437   : > { %v9496_v4 = vadd.f32 %v9495_v41, %v9494_v35  ;;  %v9497_v36 = vpop.f32.mrb[58].mxu1 }
 0x438   : > { %v9498_v19 = vpop.f32.mrb[59].mxu1 }
 0x439   : > { %v8261_v60 = vadd.f32 %v9496_v4, %v12576_v28  ;;  %v9499_v22 = vadd.f32 %v9498_v19, %v9497_v36 }
 0x43b   : > { %v12649_v6 = vadd.f32 %v12537_v17, %v8261_v60  ;;  %v8264_v25 = vadd.f32 %v9499_v22, %v12576_v28  ;;  %v8500_v60 = vsel %vm871_vm1, %v12582_v2, 0.0  ;;  %v8503_v22 = vsel %vm871_vm1, %v12592_v58, 0.0 }
 0x43d   : > { %v12653_v57 = vadd.f32 %v12542_v9, %v8264_v25 }
 0x43f   : > { %v9500_v48 = vpop.f32.mrb[60].mxu1 }
 0x440   : > { %v9501_v47 = vpop.f32.mrb[61].mxu1 }
 0x441   : > { %v9502_v20 = vadd.f32 %v9501_v47, %v9500_v48  ;;  %v9503_v43 = vpop.f32.mrb[62].mxu1 }
 0x442   : > { %v9504_v23 = vpop.f32.mrb[63].mxu1 }
 0x443   : > { %v8269_v3 = vadd.f32 %v9502_v20, %v12576_v28  ;;  %v9505_v37 = vadd.f32 %v9504_v23, %v9503_v43  ;;  %v8505_v23 = vsel %vm871_vm1, %v12596_v50, 0.0 }
 0x445   : > { %v12657_v40 = vadd.f32 %v12535_v10, %v8269_v3  ;;  %v8272_v12 = vadd.f32 %v9505_v37, %v12576_v28  ;;  %v8507_v37 = vsel %vm871_vm1, %v12609_v13, 0.0 }
 0x447   : > { %v12661_v17 = vadd.f32 %v12539_v33, %v8272_v12  ;;  %v9506_v21 = vpop.f32.mrb[64].mxu1 }
 0x448   : > { %v9507_v5 = vpop.f32.mrb[65].mxu1 }
 0x449   : > { %v9508_v9 = vadd.f32 %v9507_v5, %v9506_v21  ;;  %v9509_v34 = vpop.f32.mrb[66].mxu1  ;;  %v8509_v5 = vsel %vm871_vm1, %v12613_v30, 0.0 }
 0x44a   : > { %v9510_v46 = vpop.f32.mrb[67].mxu1 }
 0x44b   : > { %v8277_v52 = vadd.f32 %v9508_v9, %v12576_v28  ;;  %v9511_v59 = vadd.f32 %v9510_v46, %v9509_v34 }
 0x44d   : > { %v12665_v7 = vadd.f32 %v12559_v32, %v8277_v52  ;;  %v8280_v61 = vadd.f32 %v9511_v59, %v12576_v28 }
 0x44f   : > { %v12669_v10 = vadd.f32 %v12566_v63, %v8280_v61  ;;  %v9512_v39 = vpop.f32.mrb[68].mxu1  ;;  %v8501_v63 = vsel %vm871_vm1, %v12586_v14, 0.0 }
 0x450   : > { %v9513_v29 = vpop.f32.mrb[69].mxu1  ;;  %v8502_v25 = vadd.f32 %v8501_v63, %v8500_v60  ;;  %v8517_v63 = vsel %vm871_vm1, %v12637_v27, 0.0  ;;  %v8521_v60 = vsel %vm871_vm1, %v12645_v55, 0.0 }
 0x451   : > { %v9514_v33 = vadd.f32 %v9513_v29, %v9512_v39  ;;  %v9515_v44 = vpop.f32.mrb[70].mxu1 }
 0x452   : > { %v9516_v0 = vpop.f32.mrb[71].mxu1 }
 0x453   : > { %v8285_v38 = vadd.f32 %v9514_v33, %v12576_v28  ;;  %v9517_v49 = vadd.f32 %v9516_v0, %v9515_v44  ;;  %v8515_v44 = vsel %vm871_vm1, %v12633_v15, 0.0 }
 0x455   : > { %v12673_v56 = vadd.f32 %v12556_v11, %v8285_v38  ;;  %v8288_v35 = vadd.f32 %v9517_v49, %v12576_v28 }
 0x457   : > { %v12677_v32 = vadd.f32 %v12563_v16, %v8288_v35  ;;  %v8504_v16 = vadd.f32 %v8503_v22, %v8502_v25 }
 0x459   : > { %v8506_v12 = vadd.f32 %v8505_v23, %v8504_v16  ;;  %v8525_v16 = vsel %vm871_vm1, %v12653_v57, 0.0 }
 0x45b   : > { %v8508_v21 = vadd.f32 %v8507_v37, %v8506_v12  ;;  %v8527_v12 = vsel %vm871_vm1, %v12657_v40, 0.0 }
 0x45d   : > { %v8510_v9 = vadd.f32 %v8509_v5, %v8508_v21 }
 0x465   : > { %v9518_v41 = vpop.f32.mrb[72].mxu1 }
 0x466   : > { %v9519_v4 = vpop.f32.mrb[73].mxu1 }
 0x467   : > { %v9520_v36 = vadd.f32 %v9519_v4, %v9518_v41  ;;  %v9521_v19 = vpop.f32.mrb[74].mxu1  ;;  %v8519_v4 = vsel %vm871_vm1, %v12641_v54, 0.0 }
 0x468   : > { %v9522_v11 = vpop.f32.mrb[75].mxu1 }
 0x469   : > { %v8293_v48 = vadd.f32 %v9520_v36, %v12576_v28  ;;  %v9523_v47 = vadd.f32 %v9522_v11, %v9521_v19 }
 0x46b   : > { %v12687_v20 = vadd.f32 %v12601_v18, %v8293_v48  ;;  %v8296_v43 = vadd.f32 %v9523_v47, %v12576_v28  ;;  %v8511_v18 = vsel %vm871_vm1, %v12617_v31, 0.0 }
 0x46c   : > { %v8512_v52 = vadd.f32 %v8511_v18, %v8510_v9 }
 0x46d   : > { %v12693_v3 = vadd.f32 %v12605_v53, %v8296_v43  ;;  %v8513_v53 = vsel %vm871_vm1, %v12621_v42, 0.0 }
 0x46e   : > { %v8514_v0 = vadd.f32 %v8513_v53, %v8512_v52  ;;  %v8531_v52 = vsel %vm871_vm1, %v12665_v7, 0.0  ;;  %v8533_v53 = vsel %vm871_vm1, %v12669_v10, 0.0 }
 0x470   : > { %v8516_v35 = vadd.f32 %v8515_v44, %v8514_v0 }
 0x472   : > { %v8518_v36 = vadd.f32 %v8517_v63, %v8516_v35  ;;  %v8539_v63 = vsel %vm871_vm1, %v12687_v20, 0.0 }
 0x474   : > { %v8520_v19 = vadd.f32 %v8519_v4, %v8518_v36 }
 0x475   : > { %v9524_v34 = vpop.f32.mrb[76].mxu1 }
 0x476   : > { %v9525_v46 = vpop.f32.mrb[77].mxu1  ;;  %v8522_v22 = vadd.f32 %v8521_v60, %v8520_v19 }
 0x477   : > { %v9526_v59 = vadd.f32 %v9525_v46, %v9524_v34  ;;  %v9527_v61 = vpop.f32.mrb[78].mxu1  ;;  %v8529_v46 = vsel %vm871_vm1, %v12661_v17, 0.0 }
 0x478   : > { %v9528_v39 = vpop.f32.mrb[79].mxu1 }
 0x479   : > { %v8301_v29 = vadd.f32 %v9526_v59, %v12576_v28  ;;  %v9529_v33 = vadd.f32 %v9528_v39, %v9527_v61 }
 0x47b   : > { %v12707_v38 = vadd.f32 %v12599_v26, %v8301_v29  ;;  %v8304_v49 = vadd.f32 %v9529_v33, %v12576_v28  ;;  %v8523_v26 = vsel %vm871_vm1, %v12649_v6, 0.0 }
 0x47c   : > { %v8524_v48 = vadd.f32 %v8523_v26, %v8522_v22 }
 0x47d   : > { %v12711_v41 = vadd.f32 %v12603_v51, %v8304_v49 }
 0x47e   : > { %v8526_v21 = vadd.f32 %v8525_v16, %v8524_v48  ;;  %v8543_v48 = vsel %vm871_vm1, %v12707_v38, 0.0 }
 0x480   : > { %v8528_v9 = vadd.f32 %v8527_v12, %v8526_v21  ;;  %v8545_v12 = vsel %vm871_vm1, %v12711_v41, 0.0 }
 0x482   : > { %v8530_v59 = vadd.f32 %v8529_v46, %v8528_v9 }
 0x484   : > { %v8532_v61 = vadd.f32 %v8531_v52, %v8530_v59 }
 0x486   : > { %v9530_v11 = vpop.f32.mrb[80].mxu1  ;;  %v8534_v39 = vadd.f32 %v8533_v53, %v8532_v61 }
 0x487   : > { %v9531_v25 = vpop.f32.mrb[81].mxu1 }
 0x488   : > { %v9532_v51 = vadd.f32 %v9531_v25, %v9530_v11  ;;  %v9533_v47 = vpop.f32.mrb[82].mxu1  ;;  %v8541_v11 = vsel %vm871_vm1, %v12693_v3, 0.0 }
 0x489   : > { %v9534_v43 = vpop.f32.mrb[83].mxu1 }
 0x48a   : > { %v8309_v23 = vadd.f32 %v9532_v51, %v12576_v28  ;;  %v9535_v37 = vadd.f32 %v9534_v43, %v9533_v47 }
 0x48c   : > { %v12727_v5 = vadd.f32 %v12625_v8, %v8309_v23  ;;  %v8312_v18 = vadd.f32 %v9535_v37, %v12576_v28  ;;  %v8535_v8 = vsel %vm871_vm1, %v12673_v56, 0.0 }
 0x48d   : > { %v8536_v33 = vadd.f32 %v8535_v8, %v8534_v39 }
 0x48e   : > { %v12731_v34 = vadd.f32 %v12629_v24, %v8312_v18  ;;  %v8537_v24 = vsel %vm871_vm1, %v12677_v32, 0.0  ;;  %v8547_v18 = vsel %vm871_vm1, %v12727_v5, 0.0 }
 0x48f   : > { %v8538_v19 = vadd.f32 %v8537_v24, %v8536_v33 }
 0x490   : > { %v8549_v59 = vsel %vm871_vm1, %v12731_v34, 0.0 }
 0x491   : > { %v8540_v22 = vadd.f32 %v8539_v63, %v8538_v19 }
 0x493   : > { %v8542_v47 = vadd.f32 %v8541_v11, %v8540_v22 }
 0x495   : > { %v8544_v37 = vadd.f32 %v8543_v48, %v8542_v47 }
 0x497   : > { %v8546_v9 = vadd.f32 %v8545_v12, %v8544_v37 }
 0x499   : > { %v8548_v46 = vadd.f32 %v8547_v18, %v8546_v9 }
 0x49a   : > { %v9536_v29 = vpop.f32.mrb[84].mxu1 }
 0x49b   : > { %v9537_v44 = vpop.f32.mrb[85].mxu1  ;;  %v8550_v33 = vadd.f32 %v8549_v59, %v8548_v46 }
 0x49c   : > { %v9538_v0 = vadd.f32 %v9537_v44, %v9536_v29  ;;  %v9539_v49 = vpop.f32.mrb[86].mxu1 }
 0x49d   : > { %v9540_v35 = vpop.f32.mrb[87].mxu1 }
 0x49e   : > { %v8317_v4 = vadd.f32 %v9538_v0, %v12576_v28  ;;  %v9541_v36 = vadd.f32 %v9540_v35, %v9539_v49 }
 0x4a0   : > { %v12747_v60 = vadd.f32 %v12623_v62, %v8317_v4  ;;  %v8320_v26 = vadd.f32 %v9541_v36, %v12576_v28 }
 0x4a2   : > { %v12753_v25 = vadd.f32 %v12627_v45, %v8320_v26  ;;  %v8551_v39 = vsel %vm871_vm1, %v12747_v60, 0.0 }
 0x4a3   : > { %v9542_v51 = vpop.f32.mrb[88].mxu1  ;;  %v8552_v24 = vadd.f32 %v8551_v39, %v8550_v33  ;;  %v8576_v33 = vld [vmem:[%s12993_s6] sm:$0xff] }
 0x4a4   : > { %v9543_v16 = vpop.f32.mrb[89].mxu1  ;;  %v8553_v35 = vsel %vm871_vm1, %v12753_v25, 0.0 }
 0x4a5   : > { %v9544_v43 = vadd.f32 %v9543_v16, %v9542_v51  ;;  %v9545_v23 = vpop.f32.mrb[90].mxu1  ;;  %v8554_v11 = vadd.f32 %v8553_v35, %v8552_v24 }
 0x4a6   : > { %v9546_v62 = vpop.f32.mrb[91].mxu1 }
 0x4a7   : > { %v9547_v21 = vadd.f32 %v9546_v62, %v9545_v23  ;;  %v8325_v49 = vadd.f32 %v9544_v43, %v12576_v28 }
 0x4a9   : > { %v8328_v22 = vadd.f32 %v9547_v21, %v12576_v28 }
 0x4ab   : > { %v9548_v45 = vpop.f32.mrb[92].mxu1 }
 0x4ac   : > { %v9549_v52 = vpop.f32.mrb[93].mxu1 }
 0x4ad   : > { %v9550_v61 = vadd.f32 %v9549_v52, %v9548_v45  ;;  %v9551_v53 = vpop.f32.mrb[94].mxu1 }
 0x4ae   : > { %v9552_v8 = vpop.f32.mrb[95].mxu1 }
 0x4af   : > { %v9553_v29 = vadd.f32 %v9552_v8, %v9551_v53  ;;  %v8333_v44 = vadd.f32 %v9550_v61, %v12576_v28  ;;  %v8571_v61 = vld [vmem:[%s12992_s5] sm:$0xff] }
 0x4b1   : > { %v8336_v36 = vadd.f32 %v9553_v29, %v12576_v28  ;;  %v9902_v29 = vmov 0  }
 0x4b2   : > { %9665 = vset.pattern.permute.xlu1 %v9902_v29  ;;  %9666 = vset.pattern.permute.xlu0 %v9902_v29 }
 0x4b3   : > { %v9642_v0 = vpop.f32.mrb[96].mxu1 }
 0x4b4   : > { %v12769_v63 = vadd.f32 %v9642_v0, %v8333_v44  ;;  %v8485_v4 = vpop.f32.mrb[97].mxu1 }
 0x4b5   : > { %v12772_v19 = vadd.f32 %v8485_v4, %v8325_v49  ;;  %v9643_v26 = vpop.f32.mrb[98].mxu1  ;;  %v8579_v49 = vld [vmem:[%s12994_s7] sm:$0xff] }
 0x4b6   : > { %v12775_v48 = vadd.f32 %v9643_v26, %v8336_v36  ;;  %v8488_v51 = vpop.f32.mrb[99].mxu1  ;;  %v8559_v62 = vsel %vm871_vm1, %v12769_v63, 0.0 }
 0x4b7   : > { %v8555_v47 = vsel %vm871_vm1, %v12772_v19, 0.0  ;;  %v12779_v16 = vadd.f32 %v8488_v51, %v8328_v22 }
 0x4b8   : > { %v8556_v43 = vadd.f32 %v8555_v47, %v8554_v11  ;;  %v8561_v28 = vsel %vm871_vm1, %v12775_v48, 0.0 }
 0x4b9   : > { %v8557_v23 = vsel %vm871_vm1, %v12779_v16, 0.0 }
 0x4ba   : > { %v8558_v37 = vadd.f32 %v8557_v23, %v8556_v43  ;;  %v8593_v43 = vld [vmem:[%s12995_s8] sm:$0x1] }
 0x4bc   : > { %v8560_v12 = vadd.f32 %v8559_v62, %v8558_v37 }
 0x4be   : > { %v8562_v21 = vadd.f32 %v8561_v28, %v8560_v12 }
 0x4c0   : > { %v8563_v18 = vrot.slane %v8562_v21, 4 }
 0x4c2   : > { %v8564_v9 = vadd.f32 %v8563_v18, %v8562_v21  ;;  %v8601_v21 = vlaneseq }
 0x4c4   : > { %v8565_v45 = vrot.slane %v8564_v9, 2  ;;  %v8602_v18 = vshrl.u32 %v8601_v21, 7  ;;  %v9820_v21 = vld [vmem:[%s10075_s24 + $0x68] sm:$0xff] }
 0x4c6   : > { %v8566_v46 = vadd.f32 %v8565_v45, %v8564_v9  ;;  %v8603_v9 = vsub.s32 0, %v8602_v18 }
 0x4c8   : > { %v8567_v52 = vrot.slane %v8566_v46, 1 }
 0x4ca   : > { %v8568_v59 = vadd.f32 %v8567_v52, %v8566_v46 }
 0x4cc   : > { %v8570_v53 = vmul.f32 0.00390625, %v8568_v59 }
 0x4ce   : > { %v8572_v8 = vmul.f32 %v8571_v61, %v8570_v53 }
 0x4d0   : > { %v8573_v39 = vsel %vm871_vm1, %v8572_v8, 0.0 }
 0x4d1   : > { %8574 = vadd.xlane.f32.xlu0 %v8573_v39 }
 0x55e   : > { %v8575_v44 = vpop.xlane.xlu0 %8574 }
 0x55f   : > { %v8577_v24 = vadd.f32 %v8576_v33, %v8575_v44 }
 0x561   : > { %v8578_v0 = vmax.f32 %v8577_v24, 0.0 }
 0x563   : > { %8582 = vperm.xlu1 %9665, %v8578_v0   ;;  %v9811_v0 = vld [vmem:[%s10075_s24 + $0x20] sm:$0xff] }
 0x5e2   : > { %v8583_v35 = vpop.permute.xlu1 %8582 }
 0x5e3   : > { %v8585_v4 = vmul.f32 %v8583_v35, %v8579_v49  ;;  %v9812_v49 = vld [vmem:[%s10075_s24 + $0x28] sm:$0xff] }
 0x5e5   : > { %v8586_v36 = vsel %vm871_vm1, %v8585_v4, 0.0  ;;  %v9813_v4 = vld [vmem:[%s10075_s24 + $0x30] sm:$0xff] }
 0x5e6   : > { %v8587_v26 = vrot.slane %v8586_v36, 4 }
 0x5e8   : > { %v8588_v22 = vadd.f32 %v8587_v26, %v8586_v36  ;;  %v9814_v36 = vld [vmem:[%s10075_s24 + $0x38] sm:$0xff] }
 0x5ea   : > { %v8589_v11 = vrot.slane %v8588_v22, 2 }
 0x5ec   : > { %v8590_v51 = vadd.f32 %v8589_v11, %v8588_v22  ;;  %v9815_v22 = vld [vmem:[%s10075_s24 + $0x40] sm:$0xff] }
 0x5ee   : > { %v8591_v47 = vrot.slane %v8590_v51, 1 }
 0x5f0   : > { %v8592_v23 = vadd.f32 %v8591_v47, %v8590_v51  ;;  %v9816_v51 = vld [vmem:[%s10075_s24 + $0x48] sm:$0xff] }
 0x5f2   : > { %v8594_v37 = vadd.f32 %v8593_v43, %v8592_v23  ;;  %v9817_v43 = vld [vmem:[%s10075_s24 + $0x50] sm:$0xff] }
 0x5f4   : > { %v9247_v62 = vmul.f32 -1.442695, %v8594_v37  ;;  %v9818_v37 = vld [vmem:[%s10075_s24 + $0x58] sm:$0xff] }
 0x5f6   : > { %9799 = vpow2.f32 %v9247_v62 }
 0x600   : > { %v9800_v12 = vpop.eup %9799 }
 0x601   : > { %v8598_v28 = vadd.f32 1.0, %v9800_v12  ;;  %v9819_v12 = vld [vmem:[%s10075_s24 + $0x60] sm:$0xff] }
 0x603   : > { %9801 = vrcp.f32 %v8598_v28 }
 0x60d   : > { %v9802_v45 = vpop.eup %9801 }
 0x60e   : > { %v8604_v46 = vrot.slane %v9802_v45, %v8603_v9  ;;  %v9821_v9 = vld [vmem:[%s10075_s24 + $0x70] sm:$0xff] }
 0x610   : > { %v8605_v52 = vmul.f32 %v8604_v46, %v12582_v2  ;;  %v8606_v59 = vmul.f32 %v8604_v46, %v12586_v14  ;;  %v8607_v61 = vmul.f32 %v8604_v46, %v12592_v58  ;;  %v8608_v53 = vmul.f32 %v8604_v46, %v12596_v50 }
 0x611   : > { %v8609_v8 = vmul.f32 %v8604_v46, %v12609_v13  ;;  %v8610_v39 = vmul.f32 %v8604_v46, %v12613_v30  ;;  %v8611_v29 = vmul.f32 %v8604_v46, %v12617_v31  ;;  %v8612_v33 = vmul.f32 %v8604_v46, %v12621_v42 }
 0x612   : > { %v8613_v44 = vmul.f32 %v8604_v46, %v12633_v15  ;;  %v8614_v24 = vmul.f32 %v8604_v46, %v12637_v27  ;;  %v8615_v2 = vmul.f32 %v8604_v46, %v12641_v54  ;;  %v8616_v14 = vmul.f32 %v8604_v46, %v12645_v55 }
 0x613   : > { %v8617_v58 = vmul.f32 %v8604_v46, %v12649_v6  ;;  %v8618_v50 = vmul.f32 %v8604_v46, %v12653_v57  ;;  %v8619_v13 = vmul.f32 %v8604_v46, %v12657_v40  ;;  %v8620_v30 = vmul.f32 %v8604_v46, %v12661_v17 }
 0x614   : > { %v8621_v31 = vmul.f32 %v8604_v46, %v12665_v7  ;;  %v8622_v42 = vmul.f32 %v8604_v46, %v12669_v10  ;;  %v8623_v15 = vmul.f32 %v8604_v46, %v12673_v56  ;;  %v8624_v27 = vmul.f32 %v8604_v46, %v12677_v32 }
 0x615   : > { %v12822_v54 = vmul.f32 %v8604_v46, %v12687_v20  ;;  %v12825_v55 = vmul.f32 %v8604_v46, %v12693_v3  ;;  %v12828_v6 = vmul.f32 %v8604_v46, %v12707_v38  ;;  %v12831_v57 = vmul.f32 %v8604_v46, %v12711_v41  ;;  %v9807_v38 = vld [vmem:[%s10075_s24] sm:$0xff] }
 0x616   : > { %v12834_v40 = vmul.f32 %v8604_v46, %v12727_v5  ;;  %v12837_v17 = vmul.f32 %v8604_v46, %v12731_v34  ;;  %v12840_v7 = vmul.f32 %v8604_v46, %v12747_v60  ;;  %v12843_v10 = vmul.f32 %v8604_v46, %v12753_v25  ;;  %v9808_v5 = vld [vmem:[%s10075_s24 + $0x8] sm:$0xff]  ;;  %v9809_v60 = vld [vmem:[%s10075_s24 + $0x10] sm:$0xff] }
 0x617   : > { %v12846_v56 = vmul.f32 %v8604_v46, %v12772_v19  ;;  %v12849_v32 = vmul.f32 %v8604_v46, %v12779_v16  ;;  %v12852_v20 = vmul.f32 %v8604_v46, %v12769_v63  ;;  %v12855_v3 = vmul.f32 %v8604_v46, %v12775_v48  ;;  %v9810_v19 = vld [vmem:[%s10075_s24 + $0x18] sm:$0xff] }
 0x618   : > { %v8637_v41 = vadd.f32 %v9807_v38, %v8605_v52  ;;  %v8638_v34 = vadd.f32 %v9808_v5, %v8606_v59  ;;  %v8639_v25 = vadd.f32 %v9809_v60, %v8607_v61  ;;  %v8640_v16 = vadd.f32 %v9810_v19, %v8608_v53  ;;  %v9822_v46 = vld [vmem:[%s10075_s24 + $0x78] sm:$0xff]  ;;  %v9823_v59 = vld [vmem:[%s10075_s24 + $0x80] sm:$0xff]  ;;  %v9824_v53 = vld [vmem:[%s10075_s24 + $0x88] sm:$0xff] }
 0x619   : > { %v8641_v63 = vadd.f32 %v9811_v0, %v8609_v8  ;;  %v8642_v35 = vadd.f32 %v9812_v49, %v8610_v39  ;;  %v8643_v48 = vadd.f32 %v9813_v4, %v8611_v29  ;;  %v8644_v26 = vadd.f32 %v9814_v36, %v8612_v33  ;;  %v9825_v39 = vld [vmem:[%s10075_s24 + $0x90] sm:$0xff]  ;;  %v9826_v33 = vld [vmem:[%s10075_s24 + $0x98] sm:$0xff] }
 0x61a   : > { %v8645_v11 = vadd.f32 %v9815_v22, %v8613_v44  ;;  %v8646_v47 = vadd.f32 %v9816_v51, %v8614_v24  ;;  %v8647_v23 = vadd.f32 %v9817_v43, %v8615_v2  ;;  %v8648_v62 = vadd.f32 %v9818_v37, %v8616_v14  ;;  %8670 = vst.msk [vmem:[%s12871_s12] sm:$0xff] %vm871_vm1, %v8637_v41  ;;  %v9827_v24 = vld [vmem:[%s10075_s24 + $0xa0] sm:$0xff]  ;;  %v9828_v14 = vld [vmem:[%s10075_s24 + $0xa8] sm:$0xff]  ;;  %v9837_v41 = vld [vmem:[%s10075_s24 + $0xf0] sm:$0xff] }
 0x61b   : > { %8671 = vst.msk [vmem:[%s12871_s12 + $0x8] sm:$0xff] %vm871_vm1, %v8638_v34  ;;  %8672 = vst.msk [vmem:[%s12871_s12 + $0x10] sm:$0xff] %vm871_vm1, %v8639_v25  ;;  %v8649_v28 = vadd.f32 %v9819_v12, %v8617_v58  ;;  %v8650_v18 = vadd.f32 %v9820_v21, %v8618_v50  ;;  %v8651_v45 = vadd.f32 %v9821_v9, %v8619_v13  ;;  %v9829_v50 = vld [vmem:[%s10075_s24 + $0xb0] sm:$0xff]  ;;  %v9838_v34 = vld [vmem:[%s10075_s24 + $0xf8] sm:$0xff] }
 0x61c   : > { %8673 = vst.msk [vmem:[%s12871_s12 + $0x18] sm:$0xff] %vm871_vm1, %v8640_v16  ;;  %v8652_v52 = vadd.f32 %v9822_v46, %v8620_v30  ;;  %8674 = vst.msk [vmem:[%s12871_s12 + $0x20] sm:$0xff] %vm871_vm1, %v8641_v63  ;;  %v8653_v61 = vadd.f32 %v9823_v59, %v8621_v31  ;;  %v8654_v8 = vadd.f32 %v9824_v53, %v8622_v42  ;;  %v9830_v30 = vld [vmem:[%s10075_s24 + $0xb8] sm:$0xff]  ;;  %v9831_v42 = vld [vmem:[%s10075_s24 + $0xc0] sm:$0xff] }
 0x61d   : > { %8675 = vst.msk [vmem:[%s12871_s12 + $0x28] sm:$0xff] %vm871_vm1, %v8642_v35  ;;  %8676 = vst.msk [vmem:[%s12871_s12 + $0x30] sm:$0xff] %vm871_vm1, %v8643_v48  ;;  %v8655_v29 = vadd.f32 %v9825_v39, %v8623_v15  ;;  %v8656_v44 = vadd.f32 %v9826_v33, %v8624_v27  ;;  %v8657_v2 = vadd.f32 %v9827_v24, %v12822_v54  ;;  %v9832_v27 = vld [vmem:[%s10075_s24 + $0xc8] sm:$0xff] }
 0x61e   : > { %8677 = vst.msk [vmem:[%s12871_s12 + $0x38] sm:$0xff] %vm871_vm1, %v8644_v26  ;;  %8678 = vst.msk [vmem:[%s12871_s12 + $0x40] sm:$0xff] %vm871_vm1, %v8645_v11  ;;  %v8658_v58 = vadd.f32 %v9828_v14, %v12825_v55  ;;  %v8659_v13 = vadd.f32 %v9829_v50, %v12828_v6  ;;  %v8660_v31 = vadd.f32 %v9830_v30, %v12831_v57  ;;  %v9833_v55 = vld [vmem:[%s10075_s24 + $0xd0] sm:$0xff]  ;;  %v9834_v57 = vld [vmem:[%s10075_s24 + $0xd8] sm:$0xff] }
 0x61f   : > { %8679 = vst.msk [vmem:[%s12871_s12 + $0x48] sm:$0xff] %vm871_vm1, %v8646_v47  ;;  %8680 = vst.msk [vmem:[%s12871_s12 + $0x50] sm:$0xff] %vm871_vm1, %v8647_v23  ;;  %v8661_v15 = vadd.f32 %v9831_v42, %v12834_v40  ;;  %v8662_v54 = vadd.f32 %v9832_v27, %v12837_v17  ;;  %v8663_v6 = vadd.f32 %v9833_v55, %v12840_v7  ;;  %v9835_v40 = vld [vmem:[%s10075_s24 + $0xe0] sm:$0xff]  ;;  %v9836_v7 = vld [vmem:[%s10075_s24 + $0xe8] sm:$0xff]  ;;  %s8707_s24 = sshll.u32 (%p172_p8), %s9903_s23, 4  ;;  %s8708_s24 = int_to_ptr.vmem [resolvable:$true] %s8707_s24 }
 0x620   : > { %8681 = vst.msk [vmem:[%s12871_s12 + $0x58] sm:$0xff] %vm871_vm1, %v8648_v62  ;;  %8682 = vst.msk [vmem:[%s12871_s12 + $0x60] sm:$0xff] %vm871_vm1, %v8649_v28  ;;  %v8664_v38 = vadd.f32 %v9834_v57, %v12843_v10  ;;  %v8665_v17 = vadd.f32 %v9835_v40, %v12846_v56  ;;  %v8666_v10 = vadd.f32 %v9836_v7, %v12849_v32  ;;  %s9861_s13 = scalar_lea.vmem (%p172_p8), %s8708_s24, 8192  ;;  %p9866_p10 = scmp.lt.s32.totalorder (%p172_p8), %s8708_s24, %s8708_s24 }
 0x621   : > { %8683 = vst.msk [vmem:[%s12871_s12 + $0x68] sm:$0xff] %vm871_vm1, %v8650_v18  ;;  %8684 = vst.msk [vmem:[%s12871_s12 + $0x70] sm:$0xff] %vm871_vm1, %v8651_v45  ;;  %v8667_v5 = vadd.f32 %v9837_v41, %v12852_v20  ;;  %v8668_v60 = vadd.f32 %v9838_v34, %v12855_v3  ;;  %p9862_p9 = scmp.ne.s32.totalorder (%p172_p8), %s8708_s24, %s9861_s13  ;;  %p9867_p11 = scmp.lt.s32.totalorder (%p172_p8), %s9861_s13, %s9861_s13 }
 0x622   : > { %8685 = vst.msk [vmem:[%s12871_s12 + $0x78] sm:$0xff] %vm871_vm1, %v8652_v52  ;;  %8686 = vst.msk [vmem:[%s12871_s12 + $0x80] sm:$0xff] %vm871_vm1, %v8653_v61 }
 0x623   : > { %8687 = vst.msk [vmem:[%s12871_s12 + $0x88] sm:$0xff] %vm871_vm1, %v8654_v8  ;;  %8688 = vst.msk [vmem:[%s12871_s12 + $0x90] sm:$0xff] %vm871_vm1, %v8655_v29  ;;  %p9868_p12 = por (%p172_p8), %p9867_p11, %p9866_p10 }
 0x624   : > { %8689 = vst.msk [vmem:[%s12871_s12 + $0x98] sm:$0xff] %vm871_vm1, %v8656_v44  ;;  %8690 = vst.msk [vmem:[%s12871_s12 + $0xa0] sm:$0xff] %vm871_vm1, %v8657_v2  ;;  %174 = sbr.rel (!%p172_p8) target bundleno = 54 (0x36), region = 72 }
 0x625   : > { %8691 = vst.msk [vmem:[%s12871_s12 + $0xa8] sm:$0xff] %vm871_vm1, %v8658_v58  ;;  %8692 = vst.msk [vmem:[%s12871_s12 + $0xb0] sm:$0xff] %vm871_vm1, %v8659_v13  ;;  %p9869_p13 = pnand (%p172_p8), %p9868_p12, %p9862_p9 }
 0x626   : > { %8693 = vst.msk [vmem:[%s12871_s12 + $0xb8] sm:$0xff] %vm871_vm1, %v8660_v31  ;;  %8694 = vst.msk [vmem:[%s12871_s12 + $0xc0] sm:$0xff] %vm871_vm1, %v8661_v15 }
 0x627   : > { %8695 = vst.msk [vmem:[%s12871_s12 + $0xc8] sm:$0xff] %vm871_vm1, %v8662_v54  ;;  %8696 = vst.msk [vmem:[%s12871_s12 + $0xd0] sm:$0xff] %vm871_vm1, %v8663_v6 }
 0x628   : > { %8697 = vst.msk [vmem:[%s12871_s12 + $0xd8] sm:$0xff] %vm871_vm1, %v8664_v38  ;;  %8698 = vst.msk [vmem:[%s12871_s12 + $0xe0] sm:$0xff] %vm871_vm1, %v8665_v17 }
 0x629   : > { %8699 = vst.msk [vmem:[%s12871_s12 + $0xe8] sm:$0xff] %vm871_vm1, %v8666_v10  ;;  %8700 = vst.msk [vmem:[%s12871_s12 + $0xf0] sm:$0xff] %vm871_vm1, %v8667_v5 }
 0x62a   : > { %8701 = vst.msk [vmem:[%s12871_s12 + $0xf8] sm:$0xff] %vm871_vm1, %v8668_v60 }
 0x62b   :  { %9872 = shalt.err (!%p9869_p13)
}
 0x62c   :  { %s9873_s16 = scalar_lea.hbm %s12996_s9, 8192 }
 0x62d   :  { %p9874_p0 = scmp.ne.s32.totalorder %s12996_s9, %s9873_s16  ;;  %p9877_p1 = scmp.lt.u32.totalorder %s9873_s16, %s12996_s9 }
 0x62f   :  { %p9879_p2 = pnand %p9877_p1, %p9874_p0 }
 0x631   :  { %9882 = shalt.err (!%p9879_p2)
}
 0x632   :  { %8713 = dma.vmem_to_hbm [thread:$0]  %s8708_s24, 8192, %s12996_s9, [#allocation6], %s9896_s19, %s9896_s19, %s9897_s20  }
 0x633   :  { %9889 = dma.done.wait [#allocation6], 8192  }
 0x634   :  { %9890 = vsyncadd [#allocation6], 4294959104 }
 0x635   :  { %8717 = vsyncpa [#allocation5], 1 }
 0x636   :  { %8718 = vsyncpa [#allocation6], 1 }

</bundles_post_ra>
